<compile_context>
chip_gen: v6e
topology: v6e:2x2x1
jax: 0.10.0
libtpu: 0.0.40
codegen_flags: <defaults>
</compile_context>

<pallas_src>
import math

import jax
import jax.numpy as jnp
import numpy as np
from jax.experimental import pallas as pl
from jax.experimental.pallas import tpu as pltpu


def _softmax_lastdim(x):
    m = jnp.max(x, axis=-1, keepdims=True)
    e = jnp.exp(x - m)
    return e * pl.reciprocal(jnp.sum(e, axis=-1, keepdims=True), approx=True)


def _layernorm(x, g, b, eps=1e-5):
    mu = jnp.mean(x, axis=-1, keepdims=True)
    var = jnp.mean((x - mu) ** 2, axis=-1, keepdims=True)  # PyTorch LN: biased var
    return (x - mu) * jax.lax.rsqrt(var + eps) * g + b


def mhca_kernel(q_ref, k_ref, v_ref,
                wq_ref, bq_ref, wk_ref, bk_ref, wv_ref, bv_ref,
                wfq_ref, bfq_ref, wfk_ref, bfk_ref,
                lnq_w_ref, lnq_b_ref, lnk_w_ref, lnk_b_ref,
                qout_ref, kout_ref):
    _, L, D = q_ref.shape
    H, hd, _ = wfq_ref.shape

    # --- D-wide input projections: one bf16 MXU matmul each, f32 accumulation.
    # 1/sqrt(head_dim) is already folded into wq / bq host-side.
    q16 = q_ref[0].astype(jnp.bfloat16)
    k16 = k_ref[0].astype(jnp.bfloat16)
    v16 = v_ref[0].astype(jnp.bfloat16)

    q_all = (jnp.dot(q16, wq_ref[...], preferred_element_type=jnp.float32)
             + bq_ref[0]).astype(jnp.bfloat16)
    k_all = (jnp.dot(k16, wk_ref[...], preferred_element_type=jnp.float32)
             + bk_ref[0]).astype(jnp.bfloat16)
    v_all = (jnp.dot(v16, wv_ref[...], preferred_element_type=jnp.float32)
             + bv_ref[0]).astype(jnp.bfloat16)

    # --- Per-head attention: static unroll, per-head lane views (no H broadcast).
    acc_q = jnp.zeros((L, D), jnp.float32)
    acc_k = jnp.zeros((L, D), jnp.float32)
    for h in range(H):
        lo = h * hd
        qh = q_all[:, lo:lo + hd]            # (L, hd) bf16
        kh = k_all[:, lo:lo + hd]
        vh = v_all[:, lo:lo + hd]

        # Scores computed ONCE per head; shared by both attention directions.
        s = jax.lax.dot_general(qh, kh, (((1,), (1,)), ((), ())),
                                preferred_element_type=jnp.float32)   # (Lq, Lk)

        # q -> k direction: softmax over the k axis (rows of s).
        p_qk = _softmax_lastdim(s)
        x_q = jnp.dot(p_qk.astype(jnp.bfloat16), vh,
                      preferred_element_type=jnp.float32)             # (Lq, hd)

        # k -> q direction: energy_k == s^T, so one XLU transpose + the same
        # row softmax (normalizes over q, matching softmax(energy_k, dim=-1)).
        p_kq = _softmax_lastdim(s.T)                                  # (Lk, Lq)
        x_k = jnp.dot(p_kq.astype(jnp.bfloat16), vh,
                      preferred_element_type=jnp.float32)             # (Lk, hd)

        # Head-contracting output projection: accumulate (L, hd) @ (hd, D)
        # partials in f32 (no concat, no H-sized stack of f32 partials).
        acc_q = acc_q + jnp.dot(x_q.astype(jnp.bfloat16), wfq_ref[h],
                                preferred_element_type=jnp.float32)
        acc_k = acc_k + jnp.dot(x_k.astype(jnp.bfloat16), wfk_ref[h],
                                preferred_element_type=jnp.float32)

    # --- Residual + LayerNorm epilogue (f32). Residuals re-read here so the
    # f32 input copies have short live ranges (dropout == identity in eval).
    q_out = _layernorm(q_ref[0] + acc_q + bfq_ref[0], lnq_w_ref[0], lnq_b_ref[0])
    k_out = _layernorm(k_ref[0] + acc_k + bfk_ref[0], lnk_w_ref[0], lnk_b_ref[0])
    qout_ref[0] = q_out.astype(qout_ref.dtype)
    kout_ref[0] = k_out.astype(kout_ref.dtype)


def mhca_forward(query, key, value, kparams):
    B, L, D = query.shape
    H, hd, _ = kparams["wfq_h"].shape
    assert H * hd == D

    seq_spec = pl.BlockSpec((1, L, D), lambda b: (b, 0, 0))
    wmat_spec = pl.BlockSpec((D, D), lambda b: (0, 0))        # unsplit proj weights
    wout_spec = pl.BlockSpec((H, hd, D), lambda b: (0, 0, 0)) # per-head out-proj rows
    vec_spec = pl.BlockSpec((1, D), lambda b: (0, 0))
    # NOTE: all weight/bias specs are grid-invariant; at real model sizes they
    # should be single-buffered (pipeline_mode=pl.Buffered(1)) and the sequence
    # tiled flash-style; at these test shapes everything fits comfortably.

    in_specs = [seq_spec, seq_spec, seq_spec,
                wmat_spec, vec_spec, wmat_spec, vec_spec, wmat_spec, vec_spec,
                wout_spec, vec_spec, wout_spec, vec_spec,
                vec_spec, vec_spec, vec_spec, vec_spec]
    out_specs = [seq_spec, seq_spec]
    out_shape = [jax.ShapeDtypeStruct((B, L, D), query.dtype),
                 jax.ShapeDtypeStruct((B, L, D), query.dtype)]

    return pl.pallas_call(
        mhca_kernel,
        grid=(B,),
        in_specs=in_specs,
        out_specs=out_specs,
        out_shape=out_shape,
        compiler_params=pltpu.CompilerParams(
            dimension_semantics=("parallel",),
            # Generous vs. this kernel's needs (< 4 MiB at test shapes), safe on
            # every generation; budget per-generation when tiling real shapes.
            vmem_limit_bytes=32 * 1024 * 1024),
    )(query, key, value,
      kparams["wq"], kparams["bq"], kparams["wk"], kparams["bk"],
      kparams["wv"], kparams["bv"],
      kparams["wfq_h"], kparams["bfq"], kparams["wfk_h"], kparams["bfk"],
      kparams["lnq_w"], kparams["lnq_b"], kparams["lnk_w"], kparams["lnk_b"])


def init_params(key, d_model):
    # xavier_uniform for the 5 Linear weights, zeros for biases,
    # ones/zeros for LayerNorm weight/bias (PyTorch defaults).
    bound = math.sqrt(6.0 / (d_model + d_model))
    ks = jax.random.split(key, 5)

    def xavier(k):  # weight stored as (out, in), then transposed -> (in, out)
        w = jax.random.uniform(k, (d_model, d_model), jnp.float32, -bound, bound)
        return jnp.asarray(w.T)

    zeros_vec = jnp.zeros((1, d_model), jnp.float32)
    ones_vec = jnp.ones((1, d_model), jnp.float32)
    return {
        "wq_t": xavier(ks[0]), "bq": zeros_vec,
        "wk_t": xavier(ks[1]), "bk": zeros_vec,
        "wv_t": xavier(ks[2]), "bv": zeros_vec,
        "wfq_t": xavier(ks[3]), "bfq": zeros_vec,
        "wfk_t": xavier(ks[4]), "bfk": zeros_vec,
        "lnq_w": ones_vec, "lnq_b": zeros_vec,
        "lnk_w": ones_vec, "lnk_b": zeros_vec,
    }


def prepare_kernel_params(params, n_heads):
    """One-time host-side prep: bf16 weights, scale folding, per-head out-proj rows."""
    D = params["wq_t"].shape[0]
    hd = D // n_heads
    inv_scale = 1.0 / math.sqrt(hd)

    def split_out(w_t):  # (D_in = H*hd, D_out) -> (H, hd, D_out): rows of head h
        return w_t.reshape(n_heads, hd, D)

    return {
        # 1/sqrt(head_dim) folded into the q projection (used by both attn dirs),
        # applied in f32 before the bf16 cast.
        "wq": (params["wq_t"] * inv_scale).astype(jnp.bfloat16),
        "bq": params["bq"] * inv_scale,
        "wk": params["wk_t"].astype(jnp.bfloat16),
        "bk": params["bk"],
        "wv": params["wv_t"].astype(jnp.bfloat16),
        "bv": params["bv"],
        "wfq_h": split_out(params["wfq_t"]).astype(jnp.bfloat16),
        "bfq": params["bfq"],
        "wfk_h": split_out(params["wfk_t"]).astype(jnp.bfloat16),
        "bfk": params["bfk"],
        "lnq_w": params["lnq_w"], "lnq_b": params["lnq_b"],
        "lnk_w": params["lnk_w"], "lnk_b": params["lnk_b"],
    }


def reference_forward(query, key, value, params, n_heads):
    """Pure-JAX f32 reference mirroring the PyTorch forward (eval mode)."""
    B, L, D = query.shape
    hd = D // n_heads
    scale = math.sqrt(hd)

    def lin(x, wt, b):
        return x @ wt + b[0]

    q = lin(query, params["wq_t"], params["bq"])
    k = lin(key, params["wk_t"], params["bk"])
    v = lin(value, params["wv_t"], params["bv"])
    q = q.reshape(B, L, n_heads, hd).transpose(0, 2, 1, 3)
    k = k.reshape(B, L, n_heads, hd).transpose(0, 2, 1, 3)
    v = v.reshape(B, L, n_heads, hd).transpose(0, 2, 1, 3)

    e = jnp.einsum("bhqd,bhkd->bhqk", q, k) / scale
    a_qk = jax.nn.softmax(e, axis=-1)
    x_q = jnp.einsum("bhqk,bhkd->bhqd", a_qk, v).transpose(0, 2, 1, 3).reshape(B, L, D)

    e_k = jnp.einsum("bhkd,bhqd->bhkq", k, q) / scale
    a_kq = jax.nn.softmax(e_k, axis=-1)
    x_k = jnp.einsum("bhkq,bhqd->bhkd", a_kq, v).transpose(0, 2, 1, 3).reshape(B, L, D)

    def ln(x, g, b, eps=1e-5):
        mu = jnp.mean(x, -1, keepdims=True)
        var = jnp.mean((x - mu) ** 2, -1, keepdims=True)
        return (x - mu) / jnp.sqrt(var + eps) * g[0] + b[0]

    q_out = ln(query + lin(x_q, params["wfq_t"], params["bfq"]),
               params["lnq_w"], params["lnq_b"])
    k_out = ln(key + lin(x_k, params["wfk_t"], params["bfk"]),
               params["lnk_w"], params["lnk_b"])
    return q_out, k_out


if __name__ == "__main__":
    # Small correctness shapes, but lane/sublane-aligned (D multiple of 128,
    # L multiple of 8) so the projections, per-head views and score transpose
    # all hit native layouts; perf tuning should use real (large L) shapes.
    B, L, D, H = 2, 128, 128, 4   # batch, seq len, d_model, n_heads

    root = jax.random.PRNGKey(0)
    k_q, k_k, k_v, k_p = jax.random.split(root, 4)
    query = jax.random.normal(k_q, (B, L, D), jnp.float32)
    key = jax.random.normal(k_k, (B, L, D), jnp.float32)
    value = jax.random.normal(k_v, (B, L, D), jnp.float32)

    params = init_params(k_p, D)
    kparams = prepare_kernel_params(params, H)   # one-time weight prep

    q_out, k_out = mhca_forward(query, key, value, kparams)
    jax.block_until_ready((q_out, k_out))

    # Sanity check against the pure-f32 JAX reference (kernel uses bf16 MXU
    # operands + approx reciprocal, hence the relaxed tolerance).
    q_exp, k_exp = reference_forward(query, key, value, params, H)
    np.testing.assert_allclose(np.asarray(q_out), np.asarray(q_exp), rtol=5e-2, atol=5e-2)
    np.testing.assert_allclose(np.asarray(k_out), np.asarray(k_exp), rtol=5e-2, atol=5e-2)

    print("KERNEL_OK")
</pallas_src>

<mosaic_0001>
module attributes {stable_mosaic.version = 11 : i64} {
  func.func @mhca_kernel(%arg0: i32, %arg1: memref<1x128x128xf32, #tpu.memory_space<vmem>>, %arg2: memref<1x128x128xf32, #tpu.memory_space<vmem>>, %arg3: memref<1x128x128xf32, #tpu.memory_space<vmem>>, %arg4: memref<128x128xbf16, #tpu.memory_space<vmem>>, %arg5: memref<1x128xf32, #tpu.memory_space<vmem>>, %arg6: memref<128x128xbf16, #tpu.memory_space<vmem>>, %arg7: memref<1x128xf32, #tpu.memory_space<vmem>>, %arg8: memref<128x128xbf16, #tpu.memory_space<vmem>>, %arg9: memref<1x128xf32, #tpu.memory_space<vmem>>, %arg10: memref<4x32x128xbf16, #tpu.memory_space<vmem>>, %arg11: memref<1x128xf32, #tpu.memory_space<vmem>>, %arg12: memref<4x32x128xbf16, #tpu.memory_space<vmem>>, %arg13: memref<1x128xf32, #tpu.memory_space<vmem>>, %arg14: memref<1x128xf32, #tpu.memory_space<vmem>>, %arg15: memref<1x128xf32, #tpu.memory_space<vmem>>, %arg16: memref<1x128xf32, #tpu.memory_space<vmem>>, %arg17: memref<1x128xf32, #tpu.memory_space<vmem>>, %arg18: memref<1x128x128xf32, #tpu.memory_space<vmem>>, %arg19: memref<1x128x128xf32, #tpu.memory_space<vmem>>) attributes {dimension_semantics = [#tpu.dimension_semantics<parallel>], iteration_bounds = array<i64: 2>, scalar_prefetch = 0 : i64, scratch_operands = 0 : i64, tpu.core_type = #tpu.core_type<tc>, window_params = [{transform_indices = @transform_0, window_bounds = array<i64: 1, 128, 128>}, {transform_indices = @transform_1, window_bounds = array<i64: 1, 128, 128>}, {transform_indices = @transform_2, window_bounds = array<i64: 1, 128, 128>}, {pipeline_mode = #tpu.pipeline_mode<synchronous>, transform_indices = @transform_3, window_bounds = array<i64: 128, 128>}, {pipeline_mode = #tpu.pipeline_mode<synchronous>, transform_indices = @transform_4, window_bounds = array<i64: 1, 128>}, {pipeline_mode = #tpu.pipeline_mode<synchronous>, transform_indices = @transform_5, window_bounds = array<i64: 128, 128>}, {pipeline_mode = #tpu.pipeline_mode<synchronous>, transform_indices = @transform_6, window_bounds = array<i64: 1, 128>}, {pipeline_mode = #tpu.pipeline_mode<synchronous>, transform_indices = @transform_7, window_bounds = array<i64: 128, 128>}, {pipeline_mode = #tpu.pipeline_mode<synchronous>, transform_indices = @transform_8, window_bounds = array<i64: 1, 128>}, {pipeline_mode = #tpu.pipeline_mode<synchronous>, transform_indices = @transform_9, window_bounds = array<i64: 4, 32, 128>}, {pipeline_mode = #tpu.pipeline_mode<synchronous>, transform_indices = @transform_10, window_bounds = array<i64: 1, 128>}, {pipeline_mode = #tpu.pipeline_mode<synchronous>, transform_indices = @transform_11, window_bounds = array<i64: 4, 32, 128>}, {pipeline_mode = #tpu.pipeline_mode<synchronous>, transform_indices = @transform_12, window_bounds = array<i64: 1, 128>}, {pipeline_mode = #tpu.pipeline_mode<synchronous>, transform_indices = @transform_13, window_bounds = array<i64: 1, 128>}, {pipeline_mode = #tpu.pipeline_mode<synchronous>, transform_indices = @transform_14, window_bounds = array<i64: 1, 128>}, {pipeline_mode = #tpu.pipeline_mode<synchronous>, transform_indices = @transform_15, window_bounds = array<i64: 1, 128>}, {pipeline_mode = #tpu.pipeline_mode<synchronous>, transform_indices = @transform_16, window_bounds = array<i64: 1, 128>}, {transform_indices = @transform_17, window_bounds = array<i64: 1, 128, 128>}, {transform_indices = @transform_18, window_bounds = array<i64: 1, 128, 128>}]} {
    %c0 = arith.constant 0 : index
    %c0_0 = arith.constant 0 : index
    %c0_1 = arith.constant 0 : index
    %0 = vector.load %arg1[%c0, %c0_0, %c0_1] : memref<1x128x128xf32, #tpu.memory_space<vmem>>, vector<1x128x128xf32>
    %1 = vector.shape_cast %0 : vector<1x128x128xf32> to vector<128x128xf32>
    %2 = arith.truncf %1 : vector<128x128xf32> to vector<128x128xbf16>
    %c0_2 = arith.constant 0 : index
    %c0_3 = arith.constant 0 : index
    %c0_4 = arith.constant 0 : index
    %3 = vector.load %arg2[%c0_2, %c0_3, %c0_4] : memref<1x128x128xf32, #tpu.memory_space<vmem>>, vector<1x128x128xf32>
    %4 = vector.shape_cast %3 : vector<1x128x128xf32> to vector<128x128xf32>
    %5 = arith.truncf %4 : vector<128x128xf32> to vector<128x128xbf16>
    %c0_5 = arith.constant 0 : index
    %c0_6 = arith.constant 0 : index
    %c0_7 = arith.constant 0 : index
    %6 = vector.load %arg3[%c0_5, %c0_6, %c0_7] : memref<1x128x128xf32, #tpu.memory_space<vmem>>, vector<1x128x128xf32>
    %7 = vector.shape_cast %6 : vector<1x128x128xf32> to vector<128x128xf32>
    %8 = arith.truncf %7 : vector<128x128xf32> to vector<128x128xbf16>
    %c0_8 = arith.constant 0 : index
    %c0_9 = arith.constant 0 : index
    %9 = vector.load %arg4[%c0_8, %c0_9] : memref<128x128xbf16, #tpu.memory_space<vmem>>, vector<128x128xbf16>
    %cst = arith.constant dense<0.000000e+00> : vector<128x128xf32>
    %10 = tpu.matmul %2, %9, %cst {dimension_numbers = #tpu.dot_dimension_numbers<[1], [0], [0], [1], [0, 0, 1, 1], [], []>} : vector<128x128xbf16>, vector<128x128xbf16>, vector<128x128xf32> -> vector<128x128xf32>
    %c0_10 = arith.constant 0 : index
    %c0_11 = arith.constant 0 : index
    %11 = vector.load %arg5[%c0_10, %c0_11] : memref<1x128xf32, #tpu.memory_space<vmem>>, vector<1x128xf32>
    %12 = vector.shape_cast %11 : vector<1x128xf32> to vector<128xf32>
    %13 = vector.shape_cast %12 : vector<128xf32> to vector<1x128xf32>
    %14 = vector.broadcast %13 : vector<1x128xf32> to vector<128x128xf32>
    %15 = arith.addf %10, %14 : vector<128x128xf32>
    %16 = arith.truncf %15 : vector<128x128xf32> to vector<128x128xbf16>
    %c0_12 = arith.constant 0 : index
    %c0_13 = arith.constant 0 : index
    %17 = vector.load %arg6[%c0_12, %c0_13] : memref<128x128xbf16, #tpu.memory_space<vmem>>, vector<128x128xbf16>
    %cst_14 = arith.constant dense<0.000000e+00> : vector<128x128xf32>
    %18 = tpu.matmul %5, %17, %cst_14 {dimension_numbers = #tpu.dot_dimension_numbers<[1], [0], [0], [1], [0, 0, 1, 1], [], []>} : vector<128x128xbf16>, vector<128x128xbf16>, vector<128x128xf32> -> vector<128x128xf32>
    %c0_15 = arith.constant 0 : index
    %c0_16 = arith.constant 0 : index
    %19 = vector.load %arg7[%c0_15, %c0_16] : memref<1x128xf32, #tpu.memory_space<vmem>>, vector<1x128xf32>
    %20 = vector.shape_cast %19 : vector<1x128xf32> to vector<128xf32>
    %21 = vector.shape_cast %20 : vector<128xf32> to vector<1x128xf32>
    %22 = vector.broadcast %21 : vector<1x128xf32> to vector<128x128xf32>
    %23 = arith.addf %18, %22 : vector<128x128xf32>
    %24 = arith.truncf %23 : vector<128x128xf32> to vector<128x128xbf16>
    %c0_17 = arith.constant 0 : index
    %c0_18 = arith.constant 0 : index
    %25 = vector.load %arg8[%c0_17, %c0_18] : memref<128x128xbf16, #tpu.memory_space<vmem>>, vector<128x128xbf16>
    %cst_19 = arith.constant dense<0.000000e+00> : vector<128x128xf32>
    %26 = tpu.matmul %8, %25, %cst_19 {dimension_numbers = #tpu.dot_dimension_numbers<[1], [0], [0], [1], [0, 0, 1, 1], [], []>} : vector<128x128xbf16>, vector<128x128xbf16>, vector<128x128xf32> -> vector<128x128xf32>
    %c0_20 = arith.constant 0 : index
    %c0_21 = arith.constant 0 : index
    %27 = vector.load %arg9[%c0_20, %c0_21] : memref<1x128xf32, #tpu.memory_space<vmem>>, vector<1x128xf32>
    %28 = vector.shape_cast %27 : vector<1x128xf32> to vector<128xf32>
    %29 = vector.shape_cast %28 : vector<128xf32> to vector<1x128xf32>
    %30 = vector.broadcast %29 : vector<1x128xf32> to vector<128x128xf32>
    %31 = arith.addf %26, %30 : vector<128x128xf32>
    %32 = arith.truncf %31 : vector<128x128xf32> to vector<128x128xbf16>
    %cst_22 = arith.constant 0.000000e+00 : f32
    %33 = vector.broadcast %cst_22 : f32 to vector<128x128xf32>
    %cst_23 = arith.constant 0.000000e+00 : f32
    %34 = vector.broadcast %cst_23 : f32 to vector<128x128xf32>
    %35 = vector.extract_strided_slice %16 {offsets = [0, 0], sizes = [128, 32], strides = [1, 1]} : vector<128x128xbf16> to vector<128x32xbf16>
    %36 = vector.extract_strided_slice %24 {offsets = [0, 0], sizes = [128, 32], strides = [1, 1]} : vector<128x128xbf16> to vector<128x32xbf16>
    %37 = vector.extract_strided_slice %32 {offsets = [0, 0], sizes = [128, 32], strides = [1, 1]} : vector<128x128xbf16> to vector<128x32xbf16>
    %cst_24 = arith.constant dense<0.000000e+00> : vector<128x128xf32>
    %38 = tpu.matmul %35, %36, %cst_24 {dimension_numbers = #tpu.dot_dimension_numbers<[1], [1], [0], [0], [0, 0, 1, 0], [], []>} : vector<128x32xbf16>, vector<128x32xbf16>, vector<128x128xf32> -> vector<128x128xf32>
    %cst_25 = arith.constant dense<0xFF800000> : vector<128xf32>
    %39 = vector.multi_reduction <maximumf>, %38, %cst_25 [1] : vector<128x128xf32> to vector<128xf32>
    %40 = vector.shape_cast %39 : vector<128xf32> to vector<128x1xf32>
    %41 = vector.broadcast %40 : vector<128x1xf32> to vector<128x128xf32>
    %42 = arith.subf %38, %41 : vector<128x128xf32>
    %43 = math.exp %42 : vector<128x128xf32>
    %cst_26 = arith.constant dense<0.000000e+00> : vector<128xf32>
    %44 = vector.multi_reduction <add>, %43, %cst_26 [1] : vector<128x128xf32> to vector<128xf32>
    %45 = vector.shape_cast %44 : vector<128xf32> to vector<128x1xf32>
    %46 = tpu.reciprocal %45 {approx = true} : vector<128x1xf32> -> vector<128x1xf32>
    %47 = vector.broadcast %46 : vector<128x1xf32> to vector<128x128xf32>
    %48 = arith.mulf %43, %47 : vector<128x128xf32>
    %49 = arith.truncf %48 : vector<128x128xf32> to vector<128x128xbf16>
    %cst_27 = arith.constant dense<0.000000e+00> : vector<128x32xf32>
    %50 = tpu.matmul %49, %37, %cst_27 {dimension_numbers = #tpu.dot_dimension_numbers<[1], [0], [0], [1], [0, 0, 1, 1], [], []>} : vector<128x128xbf16>, vector<128x32xbf16>, vector<128x32xf32> -> vector<128x32xf32>
    %51 = tpu.transpose %38, [1, 0] : vector<128x128xf32> -> vector<128x128xf32>
    %cst_28 = arith.constant dense<0xFF800000> : vector<128xf32>
    %52 = vector.multi_reduction <maximumf>, %51, %cst_28 [1] : vector<128x128xf32> to vector<128xf32>
    %53 = vector.shape_cast %52 : vector<128xf32> to vector<128x1xf32>
    %54 = vector.broadcast %53 : vector<128x1xf32> to vector<128x128xf32>
    %55 = arith.subf %51, %54 : vector<128x128xf32>
    %56 = math.exp %55 : vector<128x128xf32>
    %cst_29 = arith.constant dense<0.000000e+00> : vector<128xf32>
    %57 = vector.multi_reduction <add>, %56, %cst_29 [1] : vector<128x128xf32> to vector<128xf32>
    %58 = vector.shape_cast %57 : vector<128xf32> to vector<128x1xf32>
    %59 = tpu.reciprocal %58 {approx = true} : vector<128x1xf32> -> vector<128x1xf32>
    %60 = vector.broadcast %59 : vector<128x1xf32> to vector<128x128xf32>
    %61 = arith.mulf %56, %60 : vector<128x128xf32>
    %62 = arith.truncf %61 : vector<128x128xf32> to vector<128x128xbf16>
    %cst_30 = arith.constant dense<0.000000e+00> : vector<128x32xf32>
    %63 = tpu.matmul %62, %37, %cst_30 {dimension_numbers = #tpu.dot_dimension_numbers<[1], [0], [0], [1], [0, 0, 1, 1], [], []>} : vector<128x128xbf16>, vector<128x32xbf16>, vector<128x32xf32> -> vector<128x32xf32>
    %64 = arith.truncf %50 : vector<128x32xf32> to vector<128x32xbf16>
    %c0_31 = arith.constant 0 : index
    %c0_32 = arith.constant 0 : index
    %c0_33 = arith.constant 0 : index
    %65 = vector.load %arg10[%c0_31, %c0_32, %c0_33] : memref<4x32x128xbf16, #tpu.memory_space<vmem>>, vector<1x32x128xbf16>
    %66 = vector.shape_cast %65 : vector<1x32x128xbf16> to vector<32x128xbf16>
    %cst_34 = arith.constant dense<0.000000e+00> : vector<128x128xf32>
    %67 = tpu.matmul %64, %66, %cst_34 {dimension_numbers = #tpu.dot_dimension_numbers<[1], [0], [0], [1], [0, 0, 1, 1], [], []>} : vector<128x32xbf16>, vector<32x128xbf16>, vector<128x128xf32> -> vector<128x128xf32>
    %68 = arith.addf %33, %67 : vector<128x128xf32>
    %69 = arith.truncf %63 : vector<128x32xf32> to vector<128x32xbf16>
    %c0_35 = arith.constant 0 : index
    %c0_36 = arith.constant 0 : index
    %c0_37 = arith.constant 0 : index
    %70 = vector.load %arg12[%c0_35, %c0_36, %c0_37] : memref<4x32x128xbf16, #tpu.memory_space<vmem>>, vector<1x32x128xbf16>
    %71 = vector.shape_cast %70 : vector<1x32x128xbf16> to vector<32x128xbf16>
    %cst_38 = arith.constant dense<0.000000e+00> : vector<128x128xf32>
    %72 = tpu.matmul %69, %71, %cst_38 {dimension_numbers = #tpu.dot_dimension_numbers<[1], [0], [0], [1], [0, 0, 1, 1], [], []>} : vector<128x32xbf16>, vector<32x128xbf16>, vector<128x128xf32> -> vector<128x128xf32>
    %73 = arith.addf %34, %72 : vector<128x128xf32>
    %74 = vector.extract_strided_slice %16 {offsets = [0, 32], sizes = [128, 32], strides = [1, 1]} : vector<128x128xbf16> to vector<128x32xbf16>
    %75 = vector.extract_strided_slice %24 {offsets = [0, 32], sizes = [128, 32], strides = [1, 1]} : vector<128x128xbf16> to vector<128x32xbf16>
    %76 = vector.extract_strided_slice %32 {offsets = [0, 32], sizes = [128, 32], strides = [1, 1]} : vector<128x128xbf16> to vector<128x32xbf16>
    %cst_39 = arith.constant dense<0.000000e+00> : vector<128x128xf32>
    %77 = tpu.matmul %74, %75, %cst_39 {dimension_numbers = #tpu.dot_dimension_numbers<[1], [1], [0], [0], [0, 0, 1, 0], [], []>} : vector<128x32xbf16>, vector<128x32xbf16>, vector<128x128xf32> -> vector<128x128xf32>
    %cst_40 = arith.constant dense<0xFF800000> : vector<128xf32>
    %78 = vector.multi_reduction <maximumf>, %77, %cst_40 [1] : vector<128x128xf32> to vector<128xf32>
    %79 = vector.shape_cast %78 : vector<128xf32> to vector<128x1xf32>
    %80 = vector.broadcast %79 : vector<128x1xf32> to vector<128x128xf32>
    %81 = arith.subf %77, %80 : vector<128x128xf32>
    %82 = math.exp %81 : vector<128x128xf32>
    %cst_41 = arith.constant dense<0.000000e+00> : vector<128xf32>
    %83 = vector.multi_reduction <add>, %82, %cst_41 [1] : vector<128x128xf32> to vector<128xf32>
    %84 = vector.shape_cast %83 : vector<128xf32> to vector<128x1xf32>
    %85 = tpu.reciprocal %84 {approx = true} : vector<128x1xf32> -> vector<128x1xf32>
    %86 = vector.broadcast %85 : vector<128x1xf32> to vector<128x128xf32>
    %87 = arith.mulf %82, %86 : vector<128x128xf32>
    %88 = arith.truncf %87 : vector<128x128xf32> to vector<128x128xbf16>
    %cst_42 = arith.constant dense<0.000000e+00> : vector<128x32xf32>
    %89 = tpu.matmul %88, %76, %cst_42 {dimension_numbers = #tpu.dot_dimension_numbers<[1], [0], [0], [1], [0, 0, 1, 1], [], []>} : vector<128x128xbf16>, vector<128x32xbf16>, vector<128x32xf32> -> vector<128x32xf32>
    %90 = tpu.transpose %77, [1, 0] : vector<128x128xf32> -> vector<128x128xf32>
    %cst_43 = arith.constant dense<0xFF800000> : vector<128xf32>
    %91 = vector.multi_reduction <maximumf>, %90, %cst_43 [1] : vector<128x128xf32> to vector<128xf32>
    %92 = vector.shape_cast %91 : vector<128xf32> to vector<128x1xf32>
    %93 = vector.broadcast %92 : vector<128x1xf32> to vector<128x128xf32>
    %94 = arith.subf %90, %93 : vector<128x128xf32>
    %95 = math.exp %94 : vector<128x128xf32>
    %cst_44 = arith.constant dense<0.000000e+00> : vector<128xf32>
    %96 = vector.multi_reduction <add>, %95, %cst_44 [1] : vector<128x128xf32> to vector<128xf32>
    %97 = vector.shape_cast %96 : vector<128xf32> to vector<128x1xf32>
    %98 = tpu.reciprocal %97 {approx = true} : vector<128x1xf32> -> vector<128x1xf32>
    %99 = vector.broadcast %98 : vector<128x1xf32> to vector<128x128xf32>
    %100 = arith.mulf %95, %99 : vector<128x128xf32>
    %101 = arith.truncf %100 : vector<128x128xf32> to vector<128x128xbf16>
    %cst_45 = arith.constant dense<0.000000e+00> : vector<128x32xf32>
    %102 = tpu.matmul %101, %76, %cst_45 {dimension_numbers = #tpu.dot_dimension_numbers<[1], [0], [0], [1], [0, 0, 1, 1], [], []>} : vector<128x128xbf16>, vector<128x32xbf16>, vector<128x32xf32> -> vector<128x32xf32>
    %103 = arith.truncf %89 : vector<128x32xf32> to vector<128x32xbf16>
    %c1 = arith.constant 1 : index
    %c0_46 = arith.constant 0 : index
    %c0_47 = arith.constant 0 : index
    %104 = vector.load %arg10[%c1, %c0_46, %c0_47] : memref<4x32x128xbf16, #tpu.memory_space<vmem>>, vector<1x32x128xbf16>
    %105 = vector.shape_cast %104 : vector<1x32x128xbf16> to vector<32x128xbf16>
    %cst_48 = arith.constant dense<0.000000e+00> : vector<128x128xf32>
    %106 = tpu.matmul %103, %105, %cst_48 {dimension_numbers = #tpu.dot_dimension_numbers<[1], [0], [0], [1], [0, 0, 1, 1], [], []>} : vector<128x32xbf16>, vector<32x128xbf16>, vector<128x128xf32> -> vector<128x128xf32>
    %107 = arith.addf %68, %106 : vector<128x128xf32>
    %108 = arith.truncf %102 : vector<128x32xf32> to vector<128x32xbf16>
    %c1_49 = arith.constant 1 : index
    %c0_50 = arith.constant 0 : index
    %c0_51 = arith.constant 0 : index
    %109 = vector.load %arg12[%c1_49, %c0_50, %c0_51] : memref<4x32x128xbf16, #tpu.memory_space<vmem>>, vector<1x32x128xbf16>
    %110 = vector.shape_cast %109 : vector<1x32x128xbf16> to vector<32x128xbf16>
    %cst_52 = arith.constant dense<0.000000e+00> : vector<128x128xf32>
    %111 = tpu.matmul %108, %110, %cst_52 {dimension_numbers = #tpu.dot_dimension_numbers<[1], [0], [0], [1], [0, 0, 1, 1], [], []>} : vector<128x32xbf16>, vector<32x128xbf16>, vector<128x128xf32> -> vector<128x128xf32>
    %112 = arith.addf %73, %111 : vector<128x128xf32>
    %113 = vector.extract_strided_slice %16 {offsets = [0, 64], sizes = [128, 32], strides = [1, 1]} : vector<128x128xbf16> to vector<128x32xbf16>
    %114 = vector.extract_strided_slice %24 {offsets = [0, 64], sizes = [128, 32], strides = [1, 1]} : vector<128x128xbf16> to vector<128x32xbf16>
    %115 = vector.extract_strided_slice %32 {offsets = [0, 64], sizes = [128, 32], strides = [1, 1]} : vector<128x128xbf16> to vector<128x32xbf16>
    %cst_53 = arith.constant dense<0.000000e+00> : vector<128x128xf32>
    %116 = tpu.matmul %113, %114, %cst_53 {dimension_numbers = #tpu.dot_dimension_numbers<[1], [1], [0], [0], [0, 0, 1, 0], [], []>} : vector<128x32xbf16>, vector<128x32xbf16>, vector<128x128xf32> -> vector<128x128xf32>
    %cst_54 = arith.constant dense<0xFF800000> : vector<128xf32>
    %117 = vector.multi_reduction <maximumf>, %116, %cst_54 [1] : vector<128x128xf32> to vector<128xf32>
    %118 = vector.shape_cast %117 : vector<128xf32> to vector<128x1xf32>
    %119 = vector.broadcast %118 : vector<128x1xf32> to vector<128x128xf32>
    %120 = arith.subf %116, %119 : vector<128x128xf32>
    %121 = math.exp %120 : vector<128x128xf32>
    %cst_55 = arith.constant dense<0.000000e+00> : vector<128xf32>
    %122 = vector.multi_reduction <add>, %121, %cst_55 [1] : vector<128x128xf32> to vector<128xf32>
    %123 = vector.shape_cast %122 : vector<128xf32> to vector<128x1xf32>
    %124 = tpu.reciprocal %123 {approx = true} : vector<128x1xf32> -> vector<128x1xf32>
    %125 = vector.broadcast %124 : vector<128x1xf32> to vector<128x128xf32>
    %126 = arith.mulf %121, %125 : vector<128x128xf32>
    %127 = arith.truncf %126 : vector<128x128xf32> to vector<128x128xbf16>
    %cst_56 = arith.constant dense<0.000000e+00> : vector<128x32xf32>
    %128 = tpu.matmul %127, %115, %cst_56 {dimension_numbers = #tpu.dot_dimension_numbers<[1], [0], [0], [1], [0, 0, 1, 1], [], []>} : vector<128x128xbf16>, vector<128x32xbf16>, vector<128x32xf32> -> vector<128x32xf32>
    %129 = tpu.transpose %116, [1, 0] : vector<128x128xf32> -> vector<128x128xf32>
    %cst_57 = arith.constant dense<0xFF800000> : vector<128xf32>
    %130 = vector.multi_reduction <maximumf>, %129, %cst_57 [1] : vector<128x128xf32> to vector<128xf32>
    %131 = vector.shape_cast %130 : vector<128xf32> to vector<128x1xf32>
    %132 = vector.broadcast %131 : vector<128x1xf32> to vector<128x128xf32>
    %133 = arith.subf %129, %132 : vector<128x128xf32>
    %134 = math.exp %133 : vector<128x128xf32>
    %cst_58 = arith.constant dense<0.000000e+00> : vector<128xf32>
    %135 = vector.multi_reduction <add>, %134, %cst_58 [1] : vector<128x128xf32> to vector<128xf32>
    %136 = vector.shape_cast %135 : vector<128xf32> to vector<128x1xf32>
    %137 = tpu.reciprocal %136 {approx = true} : vector<128x1xf32> -> vector<128x1xf32>
    %138 = vector.broadcast %137 : vector<128x1xf32> to vector<128x128xf32>
    %139 = arith.mulf %134, %138 : vector<128x128xf32>
    %140 = arith.truncf %139 : vector<128x128xf32> to vector<128x128xbf16>
    %cst_59 = arith.constant dense<0.000000e+00> : vector<128x32xf32>
    %141 = tpu.matmul %140, %115, %cst_59 {dimension_numbers = #tpu.dot_dimension_numbers<[1], [0], [0], [1], [0, 0, 1, 1], [], []>} : vector<128x128xbf16>, vector<128x32xbf16>, vector<128x32xf32> -> vector<128x32xf32>
    %142 = arith.truncf %128 : vector<128x32xf32> to vector<128x32xbf16>
    %c2 = arith.constant 2 : index
    %c0_60 = arith.constant 0 : index
    %c0_61 = arith.constant 0 : index
    %143 = vector.load %arg10[%c2, %c0_60, %c0_61] : memref<4x32x128xbf16, #tpu.memory_space<vmem>>, vector<1x32x128xbf16>
    %144 = vector.shape_cast %143 : vector<1x32x128xbf16> to vector<32x128xbf16>
    %cst_62 = arith.constant dense<0.000000e+00> : vector<128x128xf32>
    %145 = tpu.matmul %142, %144, %cst_62 {dimension_numbers = #tpu.dot_dimension_numbers<[1], [0], [0], [1], [0, 0, 1, 1], [], []>} : vector<128x32xbf16>, vector<32x128xbf16>, vector<128x128xf32> -> vector<128x128xf32>
    %146 = arith.addf %107, %145 : vector<128x128xf32>
    %147 = arith.truncf %141 : vector<128x32xf32> to vector<128x32xbf16>
    %c2_63 = arith.constant 2 : index
    %c0_64 = arith.constant 0 : index
    %c0_65 = arith.constant 0 : index
    %148 = vector.load %arg12[%c2_63, %c0_64, %c0_65] : memref<4x32x128xbf16, #tpu.memory_space<vmem>>, vector<1x32x128xbf16>
    %149 = vector.shape_cast %148 : vector<1x32x128xbf16> to vector<32x128xbf16>
    %cst_66 = arith.constant dense<0.000000e+00> : vector<128x128xf32>
    %150 = tpu.matmul %147, %149, %cst_66 {dimension_numbers = #tpu.dot_dimension_numbers<[1], [0], [0], [1], [0, 0, 1, 1], [], []>} : vector<128x32xbf16>, vector<32x128xbf16>, vector<128x128xf32> -> vector<128x128xf32>
    %151 = arith.addf %112, %150 : vector<128x128xf32>
    %152 = vector.extract_strided_slice %16 {offsets = [0, 96], sizes = [128, 32], strides = [1, 1]} : vector<128x128xbf16> to vector<128x32xbf16>
    %153 = vector.extract_strided_slice %24 {offsets = [0, 96], sizes = [128, 32], strides = [1, 1]} : vector<128x128xbf16> to vector<128x32xbf16>
    %154 = vector.extract_strided_slice %32 {offsets = [0, 96], sizes = [128, 32], strides = [1, 1]} : vector<128x128xbf16> to vector<128x32xbf16>
    %cst_67 = arith.constant dense<0.000000e+00> : vector<128x128xf32>
    %155 = tpu.matmul %152, %153, %cst_67 {dimension_numbers = #tpu.dot_dimension_numbers<[1], [1], [0], [0], [0, 0, 1, 0], [], []>} : vector<128x32xbf16>, vector<128x32xbf16>, vector<128x128xf32> -> vector<128x128xf32>
    %cst_68 = arith.constant dense<0xFF800000> : vector<128xf32>
    %156 = vector.multi_reduction <maximumf>, %155, %cst_68 [1] : vector<128x128xf32> to vector<128xf32>
    %157 = vector.shape_cast %156 : vector<128xf32> to vector<128x1xf32>
    %158 = vector.broadcast %157 : vector<128x1xf32> to vector<128x128xf32>
    %159 = arith.subf %155, %158 : vector<128x128xf32>
    %160 = math.exp %159 : vector<128x128xf32>
    %cst_69 = arith.constant dense<0.000000e+00> : vector<128xf32>
    %161 = vector.multi_reduction <add>, %160, %cst_69 [1] : vector<128x128xf32> to vector<128xf32>
    %162 = vector.shape_cast %161 : vector<128xf32> to vector<128x1xf32>
    %163 = tpu.reciprocal %162 {approx = true} : vector<128x1xf32> -> vector<128x1xf32>
    %164 = vector.broadcast %163 : vector<128x1xf32> to vector<128x128xf32>
    %165 = arith.mulf %160, %164 : vector<128x128xf32>
    %166 = arith.truncf %165 : vector<128x128xf32> to vector<128x128xbf16>
    %cst_70 = arith.constant dense<0.000000e+00> : vector<128x32xf32>
    %167 = tpu.matmul %166, %154, %cst_70 {dimension_numbers = #tpu.dot_dimension_numbers<[1], [0], [0], [1], [0, 0, 1, 1], [], []>} : vector<128x128xbf16>, vector<128x32xbf16>, vector<128x32xf32> -> vector<128x32xf32>
    %168 = tpu.transpose %155, [1, 0] : vector<128x128xf32> -> vector<128x128xf32>
    %cst_71 = arith.constant dense<0xFF800000> : vector<128xf32>
    %169 = vector.multi_reduction <maximumf>, %168, %cst_71 [1] : vector<128x128xf32> to vector<128xf32>
    %170 = vector.shape_cast %169 : vector<128xf32> to vector<128x1xf32>
    %171 = vector.broadcast %170 : vector<128x1xf32> to vector<128x128xf32>
    %172 = arith.subf %168, %171 : vector<128x128xf32>
    %173 = math.exp %172 : vector<128x128xf32>
    %cst_72 = arith.constant dense<0.000000e+00> : vector<128xf32>
    %174 = vector.multi_reduction <add>, %173, %cst_72 [1] : vector<128x128xf32> to vector<128xf32>
    %175 = vector.shape_cast %174 : vector<128xf32> to vector<128x1xf32>
    %176 = tpu.reciprocal %175 {approx = true} : vector<128x1xf32> -> vector<128x1xf32>
    %177 = vector.broadcast %176 : vector<128x1xf32> to vector<128x128xf32>
    %178 = arith.mulf %173, %177 : vector<128x128xf32>
    %179 = arith.truncf %178 : vector<128x128xf32> to vector<128x128xbf16>
    %cst_73 = arith.constant dense<0.000000e+00> : vector<128x32xf32>
    %180 = tpu.matmul %179, %154, %cst_73 {dimension_numbers = #tpu.dot_dimension_numbers<[1], [0], [0], [1], [0, 0, 1, 1], [], []>} : vector<128x128xbf16>, vector<128x32xbf16>, vector<128x32xf32> -> vector<128x32xf32>
    %181 = arith.truncf %167 : vector<128x32xf32> to vector<128x32xbf16>
    %c3 = arith.constant 3 : index
    %c0_74 = arith.constant 0 : index
    %c0_75 = arith.constant 0 : index
    %182 = vector.load %arg10[%c3, %c0_74, %c0_75] : memref<4x32x128xbf16, #tpu.memory_space<vmem>>, vector<1x32x128xbf16>
    %183 = vector.shape_cast %182 : vector<1x32x128xbf16> to vector<32x128xbf16>
    %cst_76 = arith.constant dense<0.000000e+00> : vector<128x128xf32>
    %184 = tpu.matmul %181, %183, %cst_76 {dimension_numbers = #tpu.dot_dimension_numbers<[1], [0], [0], [1], [0, 0, 1, 1], [], []>} : vector<128x32xbf16>, vector<32x128xbf16>, vector<128x128xf32> -> vector<128x128xf32>
    %185 = arith.addf %146, %184 : vector<128x128xf32>
    %186 = arith.truncf %180 : vector<128x32xf32> to vector<128x32xbf16>
    %c3_77 = arith.constant 3 : index
    %c0_78 = arith.constant 0 : index
    %c0_79 = arith.constant 0 : index
    %187 = vector.load %arg12[%c3_77, %c0_78, %c0_79] : memref<4x32x128xbf16, #tpu.memory_space<vmem>>, vector<1x32x128xbf16>
    %188 = vector.shape_cast %187 : vector<1x32x128xbf16> to vector<32x128xbf16>
    %cst_80 = arith.constant dense<0.000000e+00> : vector<128x128xf32>
    %189 = tpu.matmul %186, %188, %cst_80 {dimension_numbers = #tpu.dot_dimension_numbers<[1], [0], [0], [1], [0, 0, 1, 1], [], []>} : vector<128x32xbf16>, vector<32x128xbf16>, vector<128x128xf32> -> vector<128x128xf32>
    %190 = arith.addf %151, %189 : vector<128x128xf32>
    %c0_81 = arith.constant 0 : index
    %c0_82 = arith.constant 0 : index
    %c0_83 = arith.constant 0 : index
    %191 = vector.load %arg1[%c0_81, %c0_82, %c0_83] : memref<1x128x128xf32, #tpu.memory_space<vmem>>, vector<1x128x128xf32>
    %192 = vector.shape_cast %191 : vector<1x128x128xf32> to vector<128x128xf32>
    %193 = arith.addf %192, %185 : vector<128x128xf32>
    %c0_84 = arith.constant 0 : index
    %c0_85 = arith.constant 0 : index
    %194 = vector.load %arg11[%c0_84, %c0_85] : memref<1x128xf32, #tpu.memory_space<vmem>>, vector<1x128xf32>
    %195 = vector.shape_cast %194 : vector<1x128xf32> to vector<128xf32>
    %196 = vector.shape_cast %195 : vector<128xf32> to vector<1x128xf32>
    %197 = vector.broadcast %196 : vector<1x128xf32> to vector<128x128xf32>
    %198 = arith.addf %193, %197 : vector<128x128xf32>
    %c0_86 = arith.constant 0 : index
    %c0_87 = arith.constant 0 : index
    %199 = vector.load %arg14[%c0_86, %c0_87] : memref<1x128xf32, #tpu.memory_space<vmem>>, vector<1x128xf32>
    %200 = vector.shape_cast %199 : vector<1x128xf32> to vector<128xf32>
    %c0_88 = arith.constant 0 : index
    %c0_89 = arith.constant 0 : index
    %201 = vector.load %arg15[%c0_88, %c0_89] : memref<1x128xf32, #tpu.memory_space<vmem>>, vector<1x128xf32>
    %202 = vector.shape_cast %201 : vector<1x128xf32> to vector<128xf32>
    %cst_90 = arith.constant dense<0.000000e+00> : vector<128xf32>
    %203 = vector.multi_reduction <add>, %198, %cst_90 [1] : vector<128x128xf32> to vector<128xf32>
    %204 = vector.shape_cast %203 : vector<128xf32> to vector<128x1xf32>
    %cst_91 = arith.constant 1.280000e+02 : f32
    %205 = vector.broadcast %cst_91 : f32 to vector<128x1xf32>
    %206 = arith.divf %204, %205 : vector<128x1xf32>
    %207 = vector.broadcast %206 : vector<128x1xf32> to vector<128x128xf32>
    %208 = arith.subf %198, %207 : vector<128x128xf32>
    %209 = arith.mulf %208, %208 : vector<128x128xf32>
    %cst_92 = arith.constant dense<0.000000e+00> : vector<128xf32>
    %210 = vector.multi_reduction <add>, %209, %cst_92 [1] : vector<128x128xf32> to vector<128xf32>
    %211 = vector.shape_cast %210 : vector<128xf32> to vector<128x1xf32>
    %cst_93 = arith.constant 1.280000e+02 : f32
    %212 = vector.broadcast %cst_93 : f32 to vector<128x1xf32>
    %213 = arith.divf %211, %212 : vector<128x1xf32>
    %214 = vector.broadcast %206 : vector<128x1xf32> to vector<128x128xf32>
    %215 = arith.subf %198, %214 : vector<128x128xf32>
    %cst_94 = arith.constant 9.99999974E-6 : f32
    %216 = vector.broadcast %cst_94 : f32 to vector<128x1xf32>
    %217 = arith.addf %213, %216 : vector<128x1xf32>
    %218 = math.rsqrt %217 : vector<128x1xf32>
    %219 = vector.broadcast %218 : vector<128x1xf32> to vector<128x128xf32>
    %220 = arith.mulf %215, %219 : vector<128x128xf32>
    %221 = vector.shape_cast %200 : vector<128xf32> to vector<1x128xf32>
    %222 = vector.broadcast %221 : vector<1x128xf32> to vector<128x128xf32>
    %223 = arith.mulf %220, %222 : vector<128x128xf32>
    %224 = vector.shape_cast %202 : vector<128xf32> to vector<1x128xf32>
    %225 = vector.broadcast %224 : vector<1x128xf32> to vector<128x128xf32>
    %226 = arith.addf %223, %225 : vector<128x128xf32>
    %c0_95 = arith.constant 0 : index
    %c0_96 = arith.constant 0 : index
    %c0_97 = arith.constant 0 : index
    %227 = vector.load %arg2[%c0_95, %c0_96, %c0_97] : memref<1x128x128xf32, #tpu.memory_space<vmem>>, vector<1x128x128xf32>
    %228 = vector.shape_cast %227 : vector<1x128x128xf32> to vector<128x128xf32>
    %229 = arith.addf %228, %190 : vector<128x128xf32>
    %c0_98 = arith.constant 0 : index
    %c0_99 = arith.constant 0 : index
    %230 = vector.load %arg13[%c0_98, %c0_99] : memref<1x128xf32, #tpu.memory_space<vmem>>, vector<1x128xf32>
    %231 = vector.shape_cast %230 : vector<1x128xf32> to vector<128xf32>
    %232 = vector.shape_cast %231 : vector<128xf32> to vector<1x128xf32>
    %233 = vector.broadcast %232 : vector<1x128xf32> to vector<128x128xf32>
    %234 = arith.addf %229, %233 : vector<128x128xf32>
    %c0_100 = arith.constant 0 : index
    %c0_101 = arith.constant 0 : index
    %235 = vector.load %arg16[%c0_100, %c0_101] : memref<1x128xf32, #tpu.memory_space<vmem>>, vector<1x128xf32>
    %236 = vector.shape_cast %235 : vector<1x128xf32> to vector<128xf32>
    %c0_102 = arith.constant 0 : index
    %c0_103 = arith.constant 0 : index
    %237 = vector.load %arg17[%c0_102, %c0_103] : memref<1x128xf32, #tpu.memory_space<vmem>>, vector<1x128xf32>
    %238 = vector.shape_cast %237 : vector<1x128xf32> to vector<128xf32>
    %cst_104 = arith.constant dense<0.000000e+00> : vector<128xf32>
    %239 = vector.multi_reduction <add>, %234, %cst_104 [1] : vector<128x128xf32> to vector<128xf32>
    %240 = vector.shape_cast %239 : vector<128xf32> to vector<128x1xf32>
    %cst_105 = arith.constant 1.280000e+02 : f32
    %241 = vector.broadcast %cst_105 : f32 to vector<128x1xf32>
    %242 = arith.divf %240, %241 : vector<128x1xf32>
    %243 = vector.broadcast %242 : vector<128x1xf32> to vector<128x128xf32>
    %244 = arith.subf %234, %243 : vector<128x128xf32>
    %245 = arith.mulf %244, %244 : vector<128x128xf32>
    %cst_106 = arith.constant dense<0.000000e+00> : vector<128xf32>
    %246 = vector.multi_reduction <add>, %245, %cst_106 [1] : vector<128x128xf32> to vector<128xf32>
    %247 = vector.shape_cast %246 : vector<128xf32> to vector<128x1xf32>
    %cst_107 = arith.constant 1.280000e+02 : f32
    %248 = vector.broadcast %cst_107 : f32 to vector<128x1xf32>
    %249 = arith.divf %247, %248 : vector<128x1xf32>
    %250 = vector.broadcast %242 : vector<128x1xf32> to vector<128x128xf32>
    %251 = arith.subf %234, %250 : vector<128x128xf32>
    %cst_108 = arith.constant 9.99999974E-6 : f32
    %252 = vector.broadcast %cst_108 : f32 to vector<128x1xf32>
    %253 = arith.addf %249, %252 : vector<128x1xf32>
    %254 = math.rsqrt %253 : vector<128x1xf32>
    %255 = vector.broadcast %254 : vector<128x1xf32> to vector<128x128xf32>
    %256 = arith.mulf %251, %255 : vector<128x128xf32>
    %257 = vector.shape_cast %236 : vector<128xf32> to vector<1x128xf32>
    %258 = vector.broadcast %257 : vector<1x128xf32> to vector<128x128xf32>
    %259 = arith.mulf %256, %258 : vector<128x128xf32>
    %260 = vector.shape_cast %238 : vector<128xf32> to vector<1x128xf32>
    %261 = vector.broadcast %260 : vector<1x128xf32> to vector<128x128xf32>
    %262 = arith.addf %259, %261 : vector<128x128xf32>
    %c0_109 = arith.constant 0 : index
    %c0_110 = arith.constant 0 : index
    %c0_111 = arith.constant 0 : index
    %263 = vector.load %arg18[%c0_109, %c0_110, %c0_111] : memref<1x128x128xf32, #tpu.memory_space<vmem>>, vector<1x128x128xf32>
    %264 = vector.shape_cast %263 : vector<1x128x128xf32> to vector<128x128xf32>
    %265 = vector.shape_cast %226 : vector<128x128xf32> to vector<1x128x128xf32>
    tpu.vector_store %arg18[%c0_109, %c0_110, %c0_111], %265 {strides = array<i32>} : memref<1x128x128xf32, #tpu.memory_space<vmem>>, vector<1x128x128xf32>,
    %c0_112 = arith.constant 0 : index
    %c0_113 = arith.constant 0 : index
    %c0_114 = arith.constant 0 : index
    %266 = vector.load %arg19[%c0_112, %c0_113, %c0_114] : memref<1x128x128xf32, #tpu.memory_space<vmem>>, vector<1x128x128xf32>
    %267 = vector.shape_cast %266 : vector<1x128x128xf32> to vector<128x128xf32>
    %268 = vector.shape_cast %262 : vector<128x128xf32> to vector<1x128x128xf32>
    tpu.vector_store %arg19[%c0_112, %c0_113, %c0_114], %268 {strides = array<i32>} : memref<1x128x128xf32, #tpu.memory_space<vmem>>, vector<1x128x128xf32>,
    return
  }
  func.func @transform_0(%arg0: i32) -> (i32, i32, i32) {
    %c0_i32 = arith.constant 0 : i32
    %c0_i32_0 = arith.constant 0 : i32
    %c0_i32_1 = arith.constant 0 : i32
    return %arg0, %c0_i32, %c0_i32_0 : i32, i32, i32
  }
  func.func @transform_1(%arg0: i32) -> (i32, i32, i32) {
    %c0_i32 = arith.constant 0 : i32
    %c0_i32_0 = arith.constant 0 : i32
    %c0_i32_1 = arith.constant 0 : i32
    return %arg0, %c0_i32, %c0_i32_0 : i32, i32, i32
  }
  func.func @transform_2(%arg0: i32) -> (i32, i32, i32) {
    %c0_i32 = arith.constant 0 : i32
    %c0_i32_0 = arith.constant 0 : i32
    %c0_i32_1 = arith.constant 0 : i32
    return %arg0, %c0_i32, %c0_i32_0 : i32, i32, i32
  }
  func.func @transform_3(%arg0: i32) -> (i32, i32) {
    %c0_i32 = arith.constant 0 : i32
    %c0_i32_0 = arith.constant 0 : i32
    %c0_i32_1 = arith.constant 0 : i32
    return %c0_i32, %c0_i32_0 : i32, i32
  }
  func.func @transform_4(%arg0: i32) -> (i32, i32) {
    %c0_i32 = arith.constant 0 : i32
    %c0_i32_0 = arith.constant 0 : i32
    %c0_i32_1 = arith.constant 0 : i32
    return %c0_i32, %c0_i32_0 : i32, i32
  }
  func.func @transform_5(%arg0: i32) -> (i32, i32) {
    %c0_i32 = arith.constant 0 : i32
    %c0_i32_0 = arith.constant 0 : i32
    %c0_i32_1 = arith.constant 0 : i32
    return %c0_i32, %c0_i32_0 : i32, i32
  }
  func.func @transform_6(%arg0: i32) -> (i32, i32) {
    %c0_i32 = arith.constant 0 : i32
    %c0_i32_0 = arith.constant 0 : i32
    %c0_i32_1 = arith.constant 0 : i32
    return %c0_i32, %c0_i32_0 : i32, i32
  }
  func.func @transform_7(%arg0: i32) -> (i32, i32) {
    %c0_i32 = arith.constant 0 : i32
    %c0_i32_0 = arith.constant 0 : i32
    %c0_i32_1 = arith.constant 0 : i32
    return %c0_i32, %c0_i32_0 : i32, i32
  }
  func.func @transform_8(%arg0: i32) -> (i32, i32) {
    %c0_i32 = arith.constant 0 : i32
    %c0_i32_0 = arith.constant 0 : i32
    %c0_i32_1 = arith.constant 0 : i32
    return %c0_i32, %c0_i32_0 : i32, i32
  }
  func.func @transform_9(%arg0: i32) -> (i32, i32, i32) {
    %c0_i32 = arith.constant 0 : i32
    %c0_i32_0 = arith.constant 0 : i32
    %c0_i32_1 = arith.constant 0 : i32
    %c0_i32_2 = arith.constant 0 : i32
    return %c0_i32, %c0_i32_0, %c0_i32_1 : i32, i32, i32
  }
  func.func @transform_10(%arg0: i32) -> (i32, i32) {
    %c0_i32 = arith.constant 0 : i32
    %c0_i32_0 = arith.constant 0 : i32
    %c0_i32_1 = arith.constant 0 : i32
    return %c0_i32, %c0_i32_0 : i32, i32
  }
  func.func @transform_11(%arg0: i32) -> (i32, i32, i32) {
    %c0_i32 = arith.constant 0 : i32
    %c0_i32_0 = arith.constant 0 : i32
    %c0_i32_1 = arith.constant 0 : i32
    %c0_i32_2 = arith.constant 0 : i32
    return %c0_i32, %c0_i32_0, %c0_i32_1 : i32, i32, i32
  }
  func.func @transform_12(%arg0: i32) -> (i32, i32) {
    %c0_i32 = arith.constant 0 : i32
    %c0_i32_0 = arith.constant 0 : i32
    %c0_i32_1 = arith.constant 0 : i32
    return %c0_i32, %c0_i32_0 : i32, i32
  }
  func.func @transform_13(%arg0: i32) -> (i32, i32) {
    %c0_i32 = arith.constant 0 : i32
    %c0_i32_0 = arith.constant 0 : i32
    %c0_i32_1 = arith.constant 0 : i32
    return %c0_i32, %c0_i32_0 : i32, i32
  }
  func.func @transform_14(%arg0: i32) -> (i32, i32) {
    %c0_i32 = arith.constant 0 : i32
    %c0_i32_0 = arith.constant 0 : i32
    %c0_i32_1 = arith.constant 0 : i32
    return %c0_i32, %c0_i32_0 : i32, i32
  }
  func.func @transform_15(%arg0: i32) -> (i32, i32) {
    %c0_i32 = arith.constant 0 : i32
    %c0_i32_0 = arith.constant 0 : i32
    %c0_i32_1 = arith.constant 0 : i32
    return %c0_i32, %c0_i32_0 : i32, i32
  }
  func.func @transform_16(%arg0: i32) -> (i32, i32) {
    %c0_i32 = arith.constant 0 : i32
    %c0_i32_0 = arith.constant 0 : i32
    %c0_i32_1 = arith.constant 0 : i32
    return %c0_i32, %c0_i32_0 : i32, i32
  }
  func.func @transform_17(%arg0: i32) -> (i32, i32, i32) {
    %c0_i32 = arith.constant 0 : i32
    %c0_i32_0 = arith.constant 0 : i32
    %c0_i32_1 = arith.constant 0 : i32
    return %arg0, %c0_i32, %c0_i32_0 : i32, i32, i32
  }
  func.func @transform_18(%arg0: i32) -> (i32, i32, i32) {
    %c0_i32 = arith.constant 0 : i32
    %c0_i32_0 = arith.constant 0 : i32
    %c0_i32_1 = arith.constant 0 : i32
    return %arg0, %c0_i32, %c0_i32_0 : i32, i32, i32
  }
}

</mosaic_0001>

<bundles_post_ra>
// kernel: tpu_custom_call.1
= control target key start
LH: loop header
LB: loop body
LE: loop exit
PB: predicated region body
PF: predicated region fallthrough
CT: control target
= control target key end

     0   :  { %s11771_s0 = inlined_call_operand.hbm [shape: f32[2,128,128], index: 0, kind: input, shape index: {}]   ;;  %s11772_s1 = inlined_call_operand.hbm [shape: f32[2,128,128], index: 1, kind: input, shape index: {}]   ;;  %s11773_s2 = inlined_call_operand.hbm [shape: f32[2,128,128], index: 2, kind: input, shape index: {}]   ;;  %s11774_s3 = inlined_call_operand.hbm [shape: bf16[128,128], index: 3, kind: input, shape index: {}]   ;;  %s11775_s4 = inlined_call_operand.vmem [shape: f32[1,128], index: 4, kind: input, shape index: {}]   ;;  %s11776_s5 = inlined_call_operand.hbm [shape: bf16[128,128], index: 5, kind: input, shape index: {}]   ;;  %s11777_s6 = inlined_call_operand.vmem [shape: f32[1,128], index: 6, kind: input, shape index: {}]   ;;  %s11778_s7 = inlined_call_operand.hbm [shape: bf16[128,128], index: 7, kind: input, shape index: {}]   ;;  %s11779_s8 = inlined_call_operand.vmem [shape: f32[1,128], index: 8, kind: input, shape index: {}]   ;;  %s11780_s9 = inlined_call_operand.hbm [shape: bf16[4,32,128], index: 9, kind: input, shape index: {}]   ;;  %s11781_s10 = inlined_call_operand.vmem [shape: f32[1,128], index: 10, kind: input, shape index: {}]   ;;  %s11782_s11 = inlined_call_operand.hbm [shape: bf16[4,32,128], index: 11, kind: input, shape index: {}]   ;;  %s11783_s12 = inlined_call_operand.vmem [shape: f32[1,128], index: 12, kind: input, shape index: {}]   ;;  %s11784_s13 = inlined_call_operand.vmem [shape: f32[1,128], index: 13, kind: input, shape index: {}]   ;;  %s11785_s14 = inlined_call_operand.vmem [shape: f32[1,128], index: 14, kind: input, shape index: {}]   ;;  %s11786_s15 = inlined_call_operand.vmem [shape: f32[1,128], index: 15, kind: input, shape index: {}]   ;;  %s11787_s16 = inlined_call_operand.vmem [shape: f32[1,128], index: 16, kind: input, shape index: {}]   ;;  %s11788_s17 = inlined_call_operand.hbm [shape: f32[2,128,128], index: 17, kind: output, shape index: {0}]   ;;  %s11789_s18 = inlined_call_operand.hbm [shape: f32[2,128,128], index: 18, kind: output, shape index: {1}]  }
   0x1   :  { %11912 = sst [smem:[#allocation97_spill]] %s11771_s0 }
   0x2   :  { %11913 = sst [smem:[#allocation98_spill]] %s11772_s1 }
   0x3   :  { %11914 = sst [smem:[#allocation99_spill]] %s11773_s2 }
   0x4   :  { %11915 = sst [smem:[#allocation100_spill]] %s11774_s3 }
   0x5   :  { %11916 = sst [smem:[#allocation101_spill]] %s11776_s5 }
   0x6   :  { %11917 = sst [smem:[#allocation102_spill]] %s11778_s7 }
   0x7   :  { %11918 = sst [smem:[#allocation103_spill]] %s11780_s9 }
   0x8   :  { %11919 = sst [smem:[#allocation104_spill]] %s11783_s12 }
   0x9   :  { %11920 = sst [smem:[#allocation105_spill]] %s11784_s13 }
   0xa   :  { %11921 = sst [smem:[#allocation106_spill]] %s11785_s14 }
   0xb   :  { %11922 = sst [smem:[#allocation107_spill]] %s11786_s15 }
   0xc   :  { %11923 = sst [smem:[#allocation108_spill]] %s11787_s16 }
   0xd   :  { %11924 = sst [smem:[#allocation109_spill]] %s11788_s17 }
   0xe   :  { %11925 = sst [smem:[#allocation110_spill]] %s11789_s18 }
   0xf   :  { %24 = vsyncpa [#allocation3], 0 }
  0x10   :  { %26 = vsyncpa [#allocation3 + $0x1], 0 }
  0x11   :  { %27 = vsyncpa [#allocation6], 0 }
  0x12   :  { %29 = vsyncpa [#allocation6 + $0x1], 0 }
  0x13   :  { %30 = vsyncpa [#allocation9], 0 }
  0x14   :  { %31 = vsyncpa [#allocation12], 0 }
  0x15   :  { %32 = vsyncpa [#allocation15], 0 }
  0x16   :  { %33 = vsyncpa [#allocation4], 0 }
  0x17   :  { %35 = vsyncpa [#allocation4 + $0x1], 0 }
  0x18   :  { %36 = vsyncpa [#allocation18], 0 }
  0x19   :  { %38 = vsyncpa [#allocation18 + $0x1], 0  ;;  %s8668_s27 = smov 0   ;;  %s8670_s28 = smov 0  }
  0x1a   :  { %s8672_s29 = smov 0   ;;  %s8674_s30 = smov 0  }
  0x1b LB: > { %11926 = sst [smem:[#allocation26_spill]] %s8540_s27  ;;  %s8554_s0 = smov [#allocation8]   ;;  %s8552_s30 = sphi %s8674_s30, %s12241_s30   ;;  %s8548_s29 = sphi %s8672_s29, %s12245_s29   ;;  %s8544_s28 = sphi %s8670_s28, %s12244_s28   ;;  %s8540_s27 = sphi %s8668_s27, %s12243_s27  }
  0x1c   : > { %11927 = sst [smem:[#allocation27_spill]] %s8552_s30  ;;  %s485_s19 = sshll.u32 %s8554_s0, 4  ;;  %s486_s19 = int_to_ptr.vmem [resolvable:$true] %s485_s19 }
  0x1d   : > { %s8689_s1 = sadd.s32 4294967295, %s8552_s30   ;;  %p6266_p0 = scmp.ge.s32.totalorder %s8552_s30, 1 }
  0x1e   : > { %p11808_p1 = scmp.eq.s32.totalorder %s8689_s1, 0  ;;  %p434_p2 = scmp.eq.s32.totalorder %s8689_s1, 1 }
  0x1f   : > { %p473_p3 = scmp.lt.s32.totalorder %s8552_s30, 3  ;;  %s8555_s21 = smov [#allocation11]  }
  0x20   : > { %s517_s22 = sshll.u32 %s8555_s21, 4  ;;  %s8239_s24 = scalar_lea.vmem %s486_s19, 1024  ;;  %s518_s22 = int_to_ptr.vmem [resolvable:$true] %s517_s22 }
  0x21   : > { %p8695_p4 = pnand %p6266_p0, %p473_p3  ;;  %p8240_p9 = scmp.ne.s32.totalorder %s486_s19, %s8239_s24 }
  0x22   : > { %p8247_p12 = scmp.lt.s32.totalorder %s486_s19, %s486_s19  ;;  %p8248_p13 = scmp.lt.s32.totalorder %s8239_s24, %s8239_s24 }
  0x23   : > { %s11928_s20 = scalar_select %p8695_p4, 1, 0 }
  0x24   : > { %p7489_p6 = pneg %p8695_p4  ;;  %p8249_p0 = por %p8248_p13, %p8247_p12 }
  0x26   : > { %p8704_p7 = pnand %p7489_p6, %p11808_p1 }
  0x28   : > { %s11929_s2 = scalar_select %p8704_p7, 1, 0 }
  0x29   : > { %p8710_p8 = pneg %p8704_p7 }
  0x2b   : > { %s11930_s23 = scalar_select %p8710_p8, 1, 0 }
  0x2c   : > { %p8242_p10 = pnand %p8240_p9, %p8710_p8 }
  0x2e   : > { %p8243_p11 = pneg %p8242_p10 }
  0x30   : > { %p8250_p3 = pnand %p8249_p0, %p8243_p11 }
  0x32   : > { %8253 = shalt.err (!%p8250_p3)
}
  0x33   : > { %s11794_s25 = smov 64   ;;  %s11796_s26 = smov 4  }
  0x34   : > { %s11931_s3 = sld [smem:[#allocation100_spill]]  ;;  %s8265_s18 = scalar_lea.vmem %s518_s22, 1024 }
  0x35   : > { %p8266_p6 = scmp.ne.s32.totalorder %s518_s22, %s8265_s18  ;;  %p8273_p12 = scmp.lt.s32.totalorder %s518_s22, %s518_s22 }
  0x36   : > { %p8274_p11 = scmp.lt.s32.totalorder %s8265_s18, %s8265_s18 }
  0x37   : > { %p8268_p9 = pnand %p8266_p6, %p8710_p8 }
  0x38   : > { %p8275_p13 = por %p8274_p11, %p8273_p12 }
  0x39   : > { %p8269_p10 = pneg %p8268_p9 }
  0x3a   : > { %7492 = dma.hbm_to_vmem [thread:$0]  (!%p8704_p7), %s11931_s3, 1024, %s486_s19, [#allocation9], %s11794_s25, %s11794_s25, %s11796_s26  }
  0x3b   : > { %p8276_p0 = pnand %p8275_p13, %p8269_p10 }
  0x3d   : > { %8279 = shalt.err (!%p8276_p0)
}
  0x3e   : > { %s11932_s7 = sld [smem:[#allocation102_spill]]  ;;  %s6265_s18 = sadd.s32 4294967294, %s8552_s30  }
  0x3f   : > { %s8736_s19 = sadd.s32 1, %s8552_s30   ;;  %s51_s16 = sadd.s32 1, %s8548_s29 }
  0x40   : > { %11933 = sst [smem:[#allocation28_spill]] %s8736_s19  ;;  %s48_s0 = ssub.s32 %s8552_s30, %s8736_s19 }
  0x41   : > { %p58_p3 = scmp.ne.s32.totalorder %s8548_s29, %s8544_s28  ;;  %p49_p6 = scmp.eq.s32.totalorder %s48_s0, 0 }
  0x42   : > { %p59_p9 = scmp.eq.s32.totalorder %s8552_s30, 0  ;;  %p64_p10 = scmp.ne.s32.totalorder %s8544_s28, %s8540_s27 }
  0x43   : > { %p8748_p12 = por %p434_p2, %p58_p3  ;;  %p440_p0 = scmp.eq.s32.totalorder %s6265_s18, 1 }
  0x44   : > { %7498 = dma.hbm_to_vmem [thread:$0]  (!%p8704_p7), %s11932_s7, 1024, %s518_s22, [#allocation12], %s11794_s25, %s11794_s25, %s11796_s26  }
  0x45   : > { %s11934_s21 = scalar_select %p8748_p12, 1, 0 }
  0x46   : > { %s8753_s24 = scalar_select %p49_p6, %s8548_s29, %s51_s16  }
  0x47   : > { %11935 = sst [smem:[#allocation29_spill]] %s11934_s21  ;;  %p60_p11 = por %p59_p9, %p58_p3 }
  0x48   : > { %11936 = sst [smem:[#allocation30_spill]] %s8753_s24  ;;  %p8757_p13 = por %p11808_p1, %p64_p10 }
  0x49   : > { %p7527_p5 = scmp.lt.s32.totalorder %s8552_s30, 2  ;;  %s11803_s25 = sand.u32 1, %s8548_s29  }
  0x4a   : > { %s11937_s22 = scalar_select %p8757_p13, 1, 0 }
  0x4b   : > { %s8764_s26 = sshll.u32 %s8552_s30, 11  ;;  %p8766_p4 = por %p440_p0, %p64_p10 }
  0x4c   : > { %s8772_s3 = sshll.u32 %s11803_s25, 7  ;;  %p8774_p2 = pnand %p7527_p5, %p60_p11 }
  0x4d   : > { %s11938_s0 = scalar_select %p8766_p4, 1, 0 }
  0x4e   : > { %s599_s7 = sand.u32 1, %s8552_s30   ;;  %s11941_s19 = sld [smem:[#allocation98_spill]] }
  0x4f   : > { %11939 = sst [smem:[#allocation31_spill]] %s11938_s0  ;;  %s603_s15 = scalar_lea.vmem [#allocation5], %s8772_s3 }
  0x50   : > { %s610_s0 = sshll.u32 %s603_s15, 4  ;;  %s8558_s25 = smov [#allocation10]   ;;  %s8786_s0 = int_to_ptr.vmem [resolvable:$true] %s610_s0 }
  0x51   : > { %s8788_s17 = sshll.u32 %s8558_s25, 4  ;;  %s8790_s21 = scalar_lea.sflag [#allocation6], %s599_s7  ;;  %s502_s17 = int_to_ptr.vmem [resolvable:$true] %s8788_s17 }
  0x52   : > { %p8796_p3 = pneg %p8774_p2 }
  0x54   : > { %s8783_s27 = scalar_lea.hbm %s11941_s19, %s8764_s26  ;;  %s8285_s18 = scalar_lea.hbm %s11941_s19, 4096 }
  0x55   : > { %s8280_s14 = scalar_lea.hbm %s8783_s27, 2048  ;;  %p8286_p10 = scmp.lt.s32.totalorder %s8783_s27, %s11941_s19 }
  0x56   : > { %p8281_p5 = scmp.ne.s32.totalorder %s8783_s27, %s8280_s14  ;;  %p8287_p11 = scmp.lt.s32.totalorder %s8285_s18, %s8280_s14 }
  0x58   : > { %p8283_p6 = pnand %p8796_p3, %p8281_p5  ;;  %p8288_p0 = por %p8287_p11, %p8286_p10 }
  0x5a   : > { %p8284_p9 = pneg %p8283_p6 }
  0x5c   : > { %p8289_p1 = pnand %p8288_p0, %p8284_p9 }
  0x5e   : > { %8292 = shalt.err (!%p8289_p1)
}
  0x5f   : > { %s8293_s7 = scalar_lea.vmem %s8786_s0, 2048  ;;  %s8559_s12 = smov [#allocation5]  }
  0x60   : > { %p8294_p4 = scmp.ne.s32.totalorder %s8786_s0, %s8293_s7  ;;  %s8298_s24 = sshll.u32 %s8559_s12, 4  ;;  %s8299_s24 = int_to_ptr.vmem [resolvable:$false] %s8298_s24 }
  0x61   : > { %s8300_s15 = scalar_lea.vmem %s8299_s24, 4096  ;;  %p8301_p12 = scmp.lt.s32.totalorder %s8786_s0, %s8299_s24 }
  0x62   : > { %p8296_p5 = pnand %p8294_p4, %p8796_p3  ;;  %p8302_p13 = scmp.lt.s32.totalorder %s8300_s15, %s8293_s7 }
  0x64   : > { %p8297_p6 = pneg %p8296_p5  ;;  %p8303_p7 = por %p8302_p13, %p8301_p12 }
  0x66   : > { %p8304_p8 = pnand %p8303_p7, %p8297_p6 }
  0x68   : > { %8307 = shalt.err (!%p8304_p8)
}
  0x69   : > { %s11815_s13 = smov 128   ;;  %s11817_s14 = smov 8  }
  0x6a   : > { %7511 = dma.hbm_to_vmem [thread:$0]  (!%p8774_p2), %s8783_s27, 2048, %s8786_s0, %s8790_s21, %s11815_s13, %s11815_s13, %s11817_s14  }
  0x6b   : > { %s8319_s12 = scalar_lea.vmem %s502_s17, 1024  ;;  %p11943_p4 = scmp.ne.s32.totalorder %s11930_s23, 0 }
  0x6c   : > { %p8320_p1 = scmp.ne.s32.totalorder %s502_s17, %s8319_s12  ;;  %p8327_p8 = scmp.lt.s32.totalorder %s502_s17, %s502_s17 }
  0x6d   : > { %p8328_p13 = scmp.lt.s32.totalorder %s8319_s12, %s8319_s12 }
  0x6e   : > { %p8322_p12 = pnand %p8320_p1, %p11943_p4 }
  0x6f   : > { %p8329_p9 = por %p8328_p13, %p8327_p8 }
  0x70   : > { %p8323_p7 = pneg %p8322_p12 }
  0x72   : > { %p8330_p10 = pnand %p8329_p9, %p8323_p7 }
  0x74   : > { %8333 = shalt.err (!%p8330_p10)
}
  0x75   : > { %p11944_p11 = scmp.ne.s32.totalorder %s11929_s2, 0  ;;  %s11945_s18 = smov 4  }
  0x76   : > { %s11946_s25 = smov 64   ;;  %s11947_s5 = sld [smem:[#allocation101_spill]] }
  0x77   : > { %s8562_s27 = smov [#allocation13]   ;;  %s8563_s15 = smov [#allocation14]  }
  0x78   : > { %s533_s0 = sshll.u32 %s8562_s27, 4  ;;  %s549_s13 = sshll.u32 %s8563_s15, 4  ;;  %s534_s0 = int_to_ptr.vmem [resolvable:$true] %s533_s0  ;;  %s550_s13 = int_to_ptr.vmem [resolvable:$true] %s549_s13 }
  0x79   : > { %s8345_s14 = scalar_lea.vmem %s534_s0, 1024  ;;  %p8353_p1 = scmp.lt.s32.totalorder %s534_s0, %s534_s0 }
  0x7a   : > { %p8346_p0 = scmp.ne.s32.totalorder %s534_s0, %s8345_s14  ;;  %p8354_p12 = scmp.lt.s32.totalorder %s8345_s14, %s8345_s14 }
  0x7c   : > { %7495 = dma.hbm_to_vmem [thread:$0]  (!%p11944_p11), %s11947_s5, 1024, %s502_s17, [#allocation9], %s11946_s25, %s11946_s25, %s11945_s18  }
  0x7d   : > { %p8348_p5 = pnand %p8346_p0, %p11943_p4  ;;  %p8355_p7 = por %p8354_p12, %p8353_p1 }
  0x7f   : > { %p8349_p6 = pneg %p8348_p5 }
  0x81   : > { %p8356_p8 = pnand %p8355_p7, %p8349_p6 }
  0x83   : > { %8359 = shalt.err (!%p8356_p8)
}
  0x84   : > { %s11948_s9 = sld [smem:[#allocation103_spill]]  ;;  %s8371_s7 = scalar_lea.vmem %s550_s13, 1024 }
  0x85   : > { %p8372_p13 = scmp.ne.s32.totalorder %s550_s13, %s8371_s7  ;;  %p8379_p0 = scmp.lt.s32.totalorder %s550_s13, %s550_s13 }
  0x86   : > { %p8380_p5 = scmp.lt.s32.totalorder %s8371_s7, %s8371_s7 }
  0x87   : > { %p8374_p9 = pnand %p8372_p13, %p11943_p4 }
  0x88   : > { %p8381_p6 = por %p8380_p5, %p8379_p0 }
  0x89   : > { %p8375_p10 = pneg %p8374_p9 }
  0x8a   : > { %7501 = dma.hbm_to_vmem [thread:$0]  (!%p11944_p11), %s11948_s9, 1024, %s534_s0, [#allocation12], %s11946_s25, %s11946_s25, %s11945_s18  }
  0x8b   : > { %p8382_p1 = pnand %p8381_p6, %p8375_p10 }
  0x8d   : > { %8385 = shalt.err (!%p8382_p1)
}
  0x8e   : > { %7504 = dma.hbm_to_vmem [thread:$0]  (!%p11944_p11), %s11782_s11, 1024, %s550_s13, [#allocation15], %s11946_s25, %s11946_s25, %s11945_s18  }
  0x8f   : > { %s11949_s0 = sld [smem:[#allocation97_spill]]  ;;  %s582_s2 = scalar_lea.vmem [#allocation2], %s8772_s3 }
  0x90   : > { %s589_s17 = sshll.u32 %s582_s2, 4  ;;  %s11950_s14 = sld [smem:[#allocation99_spill]]  ;;  %s8860_s17 = int_to_ptr.vmem [resolvable:$true] %s589_s17 }
  0x91   : > { %s11951_s5 = sand.u32 1, %s8548_s29  }
  0x92   : > { %s579_s9 = scalar_lea.sflag [#allocation3], %s11951_s5 }
  0x95   : > { %s8857_s15 = scalar_lea.hbm %s11949_s0, %s8764_s26  ;;  %s8391_s23 = scalar_lea.hbm %s11949_s0, 4096 }
  0x96   : > { %s8866_s24 = scalar_lea.hbm %s11950_s14, %s8764_s26  ;;  %s8386_s13 = scalar_lea.hbm %s8857_s15, 2048 }
  0x97   : > { %p8387_p4 = scmp.ne.s32.totalorder %s8857_s15, %s8386_s13  ;;  %p8392_p7 = scmp.lt.s32.totalorder %s8857_s15, %s11949_s0 }
  0x98   : > { %p8393_p8 = scmp.lt.s32.totalorder %s8391_s23, %s8386_s13 }
  0x99   : > { %p8389_p11 = pnand %p8387_p4, %p8796_p3 }
  0x9a   : > { %p8394_p13 = por %p8393_p8, %p8392_p7 }
  0x9b   : > { %p8390_p12 = pneg %p8389_p11 }
  0x9d   : > { %p8395_p9 = pnand %p8394_p13, %p8390_p12 }
  0x9f   : > { %8398 = shalt.err (!%p8395_p9)
}
  0xa0   : > { %s8399_s5 = scalar_lea.vmem %s8860_s17, 2048  ;;  %s8564_s26 = smov [#allocation2]  }
  0xa1   : > { %p8400_p10 = scmp.ne.s32.totalorder %s8860_s17, %s8399_s5  ;;  %s8404_s12 = sshll.u32 %s8564_s26, 4  ;;  %s8405_s12 = int_to_ptr.vmem [resolvable:$false] %s8404_s12 }
  0xa2   : > { %s8406_s7 = scalar_lea.vmem %s8405_s12, 4096  ;;  %p8407_p6 = scmp.lt.s32.totalorder %s8860_s17, %s8405_s12 }
  0xa3   : > { %p8402_p0 = pnand %p8400_p10, %p8796_p3  ;;  %p8408_p1 = scmp.lt.s32.totalorder %s8406_s7, %s8399_s5 }
  0xa5   : > { %p8403_p5 = pneg %p8402_p0  ;;  %p8409_p4 = por %p8408_p1, %p8407_p6 }
  0xa7   : > { %p8410_p11 = pnand %p8409_p4, %p8403_p5 }
  0xa9   : > { %8413 = shalt.err (!%p8410_p11)
}
  0xaa   : > { %s11952_s13 = smov 8   ;;  %s11953_s18 = smov 128  }
  0xab   : > { %7508 = dma.hbm_to_vmem [thread:$0]  (!%p8774_p2), %s8857_s15, 2048, %s8860_s17, %s579_s9, %s11953_s18, %s11953_s18, %s11952_s13  }
  0xac   : > { %s624_s25 = scalar_lea.vmem [#allocation7], %s8772_s3  ;;  %s8414_s27 = scalar_lea.hbm %s8866_s24, 2048 }
  0xad   : > { %s631_s23 = sshll.u32 %s624_s25, 4  ;;  %p8415_p12 = scmp.ne.s32.totalorder %s8866_s24, %s8414_s27  ;;  %s632_s23 = int_to_ptr.vmem [resolvable:$true] %s631_s23 }
  0xae   : > { %s8419_s26 = scalar_lea.hbm %s11950_s14, 4096  ;;  %p8420_p13 = scmp.lt.s32.totalorder %s8866_s24, %s11950_s14 }
  0xaf   : > { %p8417_p7 = pnand %p8415_p12, %p8796_p3  ;;  %p8421_p9 = scmp.lt.s32.totalorder %s8419_s26, %s8414_s27 }
  0xb1   : > { %p8418_p8 = pneg %p8417_p7  ;;  %p8422_p10 = por %p8421_p9, %p8420_p13 }
  0xb3   : > { %p8423_p0 = pnand %p8422_p10, %p8418_p8 }
  0xb5   : > { %8426 = shalt.err (!%p8423_p0)
}
  0xb6   : > { %s8427_s3 = scalar_lea.vmem %s632_s23, 2048  ;;  %s8565_s9 = smov [#allocation7]  }
  0xb7   : > { %p8428_p5 = scmp.ne.s32.totalorder %s632_s23, %s8427_s3  ;;  %s8432_s15 = sshll.u32 %s8565_s9, 4  ;;  %s8433_s15 = int_to_ptr.vmem [resolvable:$false] %s8432_s15 }
  0xb8   : > { %s8434_s17 = scalar_lea.vmem %s8433_s15, 4096  ;;  %p8435_p4 = scmp.lt.s32.totalorder %s632_s23, %s8433_s15 }
  0xb9   : > { %p8430_p6 = pnand %p8428_p5, %p8796_p3  ;;  %p8436_p11 = scmp.lt.s32.totalorder %s8434_s17, %s8427_s3 }
  0xbb   : > { %p8431_p1 = pneg %p8430_p6  ;;  %p8437_p12 = por %p8436_p11, %p8435_p4 }
  0xbd   : > { %p8438_p7 = pnand %p8437_p12, %p8431_p1 }
  0xbf   : > { %8441 = shalt.err (!%p8438_p7)
}
  0xc0   : > { %7514 = dma.hbm_to_vmem [thread:$0]  (!%p8774_p2), %s8866_s24, 2048, %s632_s23, %s8790_s21, %s11953_s18, %s11953_s18, %s11952_s13  }
  0xc1   : > { %p11954_p3 = scmp.ne.s32.totalorder %s11928_s20, 0 }
  0xc3   : > { %643 = sbr.rel (%p11954_p3) target bundleno = 4021 (0xfb5), region = 88 }
  0xc8   : > { %s8917_s30 = sand.u32 1, %s8544_s28   ;;  %p11955_p8 = scmp.ne.s32.totalorder %s11937_s22, 0 }
  0xc9   : > { %s8920_s25 = sshll.u32 %s8917_s30, 7  ;;  %s646_s27 = scalar_lea.sflag [#allocation3], %s8917_s30 }
  0xca   : > { %s8924_s16 = scalar_lea.vmem [#allocation2], %s8920_s25 }
  0xcb   : > { %8511 = dma.done.wait (%p11955_p8), %s646_s27, 2048  }
  0xcc   : > { %8513 = vsyncadd (%p11955_p8), %s646_s27, 4294965248  ;;  %s654_s20 = sand.u32 1, %s8689_s1   ;;  %s8932_s24 = scalar_lea.vmem [#allocation5], %s8920_s25 }
  0xcd   : > { %s655_s21 = scalar_lea.sflag [#allocation6], %s654_s20 }
  0xce   : > { %8515 = dma.done.wait (%p11955_p8), %s655_s21, 4096  }
  0xcf   : > { %8517 = vsyncadd (%p11955_p8), %s655_s21, 4294963200  ;;  %s8939_s13 = scalar_lea.vmem [#allocation7], %s8920_s25  ;;  %p11956_p2 = scmp.eq.s32.totalorder %s8689_s1, 0 }
  0xd1   : > { %8519 = dma.done.wait (%p11956_p2), [#allocation9], 2048   ;;  %p11957_p13 = pmov %p11956_p2 }
  0xd2   : > { %p11958_p9 = pmov %p11956_p2 }
  0xd3   : > { %8521 = vsyncadd (%p11957_p13), [#allocation9], 4294965248 }
  0xd4   : > { %8523 = dma.done.wait (%p11958_p9), [#allocation12], 2048   ;;  %p11959_p10 = pmov %p11956_p2 }
  0xd5   : > { %p11960_p0 = pmov %p11956_p2 }
  0xd6   : > { %8525 = vsyncadd (%p11959_p10), [#allocation12], 4294965248 }
  0xd7   : > { %8527 = dma.done.wait (%p11960_p0), [#allocation15], 1024   ;;  %p11961_p5 = pmov %p11960_p0 }
  0xd8   : > { %v7580_v0 = vld [vmem:[#allocation10 + $0x38] sm:$0xff]   ;;  %v7581_v1 = vld [vmem:[#allocation10 + $0x30] sm:$0xff]   ;;  %v7583_v3 = vld [vmem:[#allocation10 + $0x28] sm:$0xff]   ;;  %vm1356_vm0 = vcmask 261120   ;;  %s8566_s5 = smov 96   ;;  %s8567_s7 = smov 64  }
  0xd9   : > { %8529 = vsyncadd (%p11961_p5), [#allocation15], 4294966272  ;;  %6803 = vmatprep.subr.bf16.mxu1 %v7580_v0  ;;  %v7582_v2 = vld [vmem:[#allocation8 + $0x38] sm:$0xff]   ;;  %v7584_v4 = vld [vmem:[#allocation8 + $0x30] sm:$0xff]   ;;  %s8568_s3 = smov 32   ;;  %s12229_s18 = sld [smem:[#allocation106_spill]] }
  0xda   : > { %6804 = vmatpush3.bf16.msra.mxu1 %v7580_v0  ;;  %6771 = vmatprep.subr.bf16.mxu0 %v7582_v2  ;;  %v7586_v5 = vld [vmem:[#allocation8 + $0x28] sm:$0xff]   ;;  %v7585_v6 = vld [vmem:[#allocation10 + $0x20] sm:$0xff]   ;;  %v7587_v8 = vld [vmem:[#allocation10 + $0x18] sm:$0xff]   ;;  %s11544_s23 = scalar_lea.vmem [#allocation16], %s8920_s25  ;;  %s12230_s2 = sld [smem:[#allocation29_spill]] }
  0xdb   : > { %6805 = vmatprep.subr.bf16.mxu1 %v7581_v1  ;;  %6772 = vmatpush3.bf16.msra.mxu0 %v7582_v2  ;;  %v7588_v7 = vld [vmem:[#allocation8 + $0x20] sm:$0xff]   ;;  %v7590_v9 = vld [vmem:[#allocation8 + $0x18] sm:$0xff]   ;;  %v781_v11 = vld [vmem:[%s8932_s24 + $0x8] sm:$0xff]  ;;  %s6053_s26 = sshll.u32 %s11544_s23, 4  ;;  %s6035_s15 = scalar_lea.sflag [#allocation4], %s8917_s30  ;;  %s11612_s26 = int_to_ptr.vmem [resolvable:$true] %s6053_s26 }
  0xdc   : > { %6773 = vmatprep.subr.bf16.mxu0 %v7584_v4  ;;  %v780_v10 = vld [vmem:[%s8932_s24] sm:$0xff]  ;;  %v7589_v12 = vld [vmem:[#allocation10 + $0x10] sm:$0xff]   ;;  %v757_v15 = vld [vmem:[%s8924_s16 + $0x8] sm:$0xff]  ;;  %s8442_s17 = scalar_lea.vmem %s11612_s26, 2048  ;;  %s8569_s27 = smov [#allocation16]  }
  0xdd   : > { %v796_v13 = vpack.c.bf16 %v781_v11, %v780_v10  ;;  %v756_v14 = vld [vmem:[%s8924_s16] sm:$0xff]  ;;  %v7592_v16 = vld [vmem:[#allocation8 + $0x10] sm:$0xff]   ;;  %v7591_v18 = vld [vmem:[#allocation10 + $0x8] sm:$0xff]   ;;  %p8443_p6 = scmp.ne.s32.totalorder %s11612_s26, %s8442_s17 }
  0xde   : > { %6806 = vmatpush3.bf16.msra.mxu1 %v7581_v1  ;;  %v772_v17 = vpack.c.bf16 %v757_v15, %v756_v14  ;;  %v7594_v19 = vld [vmem:[#allocation8 + $0x8] sm:$0xff]   ;;  %v7593_v20 = vld [vmem:[#allocation10] sm:$0xff]   ;;  %v782_v21 = vld [vmem:[%s8932_s24 + $0x10] sm:$0xff] }
  0xdf   : > { %6807 = vmatprep.subr.bf16.mxu1 %v7583_v3  ;;  %6774 = vmatpush3.bf16.msra.mxu0 %v7584_v4  ;;  %v783_v22 = vld [vmem:[%s8932_s24 + $0x18] sm:$0xff]  ;;  %v7595_v23 = vld [vmem:[#allocation8] sm:$0xff]   ;;  %v758_v25 = vld [vmem:[%s8924_s16 + $0x10] sm:$0xff] }
  0xe0   : > { %6775 = vmatprep.subr.bf16.mxu0 %v7586_v5  ;;  %6819 = vmatprep.mubr.bf16.mxu1 %v796_v13  ;;  %v784_v24 = vld [vmem:[%s8932_s24 + $0x20] sm:$0xff]  ;;  %v759_v26 = vld [vmem:[%s8924_s16 + $0x18] sm:$0xff]  ;;  %v785_v27 = vld [vmem:[%s8932_s24 + $0x28] sm:$0xff]  ;;  %v797_v30 = vpack.c.bf16 %v783_v22, %v782_v21  ;;  %p12232_p1 = scmp.ne.s32.totalorder %s12230_s2, 0 }
  0xe1   : > { %6787 = vmatprep.mubr.bf16.mxu0 %v772_v17  ;;  %v760_v28 = vld [vmem:[%s8924_s16 + $0x20] sm:$0xff]  ;;  %v761_v29 = vld [vmem:[%s8924_s16 + $0x28] sm:$0xff]  ;;  %v7596_v31 = vld [vmem:[#allocation11 + $0x38] sm:$0xff]   ;;  %v798_v32 = vpack.c.bf16 %v785_v27, %v784_v24  ;;  %v773_v33 = vpack.c.bf16 %v759_v26, %v758_v25 }
  0xe2   : > { %6808 = vmatpush3.bf16.msra.mxu1 %v7583_v3  ;;  %v786_v34 = vld [vmem:[%s8932_s24 + $0x30] sm:$0xff]  ;;  %v787_v35 = vld [vmem:[%s8932_s24 + $0x38] sm:$0xff]  ;;  %v774_v36 = vpack.c.bf16 %v761_v29, %v760_v28  ;;  %v788_v37 = vld [vmem:[%s8932_s24 + $0x40] sm:$0xff]  ;;  %p8444_p4 = pnand %p8443_p6, %p12232_p1 }
  0xe3   : > { %6809 = vmatprep.subr.bf16.mxu1 %v7585_v6  ;;  %6776 = vmatpush3.bf16.msra.mxu0 %v7586_v5  ;;  %v789_v38 = vld [vmem:[%s8932_s24 + $0x48] sm:$0xff]  ;;  %v7597_v39 = vld [vmem:[#allocation11 + $0x30] sm:$0xff]   ;;  %v763_v41 = vld [vmem:[%s8924_s16 + $0x38] sm:$0xff]  ;;  %v799_v45 = vpack.c.bf16 %v787_v35, %v786_v34 }
  0xe4   : > { %6777 = vmatprep.subr.bf16.mxu0 %v7588_v7  ;;  %v762_v40 = vld [vmem:[%s8924_s16 + $0x30] sm:$0xff]  ;;  %v764_v42 = vld [vmem:[%s8924_s16 + $0x40] sm:$0xff]  ;;  %v765_v43 = vld [vmem:[%s8924_s16 + $0x48] sm:$0xff]  ;;  %v800_v46 = vpack.c.bf16 %v789_v38, %v788_v37  ;;  %p8445_p11 = pneg %p8444_p4 }
  0xe5   : > { %v7598_v44 = vld [vmem:[#allocation11 + $0x28] sm:$0xff]   ;;  %v775_v47 = vpack.c.bf16 %v763_v41, %v762_v40  ;;  %v7599_v48 = vld [vmem:[#allocation11 + $0x20] sm:$0xff]   ;;  %v790_v49 = vld [vmem:[%s8932_s24 + $0x50] sm:$0xff]  ;;  %v776_v51 = vpack.c.bf16 %v765_v43, %v764_v42 }
  0xe6   : > { %6810 = vmatpush3.bf16.msra.mxu1 %v7585_v6  ;;  %v791_v50 = vld [vmem:[%s8932_s24 + $0x58] sm:$0xff]  ;;  %v792_v52 = vld [vmem:[%s8932_s24 + $0x60] sm:$0xff]  ;;  %v793_v53 = vld [vmem:[%s8932_s24 + $0x68] sm:$0xff] }
  0xe7   : > { %6811 = vmatprep.subr.bf16.mxu1 %v7587_v8  ;;  %6778 = vmatpush3.bf16.msra.mxu0 %v7588_v7  ;;  %v766_v54 = vld [vmem:[%s8924_s16 + $0x50] sm:$0xff]  ;;  %v767_v55 = vld [vmem:[%s8924_s16 + $0x58] sm:$0xff]  ;;  %v801_v56 = vpack.c.bf16 %v791_v50, %v790_v49  ;;  %v768_v57 = vld [vmem:[%s8924_s16 + $0x60] sm:$0xff]  ;;  %v802_v60 = vpack.c.bf16 %v793_v53, %v792_v52 }
  0xe8   : > { %6779 = vmatprep.subr.bf16.mxu0 %v7590_v9  ;;  %v769_v58 = vld [vmem:[%s8924_s16 + $0x68] sm:$0xff]  ;;  %v7600_v59 = vld [vmem:[#allocation11 + $0x18] sm:$0xff]   ;;  %v777_v61 = vpack.c.bf16 %v767_v55, %v766_v54  ;;  %v7601_v63 = vld [vmem:[#allocation11 + $0x10] sm:$0xff]  }
  0xe9   : > { %v778_v62 = vpack.c.bf16 %v769_v58, %v768_v57  ;;  %v794_v0 = vld [vmem:[%s8932_s24 + $0x70] sm:$0xff]  ;;  %v795_v1 = vld [vmem:[%s8932_s24 + $0x78] sm:$0xff]  ;;  %v7602_v5 = vld [vmem:[#allocation11 + $0x8] sm:$0xff]  }
  0xea   : > { %6812 = vmatpush3.bf16.msra.mxu1 %v7587_v8  ;;  %v770_v2 = vld [vmem:[%s8924_s16 + $0x70] sm:$0xff]  ;;  %v771_v3 = vld [vmem:[%s8924_s16 + $0x78] sm:$0xff]  ;;  %v803_v4 = vpack.c.bf16 %v795_v1, %v794_v0  ;;  %v7603_v7 = vld [vmem:[#allocation11] sm:$0xff]  }
  0xeb   : > { %6813 = vmatprep.subr.bf16.mxu1 %v7589_v12  ;;  %6780 = vmatpush3.bf16.msra.mxu0 %v7590_v9  ;;  %v779_v6 = vpack.c.bf16 %v771_v3, %v770_v2  ;;  %v804_v8 = vld [vmem:[%s8939_s13] sm:$0xff]  ;;  %v805_v9 = vld [vmem:[%s8939_s13 + $0x8] sm:$0xff]  ;;  %v806_v11 = vld [vmem:[%s8939_s13 + $0x10] sm:$0xff] }
  0xec   : > { %6781 = vmatprep.subr.bf16.mxu0 %v7592_v16  ;;  %v820_v10 = vpack.c.bf16 %v805_v9, %v804_v8  ;;  %v808_v14 = vld [vmem:[%s8939_s13 + $0x20] sm:$0xff]  ;;  %v809_v15 = vld [vmem:[%s8939_s13 + $0x28] sm:$0xff]  ;;  %v810_v17 = vld [vmem:[%s8939_s13 + $0x30] sm:$0xff] }
  0xed   : > { %v813_v21 = vld [vmem:[%s8939_s13 + $0x48] sm:$0xff]  ;;  %v815_v24 = vld [vmem:[%s8939_s13 + $0x58] sm:$0xff]  ;;  %v816_v26 = vld [vmem:[%s8939_s13 + $0x60] sm:$0xff] }
  0xee   : > { %6814 = vmatpush3.bf16.msra.mxu1 %v7589_v12  ;;  %v807_v12 = vld [vmem:[%s8939_s13 + $0x18] sm:$0xff]  ;;  %v817_v27 = vld [vmem:[%s8939_s13 + $0x68] sm:$0xff]  ;;  %v818_v29 = vld [vmem:[%s8939_s13 + $0x70] sm:$0xff] }
  0xef   : > { %6815 = vmatprep.subr.bf16.mxu1 %v7591_v18  ;;  %6782 = vmatpush3.bf16.msra.mxu0 %v7592_v16  ;;  %v821_v13 = vpack.c.bf16 %v807_v12, %v806_v11  ;;  %v822_v16 = vpack.c.bf16 %v809_v15, %v808_v14  ;;  %v826_v28 = vpack.c.bf16 %v817_v27, %v816_v26 }
  0xf0   : > { %6783 = vmatprep.subr.bf16.mxu0 %v7594_v19 }
  0xf2   : > { %6816 = vmatpush3.bf16.msra.mxu1 %v7591_v18  ;;  %v811_v18 = vld [vmem:[%s8939_s13 + $0x38] sm:$0xff] }
  0xf3   : > { %6817 = vmatprep.subr.bf16.mxu1 %v7593_v20  ;;  %6784 = vmatpush3.bf16.msra.mxu0 %v7594_v19  ;;  %v823_v19 = vpack.c.bf16 %v811_v18, %v810_v17 }
  0xf4   : > { %6785 = vmatprep.subr.bf16.mxu0 %v7595_v23 }
  0xf6   : > { %6818 = vmatpush3.bf16.msra.mxu1 %v7593_v20  ;;  %v812_v20 = vld [vmem:[%s8939_s13 + $0x40] sm:$0xff] }
  0xf7   : > { %6786 = vmatpush3.bf16.msra.mxu0 %v7595_v23  ;;  %v824_v22 = vpack.c.bf16 %v813_v21, %v812_v20  ;;  %v814_v23 = vld [vmem:[%s8939_s13 + $0x50] sm:$0xff] }
  0xf8   : > { %6835 = vmatprep.subr.bf16.mxu0 %v7596_v31  ;;  %v825_v25 = vpack.c.bf16 %v815_v24, %v814_v23 }
  0xf9   : > { %6820 = vmatmul.mubr.bf16.vlgmr.msra.gmra.mxu1 %v797_v30  ;;  %v819_v30 = vld [vmem:[%s8939_s13 + $0x78] sm:$0xff] }
  0xfa   : > { %6823 = vmatprep.mubr.bf16.mxu1 %v798_v32  ;;  %6788 = vmatmul.mubr.bf16.vlgmr.msra.gmra.mxu0 %v773_v33 }
  0xfb   : > { %6791 = vmatprep.mubr.bf16.mxu0 %v774_v36  ;;  %6836 = vmatpush3.bf16.msra.mxu0 %v7596_v31  ;;  %v827_v31 = vpack.c.bf16 %v819_v30, %v818_v29  ;;  %v9008_v36 = vld [vmem:[%s11775_s4] ss:$0 sm:$0xff] }
  0xfc   : > { %6837 = vmatprep.subr.bf16.mxu0 %v7597_v39 }
  0xff   : > { %6838 = vmatpush3.bf16.msra.mxu0 %v7597_v39 }
 0x100   : > { %6839 = vmatprep.subr.bf16.mxu0 %v7598_v44 }
 0x101   : > { %6824 = vmatmul.mubr.bf16.gmra.mxu1 %v799_v45 }
 0x102   : > { %6827 = vmatprep.mubr.bf16.mxu1 %v800_v46  ;;  %6792 = vmatmul.mubr.bf16.gmra.mxu0 %v775_v47  ;;  %v6302_v47 = vld [vmem:[%s11777_s6] ss:$0 sm:$0xff] }
 0x103   : > { %6795 = vmatprep.mubr.bf16.mxu0 %v776_v51  ;;  %6840 = vmatpush3.bf16.msra.mxu0 %v7598_v44 }
 0x104   : > { %6841 = vmatprep.subr.bf16.mxu0 %v7599_v48 }
 0x107   : > { %6842 = vmatpush3.bf16.msra.mxu0 %v7599_v48 }
 0x108   : > { %6843 = vmatprep.subr.bf16.mxu0 %v7600_v59 }
 0x109   : > { %6828 = vmatmul.mubr.bf16.gmra.mxu1 %v801_v56 }
 0x10a   : > { %6831 = vmatprep.mubr.bf16.mxu1 %v802_v60  ;;  %6796 = vmatmul.mubr.bf16.gmra.mxu0 %v777_v61 }
 0x10b   : > { %6799 = vmatprep.mubr.bf16.mxu0 %v778_v62  ;;  %6844 = vmatpush3.bf16.msra.mxu0 %v7600_v59 }
 0x10c   : > { %6845 = vmatprep.subr.bf16.mxu0 %v7601_v63 }
 0x10f   : > { %6846 = vmatpush3.bf16.msra.mxu0 %v7601_v63 }
 0x110   : > { %6847 = vmatprep.subr.bf16.mxu0 %v7602_v5 }
 0x111   : > { %6832 = vmatmul.mubr.bf16.gmra.mxu1 %v803_v4 }
 0x112   : > { %6800 = vmatmul.mubr.bf16.gmra.mxu0 %v779_v6 }
 0x113   : > { %6848 = vmatpush3.bf16.msra.mxu0 %v7602_v5  ;;  %6851 = vmatprep.mubr.bf16.mxu0 %v820_v10 }
 0x114   : > { %6849 = vmatprep.subr.bf16.mxu0 %v7603_v7 }
 0x117   : > { %6850 = vmatpush3.bf16.msra.mxu0 %v7603_v7 }
 0x11a   : > { %6852 = vmatmul.mubr.bf16.vlgmr.msra.gmra.mxu0 %v821_v13 }
 0x11b   : > { %6855 = vmatprep.mubr.bf16.mxu0 %v822_v16 }
 0x122   : > { %6856 = vmatmul.mubr.bf16.gmra.mxu0 %v823_v19 }
 0x123   : > { %6859 = vmatprep.mubr.bf16.mxu0 %v824_v22 }
 0x12a   : > { %6860 = vmatmul.mubr.bf16.gmra.mxu0 %v825_v25 }
 0x12b   : > { %6863 = vmatprep.mubr.bf16.mxu0 %v826_v28 }
 0x132   : > { %6864 = vmatmul.mubr.bf16.gmra.mxu0 %v827_v31 }
 0x1b9   : > { %v6821_v32 = vpop.f32.mrf.mxu1 }
 0x1ba   : > { %v9003_v34 = vpop.f32.mrf.mxu0  ;;  %v1118_v58 = vadd.f32 %v6821_v32, %v6302_v47 }
 0x1bb   : > { %v9001_v33 = vpop.f32.mrf.mxu1  ;;  %v942_v32 = vadd.f32 %v9003_v34, %v9008_v36 }
 0x1bc   : > { %v933_v37 = vpop.f32.mrf.mxu0  ;;  %v1110_v31 = vadd.f32 %v6302_v47, %v9001_v33 }
 0x1bd   : > { %v6822_v35 = vpop.f32.mrf.mxu1  ;;  %v934_v40 = vadd.f32 %v9008_v36, %v933_v37 }
 0x1be   : > { %v9010_v39 = vpop.f32.mrf.mxu0  ;;  %v1121_v54 = vadd.f32 %v6822_v35, %v6302_v47 }
 0x1bf   : > { %v1112_v38 = vpop.f32.mrf.mxu1  ;;  %v945_v35 = vadd.f32 %v9010_v39, %v9008_v36 }
 0x1c0   : > { %v936_v42 = vpop.f32.mrf.mxu0  ;;  %v9029_v61 = vpack.c.bf16 %v1121_v54, %v1118_v58  ;;  %v1113_v23 = vadd.f32 %v6302_v47, %v1112_v38 }
 0x1c1   : > { %v6825_v41 = vpop.f32.mrf.mxu1  ;;  %v937_v43 = vadd.f32 %v9008_v36, %v936_v42  ;;  %v9076_v39 = vpack.c.bf16 %v945_v35, %v942_v32 }
 0x1c2   : > { %v9014_v45 = vpop.f32.mrf.mxu0  ;;  %v1134_v50 = vadd.f32 %v6825_v41, %v6302_v47  ;;  %11964 = vst [vmem:[#allocation34_spill] sm:$0xff] %v9029_v61  ;;  %v9072_v33 = vpack.c.bf16 %v1113_v23, %v1110_v31 }
 0x1c3   : > { %v1125_v44 = vpop.f32.mrf.mxu1  ;;  %v9016_v46 = vpack.c.bf16 %v937_v43, %v934_v40  ;;  %11973 = vst [vmem:[#allocation43_spill] sm:$0xff] %v9076_v39  ;;  %v958_v40 = vadd.f32 %v9014_v45, %v9008_v36 }
 0x1c4   : > { %v949_v49 = vpop.f32.mrf.mxu0  ;;  %v1126_v20 = vadd.f32 %v6302_v47, %v1125_v44  ;;  %11972 = vst [vmem:[#allocation42_spill] sm:$0xff] %v9072_v33 }
 0x1c5   : > { %11962 = vst [vmem:[#allocation32_spill] sm:$0xff] %v9016_v46  ;;  %v6826_v48 = vpop.f32.mrf.mxu1  ;;  %6883 = vmatprep.mubr.msk.bf16.mxu1 %vm1356_vm0, %v9016_v46  ;;  %v950_v0 = vadd.f32 %v9008_v36, %v949_v49 }
 0x1c6   : > { %v1137_v51 = vadd.f32 %v6826_v48, %v6302_v47  ;;  %v9023_v53 = vpop.f32.mrf.mxu0 }
 0x1c7   : > { %v1128_v52 = vpop.f32.mrf.mxu1  ;;  %v961_v41 = vadd.f32 %v9023_v53, %v9008_v36 }
 0x1c8   : > { %v9025_v55 = vpack.c.bf16 %v1137_v51, %v1134_v50  ;;  %v952_v57 = vpop.f32.mrf.mxu0  ;;  %v1129_v16 = vadd.f32 %v6302_v47, %v1128_v52 }
 0x1c9   : > { %v6829_v56 = vpop.f32.mrf.mxu1  ;;  %v953_v2 = vadd.f32 %v9008_v36, %v952_v57  ;;  %v9088_v44 = vpack.c.bf16 %v961_v41, %v958_v40 }
 0x1ca   : > { %11963 = vst [vmem:[#allocation33_spill] sm:$0xff] %v9025_v55  ;;  %2094 = vrot.lane.b32.xlu0 %v9025_v55, %s8566_s5  ;;  %v6797_v60 = vpop.f32.mrf.mxu0  ;;  %v1150_v1 = vadd.f32 %v6829_v56, %v6302_v47  ;;  %v9053_v26 = vpack.c.bf16 %v1129_v16, %v1126_v20  ;;  %v1391_v56 = vsel %vm1356_vm0, %v9025_v55, 0  ;;  %v1382_v20 = vsel %vm1356_vm0, %v9072_v33, 0 }
 0x1cb   : > { %v1141_v59 = vpop.f32.mrf.mxu1  ;;  %v9037_v11 = vpack.c.bf16 %v953_v2, %v950_v0  ;;  %11974 = vst [vmem:[#allocation44_spill] sm:$0xff] %v9088_v44  ;;  %v6311_v0 = vld [vmem:[%s11779_s8] ss:$0 sm:$0xff] }
 0x1cc   : > { %v965_v63 = vpop.f32.mrf.mxu0  ;;  %v1142_v10 = vadd.f32 %v6302_v47, %v1141_v59  ;;  %11969 = vst [vmem:[#allocation39_spill] sm:$0xff] %v9053_v26 }
 0x1cd   : > { %v6830_v62 = vpop.f32.mrf.mxu1  ;;  %11966 = vst [vmem:[#allocation36_spill] sm:$0xff] %v9037_v11  ;;  %v966_v12 = vadd.f32 %v9008_v36, %v965_v63 }
 0x1ce   : > { %v1153_v3 = vadd.f32 %v6830_v62, %v6302_v47  ;;  %2090 = vrot.lane.b32.xlu0 %v9029_v61, %s8566_s5  ;;  %v6798_v5 = vpop.f32.mrf.mxu0 }
 0x1cf   : > { %v1144_v4 = vpop.f32.mrf.mxu1  ;;  %v977_v48 = vadd.f32 %v6798_v5, %v9008_v36 }
 0x1d0   : > { %v9035_v6 = vpack.c.bf16 %v1153_v3, %v1150_v1  ;;  %v1145_v7 = vadd.f32 %v6302_v47, %v1144_v4  ;;  %v968_v9 = vpop.f32.mrf.mxu0 }
 0x1d1   : > { %v6833_v8 = vpop.f32.mrf.mxu1  ;;  %v969_v14 = vadd.f32 %v9008_v36, %v968_v9 }
 0x1d2   : > { %11965 = vst [vmem:[#allocation35_spill] sm:$0xff] %v9035_v6  ;;  %2098 = vrot.lane.b32.xlu1 %v9035_v6, %s8566_s5  ;;  %2064 = vrot.lane.b32.xlu0 %v9016_v46, %s8566_s5  ;;  %v6801_v15 = vpop.f32.mrf.mxu0  ;;  %v9045_v17 = vpack.c.bf16 %v1145_v7, %v1142_v10  ;;  %v1166_v21 = vadd.f32 %v6833_v8, %v6302_v47  ;;  %v1397_v53 = vsel %vm1356_vm0, %v9035_v6, 0  ;;  %v1385_v7 = vsel %vm1356_vm0, %v9029_v61, 0 }
 0x1d3   : > { %v1157_v13 = vpop.f32.mrf.mxu1  ;;  %v9051_v24 = vpack.c.bf16 %v969_v14, %v966_v12  ;;  %v990_v51 = vadd.f32 %v6801_v15, %v9008_v36 }
 0x1d4   : > { %11967 = vst [vmem:[#allocation37_spill] sm:$0xff] %v9045_v17  ;;  %v981_v19 = vpop.f32.mrf.mxu0  ;;  %v1158_v27 = vadd.f32 %v6302_v47, %v1157_v13 }
 0x1d5   : > { %v6834_v18 = vpop.f32.mrf.mxu1  ;;  %11968 = vst [vmem:[#allocation38_spill] sm:$0xff] %v9051_v24  ;;  %v982_v42 = vadd.f32 %v9008_v36, %v981_v19 }
 0x1d6   : > { %v1169_v22 = vadd.f32 %v6834_v18, %v6302_v47  ;;  %2096 = vrot.lane.b32.xlu1 %v9045_v17, %s8566_s5  ;;  %2068 = vrot.lane.b32.xlu0 %v9037_v11, %s8566_s5  ;;  %v6802_v30 = vpop.f32.mrf.mxu0 }
 0x1d7   : > { %v1160_v25 = vpop.f32.mrf.mxu1  ;;  %v993_v52 = vadd.f32 %v6802_v30, %v9008_v36 }
 0x1d8   : > { %v9055_v28 = vpack.c.bf16 %v1169_v22, %v1166_v21  ;;  %v1161_v29 = vadd.f32 %v6302_v47, %v1160_v25  ;;  %v984_v34 = vpop.f32.mrf.mxu0  ;;  %v974_v47 = vadd.f32 %v6797_v60, %v9008_v36  ;;  %v1388_v60 = vsel %vm1356_vm0, %v9053_v26, 0 }
 0x1d9   : > { %v985_v43 = vadd.f32 %v9008_v36, %v984_v34  ;;  %v9114_v54 = vpack.c.bf16 %v993_v52, %v990_v51  ;;  %v1394_v36 = vsel %vm1356_vm0, %v9045_v17, 0 }
 0x1da   : > { %11970 = vst [vmem:[#allocation40_spill] sm:$0xff] %v9055_v28  ;;  %v9062_v37 = vpack.c.bf16 %v1161_v29, %v1158_v27  ;;  %7427 = vmatprep.subr.msk.bf16.mxu1 %vm1356_vm0, %v9055_v28  ;;  %2092 = vrot.lane.b32.xlu1 %v9053_v26, %s8566_s5  ;;  %v1403_v38 = vsel %vm1356_vm0, %v9055_v28, 0  ;;  %v9102_v50 = vpack.c.bf16 %v977_v48, %v974_v47  ;;  %v9128_v57 = vpop.f32.mrf.mxu0 }
 0x1db   : > { %2072 = vrot.lane.b32.xlu0 %v9051_v24, %s8566_s5  ;;  %6868 = vmatpush3.bf16.xpose.msra.mxu1 %v1403_v38  ;;  %v9098_v49 = vpack.c.bf16 %v985_v43, %v982_v42  ;;  %11977 = vst [vmem:[#allocation47_spill] sm:$0xff] %v9114_v54  ;;  %v1294_v42 = vadd.f32 %v9128_v57, %v6311_v0 }
 0x1dc   : > { %11971 = vst [vmem:[#allocation41_spill] sm:$0xff] %v9062_v37  ;;  %7428 = vmatprep.subr.msk.bf16.mxu1 %vm1356_vm0, %v9062_v37  ;;  %v1400_v45 = vsel %vm1356_vm0, %v9062_v37, 0  ;;  %11976 = vst [vmem:[#allocation46_spill] sm:$0xff] %v9102_v50  ;;  %v9130_v58 = vpop.f32.mrf.mxu0 }
 0x1dd   : > { %11975 = vst [vmem:[#allocation45_spill] sm:$0xff] %v9098_v49  ;;  %v1286_v47 = vadd.f32 %v6311_v0, %v9130_v58 }
 0x1de   : > { %2088 = vrot.lane.b32.xlu1 %v9072_v33, %s8566_s5  ;;  %v6854_v59 = vpop.f32.mrf.mxu0 }
 0x1df   : > { %2102 = vrot.lane.b32.xlu0 %v9055_v28, %s8566_s5  ;;  %v1297_v43 = vadd.f32 %v6854_v59, %v6311_v0 }
 0x1e0   : > { %v9134_v62 = vpop.f32.mrf.mxu0 }
 0x1e1   : > { %v9195_v48 = vpack.c.bf16 %v1297_v43, %v1294_v42 }
 0x1e2   : > { %2066 = vrot.lane.b32.xlu1 %v9076_v39, %s8566_s5  ;;  %v6857_v63 = vpop.f32.mrf.mxu0 }
 0x1e3   : > { %2100 = vrot.lane.b32.xlu0 %v9062_v37, %s8566_s5  ;;  %6870 = vmatpush3.bf16.xpose.msra.mxu1 %v1400_v45  ;;  %v1310_v2 = vadd.f32 %v6857_v63, %v6311_v0  ;;  %11984 = vst [vmem:[#allocation54_spill] sm:$0xff] %v9195_v48  ;;  %v1289_v45 = vadd.f32 %v6311_v0, %v9134_v62 }
 0x1e4   : > { %7429 = vmatprep.subr.msk.bf16.mxu1 %vm1356_vm0, %v9035_v6  ;;  %v1301_v1 = vpop.f32.mrf.mxu0 }
 0x1e5   : > { %v1302_v4 = vadd.f32 %v6311_v0, %v1301_v1  ;;  %v9202_v51 = vpack.c.bf16 %v1289_v45, %v1286_v47 }
 0x1e6   : > { %2070 = vrot.lane.b32.xlu1 %v9088_v44, %s8566_s5  ;;  %v6858_v3 = vpop.f32.mrf.mxu0 }
 0x1e7   : > { %2076 = vrot.lane.b32.xlu0 %v9098_v49, %s8566_s5  ;;  %v1313_v5 = vadd.f32 %v6858_v3, %v6311_v0  ;;  %11985 = vst [vmem:[#allocation55_spill] sm:$0xff] %v9202_v51 }
 0x1e8   : > { %v1304_v8 = vpop.f32.mrf.mxu0 }
 0x1e9   : > { %v9143_v9 = vpack.c.bf16 %v1313_v5, %v1310_v2  ;;  %v1305_v10 = vadd.f32 %v6311_v0, %v1304_v8 }
 0x1ea   : > { %2074 = vrot.lane.b32.xlu1 %v9102_v50, %s8566_s5  ;;  %v6861_v12 = vpop.f32.mrf.mxu0 }
 0x1eb   : > { %6872 = vmatpush3.bf16.xpose.msra.mxu1 %v1397_v53  ;;  %11978 = vst [vmem:[#allocation48_spill] sm:$0xff] %v9143_v9  ;;  %v9147_v13 = vpack.c.bf16 %v1305_v10, %v1302_v4  ;;  %v1326_v15 = vadd.f32 %v6861_v12, %v6311_v0 }
 0x1ec   : > { %7430 = vmatprep.subr.msk.bf16.mxu1 %vm1356_vm0, %v9045_v17  ;;  %v1317_v14 = vpop.f32.mrf.mxu0 }
 0x1ed   : > { %11979 = vst [vmem:[#allocation49_spill] sm:$0xff] %v9147_v13  ;;  %2413 = vrot.lane.b32.xlu0 %v9147_v13, %s8566_s5  ;;  %v1318_v18 = vadd.f32 %v6311_v0, %v1317_v14 }
 0x1ee   : > { %2078 = vrot.lane.b32.xlu1 %v9114_v54, %s8566_s5  ;;  %v6862_v16 = vpop.f32.mrf.mxu0 }
 0x1ef   : > { %v1329_v19 = vadd.f32 %v6862_v16, %v6311_v0 }
 0x1f0   : > { %v1320_v21 = vpop.f32.mrf.mxu0 }
 0x1f1   : > { %v9155_v22 = vpack.c.bf16 %v1329_v19, %v1326_v15  ;;  %v1321_v23 = vadd.f32 %v6311_v0, %v1320_v21 }
 0x1f2   : > { %2415 = vrot.lane.b32.xlu1 %v9143_v9, %s8566_s5  ;;  %v6865_v25 = vpop.f32.mrf.mxu0 }
 0x1f3   : > { %6874 = vmatpush3.bf16.xpose.msra.mxu1 %v1394_v36  ;;  %11980 = vst [vmem:[#allocation50_spill] sm:$0xff] %v9155_v22  ;;  %v9157_v27 = vpack.c.bf16 %v1321_v23, %v1318_v18  ;;  %2419 = vrot.lane.b32.xlu0 %v9155_v22, %s8566_s5  ;;  %v1342_v30 = vadd.f32 %v6865_v25, %v6311_v0 }
 0x1f4   : > { %7431 = vmatprep.subr.msk.bf16.mxu1 %vm1356_vm0, %v9025_v55  ;;  %v1333_v29 = vpop.f32.mrf.mxu0 }
 0x1f5   : > { %11981 = vst [vmem:[#allocation51_spill] sm:$0xff] %v9157_v27  ;;  %v1334_v35 = vadd.f32 %v6311_v0, %v1333_v29 }
 0x1f6   : > { %2417 = vrot.lane.b32.xlu1 %v9157_v27, %s8566_s5  ;;  %v6866_v31 = vpop.f32.mrf.mxu0 }
 0x1f7   : > { %v1345_v32 = vadd.f32 %v6866_v31, %v6311_v0 }
 0x1f8   : > { %v1336_v34 = vpop.f32.mrf.mxu0 }
 0x1f9   : > { %v9167_v38 = vpack.c.bf16 %v1345_v32, %v1342_v30  ;;  %v1337_v40 = vadd.f32 %v6311_v0, %v1336_v34 }
 0x1fb   : > { %6876 = vmatpush3.bf16.xpose.msra.mxu1 %v1391_v56  ;;  %11982 = vst [vmem:[#allocation52_spill] sm:$0xff] %v9167_v38  ;;  %6899 = vmatprep.subr.bf16.mxu0 %v9167_v38  ;;  %v9172_v41 = vpack.c.bf16 %v1337_v40, %v1334_v35 }
 0x1fc   : > { %7432 = vmatprep.subr.msk.bf16.mxu1 %vm1356_vm0, %v9053_v26  ;;  %2423 = vrot.lane.b32.xlu1 %v9167_v38, %s8566_s5 }
 0x1fd   : > { %11983 = vst [vmem:[#allocation53_spill] sm:$0xff] %v9172_v41  ;;  %6900 = vmatpush3.bf16.msra.mxu0 %v9167_v38  ;;  %2421 = vrot.lane.b32.xlu0 %v9172_v41, %s8566_s5 }
 0x1fe   : > { %6901 = vmatprep.subr.bf16.mxu0 %v9172_v41 }
 0x201   : > { %6902 = vmatpush3.bf16.msra.mxu0 %v9172_v41 }
 0x202   : > { %6903 = vmatprep.subr.bf16.mxu0 %v9155_v22 }
 0x203   : > { %6878 = vmatpush3.bf16.xpose.msra.mxu1 %v1388_v60 }
 0x204   : > { %7433 = vmatprep.subr.msk.bf16.mxu1 %vm1356_vm0, %v9029_v61 }
 0x205   : > { %6904 = vmatpush3.bf16.msra.mxu0 %v9155_v22 }
 0x206   : > { %6905 = vmatprep.subr.bf16.mxu0 %v9157_v27 }
 0x209   : > { %6906 = vmatpush3.bf16.msra.mxu0 %v9157_v27 }
 0x20a   : > { %6907 = vmatprep.subr.bf16.mxu0 %v9143_v9 }
 0x20b   : > { %6880 = vmatpush3.bf16.xpose.msra.mxu1 %v1385_v7 }
 0x20c   : > { %7434 = vmatprep.subr.msk.bf16.mxu1 %vm1356_vm0, %v9072_v33 }
 0x20d   : > { %6908 = vmatpush3.bf16.msra.mxu0 %v9143_v9 }
 0x20e   : > { %6909 = vmatprep.subr.bf16.mxu0 %v9147_v13 }
 0x211   : > { %6910 = vmatpush3.bf16.msra.mxu0 %v9147_v13 }
 0x212   : > { %6911 = vmatprep.subr.bf16.mxu0 %v9195_v48 }
 0x213   : > { %6882 = vmatpush3.bf16.xpose.msra.mxu1 %v1382_v20 }
 0x215   : > { %6912 = vmatpush3.bf16.msra.mxu0 %v9195_v48 }
 0x216   : > { %6913 = vmatprep.subr.bf16.mxu0 %v9202_v51 }
 0x219   : > { %6914 = vmatpush3.bf16.msra.mxu0 %v9202_v51 }
 0x21a   : > { %6884 = vmatmul.mubr.msk.bf16.vlgmr.msra.gmra.mxu1 %vm1356_vm0, %v9076_v39  ;;  %6931 = vmatprep.subr.bf16.mxu0 %v9167_v38 }
 0x21b   : > { %6887 = vmatprep.mubr.msk.bf16.mxu1 %vm1356_vm0, %v9037_v11 }
 0x222   : > { %6888 = vmatmul.mubr.msk.bf16.gmra.mxu1 %vm1356_vm0, %v9088_v44 }
 0x223   : > { %6891 = vmatprep.mubr.msk.bf16.mxu1 %vm1356_vm0, %v9051_v24 }
 0x22a   : > { %6892 = vmatmul.mubr.msk.bf16.gmra.mxu1 %vm1356_vm0, %v9102_v50 }
 0x22b   : > { %6895 = vmatprep.mubr.msk.bf16.mxu1 %vm1356_vm0, %v9098_v49 }
 0x232   : > { %6896 = vmatmul.mubr.msk.bf16.gmra.mxu1 %vm1356_vm0, %v9114_v54 }
 0x23c   : > { %v2095_v52 = vpop.permute.xlu0 %2094 }
 0x23d   : > { %v2138_v3 = vsel %vm1356_vm0, %v2095_v52, 0 }
 0x240   : > { %v2091_v53 = vpop.permute.xlu0 %2090 }
 0x241   : > { %v2132_v8 = vsel %vm1356_vm0, %v2091_v53, 0 }
 0x244   : > { %v2065_v36 = vpop.permute.xlu0 %2064  ;;  %v2099_v63 = vpop.permute.xlu1 %2098 }
 0x245   : > { %6979 = vmatprep.mubr.msk.bf16.mxu1 %vm1356_vm0, %v2065_v36  ;;  %v2144_v0 = vsel %vm1356_vm0, %v2099_v63, 0 }
 0x248   : > { %v2069_v56 = vpop.permute.xlu0 %2068  ;;  %v2097_v1 = vpop.permute.xlu1 %2096 }
 0x249   : > { %v2141_v2 = vsel %vm1356_vm0, %v2097_v1, 0 }
 0x24c   : > { %v2093_v4 = vpop.permute.xlu1 %2092 }
 0x24d   : > { %v2073_v57 = vpop.permute.xlu0 %2072  ;;  %v2135_v5 = vsel %vm1356_vm0, %v2093_v4, 0 }
 0x250   : > { %v2089_v7 = vpop.permute.xlu1 %2088 }
 0x251   : > { %v2103_v58 = vpop.permute.xlu0 %2102  ;;  %v2129_v14 = vsel %vm1356_vm0, %v2089_v7, 0 }
 0x252   : > { %7435 = vmatprep.subr.msk.bf16.mxu1 %vm1356_vm0, %v2103_v58  ;;  %v2150_v59 = vsel %vm1356_vm0, %v2103_v58, 0 }
 0x253   : > { %6964 = vmatpush3.bf16.xpose.msra.mxu1 %v2150_v59 }
 0x254   : > { %v2067_v10 = vpop.permute.xlu1 %2066 }
 0x255   : > { %v2101_v60 = vpop.permute.xlu0 %2100 }
 0x256   : > { %7436 = vmatprep.subr.msk.bf16.mxu1 %vm1356_vm0, %v2101_v60  ;;  %v2147_v62 = vsel %vm1356_vm0, %v2101_v60, 0 }
 0x258   : > { %v2071_v12 = vpop.permute.xlu1 %2070 }
 0x259   : > { %v2077_v18 = vpop.permute.xlu0 %2076 }
 0x25b   : > { %6966 = vmatpush3.bf16.xpose.msra.mxu1 %v2147_v62 }
 0x25c   : > { %7437 = vmatprep.subr.msk.bf16.mxu1 %vm1356_vm0, %v2099_v63  ;;  %v2075_v15 = vpop.permute.xlu1 %2074 }
 0x25f   : > { %v9230_v20 = vpop.permute.xlu0 %2413 }
 0x260   : > { %v2079_v16 = vpop.permute.xlu1 %2078  ;;  %11987 = vst [vmem:[#allocation57_spill] sm:$0xff] %v9230_v20 }
 0x263   : > { %6968 = vmatpush3.bf16.xpose.msra.mxu1 %v2144_v0 }
 0x264   : > { %7438 = vmatprep.subr.msk.bf16.mxu1 %vm1356_vm0, %v2097_v1  ;;  %v9228_v19 = vpop.permute.xlu1 %2415 }
 0x265   : > { %11986 = vst [vmem:[#allocation56_spill] sm:$0xff] %v9228_v19  ;;  %v9234_v23 = vpop.permute.xlu0 %2419 }
 0x266   : > { %11989 = vst [vmem:[#allocation59_spill] sm:$0xff] %v9234_v23 }
 0x268   : > { %v9232_v21 = vpop.permute.xlu1 %2417 }
 0x269   : > { %11988 = vst [vmem:[#allocation58_spill] sm:$0xff] %v9232_v21 }
 0x26b   : > { %6970 = vmatpush3.bf16.xpose.msra.mxu1 %v2141_v2 }
 0x26c   : > { %7439 = vmatprep.subr.msk.bf16.mxu1 %vm1356_vm0, %v2095_v52 }
 0x26e   : > { %v9238_v25 = vpop.permute.xlu1 %2423 }
 0x26f   : > { %v9240_v29 = vpop.permute.xlu0 %2421 }
 0x270   : > { %11990 = vst [vmem:[#allocation60_spill] sm:$0xff] %v9240_v29 }
 0x273   : > { %6972 = vmatpush3.bf16.xpose.msra.mxu1 %v2138_v3 }
 0x274   : > { %7440 = vmatprep.subr.msk.bf16.mxu1 %vm1356_vm0, %v2093_v4 }
 0x27b   : > { %6974 = vmatpush3.bf16.xpose.msra.mxu1 %v2135_v5 }
 0x27c   : > { %7441 = vmatprep.subr.msk.bf16.mxu1 %vm1356_vm0, %v2091_v53 }
 0x283   : > { %6976 = vmatpush3.bf16.xpose.msra.mxu1 %v2132_v8 }
 0x284   : > { %7442 = vmatprep.subr.msk.bf16.mxu1 %vm1356_vm0, %v2089_v7 }
 0x28b   : > { %6978 = vmatpush3.bf16.xpose.msra.mxu1 %v2129_v14 }
 0x28c   : > { %7411 = vmatprep.subr.bf16.mxu1 %v9238_v25 }
 0x292   : > { %6980 = vmatmul.mubr.msk.bf16.vlgmr.msra.gmra.mxu1 %vm1356_vm0, %v2067_v10 }
 0x293   : > { %6983 = vmatprep.mubr.msk.bf16.mxu1 %vm1356_vm0, %v2069_v56  ;;  %7419 = vmatpush3.bf16.msra.mxu1 %v9238_v25 }
 0x294   : > { %7412 = vmatprep.subr.bf16.mxu1 %v9240_v29 }
 0x297   : > { %7420 = vmatpush3.bf16.msra.mxu1 %v9240_v29 }
 0x298   : > { %7413 = vmatprep.subr.bf16.mxu1 %v9234_v23 }
 0x29a   : > { %6984 = vmatmul.mubr.msk.bf16.gmra.mxu1 %vm1356_vm0, %v2071_v12 }
 0x29b   : > { %6987 = vmatprep.mubr.msk.bf16.mxu1 %vm1356_vm0, %v2073_v57  ;;  %7421 = vmatpush3.bf16.msra.mxu1 %v9234_v23 }
 0x29c   : > { %7414 = vmatprep.subr.bf16.mxu1 %v9232_v21 }
 0x29f   : > { %7422 = vmatpush3.bf16.msra.mxu1 %v9232_v21 }
 0x2a0   : > { %7415 = vmatprep.subr.bf16.mxu1 %v9228_v19 }
 0x2a2   : > { %6988 = vmatmul.mubr.msk.bf16.gmra.mxu1 %vm1356_vm0, %v2075_v15 }
 0x2a3   : > { %6991 = vmatprep.mubr.msk.bf16.mxu1 %vm1356_vm0, %v2077_v18  ;;  %7423 = vmatpush3.bf16.msra.mxu1 %v9228_v19 }
 0x2a4   : > { %7416 = vmatprep.subr.bf16.mxu1 %v9230_v20 }
 0x2a7   : > { %7424 = vmatpush3.bf16.msra.mxu1 %v9230_v20 }
 0x2aa   : > { %6992 = vmatmul.mubr.msk.bf16.gmra.mxu1 %vm1356_vm0, %v2079_v16 }
 0x2da   : > { %v9257_v30 = vpop.f32.mrf.mxu1 }
 0x2db   : > { %1506 = vmax.xlane.f32.xlu1 %v9257_v30 }
 0x2dc   : > { %v9260_v31 = vpop.f32.mrf.mxu1 }
 0x2de   : > { %v9262_v32 = vpop.f32.mrf.mxu1 }
 0x2df   : > { %1502 = vmax.xlane.f32.xlu1 %v9260_v31 }
 0x2e0   : > { %v9265_v35 = vpop.f32.mrf.mxu1 }
 0x2e2   : > { %v9267_v34 = vpop.f32.mrf.mxu1 }
 0x2e3   : > { %1508 = vmax.xlane.f32.xlu1 %v9262_v32 }
 0x2e4   : > { %v9270_v40 = vpop.f32.mrf.mxu1 }
 0x2e6   : > { %v9272_v42 = vpop.f32.mrf.mxu1 }
 0x2e7   : > { %1504 = vmax.xlane.f32.xlu1 %v9265_v35 }
 0x2e8   : > { %v9275_v43 = vpop.f32.mrf.mxu1 }
 0x2ea   : > { %v9277_v47 = vpop.f32.mrf.mxu1 }
 0x2eb   : > { %1514 = vmax.xlane.f32.xlu1 %v9267_v34 }
 0x2ec   : > { %v9280_v45 = vpop.f32.mrf.mxu1 }
 0x2ee   : > { %v9282_v52 = vpop.f32.mrf.mxu1 }
 0x2ef   : > { %1510 = vmax.xlane.f32.xlu1 %v9270_v40 }
 0x2f0   : > { %v9285_v53 = vpop.f32.mrf.mxu1 }
 0x2f2   : > { %v9287_v36 = vpop.f32.mrf.mxu1 }
 0x2f3   : > { %1516 = vmax.xlane.f32.xlu1 %v9272_v42 }
 0x2f4   : > { %v9290_v56 = vpop.f32.mrf.mxu1 }
 0x2f6   : > { %v9292_v57 = vpop.f32.mrf.mxu1 }
 0x2f7   : > { %1512 = vmax.xlane.f32.xlu1 %v9275_v43  ;;  %1532 = vmax.xlane.f32.xlu0 %v9292_v57 }
 0x2f8   : > { %v9302_v58 = vpop.f32.mrf.mxu1 }
 0x2fb   : > { %1522 = vmax.xlane.f32.xlu1 %v9277_v47 }
 0x2ff   : > { %1518 = vmax.xlane.f32.xlu1 %v9280_v45 }
 0x303   : > { %1524 = vmax.xlane.f32.xlu1 %v9282_v52 }
 0x307   : > { %1520 = vmax.xlane.f32.xlu1 %v9285_v53 }
 0x30b   : > { %1530 = vmax.xlane.f32.xlu1 %v9287_v36 }
 0x30f   : > { %1526 = vmax.xlane.f32.xlu1 %v9290_v56 }
 0x313   : > { %1528 = vmax.xlane.f32.xlu1 %v9302_v58 }
 0x324   : > { %1751 = vxpose.xlu0.b32.start [1/16] %v9260_v31, 128 }
 0x328   : > { %1752 = vxpose.xlu0.b32.cont [2/16] %v9265_v35, 128 }
 0x32c   : > { %1753 = vxpose.xlu0.b32.cont [3/16] %v9257_v30, 128 }
 0x330   : > { %1754 = vxpose.xlu0.b32.cont [4/16] %v9262_v32, 128 }
 0x334   : > { %1755 = vxpose.xlu0.b32.cont [5/16] %v9270_v40, 128 }
 0x338   : > { %1756 = vxpose.xlu0.b32.cont [6/16] %v9275_v43, 128 }
 0x33c   : > { %1757 = vxpose.xlu0.b32.cont [7/16] %v9267_v34, 128 }
 0x340   : > { %1758 = vxpose.xlu0.b32.cont [8/16] %v9272_v42, 128 }
 0x344   : > { %1759 = vxpose.xlu0.b32.cont [9/16] %v9280_v45, 128 }
 0x348   : > { %1760 = vxpose.xlu0.b32.cont [10/16] %v9285_v53, 128 }
 0x34c   : > { %1761 = vxpose.xlu0.b32.cont [11/16] %v9277_v47, 128 }
 0x350   : > { %1762 = vxpose.xlu0.b32.cont [12/16] %v9282_v52, 128 }
 0x352   : > { %v9323_v63 = vpop.f32.mrf.mxu1 }
 0x354   : > { %1763 = vxpose.xlu0.b32.cont [13/16] %v9290_v56, 128  ;;  %v9326_v0 = vpop.f32.mrf.mxu1 }
 0x356   : > { %v9331_v2 = vpop.f32.mrf.mxu1 }
 0x358   : > { %1764 = vxpose.xlu0.b32.cont [14/16] %v9302_v58, 128  ;;  %v9336_v4 = vpop.f32.mrf.mxu1 }
 0x35a   : > { %v9339_v5 = vpop.f32.mrf.mxu1 }
 0x35c   : > { %1765 = vxpose.xlu0.b32.cont [15/16] %v9287_v36, 128  ;;  %v9346_v10 = vpop.f32.mrf.mxu1 }
 0x35e   : > { %v9354_v15 = vpop.f32.mrf.mxu1 }
 0x360   : > { %1766 = vxpose.xlu0.b32.end [16/16] %v9292_v57, 128  ;;  %v9360_v18 = vpop.f32.mrf.mxu1 }
 0x362   : > { %v9368_v54 = vpop.f32.mrf.mxu1 }
 0x363   : > { %11992 = vst [vmem:[#allocation62_spill] sm:$0xff] %v9368_v54 }
 0x364   : > { %v1507_v59 = vpop.xlane.xlu1 %1506  ;;  %v9376_v46 = vpop.f32.mrf.mxu1 }
 0x365   : > { %11994 = vst [vmem:[#allocation64_spill] sm:$0xff] %v9376_v46  ;;  %v1536_v33 = vsub.f32 %v9257_v30, %v1507_v59 }
 0x366   : > { %v9382_v61 = vpop.f32.mrf.mxu1 }
 0x367   : > { %11996 = vst [vmem:[#allocation66_spill] sm:$0xff] %v9382_v61  ;;  %v1554_v37 = vmul.f32 1.442695, %v1536_v33 }
 0x368   : > { %v1503_v60 = vpop.xlane.xlu1 %1502  ;;  %v9390_v26 = vpop.f32.mrf.mxu1 }
 0x369   : > { %v1534_v28 = vsub.f32 %v9260_v31, %v1503_v60  ;;  %7620 = vpow2.f32 %v1554_v37 }
 0x36a   : > { %v9397_v19 = vpop.f32.mrf.mxu1 }
 0x36b   : > { %11999 = vst [vmem:[#allocation69_spill] sm:$0xff] %v9397_v19 }
 0x36c   : > { %v9321_v62 = vpop.xlane.xlu1 %1508 }
 0x36d   : > { %v1537_v30 = vsub.f32 %v9262_v32, %v9321_v62 }
 0x370   : > { %v9328_v1 = vpop.xlane.xlu1 %1504 }
 0x371   : > { %v1535_v31 = vsub.f32 %v9265_v35, %v9328_v1 }
 0x373   : > { %v1552_v37 = vmul.f32 1.442695, %v1535_v31 }
 0x374   : > { %v9334_v3 = vpop.xlane.xlu1 %1514 }
 0x376   : > { %v9427_v35 = vpop.eup %7620 }
 0x378   : > { %v9341_v7 = vpop.xlane.xlu1 %1510 }
 0x379   : > { %v1538_v1 = vsub.f32 %v9270_v40, %v9341_v7 }
 0x37c   : > { %v9352_v14 = vpop.xlane.xlu1 %1516 }
 0x380   : > { %v9343_v8 = vpop.xlane.xlu0 %1532  ;;  %v9362_v49 = vpop.xlane.xlu1 %1512 }
 0x381   : > { %v1539_v7 = vsub.f32 %v9275_v43, %v9362_v49 }
 0x384   : > { %v9374_v50 = vpop.xlane.xlu1 %1522 }
 0x388   : > { %v1519_v39 = vpop.xlane.xlu1 %1518 }
 0x389   : > { %v1542_v17 = vsub.f32 %v9280_v45, %v1519_v39  ;;  %v1550_v39 = vmul.f32 1.442695, %v1534_v28  ;;  %v9405_v45 = vpop.f32.mrf.mxu1 }
 0x38a   : > { %12001 = vst [vmem:[#allocation71_spill] sm:$0xff] %v9405_v45 }
 0x38b   : > { %v1566_v20 = vmul.f32 1.442695, %v1542_v17  ;;  %v1556_v17 = vmul.f32 1.442695, %v1537_v30  ;;  %v9413_v59 = vpop.f32.mrf.mxu1 }
 0x38c   : > { %12003 = vst [vmem:[#allocation73_spill] sm:$0xff] %v9413_v59 }
 0x38d   : > { %2253 = vmax.xlane.f32.xlu0 %v9323_v63  ;;  %7622 = vpow2.f32 %v1566_v20  ;;  %v1540_v20 = vsub.f32 %v9267_v34, %v9334_v3  ;;  %v9421_v32 = vpop.f32.mrf.mxu1  ;;  %v1558_v34 = vmul.f32 1.442695, %v1538_v1  ;;  %v1541_v3 = vsub.f32 %v9272_v42, %v9352_v14  ;;  %v1525_v14 = vpop.xlane.xlu1 %1524 }
 0x38e   : > { %7624 = vpow2.f32 %v1550_v39  ;;  %12005 = vst [vmem:[#allocation75_spill] sm:$0xff] %v9421_v32  ;;  %v1545_v43 = vsub.f32 %v9282_v52, %v1525_v14 }
 0x38f   : > { %7626 = vpow2.f32 %v1556_v17  ;;  %v1562_v62 = vmul.f32 1.442695, %v1540_v20  ;;  %v1564_v40 = vmul.f32 1.442695, %v1541_v3  ;;  %v1560_v20 = vmul.f32 1.442695, %v1539_v7 }
 0x390   : > { %7628 = vpow2.f32 %v1552_v37 }
 0x391   : > { %2249 = vmax.xlane.f32.xlu0 %v9326_v0  ;;  %7630 = vpow2.f32 %v1562_v62  ;;  %v1544_v62 = vsub.f32 %v9277_v47, %v9374_v50  ;;  %v1521_v3 = vpop.xlane.xlu1 %1520 }
 0x392   : > { %7632 = vpow2.f32 %v1558_v34  ;;  %v1543_v7 = vsub.f32 %v9285_v53, %v1521_v3 }
 0x393   : > { %7634 = vpow2.f32 %v1564_v40  ;;  %v1570_v49 = vmul.f32 1.442695, %v1544_v62  ;;  %v1572_v40 = vmul.f32 1.442695, %v1545_v43  ;;  %v1549_v43 = vsub.f32 %v9292_v57, %v9343_v8 }
 0x394   : > { %7636 = vpow2.f32 %v1560_v20  ;;  %v1568_v47 = vmul.f32 1.442695, %v1543_v7 }
 0x395   : > { %2255 = vmax.xlane.f32.xlu0 %v9331_v2  ;;  %7638 = vpow2.f32 %v1570_v49  ;;  %v1531_v50 = vpop.xlane.xlu1 %1530 }
 0x396   : > { %7640 = vpow2.f32 %v1572_v40  ;;  %v1548_v52 = vsub.f32 %v9287_v36, %v1531_v50  ;;  %v1580_v36 = vmul.f32 1.442695, %v1549_v43 }
 0x397   : > { %7642 = vpow2.f32 %v1568_v47 }
 0x398   : > { %v1578_v62 = vmul.f32 1.442695, %v1548_v52 }
 0x399   : > { %2251 = vmax.xlane.f32.xlu0 %v9336_v4  ;;  %v1527_v14 = vpop.xlane.xlu1 %1526 }
 0x39a   : > { %v9431_v39 = vpop.eup %7622  ;;  %v1546_v53 = vsub.f32 %v9290_v56, %v1527_v14  ;;  %7644 = vpow2.f32 %v1578_v62 }
 0x39b   : > { %v9439_v17 = vpop.eup %7624 }
 0x39c   : > { %v9447_v37 = vpop.eup %7626  ;;  %v1574_v3 = vmul.f32 1.442695, %v1546_v53 }
 0x39d   : > { %2261 = vmax.xlane.f32.xlu0 %v9339_v5  ;;  %v9450_v42 = vpop.eup %7628  ;;  %v1529_v7 = vpop.xlane.xlu1 %1528 }
 0x39e   : > { %v9455_v1 = vpop.eup %7630  ;;  %7646 = vpow2.f32 %v1574_v3  ;;  %v1547_v50 = vsub.f32 %v9302_v58, %v1529_v7 }
 0x39f   : > { %v9459_v34 = vpop.eup %7632  ;;  %7648 = vpow2.f32 %v1580_v36 }
 0x3a0   : > { %v9348_v12 = vpop.trf.xlu0  ;;  %v9463_v20 = vpop.eup %7634  ;;  %v1576_v52 = vmul.f32 1.442695, %v1547_v50 }
 0x3a1   : > { %1783 = vmax.xlane.f32.xlu1 %v9348_v12  ;;  %2257 = vmax.xlane.f32.xlu0 %v9346_v10  ;;  %v9466_v23 = vpop.eup %7636 }
 0x3a2   : > { %v9472_v49 = vpop.eup %7638  ;;  %7650 = vpow2.f32 %v1576_v52 }
 0x3a3   : > { %v9477_v40 = vpop.eup %7640 }
 0x3a4   : > { %v9356_v16 = vpop.trf.xlu0  ;;  %v9481_v47 = vpop.eup %7642 }
 0x3a5   : > { %11991 = vst [vmem:[#allocation61_spill] sm:$0xff] %v9356_v16  ;;  %1785 = vmax.xlane.f32.xlu1 %v9356_v16  ;;  %2263 = vmax.xlane.f32.xlu0 %v9354_v15 }
 0x3a7   : > { %v9487_v57 = vpop.eup %7644 }
 0x3a8   : > { %v9364_v24 = vpop.trf.xlu0  ;;  %12010 = vst [vmem:[#allocation80_spill] sm:$0xff] %v9487_v57 }
 0x3a9   : > { %1787 = vmax.xlane.f32.xlu1 %v9364_v24  ;;  %2259 = vmax.xlane.f32.xlu0 %v9360_v18 }
 0x3ab   : > { %v9490_v8 = vpop.eup %7646 }
 0x3ac   : > { %v9370_v11 = vpop.trf.xlu0  ;;  %v9494_v58 = vpop.eup %7648 }
 0x3ad   : > { %11993 = vst [vmem:[#allocation63_spill] sm:$0xff] %v9370_v11  ;;  %1789 = vmax.xlane.f32.xlu1 %v9370_v11  ;;  %2269 = vmax.xlane.f32.xlu0 %v9368_v54 }
 0x3af   : > { %v9500_v62 = vpop.eup %7650 }
 0x3b0   : > { %v9378_v44 = vpop.trf.xlu0 }
 0x3b1   : > { %11995 = vst [vmem:[#allocation65_spill] sm:$0xff] %v9378_v44  ;;  %1791 = vmax.xlane.f32.xlu1 %v9378_v44  ;;  %2265 = vmax.xlane.f32.xlu0 %v9376_v46 }
 0x3b4   : > { %v9384_v55 = vpop.trf.xlu0 }
 0x3b5   : > { %11997 = vst [vmem:[#allocation67_spill] sm:$0xff] %v9384_v55  ;;  %1793 = vmax.xlane.f32.xlu1 %v9384_v55  ;;  %2271 = vmax.xlane.f32.xlu0 %v9382_v61 }
 0x3b8   : > { %v9392_v6 = vpop.trf.xlu0 }
 0x3b9   : > { %11998 = vst [vmem:[#allocation68_spill] sm:$0xff] %v9392_v6  ;;  %1795 = vmax.xlane.f32.xlu1 %v9392_v6  ;;  %2267 = vmax.xlane.f32.xlu0 %v9390_v26 }
 0x3bc   : > { %v9399_v21 = vpop.trf.xlu0 }
 0x3bd   : > { %12000 = vst [vmem:[#allocation70_spill] sm:$0xff] %v9399_v21  ;;  %1797 = vmax.xlane.f32.xlu1 %v9399_v21  ;;  %2277 = vmax.xlane.f32.xlu0 %v9397_v19 }
 0x3c0   : > { %v9407_v33 = vpop.trf.xlu0 }
 0x3c1   : > { %12002 = vst [vmem:[#allocation72_spill] sm:$0xff] %v9407_v33  ;;  %1799 = vmax.xlane.f32.xlu1 %v9407_v33  ;;  %2273 = vmax.xlane.f32.xlu0 %v9405_v45 }
 0x3c4   : > { %v9415_v28 = vpop.trf.xlu0 }
 0x3c5   : > { %12004 = vst [vmem:[#allocation74_spill] sm:$0xff] %v9415_v28  ;;  %1801 = vmax.xlane.f32.xlu1 %v9415_v28  ;;  %2279 = vmax.xlane.f32.xlu0 %v9413_v59 }
 0x3c8   : > { %v9423_v60 = vpop.trf.xlu0 }
 0x3c9   : > { %12006 = vst [vmem:[#allocation76_spill] sm:$0xff] %v9423_v60  ;;  %1803 = vmax.xlane.f32.xlu1 %v9423_v60  ;;  %2275 = vmax.xlane.f32.xlu0 %v9421_v32 }
 0x3cc   : > { %v9433_v30 = vpop.trf.xlu0 }
 0x3cd   : > { %12007 = vst [vmem:[#allocation77_spill] sm:$0xff] %v9433_v30  ;;  %1598 = vadd.xlane.f32.xlu1 %v9431_v39  ;;  %1586 = vadd.xlane.f32.xlu0 %v9427_v35 }
 0x3d0   : > { %v9441_v31 = vpop.trf.xlu0 }
 0x3d1   : > { %12008 = vst [vmem:[#allocation78_spill] sm:$0xff] %v9441_v31  ;;  %1807 = vmax.xlane.f32.xlu1 %v9441_v31  ;;  %1582 = vadd.xlane.f32.xlu0 %v9439_v17 }
 0x3d4   : > { %v9484_v56 = vpop.trf.xlu0 }
 0x3d5   : > { %1588 = vadd.xlane.f32.xlu0 %v9447_v37  ;;  %12009 = vst [vmem:[#allocation79_spill] sm:$0xff] %v9484_v56 }
 0x3d8   : > { %v9497_v14 = vpop.trf.xlu0 }
 0x3d9   : > { %1584 = vadd.xlane.f32.xlu0 %v9450_v42  ;;  %12011 = vst [vmem:[#allocation81_spill] sm:$0xff] %v9497_v14 }
 0x3dc   : > { %v9504_v53 = vpop.trf.xlu0 }
 0x3dd   : > { %1594 = vadd.xlane.f32.xlu0 %v9455_v1  ;;  %12012 = vst [vmem:[#allocation82_spill] sm:$0xff] %v9504_v53 }
 0x3e1   : > { %1590 = vadd.xlane.f32.xlu0 %v9459_v34 }
 0x3e5   : > { %1596 = vadd.xlane.f32.xlu0 %v9463_v20 }
 0x3e9   : > { %1592 = vadd.xlane.f32.xlu0 %v9466_v23 }
 0x3ed   : > { %1805 = vmax.xlane.f32.xlu0 %v9433_v30 }
 0x3f1   : > { %1602 = vadd.xlane.f32.xlu0 %v9472_v49 }
 0x3f5   : > { %1604 = vadd.xlane.f32.xlu0 %v9477_v40 }
 0x3f9   : > { %1600 = vadd.xlane.f32.xlu0 %v9481_v47 }
 0x3fd   : > { %1809 = vmax.xlane.f32.xlu0 %v9484_v56 }
 0x401   : > { %1610 = vadd.xlane.f32.xlu0 %v9487_v57 }
 0x404   : > { %2530 = vxpose.xlu1.b32.start [1/16] %v9326_v0, 128 }
 0x405   : > { %1606 = vadd.xlane.f32.xlu0 %v9490_v8 }
 0x408   : > { %2531 = vxpose.xlu1.b32.cont [2/16] %v9336_v4, 128 }
 0x409   : > { %1612 = vadd.xlane.f32.xlu0 %v9494_v58 }
 0x40c   : > { %2532 = vxpose.xlu1.b32.cont [3/16] %v9323_v63, 128 }
 0x40d   : > { %1608 = vadd.xlane.f32.xlu0 %v9500_v62 }
 0x410   : > { %2533 = vxpose.xlu1.b32.cont [4/16] %v9331_v2, 128 }
 0x411   : > { %1813 = vmax.xlane.f32.xlu0 %v9504_v53 }
 0x414   : > { %2534 = vxpose.xlu1.b32.cont [5/16] %v9346_v10, 128 }
 0x416   : > { %v9509_v43 = vpop.xlane.xlu0 %2253 }
 0x418   : > { %2535 = vxpose.xlu1.b32.cont [6/16] %v9360_v18, 128 }
 0x41a   : > { %v9512_v3 = vpop.xlane.xlu0 %2249 }
 0x41c   : > { %2536 = vxpose.xlu1.b32.cont [7/16] %v9339_v5, 128 }
 0x41e   : > { %v9515_v7 = vpop.xlane.xlu0 %2255 }
 0x420   : > { %2537 = vxpose.xlu1.b32.cont [8/16] %v9354_v15, 128 }
 0x422   : > { %v9518_v36 = vpop.xlane.xlu0 %2251 }
 0x424   : > { %2538 = vxpose.xlu1.b32.cont [9/16] %v9376_v46, 128 }
 0x426   : > { %v9521_v50 = vpop.xlane.xlu0 %2261 }
 0x428   : > { %2539 = vxpose.xlu1.b32.cont [10/16] %v9390_v26, 128 }
 0x42a   : > { %v9524_v52 = vpop.xlane.xlu0 %2257  ;;  %v9532_v56 = vpop.xlane.xlu1 %1783 }
 0x42c   : > { %2540 = vxpose.xlu1.b32.cont [11/16] %v9368_v54, 128 }
 0x42e   : > { %v9527_v29 = vpop.xlane.xlu0 %2263  ;;  %v9538_v28 = vpop.xlane.xlu1 %1785 }
 0x42f   : > { %12014 = vst [vmem:[#allocation84_spill] sm:$0xff] %v9538_v28 }
 0x430   : > { %2541 = vxpose.xlu1.b32.cont [12/16] %v9382_v61, 128 }
 0x432   : > { %v9530_v53 = vpop.xlane.xlu0 %2259  ;;  %v9545_v11 = vpop.xlane.xlu1 %1787 }
 0x434   : > { %2542 = vxpose.xlu1.b32.cont [13/16] %v9405_v45, 128 }
 0x436   : > { %v9535_v30 = vpop.xlane.xlu0 %2269  ;;  %v9550_v61 = vpop.xlane.xlu1 %1789 }
 0x437   : > { %12013 = vst [vmem:[#allocation83_spill] sm:$0xff] %v9535_v30  ;;  %12017 = vst [vmem:[#allocation87_spill] sm:$0xff] %v9550_v61 }
 0x438   : > { %2543 = vxpose.xlu1.b32.cont [14/16] %v9421_v32, 128 }
 0x43a   : > { %v9540_v21 = vpop.xlane.xlu0 %2265  ;;  %v9556_v32 = vpop.xlane.xlu1 %1791 }
 0x43b   : > { %12015 = vst [vmem:[#allocation85_spill] sm:$0xff] %v9540_v21 }
 0x43c   : > { %2544 = vxpose.xlu1.b32.cont [15/16] %v9397_v19, 128 }
 0x43e   : > { %v9543_v55 = vpop.xlane.xlu0 %2271  ;;  %v9560_v46 = vpop.xlane.xlu1 %1793 }
 0x43f   : > { %12016 = vst [vmem:[#allocation86_spill] sm:$0xff] %v9543_v55  ;;  %12021 = vst [vmem:[#allocation91_spill] sm:$0xff] %v9560_v46 }
 0x440   : > { %2545 = vxpose.xlu1.b32.end [16/16] %v9413_v59, 128 }
 0x442   : > { %v9548_v31 = vpop.xlane.xlu0 %2267  ;;  %v9564_v21 = vpop.xlane.xlu1 %1795 }
 0x443   : > { %12023 = vst [vmem:[#allocation93_spill] sm:$0xff] %v9564_v21 }
 0x446   : > { %v9552_v45 = vpop.xlane.xlu0 %2277  ;;  %v9566_v6 = vpop.xlane.xlu1 %1797 }
 0x447   : > { %12018 = vst [vmem:[#allocation88_spill] sm:$0xff] %v9552_v45  ;;  %12024 = vst [vmem:[#allocation94_spill] sm:$0xff] %v9566_v6 }
 0x44a   : > { %v9554_v60 = vpop.xlane.xlu0 %2273 }
 0x44b   : > { %12019 = vst [vmem:[#allocation89_spill] sm:$0xff] %v9554_v60  ;;  %v9568_v60 = vpop.xlane.xlu1 %1799 }
 0x44c   : > { %12025 = vst [vmem:[#allocation95_spill] sm:$0xff] %v9568_v60 }
 0x44e   : > { %v9558_v33 = vpop.xlane.xlu0 %2279 }
 0x44f   : > { %12020 = vst [vmem:[#allocation90_spill] sm:$0xff] %v9558_v33  ;;  %v9571_v33 = vpop.xlane.xlu1 %1801 }
 0x450   : > { %12026 = vst [vmem:[#allocation96_spill] sm:$0xff] %v9571_v33 }
 0x452   : > { %v9562_v19 = vpop.xlane.xlu0 %2275 }
 0x453   : > { %12022 = vst [vmem:[#allocation92_spill] sm:$0xff] %v9562_v19  ;;  %v9573_v6 = vpop.xlane.xlu1 %1803 }
 0x456   : > { %v1587_v55 = vpop.xlane.xlu0 %1586 }
 0x457   : > { %v1599_v57 = vpop.xlane.xlu1 %1598 }
 0x45a   : > { %v1583_v59 = vpop.xlane.xlu0 %1582 }
 0x45e   : > { %v1589_v54 = vpop.xlane.xlu0 %1588 }
 0x45f   : > { %7652 = vrcp.f32 %v1589_v54 }
 0x460   : > { %7654 = vrcp.f32 %v1583_v59 }
 0x461   : > { %7656 = vrcp.f32 %v1587_v55 }
 0x462   : > { %v1585_v45 = vpop.xlane.xlu0 %1584 }
 0x463   : > { %7658 = vrcp.f32 %v1585_v45 }
 0x466   : > { %v1595_v61 = vpop.xlane.xlu0 %1594 }
 0x467   : > { %1811 = vmax.xlane.f32.xlu1 %v9497_v14 }
 0x46a   : > { %v1591_v19 = vpop.xlane.xlu0 %1590 }
 0x46c   : > { %v7653_v46 = vpop.eup %7652 }
 0x46d   : > { %v7655_v30 = vpop.eup %7654  ;;  %v1633_v55 = vmul.f32 %v7653_v46, %v9447_v37 }
 0x46e   : > { %v1597_v21 = vpop.xlane.xlu0 %1596  ;;  %v7657_v16 = vpop.eup %7656  ;;  %v1630_v54 = vmul.f32 %v7655_v30, %v9439_v17 }
 0x46f   : > { %7660 = vrcp.f32 %v1597_v21  ;;  %v1632_v14 = vmul.f32 %v7657_v16, %v9427_v35 }
 0x470   : > { %v7659_v28 = vpop.eup %7658  ;;  %7662 = vrcp.f32 %v1591_v19  ;;  %v9584_v19 = vpop.xlane.xlu1 %1807 }
 0x471   : > { %v1631_v45 = vmul.f32 %v7659_v28, %v9450_v42  ;;  %7664 = vrcp.f32 %v1595_v61  ;;  %v1647_v60 = vpack.c.bf16 %v1633_v55, %v1632_v14 }
 0x472   : > { %v1593_v59 = vpop.xlane.xlu0 %1592 }
 0x473   : > { %7666 = vrcp.f32 %v1593_v59  ;;  %v1646_v33 = vpack.c.bf16 %v1631_v45, %v1630_v54  ;;  %v2287_v45 = vsub.f32 %v9339_v5, %v9521_v50 }
 0x475   : > { %6915 = vmatprep.mubr.bf16.mxu0 %v1646_v33 }
 0x476   : > { %6916 = vmatmul.mubr.bf16.vlgmr.msra.gmra.mxu0 %v1647_v60  ;;  %v9579_v44 = vpop.xlane.xlu0 %1805 }
 0x477   : > { %6932 = vmatpush3.bf16.msra.mxu0 %v9167_v38 }
 0x478   : > { %6933 = vmatprep.subr.bf16.mxu0 %v9172_v41 }
 0x47a   : > { %v1603_v46 = vpop.xlane.xlu0 %1602 }
 0x47b   : > { %6934 = vmatpush3.bf16.msra.mxu0 %v9172_v41 }
 0x47c   : > { %6935 = vmatprep.subr.bf16.mxu0 %v9155_v22  ;;  %v7661_v61 = vpop.eup %7660 }
 0x47d   : > { %v7663_v21 = vpop.eup %7662  ;;  %v1637_v35 = vmul.f32 %v7661_v61, %v9463_v20 }
 0x47e   : > { %v1605_v16 = vpop.xlane.xlu0 %1604  ;;  %v7665_v28 = vpop.eup %7664  ;;  %v1634_v30 = vmul.f32 %v7663_v21, %v9459_v34 }
 0x47f   : > { %6936 = vmatpush3.bf16.msra.mxu0 %v9155_v22  ;;  %7668 = vrcp.f32 %v1605_v16  ;;  %v1636_v42 = vmul.f32 %v7665_v28, %v9455_v1  ;;  %v2283_v1 = vsub.f32 %v9323_v63, %v9509_v43  ;;  %v2309_v28 = vmul.f32 1.442695, %v2287_v45  ;;  %v12059_v22 = vld [vmem:[#allocation90_spill] sm:$0xff] }
 0x480   : > { %v7667_v33 = vpop.eup %7666  ;;  %6937 = vmatprep.subr.bf16.mxu0 %v9157_v27  ;;  %v9589_v60 = vpop.trf.xlu1  ;;  %7670 = vrcp.f32 %v1599_v57  ;;  %v2281_v57 = vsub.f32 %v9326_v0, %v9512_v3 }
 0x481   : > { %2562 = vmax.xlane.f32.xlu0 %v9589_v60  ;;  %v1635_v17 = vmul.f32 %v7667_v33, %v9466_v23  ;;  %7672 = vrcp.f32 %v1603_v46  ;;  %v1649_v20 = vpack.c.bf16 %v1637_v35, %v1636_v42  ;;  %v2301_v61 = vmul.f32 1.442695, %v2283_v1 }
 0x482   : > { %v1601_v37 = vpop.xlane.xlu0 %1600  ;;  %v2297_v43 = vmul.f32 1.442695, %v2281_v57  ;;  %v2284_v35 = vsub.f32 %v9331_v2, %v9515_v7  ;;  %v1815_v1 = vsub.f32 %v9348_v12, %v9532_v56 }
 0x483   : > { %6938 = vmatpush3.bf16.msra.mxu0 %v9157_v27  ;;  %7674 = vrcp.f32 %v1601_v37  ;;  %v1648_v14 = vpack.c.bf16 %v1635_v17, %v1634_v30  ;;  %v2285_v37 = vsub.f32 %v9346_v10, %v9524_v52  ;;  %v2282_v10 = vsub.f32 %v9336_v4, %v9518_v36 }
 0x484   : > { %6939 = vmatprep.subr.bf16.mxu0 %v9143_v9  ;;  %v9598_v55 = vpop.trf.xlu1  ;;  %7676 = vpow2.f32 %v2301_v61  ;;  %v2303_v2 = vmul.f32 1.442695, %v2284_v35  ;;  %v1817_v36 = vsub.f32 %v9364_v24, %v9545_v11  ;;  %v2286_v61 = vsub.f32 %v9360_v18, %v9530_v53 }
 0x485   : > { %2564 = vmax.xlane.f32.xlu0 %v9598_v55  ;;  %6919 = vmatprep.mubr.bf16.mxu0 %v1648_v14  ;;  %7678 = vpow2.f32 %v2297_v43  ;;  %v2305_v7 = vmul.f32 1.442695, %v2285_v37  ;;  %v2299_v42 = vmul.f32 1.442695, %v2282_v10  ;;  %v2288_v14 = vsub.f32 %v9354_v15, %v9527_v29 }
 0x486   : > { %6920 = vmatmul.mubr.bf16.gmra.mxu0 %v1649_v20  ;;  %v9601_v34 = vpop.xlane.xlu0 %1809  ;;  %7680 = vpow2.f32 %v2309_v28  ;;  %v1831_v15 = vmul.f32 1.442695, %v1815_v1  ;;  %v1835_v56 = vmul.f32 1.442695, %v1817_v36  ;;  %v2290_v24 = vsub.f32 %v9390_v26, %v9548_v31  ;;  %v12027_v26 = vld [vmem:[#allocation65_spill] sm:$0xff] }
 0x487   : > { %6940 = vmatpush3.bf16.msra.mxu0 %v9143_v9  ;;  %v2307_v18 = vmul.f32 1.442695, %v2286_v61  ;;  %v1819_v31 = vsub.f32 %v12027_v26, %v9556_v32 }
 0x488   : > { %6941 = vmatprep.subr.bf16.mxu0 %v9147_v13  ;;  %v9605_v23 = vpop.trf.xlu1 }
 0x489   : > { %2566 = vmax.xlane.f32.xlu0 %v9605_v23  ;;  %v1839_v37 = vmul.f32 1.442695, %v1819_v31  ;;  %v12039_v31 = vld [vmem:[#allocation76_spill] sm:$0xff] }
 0x48a   : > { %v1611_v54 = vpop.xlane.xlu0 %1610 }
 0x48b   : > { %6942 = vmatpush3.bf16.msra.mxu0 %v9147_v13  ;;  %v12060_v13 = vld [vmem:[#allocation73_spill] sm:$0xff] }
 0x48c   : > { %6943 = vmatprep.subr.bf16.mxu0 %v9195_v48  ;;  %v9616_v59 = vpop.trf.xlu1  ;;  %v7669_v46 = vpop.eup %7668  ;;  %v2296_v9 = vsub.f32 %v12060_v13, %v12059_v22  ;;  %v12062_v22 = vld [vmem:[#allocation92_spill] sm:$0xff] }
 0x48d   : > { %2568 = vmax.xlane.f32.xlu0 %v9616_v59  ;;  %v7671_v63 = vpop.eup %7670  ;;  %v1641_v3 = vmul.f32 %v7669_v46, %v9477_v40 }
 0x48e   : > { %v1607_v21 = vpop.xlane.xlu0 %1606  ;;  %v7673_v16 = vpop.eup %7672  ;;  %v1638_v50 = vmul.f32 %v7671_v63, %v9431_v39 }
 0x48f   : > { %6944 = vmatpush3.bf16.msra.mxu0 %v9195_v48  ;;  %v1640_v17 = vmul.f32 %v7673_v16, %v9472_v49  ;;  %7682 = vrcp.f32 %v1607_v21 }
 0x490   : > { %v7675_v0 = vpop.eup %7674  ;;  %6945 = vmatprep.subr.bf16.mxu0 %v9202_v51  ;;  %v9621_v5 = vpop.trf.xlu1 }
 0x491   : > { %2570 = vmax.xlane.f32.xlu1 %v9621_v5  ;;  %v1639_v33 = vmul.f32 %v7675_v0, %v9481_v47  ;;  %v1651_v47 = vpack.c.bf16 %v1641_v3, %v1640_v17  ;;  %v9649_v4 = vpop.eup %7676  ;;  %v2315_v0 = vmul.f32 1.442695, %v2290_v24  ;;  %v12037_v24 = vld [vmem:[#allocation95_spill] sm:$0xff] }
 0x492   : > { %v1613_v30 = vpop.xlane.xlu0 %1612  ;;  %v9653_v57 = vpop.eup %7678 }
 0x493   : > { %6946 = vmatpush3.bf16.msra.mxu0 %v9202_v51  ;;  %v1650_v40 = vpack.c.bf16 %v1639_v33, %v1638_v50  ;;  %7684 = vrcp.f32 %v1613_v30  ;;  %v9655_v45 = vpop.eup %7680  ;;  %v12028_v50 = vld [vmem:[#allocation80_spill] sm:$0xff] }
 0x494   : > { %6995 = vmatprep.subr.bf16.mxu0 %v9238_v25  ;;  %v9634_v39 = vpop.trf.xlu1  ;;  %7686 = vrcp.f32 %v1611_v54  ;;  %v2311_v54 = vmul.f32 1.442695, %v2288_v14 }
 0x495   : > { %2572 = vmax.xlane.f32.xlu0 %v9634_v39  ;;  %6923 = vmatprep.mubr.bf16.mxu0 %v1650_v40 }
 0x496   : > { %6924 = vmatmul.mubr.bf16.gmra.mxu0 %v1651_v47  ;;  %v1609_v49 = vpop.xlane.xlu0 %1608  ;;  %v12031_v47 = vld [vmem:[#allocation83_spill] sm:$0xff] }
 0x497   : > { %7688 = vrcp.f32 %v1609_v49 }
 0x498   : > { %v9639_v52 = vpop.trf.xlu1  ;;  %7690 = vpow2.f32 %v2303_v2  ;;  %v12032_v2 = vld [vmem:[#allocation62_spill] sm:$0xff] }
 0x499   : > { %2574 = vmax.xlane.f32.xlu1 %v9639_v52  ;;  %7692 = vpow2.f32 %v2305_v7  ;;  %v2291_v49 = vsub.f32 %v12032_v2, %v12031_v47  ;;  %v12033_v7 = vld [vmem:[#allocation93_spill] sm:$0xff] }
 0x49a   : > { %7694 = vpow2.f32 %v2299_v42  ;;  %v12034_v42 = vld [vmem:[#allocation68_spill] sm:$0xff] }
 0x49b   : > { %7696 = vpow2.f32 %v2311_v54  ;;  %v1821_v14 = vsub.f32 %v12034_v42, %v12033_v7  ;;  %v12044_v42 = vld [vmem:[#allocation63_spill] sm:$0xff] }
 0x49c   : > { %v9644_v20 = vpop.trf.xlu1  ;;  %v7683_v29 = vpop.eup %7682  ;;  %7698 = vpow2.f32 %v1831_v15  ;;  %v12035_v15 = vld [vmem:[#allocation85_spill] sm:$0xff] }
 0x49d   : > { %2576 = vmax.xlane.f32.xlu0 %v9644_v20  ;;  %v1642_v21 = vmul.f32 %v7683_v29, %v9490_v8  ;;  %7700 = vpow2.f32 %v1835_v56  ;;  %v2317_v29 = vmul.f32 1.442695, %v2291_v49 }
 0x49e   : > { %7702 = vpow2.f32 %v2307_v18 }
 0x49f   : > { %7704 = vpow2.f32 %v2315_v0  ;;  %v1825_v0 = vsub.f32 %v12039_v31, %v9573_v6  ;;  %v12047_v31 = vld [vmem:[#allocation94_spill] sm:$0xff] }
 0x4a0   : > { %v9657_v46 = vpop.trf.xlu1  ;;  %v7685_v12 = vpop.eup %7684  ;;  %7706 = vpow2.f32 %v1839_v37 }
 0x4a1   : > { %2578 = vmax.xlane.f32.xlu1 %v9657_v46  ;;  %2333 = vadd.xlane.f32.xlu0 %v9649_v4  ;;  %v7687_v11 = vpop.eup %7686  ;;  %v1645_v28 = vmul.f32 %v7685_v12, %v9494_v58  ;;  %v12029_v58 = vld [vmem:[#allocation84_spill] sm:$0xff] }
 0x4a2   : > { %v1644_v33 = vmul.f32 %v7687_v11, %v12028_v50  ;;  %v12036_v12 = vld [vmem:[#allocation64_spill] sm:$0xff]  ;;  %v1843_v11 = vmul.f32 1.442695, %v1821_v14 }
 0x4a3   : > { %v2289_v56 = vsub.f32 %v12036_v12, %v12035_v15 }
 0x4a4   : > { %v7689_v63 = vpop.eup %7688  ;;  %v9665_v43 = vpop.trf.xlu1  ;;  %v1653_v8 = vpack.c.bf16 %v1645_v28, %v1644_v33  ;;  %v12040_v33 = vld [vmem:[#allocation86_spill] sm:$0xff] }
 0x4a5   : > { %2341 = vadd.xlane.f32.xlu1 %v9655_v45  ;;  %2329 = vadd.xlane.f32.xlu0 %v9653_v57  ;;  %v1643_v16 = vmul.f32 %v7689_v63, %v9500_v62  ;;  %v9672_v53 = vpop.eup %7690  ;;  %v12030_v62 = vld [vmem:[#allocation61_spill] sm:$0xff]  ;;  %v12038_v63 = vld [vmem:[#allocation72_spill] sm:$0xff]  ;;  %v2313_v28 = vmul.f32 1.442695, %v2289_v56 }
 0x4a6   : > { %v9677_v35 = vpop.eup %7692  ;;  %v1816_v17 = vsub.f32 %v12030_v62, %v12029_v58  ;;  %v1851_v62 = vmul.f32 1.442695, %v1825_v0  ;;  %v12048_v0 = vld [vmem:[#allocation70_spill] sm:$0xff] }
 0x4a7   : > { %v1652_v3 = vpack.c.bf16 %v1643_v16, %v1642_v21  ;;  %v9685_v32 = vpop.eup %7694  ;;  %v1823_v21 = vsub.f32 %v12038_v63, %v12037_v24  ;;  %v12046_v24 = vld [vmem:[#allocation67_spill] sm:$0xff] }
 0x4a8   : > { %v9679_v30 = vpop.trf.xlu1  ;;  %v1833_v10 = vmul.f32 1.442695, %v1816_v17  ;;  %v9695_v1 = vpop.eup %7696  ;;  %v12042_v17 = vld [vmem:[#allocation78_spill] sm:$0xff] }
 0x4a9   : > { %2337 = vadd.xlane.f32.xlu1 %v9677_v35  ;;  %2335 = vadd.xlane.f32.xlu0 %v9672_v53  ;;  %v9701_v54 = vpop.eup %7698  ;;  %v1847_v26 = vmul.f32 1.442695, %v1823_v21  ;;  %v1827_v37 = vsub.f32 %v12042_v17, %v9584_v19  ;;  %v12043_v19 = vld [vmem:[#allocation87_spill] sm:$0xff]  ;;  %v12050_v17 = vld [vmem:[#allocation74_spill] sm:$0xff] }
 0x4aa   : > { %6927 = vmatprep.mubr.bf16.mxu0 %v1652_v3  ;;  %v9705_v61 = vpop.eup %7700  ;;  %7708 = vpow2.f32 %v1833_v10  ;;  %v1818_v14 = vsub.f32 %v12044_v42, %v12043_v19 }
 0x4ab   : > { %6928 = vmatmul.mubr.bf16.gmra.mxu0 %v1653_v8  ;;  %7710 = vpow2.f32 %v2317_v29  ;;  %v9713_v18 = vpop.eup %7702  ;;  %v12041_v8 = vld [vmem:[#allocation66_spill] sm:$0xff]  ;;  %v1855_v49 = vmul.f32 1.442695, %v1827_v37 }
 0x4ac   : > { %v9687_v40 = vpop.trf.xlu1  ;;  %7712 = vpow2.f32 %v1843_v11  ;;  %v9717_v3 = vpop.eup %7704  ;;  %v2292_v58 = vsub.f32 %v12041_v8, %v12040_v33  ;;  %v1837_v12 = vmul.f32 1.442695, %v1818_v14  ;;  %v12045_v11 = vld [vmem:[#allocation91_spill] sm:$0xff]  ;;  %v1822_v33 = vsub.f32 %v12048_v0, %v12047_v31 }
 0x4ad   : > { %2582 = vmax.xlane.f32.xlu1 %v9679_v30  ;;  %2331 = vadd.xlane.f32.xlu0 %v9685_v32  ;;  %7714 = vpow2.f32 %v2313_v28  ;;  %v9727_v47 = vpop.eup %7706  ;;  %v1820_v63 = vsub.f32 %v12046_v24, %v12045_v11  ;;  %v1814_v24 = vpop.xlane.xlu0 %1813 }
 0x4ae   : > { %7716 = vpow2.f32 %v1847_v26  ;;  %v2319_v6 = vmul.f32 1.442695, %v2292_v58  ;;  %v1845_v58 = vmul.f32 1.442695, %v1822_v33 }
 0x4af   : > { %7718 = vpow2.f32 %v1851_v62  ;;  %v1841_v26 = vmul.f32 1.442695, %v1820_v63  ;;  %v12049_v62 = vld [vmem:[#allocation96_spill] sm:$0xff] }
 0x4b0   : > { %v9697_v36 = vpop.trf.xlu1  ;;  %7720 = vpow2.f32 %v2319_v6  ;;  %v1824_v37 = vsub.f32 %v12050_v17, %v12049_v62 }
 0x4b1   : > { %2343 = vadd.xlane.f32.xlu1 %v9695_v1  ;;  %2580 = vmax.xlane.f32.xlu0 %v9665_v43  ;;  %7722 = vpow2.f32 %v1855_v49  ;;  %v12051_v49 = vld [vmem:[#allocation77_spill] sm:$0xff] }
 0x4b2   : > { %7724 = vpow2.f32 %v1837_v12  ;;  %v1849_v6 = vmul.f32 1.442695, %v1824_v37  ;;  %v1826_v19 = vsub.f32 %v12051_v49, %v9579_v44  ;;  %v12052_v12 = vld [vmem:[#allocation79_spill] sm:$0xff]  ;;  %v12054_v37 = vld [vmem:[#allocation89_spill] sm:$0xff] }
 0x4b3   : > { %7726 = vpow2.f32 %v1841_v26  ;;  %v1828_v11 = vsub.f32 %v12052_v12, %v9601_v34  ;;  %v12053_v26 = vld [vmem:[#allocation82_spill] sm:$0xff] }
 0x4b4   : > { %v9709_v16 = vpop.trf.xlu1  ;;  %7728 = vpow2.f32 %v1845_v58  ;;  %v1853_v14 = vmul.f32 1.442695, %v1826_v19  ;;  %v1830_v31 = vsub.f32 %v12053_v26, %v1814_v24  ;;  %v12056_v19 = vld [vmem:[#allocation81_spill] sm:$0xff]  ;;  %v12057_v24 = vld [vmem:[#allocation88_spill] sm:$0xff] }
 0x4b5   : > { %1867 = vadd.xlane.f32.xlu1 %v9705_v61  ;;  %1863 = vadd.xlane.f32.xlu0 %v9701_v54  ;;  %7730 = vpow2.f32 %v1849_v6  ;;  %v1857_v63 = vmul.f32 1.442695, %v1828_v11  ;;  %v12055_v6 = vld [vmem:[#allocation71_spill] sm:$0xff] }
 0x4b6   : > { %7732 = vpow2.f32 %v1853_v14  ;;  %v1861_v44 = vmul.f32 1.442695, %v1830_v31  ;;  %v2293_v49 = vsub.f32 %v12055_v6, %v12054_v37  ;;  %v2327_v37 = vmul.f32 1.442695, %v2296_v9 }
 0x4b7   : > { %v9733_v10 = vpop.eup %7708  ;;  %7734 = vpow2.f32 %v1857_v63  ;;  %v12058_v63 = vld [vmem:[#allocation69_spill] sm:$0xff] }
 0x4b8   : > { %v9719_v50 = vpop.trf.xlu1  ;;  %v9737_v7 = vpop.eup %7710  ;;  %7736 = vpow2.f32 %v1861_v44  ;;  %v2295_v26 = vsub.f32 %v12058_v63, %v12057_v24  ;;  %v2321_v31 = vmul.f32 1.442695, %v2293_v49 }
 0x4b9   : > { %2347 = vadd.xlane.f32.xlu1 %v9717_v3  ;;  %2339 = vadd.xlane.f32.xlu0 %v9713_v18  ;;  %v9741_v29 = vpop.eup %7712 }
 0x4ba   : > { %v9745_v15 = vpop.eup %7714  ;;  %v2325_v44 = vmul.f32 1.442695, %v2295_v26 }
 0x4bb   : > { %v9747_v56 = vpop.eup %7716 }
 0x4bc   : > { %v9731_v2 = vpop.trf.xlu1  ;;  %v9753_v21 = vpop.eup %7718 }
 0x4bd   : > { %1871 = vadd.xlane.f32.xlu1 %v9727_v47  ;;  %2584 = vmax.xlane.f32.xlu0 %v9687_v40  ;;  %v9757_v28 = vpop.eup %7720 }
 0x4be   : > { %v9761_v8 = vpop.eup %7722 }
 0x4bf   : > { %v9770_v42 = vpop.eup %7724 }
 0x4c0   : > { %v9777_v0 = vpop.eup %7726 }
 0x4c1   : > { %2592 = vmax.xlane.f32.xlu1 %v9731_v2  ;;  %1865 = vadd.xlane.f32.xlu0 %v9733_v10  ;;  %v9780_v33 = vpop.eup %7728 }
 0x4c2   : > { %v9783_v58 = vpop.eup %7730 }
 0x4c3   : > { %v9786_v34 = vpop.eup %7732 }
 0x4c4   : > { %v9789_v62 = vpop.eup %7734 }
 0x4c5   : > { %1875 = vadd.xlane.f32.xlu1 %v9741_v29  ;;  %2349 = vadd.xlane.f32.xlu0 %v9737_v7  ;;  %v9795_v11 = vpop.eup %7736 }
 0x4c9   : > { %1879 = vadd.xlane.f32.xlu1 %v9747_v56  ;;  %2345 = vadd.xlane.f32.xlu0 %v9745_v15 }
 0x4cd   : > { %1883 = vadd.xlane.f32.xlu1 %v9753_v21  ;;  %2586 = vmax.xlane.f32.xlu0 %v9697_v36 }
 0x4d1   : > { %1887 = vadd.xlane.f32.xlu1 %v9761_v8  ;;  %2351 = vadd.xlane.f32.xlu0 %v9757_v28 }
 0x4d5   : > { %2588 = vmax.xlane.f32.xlu0 %v9709_v16 }
 0x4d9   : > { %1869 = vadd.xlane.f32.xlu0 %v9770_v42 }
 0x4dd   : > { %2590 = vmax.xlane.f32.xlu0 %v9719_v50 }
 0x4e1   : > { %1873 = vadd.xlane.f32.xlu0 %v9777_v0 }
 0x4e5   : > { %1877 = vadd.xlane.f32.xlu0 %v9780_v33 }
 0x4e9   : > { %1881 = vadd.xlane.f32.xlu0 %v9783_v58 }
 0x4ed   : > { %1885 = vadd.xlane.f32.xlu0 %v9786_v34 }
 0x4f0   : > { %v1812_v17 = vpop.xlane.xlu1 %1811 }
 0x4f1   : > { %v1829_v14 = vsub.f32 %v12056_v19, %v1812_v17  ;;  %1889 = vadd.xlane.f32.xlu0 %v9789_v62 }
 0x4f3   : > { %v1859_v12 = vmul.f32 1.442695, %v1829_v14  ;;  %v12063_v14 = vld [vmem:[#allocation75_spill] sm:$0xff] }
 0x4f5   : > { %7738 = vpow2.f32 %v1859_v12  ;;  %1893 = vadd.xlane.f32.xlu0 %v9795_v11  ;;  %v2294_v12 = vsub.f32 %v12063_v14, %v12062_v22 }
 0x4f6   : > { %7740 = vpow2.f32 %v2321_v31 }
 0x4f7   : > { %7742 = vpow2.f32 %v2325_v44  ;;  %v2323_v63 = vmul.f32 1.442695, %v2294_v12 }
 0x4f8   : > { %7744 = vpow2.f32 %v2327_v37 }
 0x4f9   : > { %7746 = vpow2.f32 %v2323_v63 }
 0x502   : > { %v9802_v17 = vpop.eup %7738 }
 0x503   : > { %1891 = vadd.xlane.f32.xlu1 %v9802_v17  ;;  %v9805_v6 = vpop.eup %7740 }
 0x504   : > { %v9808_v49 = vpop.eup %7742 }
 0x505   : > { %12061 = vst [vmem:[#allocation65_spill] sm:$0xff] %v9808_v49  ;;  %v9813_v13 = vpop.eup %7744 }
 0x507   : > { %2353 = vadd.xlane.f32.xlu1 %v9805_v6 }
 0x50a   : > { %v2563_v19 = vpop.xlane.xlu0 %2562 }
 0x50b   : > { %2357 = vadd.xlane.f32.xlu1 %v9808_v49  ;;  %2411 = vrot.lane.b32.xlu0 %v9195_v48, %s8566_s5 }
 0x50e   : > { %v2565_v9 = vpop.xlane.xlu0 %2564 }
 0x50f   : > { %2359 = vadd.xlane.f32.xlu1 %v9813_v13  ;;  %v2595_v26 = vsub.f32 %v9598_v55, %v2565_v9 }
 0x511   : > { %v2612_v31 = vmul.f32 1.442695, %v2595_v26 }
 0x512   : > { %v2567_v24 = vpop.xlane.xlu0 %2566 }
 0x513   : > { %v2596_v44 = vsub.f32 %v9605_v23, %v2567_v24  ;;  %7748 = vpow2.f32 %v2612_v31  ;;  %v9825_v24 = vpop.eup %7746 }
 0x515   : > { %v2614_v27 = vmul.f32 1.442695, %v2596_v44 }
 0x516   : > { %v2569_v37 = vpop.xlane.xlu0 %2568 }
 0x517   : > { %v2597_v48 = vsub.f32 %v9616_v59, %v2569_v37  ;;  %7750 = vpow2.f32 %v2614_v27 }
 0x519   : > { %v2616_v22 = vmul.f32 1.442695, %v2597_v48 }
 0x51a   : > { %v2571_v41 = vpop.xlane.xlu1 %2570 }
 0x51b   : > { %v2598_v14 = vsub.f32 %v9621_v5, %v2571_v41  ;;  %7752 = vpow2.f32 %v2616_v22  ;;  %v2594_v41 = vsub.f32 %v9589_v60, %v2563_v19 }
 0x51d   : > { %v2618_v9 = vmul.f32 1.442695, %v2598_v14  ;;  %v2610_v37 = vmul.f32 1.442695, %v2594_v41 }
 0x51e   : > { %v2573_v38 = vpop.xlane.xlu0 %2572 }
 0x51f   : > { %v2599_v23 = vsub.f32 %v9634_v39, %v2573_v38  ;;  %7754 = vpow2.f32 %v2618_v9 }
 0x520   : > { %2409 = vrot.lane.b32.xlu1 %v9202_v51, %s8566_s5  ;;  %v9831_v48 = vpop.eup %7748  ;;  %s6449_s5 = sshll.u32 %s8689_s1, 11 }
 0x521   : > { %v2620_v26 = vmul.f32 1.442695, %v2599_v23  ;;  %12064 = vst [vmem:[#allocation80_spill] sm:$0xff] %v9831_v48 }
 0x522   : > { %v2575_v12 = vpop.xlane.xlu1 %2574 }
 0x523   : > { %v2600_v27 = vsub.f32 %v9639_v52, %v2575_v12  ;;  %7756 = vpow2.f32 %v2620_v26 }
 0x524   : > { %v9840_v44 = vpop.eup %7750 }
 0x525   : > { %v2622_v39 = vmul.f32 1.442695, %v2600_v27  ;;  %12065 = vst [vmem:[#allocation84_spill] sm:$0xff] %v9840_v44 }
 0x526   : > { %v2577_v55 = vpop.xlane.xlu0 %2576 }
 0x527   : > { %v2601_v31 = vsub.f32 %v9644_v20, %v2577_v55  ;;  %7758 = vpow2.f32 %v2622_v39 }
 0x528   : > { %v9848_v14 = vpop.eup %7752  ;;  %7760 = vpow2.f32 %v2610_v37 }
 0x529   : > { %v2624_v60 = vmul.f32 1.442695, %v2601_v31  ;;  %12066 = vst [vmem:[#allocation61_spill] sm:$0xff] %v9848_v14 }
 0x52a   : > { %v2579_v63 = vpop.xlane.xlu1 %2578  ;;  %2355 = vadd.xlane.f32.xlu0 %v9825_v24  ;;  %v9828_v59 = vpop.xlane.xlu0 %2333 }
 0x52b   : > { %v2602_v19 = vsub.f32 %v9657_v46, %v2579_v63  ;;  %7762 = vpow2.f32 %v2624_v60 }
 0x52c   : > { %v9854_v23 = vpop.eup %7754 }
 0x52d   : > { %v2626_v9 = vmul.f32 1.442695, %v2602_v19  ;;  %12067 = vst [vmem:[#allocation83_spill] sm:$0xff] %v9854_v23 }
 0x52e   : > { %v9834_v5 = vpop.xlane.xlu1 %2341  ;;  %2644 = vadd.xlane.f32.xlu0 %v9831_v48  ;;  %v9837_v38 = vpop.xlane.xlu0 %2329 }
 0x530   : > { %v9858_v63 = vpop.eup %7756 }
 0x531   : > { %12068 = vst [vmem:[#allocation62_spill] sm:$0xff] %v9858_v63 }
 0x532   : > { %v9842_v22 = vpop.xlane.xlu1 %2337  ;;  %2646 = vadd.xlane.f32.xlu0 %v9840_v44  ;;  %v9845_v52 = vpop.xlane.xlu0 %2335 }
 0x534   : > { %v9861_v39 = vpop.eup %7758 }
 0x535   : > { %12069 = vst [vmem:[#allocation93_spill] sm:$0xff] %v9861_v39  ;;  %v9864_v31 = vpop.eup %7760 }
 0x536   : > { %v2583_v12 = vpop.xlane.xlu1 %2582  ;;  %2648 = vadd.xlane.f32.xlu0 %v9848_v14  ;;  %v9852_v55 = vpop.xlane.xlu0 %2331  ;;  %12070 = vst [vmem:[#allocation68_spill] sm:$0xff] %v9864_v31 }
 0x537   : > { %v2604_v20 = vsub.f32 %v9679_v30, %v2583_v12 }
 0x538   : > { %v9869_v60 = vpop.eup %7762 }
 0x539   : > { %v2630_v26 = vmul.f32 1.442695, %v2604_v20  ;;  %12071 = vst [vmem:[#allocation85_spill] sm:$0xff] %v9869_v60 }
 0x53a   : > { %2650 = vadd.xlane.f32.xlu0 %v9854_v23  ;;  %v2581_v27 = vpop.xlane.xlu0 %2580 }
 0x53b   : > { %7764 = vpow2.f32 %v2630_v26  ;;  %v2603_v46 = vsub.f32 %v9665_v43, %v2581_v27  ;;  %v9871_v43 = vpop.xlane.xlu1 %2343 }
 0x53c   : > { %7766 = vpow2.f32 %v2626_v9 }
 0x53d   : > { %v2628_v41 = vmul.f32 1.442695, %v2603_v46 }
 0x53e   : > { %2652 = vadd.xlane.f32.xlu0 %v9858_v63  ;;  %v1864_v30 = vpop.xlane.xlu0 %1863 }
 0x53f   : > { %7768 = vpow2.f32 %v2628_v41  ;;  %v1868_v27 = vpop.xlane.xlu1 %1867 }
 0x540   : > { %7770 = vrcp.f32 %v1864_v30 }
 0x542   : > { %2654 = vadd.xlane.f32.xlu0 %v9861_v39  ;;  %v9866_v37 = vpop.xlane.xlu0 %2339 }
 0x543   : > { %v9886_v39 = vpop.xlane.xlu1 %2347 }
 0x544   : > { %2642 = vadd.xlane.f32.xlu1 %v9864_v31 }
 0x546   : > { %2656 = vadd.xlane.f32.xlu0 %v9869_v60  ;;  %v2585_v19 = vpop.xlane.xlu0 %2584 }
 0x547   : > { %v2605_v20 = vsub.f32 %v9687_v40, %v2585_v19  ;;  %v1872_v19 = vpop.xlane.xlu1 %1871 }
 0x548   : > { %v9874_v12 = vpop.eup %7764 }
 0x549   : > { %12072 = vst [vmem:[#allocation64_spill] sm:$0xff] %v9874_v12  ;;  %v9877_v9 = vpop.eup %7766  ;;  %2662 = vadd.xlane.f32.xlu1 %v9874_v12  ;;  %v2632_v26 = vmul.f32 1.442695, %v2605_v20 }
 0x54a   : > { %12073 = vst [vmem:[#allocation95_spill] sm:$0xff] %v9877_v9  ;;  %2658 = vadd.xlane.f32.xlu0 %v9877_v9  ;;  %v1866_v46 = vpop.xlane.xlu0 %1865 }
 0x54b   : > { %7772 = vpow2.f32 %v2632_v26  ;;  %v2593_v44 = vpop.xlane.xlu1 %2592 }
 0x54c   : > { %v9881_v41 = vpop.eup %7768  ;;  %7774 = vrcp.f32 %v1866_v46  ;;  %v2609_v31 = vsub.f32 %v9731_v2, %v2593_v44 }
 0x54d   : > { %12074 = vst [vmem:[#allocation72_spill] sm:$0xff] %v9881_v41  ;;  %v7771_v20 = vpop.eup %7770 }
 0x54e   : > { %2660 = vadd.xlane.f32.xlu0 %v9881_v41  ;;  %v9884_v51 = vpop.xlane.xlu0 %2349  ;;  %v1911_v41 = vmul.f32 %v7771_v20, %v9701_v54  ;;  %v2640_v14 = vmul.f32 1.442695, %v2609_v31 }
 0x552   : > { %v9888_v40 = vpop.xlane.xlu0 %2345 }
 0x556   : > { %v2587_v12 = vpop.xlane.xlu0 %2586 }
 0x557   : > { %v2606_v9 = vsub.f32 %v9697_v36, %v2587_v12 }
 0x558   : > { %v9891_v60 = vpop.eup %7772 }
 0x559   : > { %12075 = vst [vmem:[#allocation76_spill] sm:$0xff] %v9891_v60  ;;  %v7775_v30 = vpop.eup %7774  ;;  %v2634_v26 = vmul.f32 1.442695, %v2606_v9  ;;  %2664 = vadd.xlane.f32.xlu0 %v9891_v60  ;;  %v1876_v60 = vpop.xlane.xlu1 %1875 }
 0x55a   : > { %v9894_v46 = vpop.xlane.xlu0 %2351  ;;  %v1912_v23 = vmul.f32 %v7775_v30, %v9733_v10 }
 0x55b   : > { %7776 = vpow2.f32 %v2634_v26 }
 0x55c   : > { %v1927_v63 = vpack.c.bf16 %v1912_v23, %v1911_v41  ;;  %7778 = vrcp.f32 %v1868_v27 }
 0x55d   : > { %v1880_v2 = vpop.xlane.xlu1 %1879 }
 0x55e   : > { %6947 = vmatprep.mubr.bf16.mxu0 %v1927_v63  ;;  %v2589_v48 = vpop.xlane.xlu0 %2588 }
 0x55f   : > { %v2607_v36 = vsub.f32 %v9709_v16, %v2589_v48 }
 0x561   : > { %v2636_v12 = vmul.f32 1.442695, %v2607_v36  ;;  %v1884_v31 = vpop.xlane.xlu1 %1883  ;;  %v12076_v36 = vld [vmem:[#allocation60_spill] sm:$0xff] }
 0x562   : > { %v1870_v9 = vpop.xlane.xlu0 %1869 }
 0x563   : > { %7780 = vpow2.f32 %v2636_v12 }
 0x564   : > { %7782 = vrcp.f32 %v1870_v9 }
 0x565   : > { %7784 = vpow2.f32 %v2640_v14 }
 0x566   : > { %v2591_v49 = vpop.xlane.xlu0 %2590  ;;  %7786 = vrcp.f32 %v1872_v19 }
 0x567   : > { %v2608_v54 = vsub.f32 %v9719_v50, %v2591_v49 }
 0x568   : > { %v9901_v10 = vpop.eup %7776 }
 0x569   : > { %v2638_v23 = vmul.f32 1.442695, %v2608_v54  ;;  %2666 = vadd.xlane.f32.xlu1 %v9901_v10  ;;  %v7779_v48 = vpop.eup %7778 }
 0x56a   : > { %v1874_v44 = vpop.xlane.xlu0 %1873  ;;  %v1913_v49 = vmul.f32 %v7779_v48, %v9705_v61 }
 0x56b   : > { %7788 = vpow2.f32 %v2638_v23 }
 0x56c   : > { %7790 = vrcp.f32 %v1874_v44 }
 0x56d   : > { %7792 = vrcp.f32 %v1876_v60  ;;  %v1888_v60 = vpop.xlane.xlu1 %1887 }
 0x56e   : > { %v1878_v16 = vpop.xlane.xlu0 %1877 }
 0x56f   : > { %7794 = vrcp.f32 %v1878_v16 }
 0x570   : > { %v9904_v63 = vpop.eup %7780  ;;  %7796 = vrcp.f32 %v1880_v2  ;;  %v12077_v2 = vld [vmem:[#allocation59_spill] sm:$0xff] }
 0x571   : > { %v7783_v14 = vpop.eup %7782  ;;  %2668 = vadd.xlane.f32.xlu0 %v9904_v63 }
 0x572   : > { %v1882_v50 = vpop.xlane.xlu0 %1881  ;;  %v1914_v27 = vmul.f32 %v7783_v14, %v9770_v42  ;;  %v9909_v41 = vpop.eup %7784 }
 0x573   : > { %7798 = vrcp.f32 %v1882_v50  ;;  %v7787_v30 = vpop.eup %7786 }
 0x574   : > { %v1928_v19 = vpack.c.bf16 %v1914_v27, %v1913_v49  ;;  %7800 = vrcp.f32 %v1884_v31  ;;  %v1915_v9 = vmul.f32 %v7787_v30, %v9727_v47  ;;  %v12078_v49 = vld [vmem:[#allocation58_spill] sm:$0xff] }
 0x575   : > { %2672 = vadd.xlane.f32.xlu0 %v9909_v41 }
 0x576   : > { %6948 = vmatmul.mubr.bf16.vlgmr.msra.gmra.mxu0 %v1928_v19  ;;  %v1886_v20 = vpop.xlane.xlu0 %1885 }
 0x577   : > { %6996 = vmatpush3.bf16.msra.mxu0 %v9238_v25  ;;  %7802 = vrcp.f32 %v1886_v20  ;;  %v12079_v20 = vld [vmem:[#allocation56_spill] sm:$0xff] }
 0x578   : > { %v9913_v26 = vpop.eup %7788  ;;  %6997 = vmatprep.subr.bf16.mxu0 %v12076_v36  ;;  %7804 = vrcp.f32 %v1888_v60 }
 0x579   : > { %v7791_v61 = vpop.eup %7790  ;;  %2670 = vadd.xlane.f32.xlu1 %v9913_v26 }
 0x57a   : > { %v7793_v42 = vpop.eup %7792  ;;  %v1890_v12 = vpop.xlane.xlu0 %1889  ;;  %v1916_v54 = vmul.f32 %v7791_v61, %v9777_v0 }
 0x57b   : > { %6998 = vmatpush3.bf16.msra.mxu0 %v12076_v36  ;;  %7806 = vrcp.f32 %v1890_v12  ;;  %v1917_v16 = vmul.f32 %v7793_v42, %v9741_v29  ;;  %v12080_v12 = vld [vmem:[#allocation57_spill] sm:$0xff] }
 0x57c   : > { %v7795_v23 = vpop.eup %7794  ;;  %6999 = vmatprep.subr.bf16.mxu0 %v12077_v2  ;;  %v1929_v44 = vpack.c.bf16 %v1916_v54, %v1915_v9  ;;  %7808 = vrcp.f32 %v9852_v55  ;;  %v12085_v55 = vld [vmem:[#allocation37_spill] sm:$0xff] }
 0x57d   : > { %v1918_v48 = vmul.f32 %v7795_v23, %v9780_v33  ;;  %v7797_v31 = vpop.eup %7796 }
 0x57e   : > { %6951 = vmatprep.mubr.bf16.mxu0 %v1929_v44  ;;  %v1894_v14 = vpop.xlane.xlu0 %1893  ;;  %v1919_v0 = vmul.f32 %v7797_v31, %v9747_v56 }
 0x57f   : > { %7000 = vmatpush3.bf16.msra.mxu0 %v12077_v2  ;;  %v1930_v50 = vpack.c.bf16 %v1918_v48, %v1917_v16  ;;  %7810 = vrcp.f32 %v1894_v14  ;;  %v12086_v16 = vld [vmem:[#allocation42_spill] sm:$0xff]  ;;  %v12087_v14 = vld [vmem:[#allocation33_spill] sm:$0xff] }
 0x580   : > { %v7799_v47 = vpop.eup %7798  ;;  %7001 = vmatprep.subr.bf16.mxu0 %v12078_v49  ;;  %7812 = vrcp.f32 %v9837_v38 }
 0x581   : > { %6952 = vmatmul.mubr.bf16.gmra.mxu0 %v1930_v50  ;;  %v1920_v27 = vmul.f32 %v7799_v47, %v9783_v58  ;;  %v7801_v19 = vpop.eup %7800 }
 0x582   : > { %v9927_v60 = vpop.permute.xlu0 %2411  ;;  %v1921_v30 = vmul.f32 %v7801_v19, %v9753_v21  ;;  %v12081_v21 = vld [vmem:[#allocation40_spill] sm:$0xff] }
 0x583   : > { %7002 = vmatpush3.bf16.msra.mxu0 %v12078_v49  ;;  %7417 = vmatprep.subr.bf16.mxu1 %v9927_v60  ;;  %v1931_v29 = vpack.c.bf16 %v1920_v27, %v1919_v0 }
 0x584   : > { %v7803_v33 = vpop.eup %7802  ;;  %7003 = vmatprep.subr.bf16.mxu0 %v12079_v20  ;;  %7425 = vmatpush3.bf16.msra.mxu1 %v9927_v60 }
 0x585   : > { %6955 = vmatprep.mubr.bf16.mxu0 %v1931_v29  ;;  %v1922_v56 = vmul.f32 %v7803_v33, %v9786_v34  ;;  %v7805_v61 = vpop.eup %7804  ;;  %v12082_v34 = vld [vmem:[#allocation41_spill] sm:$0xff]  ;;  %v12090_v29 = vld [vmem:[#allocation44_spill] sm:$0xff] }
 0x586   : > { %v1923_v9 = vmul.f32 %v7805_v61, %v9761_v8  ;;  %v12083_v8 = vld [vmem:[#allocation35_spill] sm:$0xff] }
 0x587   : > { %7004 = vmatpush3.bf16.msra.mxu0 %v12079_v20  ;;  %v1932_v58 = vpack.c.bf16 %v1922_v56, %v1921_v30  ;;  %v12092_v30 = vld [vmem:[#allocation46_spill] sm:$0xff] }
 0x588   : > { %v7807_v42 = vpop.eup %7806  ;;  %7005 = vmatprep.subr.bf16.mxu0 %v12080_v12 }
 0x589   : > { %6956 = vmatmul.mubr.bf16.gmra.mxu0 %v1932_v58  ;;  %v1924_v54 = vmul.f32 %v7807_v42, %v9789_v62  ;;  %v12084_v62 = vld [vmem:[#allocation39_spill] sm:$0xff]  ;;  %v7809_v31 = vpop.eup %7808  ;;  %v12093_v58 = vld [vmem:[#allocation36_spill] sm:$0xff] }
 0x58a   : > { %3399 = vrot.lane.b32.xlu1 %v12081_v21, %s8567_s7  ;;  %v2378_v19 = vmul.f32 %v7809_v31, %v9685_v32 }
 0x58b   : > { %7006 = vmatpush3.bf16.msra.mxu0 %v12080_v12  ;;  %3397 = vrot.lane.b32.xlu0 %v12082_v34, %s8567_s7  ;;  %v1933_v44 = vpack.c.bf16 %v1924_v54, %v1923_v9  ;;  %v12094_v9 = vld [vmem:[#allocation47_spill] sm:$0xff] }
 0x58c   : > { %v1892_v23 = vpop.xlane.xlu1 %1891  ;;  %7007 = vmatprep.subr.bf16.mxu0 %v9927_v60  ;;  %v7811_v50 = vpop.eup %7810 }
 0x58d   : > { %7814 = vrcp.f32 %v1892_v23  ;;  %6959 = vmatprep.mubr.bf16.mxu0 %v1933_v44  ;;  %v1926_v27 = vmul.f32 %v7811_v50, %v9795_v11  ;;  %v12091_v11 = vld [vmem:[#allocation32_spill] sm:$0xff] }
 0x58e   : > { %3395 = vrot.lane.b32.xlu1 %v12083_v8, %s8567_s7  ;;  %7816 = vrcp.f32 %v9845_v52  ;;  %v12088_v52 = vld [vmem:[#allocation43_spill] sm:$0xff] }
 0x58f   : > { %7008 = vmatpush3.bf16.msra.mxu0 %v9927_v60  ;;  %3389 = vrot.lane.b32.xlu0 %v12084_v62, %s8567_s7  ;;  %7818 = vrcp.f32 %v9866_v37 }
 0x590   : > { %v9952_v38 = vpop.xlane.xlu1 %2353  ;;  %7820 = vrcp.f32 %v9828_v59  ;;  %v7813_v59 = vpop.eup %7812 }
 0x591   : > { %7822 = vrcp.f32 %v9842_v22  ;;  %v12089_v22 = vld [vmem:[#allocation34_spill] sm:$0xff] }
 0x592   : > { %3393 = vrot.lane.b32.xlu1 %v12085_v55, %s8567_s7  ;;  %7824 = vrcp.f32 %v9871_v43 }
 0x593   : > { %3385 = vrot.lane.b32.xlu0 %v12086_v16, %s8567_s7  ;;  %7826 = vrcp.f32 %v9888_v40  ;;  %v2377_v40 = vmul.f32 %v7813_v59, %v9653_v57 }
 0x594   : > { %v9962_v48 = vpop.xlane.xlu1 %2357  ;;  %7828 = vrcp.f32 %v9834_v5 }
 0x595   : > { %7830 = vrcp.f32 %v9886_v39 }
 0x596   : > { %3391 = vrot.lane.b32.xlu1 %v12087_v14, %s8567_s7  ;;  %7832 = vrcp.f32 %v9894_v46 }
 0x597   : > { %3371 = vrot.lane.b32.xlu0 %v12088_v52, %s8567_s7  ;;  %7834 = vrcp.f32 %v9884_v51 }
 0x598   : > { %v2360_v37 = vpop.xlane.xlu1 %2359 }
 0x599   : > { %7836 = vrcp.f32 %v2360_v37 }
 0x59a   : > { %v7815_v47 = vpop.eup %7814  ;;  %3387 = vrot.lane.b32.xlu1 %v12089_v22, %s8567_s7  ;;  %7838 = vrcp.f32 %v9952_v38 }
 0x59b   : > { %v1925_v0 = vmul.f32 %v7815_v47, %v9802_v17  ;;  %3375 = vrot.lane.b32.xlu0 %v12090_v29, %s8567_s7  ;;  %v7817_v33 = vpop.eup %7816  ;;  %v2393_v17 = vpack.c.bf16 %v2378_v19, %v2377_v40  ;;  %7840 = vrcp.f32 %v9962_v48 }
 0x59c   : > { %v9979_v43 = vpop.permute.xlu1 %2409  ;;  %v7819_v32 = vpop.eup %7818  ;;  %v2380_v57 = vmul.f32 %v7817_v33, %v9672_v53  ;;  %v12095_v53 = vld [vmem:[#allocation38_spill] sm:$0xff] }
 0x59d   : > { %7009 = vmatprep.subr.bf16.mxu0 %v9979_v43  ;;  %7418 = vmatprep.subr.bf16.mxu1 %v9979_v43  ;;  %v1934_v5 = vpack.c.bf16 %v1926_v27, %v1925_v0  ;;  %v7821_v39 = vpop.eup %7820  ;;  %v2382_v61 = vmul.f32 %v7819_v32, %v9713_v18 }
 0x59e   : > { %7010 = vmatpush3.bf16.msra.mxu0 %v9979_v43  ;;  %7426 = vmatpush3.bf16.msra.mxu1 %v9979_v43  ;;  %v7823_v56 = vpop.eup %7822  ;;  %v2379_v42 = vmul.f32 %v7821_v39, %v9649_v4 }
 0x59f   : > { %3369 = vrot.lane.b32.xlu1 %v12091_v11, %s8567_s7  ;;  %6960 = vmatmul.mubr.bf16.gmra.mxu0 %v1934_v5  ;;  %v2381_v54 = vmul.f32 %v7823_v56, %v9677_v35  ;;  %v7825_v44 = vpop.eup %7824  ;;  %v12096_v35 = vld [vmem:[#allocation45_spill] sm:$0xff] }
 0x5a0   : > { %3379 = vrot.lane.b32.xlu0 %v12092_v30, %s8567_s7  ;;  %7027 = vmatprep.subr.bf16.mxu0 %v9238_v25  ;;  %v2394_v23 = vpack.c.bf16 %v2380_v57, %v2379_v42  ;;  %v7827_v31 = vpop.eup %7826  ;;  %v2384_v4 = vmul.f32 %v7825_v44, %v9695_v1  ;;  %v7604_v5 = vld [vmem:[#allocation13 + $0x8] sm:$0xff]  }
 0x5a1   : > { %7011 = vmatprep.mubr.bf16.mxu0 %v2393_v17  ;;  %v2395_v46 = vpack.c.bf16 %v2382_v61, %v2381_v54  ;;  %v7829_v18 = vpop.eup %7828  ;;  %v2385_v50 = vmul.f32 %v7827_v31, %v9745_v15 }
 0x5a2   : > { %v7831_v51 = vpop.eup %7830  ;;  %v2383_v59 = vmul.f32 %v7829_v18, %v9655_v45 }
 0x5a3   : > { %3373 = vrot.lane.b32.xlu1 %v12093_v58, %s8567_s7  ;;  %v2386_v47 = vmul.f32 %v7831_v51, %v9717_v3  ;;  %v7833_v0 = vpop.eup %7832 }
 0x5a4   : > { %3383 = vrot.lane.b32.xlu0 %v12094_v9, %s8567_s7  ;;  %v7835_v19 = vpop.eup %7834  ;;  %v2388_v1 = vmul.f32 %v7833_v0, %v9757_v28 }
 0x5a5   : > { %v2397_v27 = vpack.c.bf16 %v2386_v47, %v2385_v50  ;;  %v2387_v3 = vmul.f32 %v7835_v19, %v9737_v7 }
 0x5a7   : > { %3377 = vrot.lane.b32.xlu1 %v12095_v53, %s8567_s7  ;;  %7012 = vmatmul.mubr.bf16.vlgmr.msra.gmra.mxu0 %v2394_v23  ;;  %v2398_v15 = vpack.c.bf16 %v2388_v1, %v2387_v3  ;;  %v12101_v1 = vld [vmem:[#allocation62_spill] sm:$0xff] }
 0x5a8   : > { %7028 = vmatpush3.bf16.msra.mxu0 %v9238_v25  ;;  %7015 = vmatprep.mubr.bf16.mxu0 %v2395_v46  ;;  %v2396_v25 = vpack.c.bf16 %v2384_v4, %v2383_v59  ;;  %v12098_v59 = vld [vmem:[#allocation61_spill] sm:$0xff] }
 0x5a9   : > { %7029 = vmatprep.subr.bf16.mxu0 %v12076_v36 }
 0x5ab   : > { %3381 = vrot.lane.b32.xlu1 %v12096_v35, %s8567_s7 }
 0x5ac   : > { %7030 = vmatpush3.bf16.msra.mxu0 %v12076_v36 }
 0x5ad   : > { %7031 = vmatprep.subr.bf16.mxu0 %v12077_v2 }
 0x5af   : > { %7016 = vmatmul.mubr.bf16.gmra.mxu0 %v2396_v25  ;;  %v12099_v25 = vld [vmem:[#allocation68_spill] sm:$0xff] }
 0x5b0   : > { %7032 = vmatpush3.bf16.msra.mxu0 %v12077_v2  ;;  %7019 = vmatprep.mubr.bf16.mxu0 %v2397_v27  ;;  %v7837_v2 = vpop.eup %7836  ;;  %v12100_v27 = vld [vmem:[#allocation80_spill] sm:$0xff] }
 0x5b1   : > { %7033 = vmatprep.subr.bf16.mxu0 %v12078_v49  ;;  %v7839_v38 = vpop.eup %7838  ;;  %v2392_v37 = vmul.f32 %v7837_v2, %v9813_v13  ;;  %v12103_v2 = vld [vmem:[#allocation83_spill] sm:$0xff] }
 0x5b2   : > { %v7841_v48 = vpop.eup %7840 }
 0x5b3   : > { %v2356_v45 = vpop.xlane.xlu0 %2355 }
 0x5b4   : > { %7034 = vmatpush3.bf16.msra.mxu0 %v12078_v49  ;;  %7842 = vrcp.f32 %v2356_v45 }
 0x5b5   : > { %7035 = vmatprep.subr.bf16.mxu0 %v12079_v20 }
 0x5b7   : > { %7020 = vmatmul.mubr.bf16.gmra.mxu0 %v2398_v15  ;;  %v2645_v36 = vpop.xlane.xlu0 %2644  ;;  %v12102_v15 = vld [vmem:[#allocation84_spill] sm:$0xff] }
 0x5b8   : > { %7036 = vmatpush3.bf16.msra.mxu0 %v12079_v20  ;;  %v2389_v20 = vmul.f32 %v7839_v38, %v9805_v6  ;;  %7844 = vrcp.f32 %v2645_v36 }
 0x5b9   : > { %7037 = vmatprep.subr.bf16.mxu0 %v12080_v12 }
 0x5bb   : > { %v2647_v28 = vpop.xlane.xlu0 %2646 }
 0x5bc   : > { %7038 = vmatpush3.bf16.msra.mxu0 %v12080_v12  ;;  %v12097_v12 = vld [vmem:[#allocation65_spill] sm:$0xff]  ;;  %7846 = vrcp.f32 %v2647_v28 }
 0x5bd   : > { %7039 = vmatprep.subr.bf16.mxu0 %v9927_v60  ;;  %v2391_v32 = vmul.f32 %v7841_v48, %v12097_v12 }
 0x5bf   : > { %v2649_v7 = vpop.xlane.xlu0 %2648  ;;  %v2400_v39 = vpack.c.bf16 %v2392_v37, %v2391_v32 }
 0x5c0   : > { %7040 = vmatpush3.bf16.msra.mxu0 %v9927_v60  ;;  %v10032_v60 = vpop.f32.mrf.mxu0  ;;  %7848 = vrcp.f32 %v2649_v7 }
 0x5c1   : > { %v7843_v49 = vpop.eup %7842  ;;  %7041 = vmatprep.subr.bf16.mxu0 %v9979_v43 }
 0x5c2   : > { %v2390_v40 = vmul.f32 %v7843_v49, %v9825_v24  ;;  %v10034_v13 = vpop.f32.mrf.mxu0  ;;  %v7605_v49 = vld [vmem:[#allocation13] sm:$0xff]  }
 0x5c3   : > { %v2651_v33 = vpop.xlane.xlu0 %2650 }
 0x5c4   : > { %7042 = vmatpush3.bf16.msra.mxu0 %v9979_v43  ;;  %v2399_v17 = vpack.c.bf16 %v2390_v40, %v2389_v20  ;;  %v10036_v57 = vpop.f32.mrf.mxu0 }
 0x5c5   : > { %7079 = vmatprep.subr.bf16.mxu0 %v7604_v5  ;;  %v7845_v23 = vpop.eup %7844 }
 0x5c6   : > { %7023 = vmatprep.mubr.bf16.mxu0 %v2399_v17  ;;  %v1691_v61 = vpop.f32.mrf.mxu0  ;;  %v2691_v19 = vmul.f32 %v7845_v23, %v12100_v27  ;;  %v12106_v23 = vld [vmem:[#allocation95_spill] sm:$0xff] }
 0x5c7   : > { %7024 = vmatmul.mubr.bf16.gmra.mxu0 %v2400_v39  ;;  %v2653_v56 = vpop.xlane.xlu0 %2652  ;;  %v12104_v39 = vld [vmem:[#allocation85_spill] sm:$0xff] }
 0x5c8   : > { %7850 = vrcp.f32 %v2653_v56  ;;  %v10038_v54 = vpop.f32.mrf.mxu0 }
 0x5c9   : > { %7852 = vrcp.f32 %v2651_v33  ;;  %v7847_v44 = vpop.eup %7846 }
 0x5ca   : > { %v1704_v51 = vpop.f32.mrf.mxu0  ;;  %v2692_v36 = vmul.f32 %v7847_v44, %v12102_v15 }
 0x5cb   : > { %v2655_v6 = vpop.xlane.xlu0 %2654 }
 0x5cc   : > { %v10044_v3 = vpop.f32.mrf.mxu0 }
 0x5cd   : > { %v2643_v24 = vpop.xlane.xlu1 %2642  ;;  %v7849_v31 = vpop.eup %7848 }
 0x5ce   : > { %7854 = vrcp.f32 %v2643_v24  ;;  %v2693_v47 = vmul.f32 %v7849_v31, %v12098_v59  ;;  %v1707_v40 = vpop.f32.mrf.mxu0 }
 0x5cf   : > { %v2657_v43 = vpop.xlane.xlu0 %2656 }
 0x5d0   : > { %7856 = vrcp.f32 %v2657_v43  ;;  %v2707_v48 = vpack.c.bf16 %v2693_v47, %v2692_v36  ;;  %v6925_v32 = vpop.f32.mrf.mxu0  ;;  %v12105_v43 = vld [vmem:[#allocation93_spill] sm:$0xff]  ;;  %v12109_v36 = vld [vmem:[#allocation76_spill] sm:$0xff] }
 0x5d1   : > { %7858 = vrcp.f32 %v2655_v6  ;;  %v7606_v6 = vld [vmem:[#allocation14 + $0x8] sm:$0xff]  }
 0x5d2   : > { %v2663_v7 = vpop.xlane.xlu1 %2662 }
 0x5d3   : > { %v2659_v42 = vpop.xlane.xlu0 %2658 }
 0x5d4   : > { %7860 = vrcp.f32 %v2659_v42 }
 0x5d5   : > { %v7851_v18 = vpop.eup %7850 }
 0x5d6   : > { %v7853_v4 = vpop.eup %7852  ;;  %v2695_v45 = vmul.f32 %v7851_v18, %v12101_v1  ;;  %v1720_v18 = vpop.f32.mrf.mxu0  ;;  %v2034_v1 = vpack.c.bf16 %v1707_v40, %v1704_v51 }
 0x5d7   : > { %v2661_v46 = vpop.xlane.xlu0 %2660  ;;  %v2694_v38 = vmul.f32 %v7853_v4, %v12103_v2 }
 0x5d8   : > { %7862 = vrcp.f32 %v2661_v46  ;;  %v12107_v46 = vld [vmem:[#allocation72_spill] sm:$0xff]  ;;  %v6926_v47 = vpop.f32.mrf.mxu0 }
 0x5d9   : > { %v2708_v20 = vpack.c.bf16 %v2695_v45, %v2694_v38  ;;  %7864 = vrcp.f32 %v2663_v7  ;;  %v7609_v38 = vld [vmem:[#allocation13 + $0x10] sm:$0xff]   ;;  %v2037_v40 = vpack.c.bf16 %v6926_v47, %v6925_v32 }
 0x5da   : > { %v1723_v27 = vpop.f32.mrf.mxu0 }
 0x5db   : > { %v7855_v50 = vpop.eup %7854  ;;  %v2036_v51 = vpack.c.bf16 %v1723_v27, %v1720_v18 }
 0x5dc   : > { %v2690_v0 = vmul.f32 %v7855_v50, %v12099_v25  ;;  %v2032_v50 = vpack.c.bf16 %v1691_v61, %v10034_v13  ;;  %v6929_v15 = vpop.f32.mrf.mxu0  ;;  %v12108_v13 = vld [vmem:[#allocation64_spill] sm:$0xff] }
 0x5dd   : > { %v7857_v37 = vpop.eup %7856 }
 0x5de   : > { %v2706_v28 = vpack.c.bf16 %v2691_v19, %v2690_v0  ;;  %v7859_v33 = vpop.eup %7858  ;;  %v2697_v56 = vmul.f32 %v7857_v37, %v12104_v39  ;;  %v2033_v0 = vpack.c.bf16 %v10036_v57, %v10032_v60  ;;  %v7607_v19 = vld [vmem:[#allocation14] sm:$0xff]   ;;  %v1736_v7 = vpop.f32.mrf.mxu0  ;;  %v2035_v60 = vpack.c.bf16 %v10044_v3, %v10038_v54 }
 0x5df   : > { %v2696_v42 = vmul.f32 %v7859_v33, %v12105_v43 }
 0x5e0   : > { %7043 = vmatprep.mubr.bf16.mxu0 %v2706_v28 }
 0x5e1   : > { %7044 = vmatmul.mubr.bf16.vlgmr.msra.gmra.mxu0 %v2707_v48  ;;  %v7861_v12 = vpop.eup %7860  ;;  %v2709_v4 = vpack.c.bf16 %v2697_v56, %v2696_v42  ;;  %v10062_v48 = vld [vmem:[#allocation14 + $0x18] sm:$0xff]  }
 0x5e2   : > { %7047 = vmatprep.mubr.bf16.mxu0 %v2708_v20  ;;  %7080 = vmatpush3.bf16.msra.mxu0 %v7604_v5  ;;  %v2665_v17 = vpop.xlane.xlu0 %2664  ;;  %v2698_v44 = vmul.f32 %v7861_v12, %v12106_v23  ;;  %v7608_v5 = vld [vmem:[#allocation13 + $0x18] sm:$0xff]  }
 0x5e3   : > { %7081 = vmatprep.subr.bf16.mxu0 %v7605_v49  ;;  %7866 = vrcp.f32 %v2665_v17  ;;  %7059 = vmatprep.subr.bf16.mxu1 %v7608_v5 }
 0x5e5   : > { %v7863_v24 = vpop.eup %7862 }
 0x5e6   : > { %v2699_v31 = vmul.f32 %v7863_v24, %v12107_v46  ;;  %7082 = vmatpush3.bf16.msra.mxu0 %v7605_v49  ;;  %v7865_v25 = vpop.eup %7864  ;;  %v6930_v49 = vpop.f32.mrf.mxu0 }
 0x5e7   : > { %7119 = vmatprep.subr.bf16.mxu0 %v7606_v6  ;;  %v2700_v61 = vmul.f32 %v7865_v25, %v12108_v13  ;;  %v2039_v17 = vpack.c.bf16 %v6930_v49, %v6929_v15 }
 0x5e8   : > { %v2710_v59 = vpack.c.bf16 %v2699_v31, %v2698_v44  ;;  %v1739_v20 = vpop.f32.mrf.mxu0 }
 0x5e9   : > { %7048 = vmatmul.mubr.bf16.gmra.mxu0 %v2709_v4  ;;  %v2038_v3 = vpack.c.bf16 %v1739_v20, %v1736_v7  ;;  %v7611_v20 = vld [vmem:[#allocation14 + $0x10] sm:$0xff]  }
 0x5ea   : > { %7051 = vmatprep.mubr.bf16.mxu1 %v2710_v59  ;;  %7083 = vmatprep.mubr.msk.bf16.mxu0 %vm1356_vm0, %v2032_v50 }
 0x5f0   : > { %v7867_v45 = vpop.eup %7866 }
 0x5f1   : > { %7084 = vmatmul.mubr.msk.bf16.vlgmr.msra.gmra.mxu0 %vm1356_vm0, %v2033_v0  ;;  %v2701_v28 = vmul.f32 %v7867_v45, %v12109_v36 }
 0x5f2   : > { %7087 = vmatprep.mubr.msk.bf16.mxu0 %vm1356_vm0, %v2034_v1  ;;  %7120 = vmatpush3.bf16.msra.mxu0 %v7606_v6  ;;  %v2667_v57 = vpop.xlane.xlu1 %2666 }
 0x5f3   : > { %7121 = vmatprep.subr.bf16.mxu0 %v7607_v19  ;;  %v2711_v2 = vpack.c.bf16 %v2701_v28, %v2700_v61  ;;  %7868 = vrcp.f32 %v2667_v57 }
 0x5f5   : > { %7052 = vmatmul.mubr.bf16.vlgmr.msra.gmra.mxu1 %v2711_v2 }
 0x5f6   : > { %7122 = vmatpush3.bf16.msra.mxu0 %v7607_v19  ;;  %7060 = vmatpush3.bf16.msra.mxu1 %v7608_v5 }
 0x5f7   : > { %7061 = vmatprep.subr.bf16.mxu1 %v7609_v38 }
 0x5f9   : > { %7088 = vmatmul.mubr.msk.bf16.gmra.mxu0 %vm1356_vm0, %v2035_v60 }
 0x5fa   : > { %7091 = vmatprep.mubr.msk.bf16.mxu0 %vm1356_vm0, %v2036_v51  ;;  %v2669_v37 = vpop.xlane.xlu0 %2668  ;;  %7062 = vmatpush3.bf16.msra.mxu1 %v7609_v38 }
 0x5fb   : > { %7870 = vrcp.f32 %v2669_v37  ;;  %7099 = vmatprep.subr.bf16.mxu1 %v10062_v48 }
 0x5fe   : > { %v2673_v54 = vpop.xlane.xlu0 %2672 }
 0x5ff   : > { %7872 = vrcp.f32 %v2673_v54 }
 0x600   : > { %v7869_v12 = vpop.eup %7868 }
 0x601   : > { %7092 = vmatmul.mubr.msk.bf16.gmra.mxu0 %vm1356_vm0, %v2037_v40  ;;  %v2702_v56 = vmul.f32 %v7869_v12, %v9901_v10 }
 0x602   : > { %7095 = vmatprep.mubr.msk.bf16.mxu0 %vm1356_vm0, %v2038_v3  ;;  %v2671_v33 = vpop.xlane.xlu1 %2670 }
 0x603   : > { %7874 = vrcp.f32 %v2671_v33 }
 0x606   : > { %v3400_v33 = vpop.permute.xlu1 %3399 }
 0x608   : > { %v7871_v39 = vpop.eup %7870 }
 0x609   : > { %7096 = vmatmul.mubr.msk.bf16.gmra.mxu0 %vm1356_vm0, %v2039_v17  ;;  %v2703_v6 = vmul.f32 %v7871_v39, %v9904_v63 }
 0x60b   : > { %v2712_v24 = vpack.c.bf16 %v2703_v6, %v2702_v56 }
 0x60c   : > { %v7873_v32 = vpop.eup %7872 }
 0x60d   : > { %7055 = vmatprep.mubr.bf16.mxu1 %v2712_v24  ;;  %v2705_v23 = vmul.f32 %v7873_v32, %v9909_v41 }
 0x610   : > { %v7875_v43 = vpop.eup %7874 }
 0x611   : > { %v2704_v42 = vmul.f32 %v7875_v43, %v9913_v26 }
 0x613   : > { %v2713_v44 = vpack.c.bf16 %v2705_v23, %v2704_v42 }
 0x615   : > { %7056 = vmatmul.mubr.bf16.gmra.mxu1 %v2713_v44 }
 0x636   : > { %v6949_v46 = vpop.f32.mrf.mxu0 }
 0x638   : > { %v1969_v31 = vpop.f32.mrf.mxu0 }
 0x63a   : > { %v6950_v18 = vpop.f32.mrf.mxu0 }
 0x63b   : > { %v2045_v50 = vpack.c.bf16 %v6950_v18, %v6949_v46 }
 0x63c   : > { %v1972_v4 = vpop.f32.mrf.mxu0 }
 0x63d   : > { %v2044_v5 = vpack.c.bf16 %v1972_v4, %v1969_v31 }
 0x63f   : > { %7123 = vmatprep.mubr.msk.bf16.mxu0 %vm1356_vm0, %v2044_v5 }
 0x640   : > { %7124 = vmatmul.mubr.msk.bf16.vlgmr.msra.gmra.mxu0 %vm1356_vm0, %v2045_v50 }
 0x641   : > { %v6953_v10 = vpop.f32.mrf.mxu0 }
 0x643   : > { %v1985_v63 = vpop.f32.mrf.mxu0 }
 0x645   : > { %v6954_v59 = vpop.f32.mrf.mxu0 }
 0x646   : > { %v2047_v26 = vpack.c.bf16 %v6954_v59, %v6953_v10 }
 0x647   : > { %v1988_v47 = vpop.f32.mrf.mxu0 }
 0x648   : > { %v2046_v25 = vpack.c.bf16 %v1988_v47, %v1985_v63  ;;  %v3447_v47 = vsel %vm1356_vm0, %v3400_v33, 0 }
 0x649   : > { %v6957_v0 = vpop.f32.mrf.mxu0 }
 0x64a   : > { %7127 = vmatprep.mubr.msk.bf16.mxu0 %vm1356_vm0, %v2046_v25 }
 0x64b   : > { %v2001_v41 = vpop.f32.mrf.mxu0  ;;  %7128 = vmatmul.mubr.msk.bf16.gmra.mxu0 %vm1356_vm0, %v2047_v26  ;;  %v3398_v26 = vpop.permute.xlu0 %3397 }
 0x64d   : > { %v6958_v27 = vpop.f32.mrf.mxu0 }
 0x64e   : > { %v2049_v45 = vpack.c.bf16 %v6958_v27, %v6957_v0 }
 0x64f   : > { %v2004_v19 = vpop.f32.mrf.mxu0 }
 0x650   : > { %v2048_v1 = vpack.c.bf16 %v2004_v19, %v2001_v41 }
 0x652   : > { %7131 = vmatprep.mubr.msk.bf16.mxu0 %vm1356_vm0, %v2048_v1  ;;  %v3444_v1 = vsel %vm1356_vm0, %v3398_v26, 0 }
 0x653   : > { %7132 = vmatmul.mubr.msk.bf16.gmra.mxu0 %vm1356_vm0, %v2049_v45  ;;  %v3396_v45 = vpop.permute.xlu1 %3395 }
 0x65f   : > { %v6961_v15 = vpop.f32.mrf.mxu0 }
 0x661   : > { %v2017_v13 = vpop.f32.mrf.mxu0 }
 0x663   : > { %v6962_v61 = vpop.f32.mrf.mxu0 }
 0x664   : > { %v2051_v2 = vpack.c.bf16 %v6962_v61, %v6961_v15 }
 0x665   : > { %v2020_v36 = vpop.f32.mrf.mxu0 }
 0x666   : > { %v2050_v28 = vpack.c.bf16 %v2020_v36, %v2017_v13  ;;  %v3441_v36 = vsel %vm1356_vm0, %v3396_v45, 0 }
 0x667   : > { %v7013_v38 = vpop.f32.mrf.mxu0 }
 0x668   : > { %7135 = vmatprep.mubr.msk.bf16.mxu0 %vm1356_vm0, %v2050_v28  ;;  %v3394_v28 = vpop.permute.xlu1 %3393 }
 0x669   : > { %v2467_v7 = vpop.f32.mrf.mxu0  ;;  %7136 = vmatmul.mubr.msk.bf16.gmra.mxu0 %vm1356_vm0, %v2051_v2 }
 0x66b   : > { %v7014_v60 = vpop.f32.mrf.mxu0 }
 0x66c   : > { %v2812_v49 = vpack.c.bf16 %v7014_v60, %v7013_v38  ;;  %v3438_v60 = vsel %vm1356_vm0, %v3394_v28, 0 }
 0x66d   : > { %v2470_v57 = vpop.f32.mrf.mxu0 }
 0x66e   : > { %v2811_v51 = vpack.c.bf16 %v2470_v57, %v2467_v7  ;;  %v3392_v57 = vpop.permute.xlu1 %3391 }
 0x66f   : > { %v7017_v37 = vpop.f32.mrf.mxu0 }
 0x670   : > { %7063 = vmatprep.mubr.msk.bf16.mxu1 %vm1356_vm0, %v2811_v51  ;;  %v3435_v51 = vsel %vm1356_vm0, %v3392_v57, 0 }
 0x671   : > { %v2483_v40 = vpop.f32.mrf.mxu0  ;;  %7064 = vmatmul.mubr.msk.bf16.vlgmr.msra.gmra.mxu1 %vm1356_vm0, %v2812_v49  ;;  %v3390_v49 = vpop.permute.xlu0 %3389 }
 0x672   : > { %7100 = vmatpush3.bf16.msra.mxu1 %v10062_v48 }
 0x673   : > { %v7018_v54 = vpop.f32.mrf.mxu0  ;;  %7101 = vmatprep.subr.bf16.mxu1 %v7611_v20 }
 0x674   : > { %v2814_v17 = vpack.c.bf16 %v7018_v54, %v7017_v37  ;;  %v3432_v37 = vsel %vm1356_vm0, %v3390_v49, 0 }
 0x675   : > { %v2486_v3 = vpop.f32.mrf.mxu0 }
 0x676   : > { %v2813_v12 = vpack.c.bf16 %v2486_v3, %v2483_v40  ;;  %7102 = vmatpush3.bf16.msra.mxu1 %v7611_v20  ;;  %v3388_v20 = vpop.permute.xlu1 %3387 }
 0x677   : > { %7443 = vmatprep.subr.msk.bf16.mxu1 %vm1356_vm0, %v3400_v33  ;;  %v7021_v39 = vpop.f32.mrf.mxu0  ;;  %v3429_v33 = vsel %vm1356_vm0, %v3388_v20, 0 }
 0x678   : > { %7067 = vmatprep.mubr.msk.bf16.mxu1 %vm1356_vm0, %v2813_v12  ;;  %v3386_v12 = vpop.permute.xlu0 %3385 }
 0x679   : > { %v2499_v56 = vpop.f32.mrf.mxu0  ;;  %7068 = vmatmul.mubr.msk.bf16.gmra.mxu1 %vm1356_vm0, %v2814_v17 }
 0x67b   : > { %v7022_v6 = vpop.f32.mrf.mxu0 }
 0x67c   : > { %v2816_v43 = vpack.c.bf16 %v7022_v6, %v7021_v39  ;;  %v3370_v6 = vpop.permute.xlu1 %3369 }
 0x67d   : > { %v2502_v24 = vpop.f32.mrf.mxu0 }
 0x67e   : > { %v2815_v32 = vpack.c.bf16 %v2502_v24, %v2499_v56  ;;  %v3426_v24 = vsel %vm1356_vm0, %v3386_v12, 0 }
 0x680   : > { %7071 = vmatprep.mubr.msk.bf16.mxu1 %vm1356_vm0, %v2815_v32  ;;  %v3372_v32 = vpop.permute.xlu0 %3371 }
 0x681   : > { %7072 = vmatmul.mubr.msk.bf16.gmra.mxu1 %vm1356_vm0, %v2816_v43  ;;  %v3374_v43 = vpop.permute.xlu1 %3373 }
 0x687   : > { %v7025_v48 = vpop.f32.mrf.mxu0 }
 0x689   : > { %v2515_v42 = vpop.f32.mrf.mxu0 }
 0x68b   : > { %v7026_v23 = vpop.f32.mrf.mxu0 }
 0x68c   : > { %v2818_v31 = vpack.c.bf16 %v7026_v23, %v7025_v48  ;;  %v3376_v48 = vpop.permute.xlu0 %3375 }
 0x68d   : > { %v2518_v44 = vpop.f32.mrf.mxu0 }
 0x68e   : > { %v2817_v46 = vpack.c.bf16 %v2518_v44, %v2515_v42  ;;  %v3378_v42 = vpop.permute.xlu1 %3377 }
 0x690   : > { %7075 = vmatprep.mubr.msk.bf16.mxu1 %vm1356_vm0, %v2817_v46  ;;  %v3380_v23 = vpop.permute.xlu0 %3379 }
 0x691   : > { %7076 = vmatmul.mubr.msk.bf16.gmra.mxu1 %vm1356_vm0, %v2818_v31 }
 0x692   : > { %v3382_v44 = vpop.permute.xlu1 %3381 }
 0x694   : > { %v3384_v46 = vpop.permute.xlu0 %3383 }
 0x6a1   : > { %v7045_v18 = vpop.f32.mrf.mxu0 }
 0x6a3   : > { %v2748_v4 = vpop.f32.mrf.mxu0 }
 0x6a5   : > { %v7046_v5 = vpop.f32.mrf.mxu0 }
 0x6a6   : > { %v3091_v63 = vpack.c.bf16 %v7046_v5, %v7045_v18 }
 0x6a7   : > { %v2751_v50 = vpop.f32.mrf.mxu0 }
 0x6a8   : > { %v3090_v10 = vpack.c.bf16 %v2751_v50, %v2748_v4 }
 0x6a9   : > { %v7049_v59 = vpop.f32.mrf.mxu0 }
 0x6aa   : > { %7103 = vmatprep.mubr.msk.bf16.mxu1 %vm1356_vm0, %v3090_v10 }
 0x6ab   : > { %v2764_v25 = vpop.f32.mrf.mxu0  ;;  %7104 = vmatmul.mubr.msk.bf16.vlgmr.msra.gmra.mxu1 %vm1356_vm0, %v3091_v63 }
 0x6ac   : > { %7140 = vmatpush3.bf16.xpose.msra.mxu1 %v3447_v47 }
 0x6ad   : > { %7444 = vmatprep.subr.msk.bf16.mxu1 %vm1356_vm0, %v3398_v26  ;;  %v7050_v0 = vpop.f32.mrf.mxu0 }
 0x6ae   : > { %v3093_v19 = vpack.c.bf16 %v7050_v0, %v7049_v59 }
 0x6af   : > { %v2767_v41 = vpop.f32.mrf.mxu0 }
 0x6b0   : > { %v3092_v27 = vpack.c.bf16 %v2767_v41, %v2764_v25 }
 0x6b2   : > { %7107 = vmatprep.mubr.msk.bf16.mxu1 %vm1356_vm0, %v3092_v27 }
 0x6b3   : > { %7108 = vmatmul.mubr.msk.bf16.gmra.mxu1 %vm1356_vm0, %v3093_v19 }
 0x6b4   : > { %7142 = vmatpush3.bf16.xpose.msra.mxu1 %v3444_v1 }
 0x6b5   : > { %7445 = vmatprep.subr.msk.bf16.mxu1 %vm1356_vm0, %v3396_v45  ;;  %v7053_v15 = vpop.f32.mrf.mxu1 }
 0x6b7   : > { %v2780_v13 = vpop.f32.mrf.mxu1 }
 0x6b9   : > { %v7054_v61 = vpop.f32.mrf.mxu1 }
 0x6ba   : > { %v3095_v7 = vpack.c.bf16 %v7054_v61, %v7053_v15 }
 0x6bb   : > { %v2783_v2 = vpop.f32.mrf.mxu1 }
 0x6bc   : > { %7144 = vmatpush3.bf16.xpose.msra.mxu1 %v3441_v36  ;;  %v3094_v38 = vpack.c.bf16 %v2783_v2, %v2780_v13 }
 0x6bd   : > { %7446 = vmatprep.subr.msk.bf16.mxu1 %vm1356_vm0, %v3394_v28 }
 0x6be   : > { %7111 = vmatprep.mubr.msk.bf16.mxu1 %vm1356_vm0, %v3094_v38 }
 0x6bf   : > { %7112 = vmatmul.mubr.msk.bf16.gmra.mxu1 %vm1356_vm0, %v3095_v7 }
 0x6c4   : > { %7146 = vmatpush3.bf16.xpose.msra.mxu1 %v3438_v60 }
 0x6c5   : > { %7447 = vmatprep.subr.msk.bf16.mxu1 %vm1356_vm0, %v3392_v57 }
 0x6cc   : > { %7148 = vmatpush3.bf16.xpose.msra.mxu1 %v3435_v51 }
 0x6cd   : > { %7448 = vmatprep.subr.msk.bf16.mxu1 %vm1356_vm0, %v3390_v49 }
 0x6d4   : > { %7150 = vmatpush3.bf16.xpose.msra.mxu1 %v3432_v37 }
 0x6d5   : > { %7449 = vmatprep.subr.msk.bf16.mxu1 %vm1356_vm0, %v3388_v20  ;;  %v7057_v40 = vpop.f32.mrf.mxu1 }
 0x6d7   : > { %v2796_v54 = vpop.f32.mrf.mxu1 }
 0x6d9   : > { %v7058_v3 = vpop.f32.mrf.mxu1 }
 0x6da   : > { %v3097_v56 = vpack.c.bf16 %v7058_v3, %v7057_v40 }
 0x6db   : > { %v2799_v17 = vpop.f32.mrf.mxu1 }
 0x6dc   : > { %7152 = vmatpush3.bf16.xpose.msra.mxu1 %v3429_v33  ;;  %v3096_v39 = vpack.c.bf16 %v2799_v17, %v2796_v54 }
 0x6dd   : > { %7450 = vmatprep.subr.msk.bf16.mxu1 %vm1356_vm0, %v3386_v12 }
 0x6de   : > { %7115 = vmatprep.mubr.msk.bf16.mxu1 %vm1356_vm0, %v3096_v39 }
 0x6df   : > { %7116 = vmatmul.mubr.msk.bf16.gmra.mxu1 %vm1356_vm0, %v3097_v56 }
 0x6e0   : > { %7155 = vmatprep.mubr.msk.bf16.mxu1 %vm1356_vm0, %v3370_v6 }
 0x6e4   : > { %7154 = vmatpush3.bf16.xpose.msra.mxu1 %v3426_v24 }
 0x6eb   : > { %7156 = vmatmul.mubr.msk.bf16.vlgmr.msra.gmra.mxu1 %vm1356_vm0, %v3372_v32 }
 0x6ec   : > { %7159 = vmatprep.mubr.msk.bf16.mxu1 %vm1356_vm0, %v3374_v43  ;;  %v12139_v43 = vld [vmem:[#allocation52_spill] sm:$0xff] }
 0x6f3   : > { %7160 = vmatmul.mubr.msk.bf16.gmra.mxu1 %vm1356_vm0, %v3376_v48 }
 0x6f4   : > { %7163 = vmatprep.mubr.msk.bf16.mxu1 %vm1356_vm0, %v3378_v42 }
 0x6fb   : > { %7164 = vmatmul.mubr.msk.bf16.gmra.mxu1 %vm1356_vm0, %v3380_v23 }
 0x6fc   : > { %7167 = vmatprep.mubr.msk.bf16.mxu1 %vm1356_vm0, %v3382_v44 }
 0x703   : > { %7168 = vmatmul.mubr.msk.bf16.gmra.mxu1 %vm1356_vm0, %v3384_v46 }
 0x731   : > { %v10123_v31 = vpop.f32.mrf.mxu1 }
 0x733   : > { %v10125_v18 = vpop.f32.mrf.mxu1 }
 0x735   : > { %v10127_v4 = vpop.f32.mrf.mxu1 }
 0x737   : > { %v10129_v5 = vpop.f32.mrf.mxu1 }
 0x738   : > { %12110 = vst [vmem:[#allocation86_spill] sm:$0xff] %v10129_v5 }
 0x739   : > { %v10131_v50 = vpop.f32.mrf.mxu1 }
 0x73a   : > { %12111 = vst [vmem:[#allocation66_spill] sm:$0xff] %v10131_v50 }
 0x73b   : > { %v10133_v10 = vpop.f32.mrf.mxu1 }
 0x73c   : > { %12112 = vst [vmem:[#allocation78_spill] sm:$0xff] %v10133_v10 }
 0x73d   : > { %v10135_v63 = vpop.f32.mrf.mxu1 }
 0x73e   : > { %12113 = vst [vmem:[#allocation87_spill] sm:$0xff] %v10135_v63 }
 0x73f   : > { %v10137_v59 = vpop.f32.mrf.mxu1 }
 0x740   : > { %12114 = vst [vmem:[#allocation63_spill] sm:$0xff] %v10137_v59 }
 0x741   : > { %v10139_v47 = vpop.f32.mrf.mxu1 }
 0x742   : > { %12115 = vst [vmem:[#allocation91_spill] sm:$0xff] %v10139_v47 }
 0x743   : > { %v10141_v25 = vpop.f32.mrf.mxu1 }
 0x744   : > { %12116 = vst [vmem:[#allocation67_spill] sm:$0xff] %v10141_v25 }
 0x745   : > { %v10143_v26 = vpop.f32.mrf.mxu1 }
 0x746   : > { %12117 = vst [vmem:[#allocation94_spill] sm:$0xff] %v10143_v26 }
 0x747   : > { %v10145_v0 = vpop.f32.mrf.mxu1 }
 0x748   : > { %12118 = vst [vmem:[#allocation70_spill] sm:$0xff] %v10145_v0 }
 0x751   : > { %v10147_v41 = vpop.f32.mrf.mxu1 }
 0x752   : > { %12119 = vst [vmem:[#allocation96_spill] sm:$0xff] %v10147_v41 }
 0x753   : > { %v10149_v27 = vpop.f32.mrf.mxu1 }
 0x754   : > { %12120 = vst [vmem:[#allocation74_spill] sm:$0xff] %v10149_v27 }
 0x755   : > { %v10151_v19 = vpop.f32.mrf.mxu1 }
 0x756   : > { %12121 = vst [vmem:[#allocation77_spill] sm:$0xff] %v10151_v19 }
 0x757   : > { %v10153_v1 = vpop.f32.mrf.mxu1 }
 0x758   : > { %12122 = vst [vmem:[#allocation79_spill] sm:$0xff] %v10153_v1 }
 0x76b   : > { %v10155_v45 = vpop.f32.mrf.mxu1 }
 0x76c   : > { %12123 = vst [vmem:[#allocation82_spill] sm:$0xff] %v10155_v45 }
 0x76d   : > { %v10157_v15 = vpop.f32.mrf.mxu1 }
 0x76e   : > { %12124 = vst [vmem:[#allocation89_spill] sm:$0xff] %v10157_v15 }
 0x76f   : > { %v10159_v13 = vpop.f32.mrf.mxu1 }
 0x770   : > { %12125 = vst [vmem:[#allocation71_spill] sm:$0xff] %v10159_v13 }
 0x771   : > { %v10161_v61 = vpop.f32.mrf.mxu1 }
 0x772   : > { %12126 = vst [vmem:[#allocation81_spill] sm:$0xff] %v10161_v61 }
 0x773   : > { %v10163_v36 = vpop.f32.mrf.mxu1 }
 0x774   : > { %12127 = vst [vmem:[#allocation88_spill] sm:$0xff] %v10163_v36 }
 0x775   : > { %v10165_v28 = vpop.f32.mrf.mxu1 }
 0x776   : > { %12128 = vst [vmem:[#allocation69_spill] sm:$0xff] %v10165_v28 }
 0x777   : > { %v10167_v2 = vpop.f32.mrf.mxu1 }
 0x778   : > { %12129 = vst [vmem:[#allocation90_spill] sm:$0xff] %v10167_v2 }
 0x779   : > { %v10169_v38 = vpop.f32.mrf.mxu1 }
 0x77a   : > { %12130 = vst [vmem:[#allocation73_spill] sm:$0xff] %v10169_v38 }
 0x77f   : > { %v10171_v7 = vpop.f32.mrf.mxu1 }
 0x780   : > { %12131 = vst [vmem:[#allocation92_spill] sm:$0xff] %v10171_v7 }
 0x781   : > { %v10173_v60 = vpop.f32.mrf.mxu1 }
 0x782   : > { %12132 = vst [vmem:[#allocation75_spill] sm:$0xff] %v10173_v60  ;;  %v12145_v60 = vld [vmem:[#allocation55_spill] sm:$0xff] }
 0x783   : > { %v10175_v57 = vpop.f32.mrf.mxu1 }
 0x784   : > { %12133 = vst [vmem:[#allocation60_spill] sm:$0xff] %v10175_v57  ;;  %v12144_v57 = vld [vmem:[#allocation54_spill] sm:$0xff] }
 0x785   : > { %v10177_v51 = vpop.f32.mrf.mxu1 }
 0x786   : > { %12134 = vst [vmem:[#allocation59_spill] sm:$0xff] %v10177_v51  ;;  %v12143_v51 = vld [vmem:[#allocation49_spill] sm:$0xff] }
 0x79f   : > { %v10179_v49 = vpop.f32.mrf.mxu1 }
 0x7a0   : > { %12135 = vst [vmem:[#allocation58_spill] sm:$0xff] %v10179_v49  ;;  %v12142_v49 = vld [vmem:[#allocation48_spill] sm:$0xff] }
 0x7a1   : > { %v10181_v37 = vpop.f32.mrf.mxu1 }
 0x7a2   : > { %12136 = vst [vmem:[#allocation56_spill] sm:$0xff] %v10181_v37  ;;  %v12141_v37 = vld [vmem:[#allocation51_spill] sm:$0xff] }
 0x7a3   : > { %v10183_v20 = vpop.f32.mrf.mxu1 }
 0x7a4   : > { %12137 = vst [vmem:[#allocation57_spill] sm:$0xff] %v10183_v20  ;;  %v12140_v20 = vld [vmem:[#allocation53_spill] sm:$0xff] }
 0x7a5   : > { %v10185_v40 = vpop.f32.mrf.mxu1 }
 0x7a6   : > { %12138 = vst [vmem:[#allocation40_spill] sm:$0xff] %v10185_v40 }
 0x7ab   : > { %v10187_v54 = vpop.f32.mrf.mxu1 }
 0x7ac   : > { %3550 = vmax.xlane.f32.xlu0 %v10187_v54 }
 0x7ad   : > { %v10190_v3 = vpop.f32.mrf.mxu1 }
 0x7ae   : > { %3546 = vmax.xlane.f32.xlu1 %v10190_v3 }
 0x7af   : > { %v10193_v33 = vpop.f32.mrf.mxu1 }
 0x7b1   : > { %v10195_v12 = vpop.f32.mrf.mxu1 }
 0x7b2   : > { %3548 = vmax.xlane.f32.xlu0 %v10195_v12 }
 0x7b3   : > { %v10198_v17 = vpop.f32.mrf.mxu1 }
 0x7b5   : > { %v10200_v39 = vpop.f32.mrf.mxu1 }
 0x7b6   : > { %3552 = vmax.xlane.f32.xlu0 %v10193_v33 }
 0x7b7   : > { %v10203_v56 = vpop.f32.mrf.mxu1 }
 0x7b9   : > { %v10205_v6 = vpop.f32.mrf.mxu1 }
 0x7ba   : > { %3560 = vmax.xlane.f32.xlu0 %v10203_v56 }
 0x7bb   : > { %v10208_v24 = vpop.f32.mrf.mxu1 }
 0x7bd   : > { %v10210_v32 = vpop.f32.mrf.mxu1 }
 0x7be   : > { %3556 = vmax.xlane.f32.xlu0 %v10205_v6 }
 0x7bf   : > { %3712 = vrot.lane.b32.xlu1 %v12139_v43, %s8567_s7  ;;  %v10215_v48 = vpop.f32.mrf.mxu1 }
 0x7c1   : > { %v10217_v42 = vpop.f32.mrf.mxu1 }
 0x7c2   : > { %3568 = vmax.xlane.f32.xlu0 %v10215_v48 }
 0x7c3   : > { %v10220_v23 = vpop.f32.mrf.mxu1 }
 0x7c5   : > { %v10222_v44 = vpop.f32.mrf.mxu1 }
 0x7c6   : > { %3564 = vmax.xlane.f32.xlu0 %v10217_v42 }
 0x7c7   : > { %v10225_v46 = vpop.f32.mrf.mxu1 }
 0x7c9   : > { %v10228_v40 = vpop.f32.mrf.mxu1 }
 0x7ca   : > { %3576 = vmax.xlane.f32.xlu0 %v10225_v46 }
 0x7ce   : > { %3572 = vmax.xlane.f32.xlu0 %v10228_v40 }
 0x7e3   : > { %3558 = vmax.xlane.f32.xlu1 %v10198_v17 }
 0x7e7   : > { %3554 = vmax.xlane.f32.xlu1 %v10200_v39 }
 0x7eb   : > { %3566 = vmax.xlane.f32.xlu1 %v10208_v24 }
 0x7ef   : > { %3562 = vmax.xlane.f32.xlu1 %v10210_v32 }
 0x7f3   : > { %3574 = vmax.xlane.f32.xlu1 %v10220_v23 }
 0x7f7   : > { %3570 = vmax.xlane.f32.xlu1 %v10222_v44 }
 0x808   : > { %3710 = vrot.lane.b32.xlu1 %v12140_v20, %s8567_s7 }
 0x80c   : > { %3706 = vrot.lane.b32.xlu1 %v12141_v37, %s8567_s7 }
 0x810   : > { %3704 = vrot.lane.b32.xlu1 %v12142_v49, %s8567_s7 }
 0x814   : > { %3702 = vrot.lane.b32.xlu1 %v12143_v51, %s8567_s7 }
 0x818   : > { %3700 = vrot.lane.b32.xlu1 %v12144_v57, %s8567_s7 }
 0x81c   : > { %3698 = vrot.lane.b32.xlu1 %v12145_v60, %s8567_s7 }
 0x835   : > { %v3551_v7 = vpop.xlane.xlu0 %3550 }
 0x836   : > { %v3580_v38 = vsub.f32 %v10187_v54, %v3551_v7 }
 0x837   : > { %v3547_v2 = vpop.xlane.xlu1 %3546 }
 0x838   : > { %v3598_v28 = vmul.f32 1.442695, %v3580_v38  ;;  %v3578_v36 = vsub.f32 %v10190_v3, %v3547_v2  ;;  %v12146_v2 = vld [vmem:[#allocation50_spill] sm:$0xff] }
 0x83a   : > { %7876 = vpow2.f32 %v3598_v28  ;;  %v3594_v61 = vmul.f32 1.442695, %v3578_v36 }
 0x83b   : > { %v10251_v13 = vpop.permute.xlu1 %3712  ;;  %v3549_v15 = vpop.xlane.xlu0 %3548 }
 0x83c   : > { %7171 = vmatprep.subr.bf16.mxu0 %v10251_v13  ;;  %7878 = vpow2.f32 %v3594_v61  ;;  %v3579_v60 = vsub.f32 %v10195_v12, %v3549_v15 }
 0x83d   : > { %7172 = vmatpush3.bf16.msra.mxu0 %v10251_v13 }
 0x83e   : > { %v3596_v1 = vmul.f32 1.442695, %v3579_v60 }
 0x83f   : > { %v3553_v45 = vpop.xlane.xlu0 %3552 }
 0x840   : > { %v3581_v57 = vsub.f32 %v10193_v33, %v3553_v45 }
 0x842   : > { %v3600_v7 = vmul.f32 1.442695, %v3581_v57 }
 0x843   : > { %v3561_v45 = vpop.xlane.xlu0 %3560 }
 0x844   : > { %7880 = vpow2.f32 %v3600_v7  ;;  %v3585_v50 = vsub.f32 %v10203_v56, %v3561_v45 }
 0x845   : > { %7882 = vpow2.f32 %v3596_v1 }
 0x847   : > { %v10257_v38 = vpop.eup %7876  ;;  %v3557_v1 = vpop.xlane.xlu0 %3556 }
 0x848   : > { %3630 = vadd.xlane.f32.xlu0 %v10257_v38  ;;  %v3583_v0 = vsub.f32 %v10205_v6, %v3557_v1 }
 0x849   : > { %v10260_v36 = vpop.eup %7878 }
 0x84a   : > { %v3604_v5 = vmul.f32 1.442695, %v3583_v0 }
 0x84b   : > { %v3569_v19 = vpop.xlane.xlu0 %3568 }
 0x84c   : > { %3626 = vadd.xlane.f32.xlu0 %v10260_v36 }
 0x84f   : > { %v3565_v63 = vpop.xlane.xlu0 %3564 }
 0x851   : > { %v10263_v28 = vpop.eup %7880 }
 0x852   : > { %3632 = vadd.xlane.f32.xlu0 %v10263_v28  ;;  %v10266_v61 = vpop.eup %7882 }
 0x853   : > { %v3577_v1 = vpop.xlane.xlu0 %3576 }
 0x856   : > { %3628 = vadd.xlane.f32.xlu0 %v10266_v61 }
 0x86c   : > { %v3559_v15 = vpop.xlane.xlu1 %3558  ;;  %3708 = vrot.lane.b32.xlu0 %v12146_v2, %s8567_s7 }
 0x86d   : > { %v3584_v27 = vsub.f32 %v10198_v17, %v3559_v15  ;;  %v3608_v15 = vmul.f32 1.442695, %v3585_v50 }
 0x86f   : > { %v3606_v26 = vmul.f32 1.442695, %v3584_v27 }
 0x870   : > { %v3555_v60 = vpop.xlane.xlu1 %3554 }
 0x871   : > { %v3582_v57 = vsub.f32 %v10200_v39, %v3555_v60 }
 0x873   : > { %v3602_v7 = vmul.f32 1.442695, %v3582_v57 }
 0x874   : > { %v3567_v41 = vpop.xlane.xlu1 %3566 }
 0x875   : > { %7884 = vpow2.f32 %v3602_v7  ;;  %v3588_v47 = vsub.f32 %v10208_v24, %v3567_v41  ;;  %v3587_v7 = vsub.f32 %v10217_v42, %v3565_v63 }
 0x876   : > { %7886 = vpow2.f32 %v3606_v26 }
 0x877   : > { %v3614_v57 = vmul.f32 1.442695, %v3588_v47  ;;  %v3612_v26 = vmul.f32 1.442695, %v3587_v7 }
 0x878   : > { %v3563_v25 = vpop.xlane.xlu1 %3562 }
 0x879   : > { %v3586_v59 = vsub.f32 %v10210_v32, %v3563_v25 }
 0x87b   : > { %v3610_v10 = vmul.f32 1.442695, %v3586_v59 }
 0x87c   : > { %v3575_v60 = vpop.xlane.xlu1 %3574 }
 0x87d   : > { %7888 = vpow2.f32 %v3610_v10  ;;  %v3592_v41 = vsub.f32 %v10220_v23, %v3575_v60  ;;  %v3573_v10 = vpop.xlane.xlu0 %3572 }
 0x87e   : > { %7890 = vpow2.f32 %v3604_v5  ;;  %v3589_v5 = vsub.f32 %v10215_v48, %v3569_v19  ;;  %v3591_v45 = vsub.f32 %v10228_v40, %v3573_v10 }
 0x87f   : > { %7892 = vpow2.f32 %v3614_v57  ;;  %v3622_v50 = vmul.f32 1.442695, %v3592_v41  ;;  %v3593_v57 = vsub.f32 %v10225_v46, %v3577_v1 }
 0x880   : > { %v3571_v27 = vpop.xlane.xlu1 %3570  ;;  %7894 = vpow2.f32 %v3608_v15  ;;  %v3616_v0 = vmul.f32 1.442695, %v3589_v5  ;;  %v3620_v15 = vmul.f32 1.442695, %v3591_v45 }
 0x881   : > { %v3590_v25 = vsub.f32 %v10222_v44, %v3571_v27  ;;  %v3624_v41 = vmul.f32 1.442695, %v3593_v57 }
 0x882   : > { %v10280_v49 = vpop.eup %7884 }
 0x883   : > { %v3618_v59 = vmul.f32 1.442695, %v3590_v25  ;;  %3634 = vadd.xlane.f32.xlu1 %v10280_v49  ;;  %v10288_v63 = vpop.eup %7886 }
 0x884   : > { %v10283_v47 = vpop.permute.xlu1 %3710 }
 0x885   : > { %7896 = vpow2.f32 %v3618_v59  ;;  %7173 = vmatprep.subr.bf16.mxu0 %v10283_v47 }
 0x886   : > { %7174 = vmatpush3.bf16.msra.mxu0 %v10283_v47  ;;  %7898 = vpow2.f32 %v3612_v26 }
 0x887   : > { %7900 = vpow2.f32 %v3622_v50  ;;  %v7612_v50 = vld [vmem:[#allocation13 + $0x28] sm:$0xff]  }
 0x888   : > { %7902 = vpow2.f32 %v3616_v0  ;;  %7235 = vmatprep.subr.bf16.mxu1 %v7612_v50  ;;  %v7613_v0 = vld [vmem:[#allocation13 + $0x20] sm:$0xff]  }
 0x889   : > { %7904 = vpow2.f32 %v3620_v15  ;;  %7236 = vmatpush3.bf16.msra.mxu1 %v7612_v50 }
 0x88a   : > { %v10291_v60 = vpop.eup %7888  ;;  %7906 = vpow2.f32 %v3624_v41  ;;  %7237 = vmatprep.subr.bf16.mxu1 %v7613_v0 }
 0x88b   : > { %3642 = vadd.xlane.f32.xlu1 %v10291_v60  ;;  %3638 = vadd.xlane.f32.xlu0 %v10288_v63  ;;  %v10295_v19 = vpop.eup %7890 }
 0x88c   : > { %v10298_v7 = vpop.eup %7892 }
 0x88d   : > { %v10302_v27 = vpop.eup %7894  ;;  %7238 = vmatpush3.bf16.msra.mxu1 %v7613_v0 }
 0x88f   : > { %3646 = vadd.xlane.f32.xlu1 %v10298_v7  ;;  %3636 = vadd.xlane.f32.xlu0 %v10295_v19 }
 0x892   : > { %v10304_v25 = vpop.eup %7896 }
 0x893   : > { %3650 = vadd.xlane.f32.xlu1 %v10304_v25  ;;  %3640 = vadd.xlane.f32.xlu0 %v10302_v27  ;;  %v10308_v59 = vpop.eup %7898 }
 0x894   : > { %v10310_v1 = vpop.eup %7900 }
 0x895   : > { %v10314_v26 = vpop.eup %7902 }
 0x896   : > { %v10317_v5 = vpop.eup %7904 }
 0x897   : > { %3654 = vadd.xlane.f32.xlu1 %v10310_v1  ;;  %3644 = vadd.xlane.f32.xlu0 %v10308_v59  ;;  %v10320_v10 = vpop.eup %7906 }
 0x89b   : > { %3648 = vadd.xlane.f32.xlu0 %v10314_v26 }
 0x89f   : > { %3652 = vadd.xlane.f32.xlu0 %v10317_v5 }
 0x8a3   : > { %3656 = vadd.xlane.f32.xlu0 %v10320_v10 }
 0x8a8   : > { %4454 = vrot.lane.b32.xlu1 %v12081_v21, %s8568_s3 }
 0x8ac   : > { %4450 = vrot.lane.b32.xlu1 %v12083_v8, %s8568_s3 }
 0x8b0   : > { %4448 = vrot.lane.b32.xlu1 %v12085_v55, %s8568_s3 }
 0x8b4   : > { %4446 = vrot.lane.b32.xlu1 %v12087_v14, %s8568_s3 }
 0x8b8   : > { %4442 = vrot.lane.b32.xlu1 %v12089_v22, %s8568_s3 }
 0x8b9   : > { %4452 = vrot.lane.b32.xlu0 %v12082_v34, %s8568_s3 }
 0x8bc   : > { %4424 = vrot.lane.b32.xlu1 %v12091_v11, %s8568_s3 }
 0x8bd   : > { %4444 = vrot.lane.b32.xlu0 %v12084_v62, %s8568_s3  ;;  %v3707_v62 = vpop.permute.xlu1 %3706 }
 0x8c0   : > { %4428 = vrot.lane.b32.xlu1 %v12093_v58, %s8568_s3 }
 0x8c1   : > { %4440 = vrot.lane.b32.xlu0 %v12086_v16, %s8568_s3  ;;  %v3705_v16 = vpop.permute.xlu1 %3704 }
 0x8c4   : > { %4432 = vrot.lane.b32.xlu1 %v12095_v53, %s8568_s3 }
 0x8c5   : > { %4426 = vrot.lane.b32.xlu0 %v12088_v52, %s8568_s3  ;;  %v3703_v52 = vpop.permute.xlu1 %3702 }
 0x8c9   : > { %4430 = vrot.lane.b32.xlu0 %v12090_v29, %s8568_s3  ;;  %v3701_v58 = vpop.permute.xlu1 %3700 }
 0x8cd   : > { %4434 = vrot.lane.b32.xlu0 %v12092_v30, %s8568_s3  ;;  %v3699_v45 = vpop.permute.xlu1 %3698 }
 0x8d1   : > { %4436 = vrot.lane.b32.xlu0 %v12096_v35, %s8568_s3  ;;  %v3631_v21 = vpop.xlane.xlu0 %3630 }
 0x8d5   : > { %4438 = vrot.lane.b32.xlu0 %v12094_v9, %s8568_s3  ;;  %v3627_v34 = vpop.xlane.xlu0 %3626 }
 0x8d6   : > { %7908 = vrcp.f32 %v3627_v34 }
 0x8db   : > { %v3633_v8 = vpop.xlane.xlu0 %3632 }
 0x8df   : > { %v3629_v55 = vpop.xlane.xlu0 %3628 }
 0x8e0   : > { %7910 = vrcp.f32 %v3629_v55 }
 0x8e1   : > { %7912 = vrcp.f32 %v3633_v8 }
 0x8e2   : > { %7914 = vrcp.f32 %v3631_v21 }
 0x8e3   : > { %v3709_v14 = vpop.permute.xlu0 %3708  ;;  %v7909_v22 = vpop.eup %7908 }
 0x8e4   : > { %7175 = vmatprep.subr.bf16.mxu0 %v3709_v14  ;;  %v3674_v11 = vmul.f32 %v7909_v22, %v10260_v36 }
 0x8e5   : > { %7176 = vmatpush3.bf16.msra.mxu0 %v3709_v14 }
 0x8e6   : > { %7177 = vmatprep.subr.bf16.mxu0 %v3707_v62 }
 0x8e9   : > { %7178 = vmatpush3.bf16.msra.mxu0 %v3707_v62 }
 0x8ea   : > { %7179 = vmatprep.subr.bf16.mxu0 %v3705_v16 }
 0x8ed   : > { %v7911_v29 = vpop.eup %7910  ;;  %3819 = vxpose.xlu1.b32.start [1/16] %v10190_v3, 128  ;;  %7180 = vmatpush3.bf16.msra.mxu0 %v3705_v16 }
 0x8ee   : > { %7181 = vmatprep.subr.bf16.mxu0 %v3703_v52  ;;  %v3675_v30 = vmul.f32 %v7911_v29, %v10266_v61  ;;  %v7913_v53 = vpop.eup %7912 }
 0x8ef   : > { %v7915_v35 = vpop.eup %7914  ;;  %v3677_v3 = vmul.f32 %v7913_v53, %v10263_v28 }
 0x8f0   : > { %v3690_v9 = vpack.c.bf16 %v3675_v30, %v3674_v11  ;;  %v3676_v36 = vmul.f32 %v7915_v35, %v10257_v38 }
 0x8f1   : > { %3820 = vxpose.xlu1.b32.cont [2/16] %v10195_v12, 128  ;;  %7182 = vmatpush3.bf16.msra.mxu0 %v3703_v52 }
 0x8f2   : > { %7183 = vmatprep.subr.bf16.mxu0 %v3701_v58  ;;  %7187 = vmatprep.mubr.bf16.mxu0 %v3690_v9  ;;  %v3691_v12 = vpack.c.bf16 %v3677_v3, %v3676_v36 }
 0x8f5   : > { %3821 = vxpose.xlu1.b32.cont [3/16] %v10187_v54, 128  ;;  %7184 = vmatpush3.bf16.msra.mxu0 %v3701_v58 }
 0x8f6   : > { %7185 = vmatprep.subr.bf16.mxu0 %v3699_v45 }
 0x8f9   : > { %3822 = vxpose.xlu1.b32.cont [4/16] %v10193_v33, 128  ;;  %7186 = vmatpush3.bf16.msra.mxu0 %v3699_v45 }
 0x8fa   : > { %7203 = vmatprep.subr.bf16.mxu0 %v10251_v13 }
 0x8fc   : > { %7188 = vmatmul.mubr.bf16.vlgmr.msra.gmra.mxu0 %v3691_v12 }
 0x8fd   : > { %3823 = vxpose.xlu1.b32.cont [5/16] %v10200_v39, 128  ;;  %7204 = vmatpush3.bf16.msra.mxu0 %v10251_v13 }
 0x8fe   : > { %7205 = vmatprep.subr.bf16.mxu0 %v10283_v47 }
 0x901   : > { %3824 = vxpose.xlu1.b32.cont [6/16] %v10205_v6, 128  ;;  %7206 = vmatpush3.bf16.msra.mxu0 %v10283_v47 }
 0x902   : > { %7207 = vmatprep.subr.bf16.mxu0 %v3709_v14 }
 0x905   : > { %3825 = vxpose.xlu1.b32.cont [7/16] %v10198_v17, 128  ;;  %7208 = vmatpush3.bf16.msra.mxu0 %v3709_v14 }
 0x906   : > { %7209 = vmatprep.subr.bf16.mxu0 %v3707_v62 }
 0x909   : > { %3826 = vxpose.xlu1.b32.cont [8/16] %v10203_v56, 128  ;;  %7210 = vmatpush3.bf16.msra.mxu0 %v3707_v62 }
 0x90a   : > { %7211 = vmatprep.subr.bf16.mxu0 %v3705_v16 }
 0x90c   : > { %v3635_v13 = vpop.xlane.xlu1 %3634 }
 0x90d   : > { %3827 = vxpose.xlu1.b32.cont [9/16] %v10210_v32, 128  ;;  %7212 = vmatpush3.bf16.msra.mxu0 %v3705_v16  ;;  %7916 = vrcp.f32 %v3635_v13 }
 0x90e   : > { %7213 = vmatprep.subr.bf16.mxu0 %v3703_v52 }
 0x911   : > { %3828 = vxpose.xlu1.b32.cont [10/16] %v10217_v42, 128  ;;  %7214 = vmatpush3.bf16.msra.mxu0 %v3703_v52 }
 0x912   : > { %7215 = vmatprep.subr.bf16.mxu0 %v3701_v58 }
 0x914   : > { %v3643_v54 = vpop.xlane.xlu1 %3642  ;;  %v3639_v33 = vpop.xlane.xlu0 %3638 }
 0x915   : > { %3829 = vxpose.xlu1.b32.cont [11/16] %v10208_v24, 128  ;;  %7216 = vmatpush3.bf16.msra.mxu0 %v3701_v58  ;;  %v10397_v58 = vpop.f32.mrf.mxu0 }
 0x916   : > { %7217 = vmatprep.subr.bf16.mxu0 %v3699_v45 }
 0x918   : > { %v3647_v17 = vpop.xlane.xlu1 %3646  ;;  %v3637_v39 = vpop.xlane.xlu0 %3636 }
 0x919   : > { %3830 = vxpose.xlu1.b32.cont [12/16] %v10215_v48, 128  ;;  %7218 = vmatpush3.bf16.msra.mxu0 %v3699_v45  ;;  %7918 = vrcp.f32 %v3637_v39 }
 0x91a   : > { %7920 = vrcp.f32 %v3639_v33  ;;  %v7917_v28 = vpop.eup %7916 }
 0x91b   : > { %v3678_v61 = vmul.f32 %v7917_v28, %v10280_v49 }
 0x91c   : > { %v3651_v56 = vpop.xlane.xlu1 %3650  ;;  %v3641_v6 = vpop.xlane.xlu0 %3640 }
 0x91d   : > { %3831 = vxpose.xlu1.b32.cont [13/16] %v10222_v44, 128  ;;  %7922 = vrcp.f32 %v3641_v6 }
 0x91e   : > { %7924 = vrcp.f32 %v3643_v54 }
 0x920   : > { %v3655_v32 = vpop.xlane.xlu1 %3654  ;;  %v3645_v42 = vpop.xlane.xlu0 %3644 }
 0x921   : > { %3832 = vxpose.xlu1.b32.cont [14/16] %v10228_v40, 128  ;;  %7926 = vrcp.f32 %v3645_v42 }
 0x922   : > { %7928 = vrcp.f32 %v3647_v17 }
 0x924   : > { %v10377_v24 = vpop.permute.xlu1 %4454  ;;  %v3649_v38 = vpop.xlane.xlu0 %3648 }
 0x925   : > { %7930 = vrcp.f32 %v3649_v38  ;;  %7451 = vmatprep.subr.msk.bf16.mxu1 %vm1356_vm0, %v10377_v24  ;;  %3833 = vxpose.xlu1.b32.cont [15/16] %v10220_v23, 128 }
 0x926   : > { %v7919_v48 = vpop.eup %7918  ;;  %7932 = vrcp.f32 %v3651_v56 }
 0x927   : > { %v3679_v47 = vmul.f32 %v7919_v48, %v10295_v19  ;;  %v7921_v40 = vpop.eup %7920 }
 0x928   : > { %v3653_v44 = vpop.xlane.xlu0 %3652  ;;  %v3680_v50 = vmul.f32 %v7921_v40, %v10288_v63 }
 0x929   : > { %7934 = vrcp.f32 %v3653_v44  ;;  %3834 = vxpose.xlu1.b32.end [16/16] %v10225_v46, 128  ;;  %v3692_v57 = vpack.c.bf16 %v3679_v47, %v3678_v61 }
 0x92a   : > { %v7923_v15 = vpop.eup %7922  ;;  %7936 = vrcp.f32 %v3655_v32 }
 0x92b   : > { %7191 = vmatprep.mubr.bf16.mxu0 %v3692_v57  ;;  %v3681_v23 = vmul.f32 %v7923_v15, %v10302_v27  ;;  %v7925_v0 = vpop.eup %7924 }
 0x92c   : > { %v3657_v41 = vpop.xlane.xlu0 %3656  ;;  %v3682_v19 = vmul.f32 %v7925_v0, %v10291_v60 }
 0x92d   : > { %7938 = vrcp.f32 %v3657_v41  ;;  %v3693_v21 = vpack.c.bf16 %v3681_v23, %v3680_v50 }
 0x92e   : > { %v7927_v34 = vpop.eup %7926 }
 0x92f   : > { %v7929_v49 = vpop.eup %7928  ;;  %7192 = vmatmul.mubr.bf16.gmra.mxu0 %v3693_v21  ;;  %v3683_v8 = vmul.f32 %v7927_v34, %v10308_v59 }
 0x930   : > { %v3684_v55 = vmul.f32 %v7929_v49, %v10298_v7 }
 0x931   : > { %v3694_v62 = vpack.c.bf16 %v3683_v8, %v3682_v19 }
 0x932   : > { %v7931_v46 = vpop.eup %7930 }
 0x933   : > { %v3685_v16 = vmul.f32 %v7931_v46, %v10314_v26  ;;  %v7933_v14 = vpop.eup %7932  ;;  %7195 = vmatprep.mubr.bf16.mxu0 %v3694_v62  ;;  %v10395_v26 = vpop.permute.xlu1 %4450 }
 0x934   : > { %v3686_v52 = vmul.f32 %v7933_v14, %v10304_v25  ;;  %v10403_v25 = vpop.f32.mrf.mxu0 }
 0x935   : > { %v3695_v63 = vpack.c.bf16 %v3685_v16, %v3684_v55 }
 0x936   : > { %v7935_v27 = vpop.eup %7934 }
 0x937   : > { %v3687_v22 = vmul.f32 %v7935_v27, %v10317_v5  ;;  %v7937_v29 = vpop.eup %7936  ;;  %7196 = vmatmul.mubr.bf16.gmra.mxu0 %v3695_v63  ;;  %v10399_v9 = vpop.permute.xlu1 %4448 }
 0x938   : > { %v3688_v59 = vmul.f32 %v7937_v29, %v10310_v1  ;;  %v10407_v5 = vpop.f32.mrf.mxu0 }
 0x939   : > { %v3696_v11 = vpack.c.bf16 %v3687_v22, %v3686_v52 }
 0x93a   : > { %v7939_v60 = vpop.eup %7938 }
 0x93b   : > { %7199 = vmatprep.mubr.bf16.mxu0 %v3696_v11  ;;  %v3689_v30 = vmul.f32 %v7939_v60, %v10320_v10  ;;  %v10409_v1 = vpop.permute.xlu1 %4446  ;;  %v10411_v10 = vpop.f32.mrf.mxu0 }
 0x93d   : > { %v3697_v7 = vpack.c.bf16 %v3689_v30, %v3688_v59  ;;  %v10415_v35 = vpop.f32.mrf.mxu0 }
 0x93f   : > { %7200 = vmatmul.mubr.bf16.gmra.mxu0 %v3697_v7  ;;  %v10413_v53 = vpop.permute.xlu1 %4442  ;;  %v10417_v45 = vpop.f32.mrf.mxu0 }
 0x943   : > { %v10419_v3 = vpop.permute.xlu1 %4424 }
 0x947   : > { %4765 = vrot.lane.b32.xlu1 %v12140_v20, %s8568_s3  ;;  %v10421_v20 = vpop.f32.mrf.mxu0  ;;  %v10423_v36 = vpop.permute.xlu1 %4428 }
 0x949   : > { %v10425_v12 = vpop.f32.mrf.mxu0 }
 0x94b   : > { %4763 = vrot.lane.b32.xlu1 %v12146_v2, %s8568_s3  ;;  %v10427_v2 = vpop.f32.mrf.mxu0  ;;  %v10429_v13 = vpop.permute.xlu1 %4432 }
 0x94d   : > { %v10431_v54 = vpop.f32.mrf.mxu0 }
 0x94f   : > { %v10436_v17 = vpop.f32.mrf.mxu0 }
 0x951   : > { %v10441_v56 = vpop.f32.mrf.mxu0 }
 0x953   : > { %v10446_v32 = vpop.f32.mrf.mxu0 }
 0x955   : > { %v10451_v38 = vpop.f32.mrf.mxu0 }
 0x957   : > { %v10456_v48 = vpop.f32.mrf.mxu0 }
 0x959   : > { %v10461_v61 = vpop.f32.mrf.mxu0 }
 0x95b   : > { %v10465_v40 = vpop.f32.mrf.mxu0 }
 0x95d   : > { %v10470_v15 = vpop.f32.mrf.mxu0 }
 0x95f   : > { %v10475_v50 = vpop.f32.mrf.mxu0 }
 0x961   : > { %v10480_v0 = vpop.f32.mrf.mxu0 }
 0x962   : > { %12147 = vst [vmem:[#allocation41_spill] sm:$0xff] %v10480_v0 }
 0x963   : > { %v10483_v21 = vpop.f32.mrf.mxu0 }
 0x964   : > { %12148 = vst [vmem:[#allocation35_spill] sm:$0xff] %v10483_v21 }
 0x965   : > { %v10488_v49 = vpop.f32.mrf.mxu0 }
 0x966   : > { %12149 = vst [vmem:[#allocation39_spill] sm:$0xff] %v10488_v49 }
 0x967   : > { %v10493_v8 = vpop.f32.mrf.mxu0 }
 0x968   : > { %12150 = vst [vmem:[#allocation37_spill] sm:$0xff] %v10493_v8 }
 0x969   : > { %v10433_v33 = vpop.trf.xlu1  ;;  %v10498_v62 = vpop.f32.mrf.mxu0 }
 0x96a   : > { %3851 = vmax.xlane.f32.xlu0 %v10433_v33  ;;  %12151 = vst [vmem:[#allocation42_spill] sm:$0xff] %v10498_v62 }
 0x96b   : > { %v10503_v16 = vpop.f32.mrf.mxu0 }
 0x96c   : > { %12152 = vst [vmem:[#allocation33_spill] sm:$0xff] %v10503_v16 }
 0x96d   : > { %v10438_v39 = vpop.trf.xlu1  ;;  %v10508_v63 = vpop.f32.mrf.mxu0 }
 0x96e   : > { %3853 = vmax.xlane.f32.xlu0 %v10438_v39  ;;  %12153 = vst [vmem:[#allocation43_spill] sm:$0xff] %v10508_v63 }
 0x96f   : > { %v10510_v27 = vpop.f32.mrf.mxu0 }
 0x970   : > { %12154 = vst [vmem:[#allocation34_spill] sm:$0xff] %v10510_v27  ;;  %v4453_v27 = vpop.permute.xlu0 %4452 }
 0x971   : > { %v10443_v6 = vpop.trf.xlu1  ;;  %v10512_v52 = vpop.f32.mrf.mxu0 }
 0x972   : > { %3855 = vmax.xlane.f32.xlu0 %v10443_v6  ;;  %12155 = vst [vmem:[#allocation44_spill] sm:$0xff] %v10512_v52 }
 0x973   : > { %v10514_v22 = vpop.f32.mrf.mxu0 }
 0x974   : > { %12156 = vst [vmem:[#allocation32_spill] sm:$0xff] %v10514_v22  ;;  %v4484_v22 = vsel %vm1356_vm0, %v10413_v53, 0 }
 0x975   : > { %v10448_v42 = vpop.trf.xlu1  ;;  %v10516_v29 = vpop.f32.mrf.mxu0 }
 0x976   : > { %3857 = vmax.xlane.f32.xlu0 %v10448_v42  ;;  %12157 = vst [vmem:[#allocation46_spill] sm:$0xff] %v10516_v29  ;;  %v4502_v29 = vsel %vm1356_vm0, %v10377_v24, 0 }
 0x977   : > { %v10518_v11 = vpop.f32.mrf.mxu0 }
 0x978   : > { %12158 = vst [vmem:[#allocation36_spill] sm:$0xff] %v10518_v11 }
 0x979   : > { %v10453_v28 = vpop.trf.xlu1  ;;  %v10522_v60 = vpop.f32.mrf.mxu0 }
 0x97a   : > { %3859 = vmax.xlane.f32.xlu0 %v10453_v28  ;;  %12159 = vst [vmem:[#allocation47_spill] sm:$0xff] %v10522_v60  ;;  %v4499_v60 = vsel %vm1356_vm0, %v4453_v27, 0 }
 0x97d   : > { %v10458_v44 = vpop.trf.xlu1 }
 0x97e   : > { %3861 = vmax.xlane.f32.xlu0 %v10458_v44 }
 0x981   : > { %v10463_v47 = vpop.trf.xlu1 }
 0x982   : > { %3863 = vmax.xlane.f32.xlu0 %v10463_v47 }
 0x985   : > { %v10468_v57 = vpop.trf.xlu1 }
 0x986   : > { %3865 = vmax.xlane.f32.xlu0 %v10468_v57 }
 0x989   : > { %v10473_v41 = vpop.trf.xlu1 }
 0x98a   : > { %3867 = vmax.xlane.f32.xlu0 %v10473_v41 }
 0x98d   : > { %v10478_v23 = vpop.trf.xlu1 }
 0x98e   : > { %3869 = vmax.xlane.f32.xlu0 %v10478_v23 }
 0x991   : > { %v10485_v34 = vpop.trf.xlu1 }
 0x992   : > { %3871 = vmax.xlane.f32.xlu0 %v10485_v34 }
 0x995   : > { %v10490_v19 = vpop.trf.xlu1 }
 0x996   : > { %3873 = vmax.xlane.f32.xlu0 %v10490_v19 }
 0x999   : > { %v10495_v46 = vpop.trf.xlu1 }
 0x99a   : > { %3875 = vmax.xlane.f32.xlu0 %v10495_v46 }
 0x99d   : > { %v10500_v55 = vpop.trf.xlu1 }
 0x99e   : > { %3877 = vmax.xlane.f32.xlu0 %v10500_v55 }
 0x9a1   : > { %v10505_v14 = vpop.trf.xlu1 }
 0x9a2   : > { %3879 = vmax.xlane.f32.xlu0 %v10505_v14 }
 0x9b8   : > { %4767 = vrot.lane.b32.xlu0 %v12139_v43, %s8568_s3  ;;  %v4445_v43 = vpop.permute.xlu0 %4444 }
 0x9bc   : > { %v7189_v59 = vpop.f32.mrf.mxu0 }
 0x9be   : > { %v3756_v30 = vpop.f32.mrf.mxu0 }
 0x9c0   : > { %v7190_v7 = vpop.f32.mrf.mxu0 }
 0x9c1   : > { %v4101_v62 = vpack.c.bf16 %v7190_v7, %v7189_v59  ;;  %v10532_v59 = vpop.trf.xlu1 }
 0x9c2   : > { %v3759_v16 = vpop.f32.mrf.mxu0 }
 0x9c3   : > { %v4100_v63 = vpack.c.bf16 %v3759_v16, %v3756_v30  ;;  %v4441_v16 = vpop.permute.xlu0 %4440  ;;  %v4487_v30 = vsel %vm1356_vm0, %v4445_v43, 0 }
 0x9c5   : > { %7239 = vmatprep.mubr.msk.bf16.mxu1 %vm1356_vm0, %v4100_v63  ;;  %v4496_v63 = vsel %vm1356_vm0, %v10395_v26, 0 }
 0x9c6   : > { %7240 = vmatmul.mubr.msk.bf16.vlgmr.msra.gmra.mxu1 %vm1356_vm0, %v4101_v62 }
 0x9c7   : > { %7276 = vmatpush3.bf16.xpose.msra.mxu1 %v4502_v29  ;;  %v10536_v62 = vpop.permute.xlu0 %4426 }
 0x9c8   : > { %7452 = vmatprep.subr.msk.bf16.mxu1 %vm1356_vm0, %v4453_v27  ;;  %v4493_v27 = vsel %vm1356_vm0, %v10399_v9, 0 }
 0x9cb   : > { %v10541_v24 = vpop.permute.xlu0 %4430 }
 0x9cf   : > { %7278 = vmatpush3.bf16.xpose.msra.mxu1 %v4499_v60  ;;  %v10547_v29 = vpop.permute.xlu0 %4434 }
 0x9d0   : > { %7453 = vmatprep.subr.msk.bf16.mxu1 %vm1356_vm0, %v10395_v26  ;;  %v4490_v26 = vsel %vm1356_vm0, %v10409_v1, 0 }
 0x9d3   : > { %v10552_v60 = vpop.permute.xlu0 %4436 }
 0x9d7   : > { %7280 = vmatpush3.bf16.xpose.msra.mxu1 %v4496_v63  ;;  %3881 = vmax.xlane.f32.xlu0 %v10532_v59 }
 0x9d8   : > { %7454 = vmatprep.subr.msk.bf16.mxu1 %vm1356_vm0, %v10399_v9  ;;  %v10557_v9 = vpop.permute.xlu0 %4438 }
 0x9df   : > { %7282 = vmatpush3.bf16.xpose.msra.mxu1 %v4493_v27 }
 0x9e0   : > { %7455 = vmatprep.subr.msk.bf16.mxu1 %vm1356_vm0, %v10409_v1 }
 0x9e7   : > { %7284 = vmatpush3.bf16.xpose.msra.mxu1 %v4490_v26 }
 0x9e8   : > { %7456 = vmatprep.subr.msk.bf16.mxu1 %vm1356_vm0, %v4445_v43 }
 0x9ed   : > { %4761 = vrot.lane.b32.xlu0 %v12141_v37, %s8568_s3 }
 0x9ef   : > { %7286 = vmatpush3.bf16.xpose.msra.mxu1 %v4487_v30  ;;  %v7193_v7 = vpop.f32.mrf.mxu0 }
 0x9f0   : > { %7457 = vmatprep.subr.msk.bf16.mxu1 %vm1356_vm0, %v10413_v53 }
 0x9f1   : > { %v3772_v63 = vpop.f32.mrf.mxu0 }
 0x9f3   : > { %v3852_v27 = vpop.xlane.xlu0 %3851  ;;  %v7194_v1 = vpop.f32.mrf.mxu0 }
 0x9f4   : > { %v3883_v26 = vsub.f32 %v10433_v33, %v3852_v27  ;;  %v4103_v43 = vpack.c.bf16 %v7194_v1, %v7193_v7  ;;  %v4481_v7 = vsel %vm1356_vm0, %v4441_v16, 0 }
 0x9f5   : > { %v3775_v11 = vpop.f32.mrf.mxu0 }
 0x9f6   : > { %v4102_v52 = vpack.c.bf16 %v3775_v11, %v3772_v63  ;;  %v3899_v49 = vmul.f32 1.442695, %v3883_v26 }
 0x9f7   : > { %7288 = vmatpush3.bf16.xpose.msra.mxu1 %v4484_v22  ;;  %v3854_v37 = vpop.xlane.xlu0 %3853  ;;  %v7197_v8 = vpop.f32.mrf.mxu0 }
 0x9f8   : > { %7458 = vmatprep.subr.msk.bf16.mxu1 %vm1356_vm0, %v4441_v16  ;;  %v3884_v30 = vsub.f32 %v10438_v39, %v3854_v37  ;;  %7243 = vmatprep.mubr.msk.bf16.mxu1 %vm1356_vm0, %v4102_v52 }
 0x9f9   : > { %v3788_v0 = vpop.f32.mrf.mxu0  ;;  %7244 = vmatmul.mubr.msk.bf16.gmra.mxu1 %vm1356_vm0, %v4103_v43 }
 0x9fa   : > { %v3901_v21 = vmul.f32 1.442695, %v3884_v30 }
 0x9fb   : > { %v3856_v33 = vpop.xlane.xlu0 %3855  ;;  %v7198_v27 = vpop.f32.mrf.mxu0 }
 0x9fc   : > { %7940 = vpow2.f32 %v3901_v21  ;;  %v3885_v53 = vsub.f32 %v10443_v6, %v3856_v33  ;;  %v4105_v1 = vpack.c.bf16 %v7198_v27, %v7197_v8 }
 0x9fd   : > { %7942 = vpow2.f32 %v3899_v49  ;;  %v3791_v11 = vpop.f32.mrf.mxu0 }
 0x9fe   : > { %v3903_v22 = vmul.f32 1.442695, %v3885_v53  ;;  %v4104_v63 = vpack.c.bf16 %v3791_v11, %v3788_v0 }
 0x9ff   : > { %7290 = vmatpush3.bf16.xpose.msra.mxu1 %v4481_v7  ;;  %v3858_v39 = vpop.xlane.xlu0 %3857  ;;  %v7201_v52 = vpop.f32.mrf.mxu0 }
 0xa00   : > { %v3886_v26 = vsub.f32 %v10448_v42, %v3858_v39  ;;  %7247 = vmatprep.mubr.msk.bf16.mxu1 %vm1356_vm0, %v4104_v63  ;;  %7944 = vpow2.f32 %v3903_v22 }
 0xa01   : > { %v3804_v21 = vpop.f32.mrf.mxu0  ;;  %7248 = vmatmul.mubr.msk.bf16.gmra.mxu1 %vm1356_vm0, %v4105_v1 }
 0xa02   : > { %v3905_v37 = vmul.f32 1.442695, %v3886_v26 }
 0xa03   : > { %v3860_v6 = vpop.xlane.xlu0 %3859  ;;  %v7202_v49 = vpop.f32.mrf.mxu0 }
 0xa04   : > { %v3887_v43 = vsub.f32 %v10453_v28, %v3860_v6  ;;  %7946 = vpow2.f32 %v3905_v37  ;;  %v4107_v8 = vpack.c.bf16 %v7202_v49, %v7201_v52 }
 0xa05   : > { %v3807_v0 = vpop.f32.mrf.mxu0 }
 0xa06   : > { %v3907_v16 = vmul.f32 1.442695, %v3887_v43  ;;  %v4106_v30 = vpack.c.bf16 %v3807_v0, %v3804_v21 }
 0xa07   : > { %v3862_v33 = vpop.xlane.xlu0 %3861 }
 0xa08   : > { %v3888_v27 = vsub.f32 %v10458_v44, %v3862_v33  ;;  %7251 = vmatprep.mubr.msk.bf16.mxu1 %vm1356_vm0, %v4106_v30  ;;  %7948 = vpow2.f32 %v3907_v16 }
 0xa09   : > { %v10575_v42 = vpop.eup %7940  ;;  %7252 = vmatmul.mubr.msk.bf16.gmra.mxu1 %vm1356_vm0, %v4107_v8 }
 0xa0a   : > { %v3909_v53 = vmul.f32 1.442695, %v3888_v27  ;;  %3933 = vadd.xlane.f32.xlu1 %v10575_v42  ;;  %v10580_v22 = vpop.eup %7942  ;;  %7291 = vmatprep.mubr.msk.bf16.mxu1 %vm1356_vm0, %v10419_v3 }
 0xa0b   : > { %v3864_v28 = vpop.xlane.xlu0 %3863 }
 0xa0c   : > { %v3889_v11 = vsub.f32 %v10463_v47, %v3864_v28  ;;  %3931 = vadd.xlane.f32.xlu0 %v10580_v22  ;;  %7950 = vpow2.f32 %v3909_v53  ;;  %v10632_v28 = vld [vmem:[#allocation14 + $0x28] sm:$0xff]  }
 0xa0d   : > { %v10586_v7 = vpop.eup %7944  ;;  %7255 = vmatprep.subr.bf16.mxu0 %v10632_v28 }
 0xa0e   : > { %v3911_v44 = vmul.f32 1.442695, %v3889_v11 }
 0xa0f   : > { %v3866_v63 = vpop.xlane.xlu0 %3865 }
 0xa10   : > { %v3890_v39 = vsub.f32 %v10468_v57, %v3866_v63  ;;  %3935 = vadd.xlane.f32.xlu0 %v10586_v7  ;;  %7952 = vpow2.f32 %v3911_v44 }
 0xa11   : > { %7292 = vmatmul.mubr.msk.bf16.vlgmr.msra.gmra.mxu1 %vm1356_vm0, %v10536_v62  ;;  %v10592_v3 = vpop.eup %7946 }
 0xa12   : > { %v3913_v1 = vmul.f32 1.442695, %v3890_v39  ;;  %7295 = vmatprep.mubr.msk.bf16.mxu1 %vm1356_vm0, %v10423_v36 }
 0xa13   : > { %v3868_v47 = vpop.xlane.xlu0 %3867 }
 0xa14   : > { %v3891_v52 = vsub.f32 %v10473_v41, %v3868_v47  ;;  %3937 = vadd.xlane.f32.xlu0 %v10592_v3  ;;  %7954 = vpow2.f32 %v3913_v1 }
 0xa15   : > { %v10598_v57 = vpop.eup %7948 }
 0xa16   : > { %v3915_v26 = vmul.f32 1.442695, %v3891_v52 }
 0xa17   : > { %v3870_v37 = vpop.xlane.xlu0 %3869 }
 0xa18   : > { %v3892_v21 = vsub.f32 %v10478_v23, %v3870_v37  ;;  %3939 = vadd.xlane.f32.xlu0 %v10598_v57  ;;  %7956 = vpow2.f32 %v3915_v26  ;;  %v3036_v26 = vadd.f32 %v10397_v58, %v10123_v31 }
 0xa19   : > { %7296 = vmatmul.mubr.msk.bf16.gmra.mxu1 %vm1356_vm0, %v10541_v24  ;;  %v10604_v36 = vpop.eup %7950 }
 0xa1a   : > { %v3917_v62 = vmul.f32 1.442695, %v3892_v21  ;;  %7299 = vmatprep.mubr.msk.bf16.mxu1 %vm1356_vm0, %v10429_v13  ;;  %v3028_v21 = vadd.f32 %v10403_v25, %v10125_v18 }
 0xa1b   : > { %v3872_v41 = vpop.xlane.xlu0 %3871 }
 0xa1c   : > { %v3893_v6 = vsub.f32 %v10485_v34, %v3872_v41  ;;  %3941 = vadd.xlane.f32.xlu0 %v10604_v36  ;;  %7958 = vpow2.f32 %v3917_v62  ;;  %v3039_v41 = vadd.f32 %v10407_v5, %v10127_v4 }
 0xa1d   : > { %v10610_v23 = vpop.eup %7952 }
 0xa1e   : > { %v3919_v49 = vmul.f32 1.442695, %v3893_v6 }
 0xa1f   : > { %v3874_v43 = vpop.xlane.xlu0 %3873 }
 0xa20   : > { %v3894_v16 = vsub.f32 %v10490_v19, %v3874_v43  ;;  %3943 = vadd.xlane.f32.xlu0 %v10610_v23  ;;  %7960 = vpow2.f32 %v3919_v49  ;;  %v12160_v49 = vld [vmem:[#allocation48_spill] sm:$0xff] }
 0xa21   : > { %7300 = vmatmul.mubr.msk.bf16.gmra.mxu1 %vm1356_vm0, %v10547_v29  ;;  %v10616_v13 = vpop.eup %7954 }
 0xa22   : > { %v3921_v24 = vmul.f32 1.442695, %v3894_v16  ;;  %7303 = vmatprep.mubr.msk.bf16.mxu1 %vm1356_vm0, %v10552_v60  ;;  %v12161_v16 = vld [vmem:[#allocation86_spill] sm:$0xff] }
 0xa23   : > { %v3876_v34 = vpop.xlane.xlu0 %3875  ;;  %v3031_v31 = vadd.f32 %v10411_v10, %v12161_v16 }
 0xa24   : > { %v3895_v0 = vsub.f32 %v10495_v46, %v3876_v34  ;;  %3945 = vadd.xlane.f32.xlu0 %v10616_v13  ;;  %7962 = vpow2.f32 %v3921_v24 }
 0xa25   : > { %v10622_v19 = vpop.eup %7956 }
 0xa26   : > { %v3923_v30 = vmul.f32 1.442695, %v3895_v0 }
 0xa27   : > { %v3878_v33 = vpop.xlane.xlu0 %3877 }
 0xa28   : > { %7964 = vpow2.f32 %v3923_v30  ;;  %v3896_v8 = vsub.f32 %v10500_v55, %v3878_v33  ;;  %3947 = vadd.xlane.f32.xlu0 %v10622_v19 }
 0xa29   : > { %7304 = vmatmul.mubr.msk.bf16.gmra.mxu1 %vm1356_vm0, %v10557_v9  ;;  %v10628_v60 = vpop.eup %7958 }
 0xa2a   : > { %v3925_v29 = vmul.f32 1.442695, %v3896_v8 }
 0xa2b   : > { %v3880_v27 = vpop.xlane.xlu0 %3879 }
 0xa2c   : > { %7966 = vpow2.f32 %v3925_v29  ;;  %v3897_v46 = vsub.f32 %v10505_v14, %v3880_v27  ;;  %3949 = vadd.xlane.f32.xlu0 %v10628_v60 }
 0xa2d   : > { %v10634_v11 = vpop.eup %7960 }
 0xa2e   : > { %v3927_v53 = vmul.f32 1.442695, %v3897_v46 }
 0xa2f   : > { %v10652_v63 = vpop.permute.xlu0 %4767 }
 0xa30   : > { %7968 = vpow2.f32 %v3927_v53  ;;  %3951 = vadd.xlane.f32.xlu0 %v10634_v11 }
 0xa31   : > { %v10638_v55 = vpop.eup %7962 }
 0xa34   : > { %3953 = vadd.xlane.f32.xlu0 %v10638_v55 }
 0xa35   : > { %v10641_v9 = vpop.eup %7964 }
 0xa36   : > { %3955 = vadd.xlane.f32.xlu1 %v10641_v9 }
 0xa39   : > { %v10644_v14 = vpop.eup %7966 }
 0xa3a   : > { %3957 = vadd.xlane.f32.xlu0 %v10644_v14 }
 0xa3d   : > { %v10647_v44 = vpop.eup %7968 }
 0xa3e   : > { %3959 = vadd.xlane.f32.xlu1 %v10647_v44 }
 0xa4f   : > { %4757 = vrot.lane.b32.xlu1 %v12143_v51, %s8568_s3 }
 0xa60   : > { %v3882_v39 = vpop.xlane.xlu0 %3881 }
 0xa61   : > { %v3898_v1 = vsub.f32 %v10532_v59, %v3882_v39  ;;  %v10666_v59 = vpop.permute.xlu1 %4765 }
 0xa63   : > { %v3929_v47 = vmul.f32 1.442695, %v3898_v1 }
 0xa64   : > { %v10680_v34 = vpop.permute.xlu0 %4761 }
 0xa65   : > { %7970 = vpow2.f32 %v3929_v47  ;;  %v10678_v24 = vpop.permute.xlu1 %4763 }
 0xa72   : > { %v10655_v52 = vpop.eup %7970 }
 0xa73   : > { %3961 = vadd.xlane.f32.xlu0 %v10655_v52 }
 0xa86   : > { %v7241_v37 = vpop.f32.mrf.mxu1 }
 0xa87   : > { %v10662_v62 = vadd.f32 %v7241_v37, %v3036_v26 }
 0xa88   : > { %v4183_v51 = vpop.f32.mrf.mxu1 }
 0xa89   : > { %v10668_v6 = vadd.f32 %v4183_v51, %v3028_v21  ;;  %4759 = vrot.lane.b32.xlu0 %v12160_v49, %s8568_s3 }
 0xa8a   : > { %v7242_v43 = vpop.f32.mrf.mxu1 }
 0xa8b   : > { %v10674_v58 = vadd.f32 %v7242_v43, %v3039_v41  ;;  %v7615_v41 = vld [vmem:[#allocation14 + $0x20] sm:$0xff]  }
 0xa8c   : > { %v4186_v18 = vpop.f32.mrf.mxu1 }
 0xa8d   : > { %v10676_v25 = vadd.f32 %v4186_v18, %v3031_v31  ;;  %v12162_v18 = vld [vmem:[#allocation66_spill] sm:$0xff] }
 0xa93   : > { %v3934_v4 = vpop.xlane.xlu1 %3933 }
 0xa94   : > { %7972 = vrcp.f32 %v3934_v4  ;;  %v3052_v4 = vadd.f32 %v10415_v35, %v12162_v18 }
 0xa95   : > { %v3932_v5 = vpop.xlane.xlu0 %3931 }
 0xa96   : > { %7974 = vrcp.f32 %v3932_v5 }
 0xa99   : > { %v3936_v0 = vpop.xlane.xlu0 %3935 }
 0xa9a   : > { %7976 = vrcp.f32 %v3936_v0 }
 0xa9d   : > { %v3938_v30 = vpop.xlane.xlu0 %3937 }
 0xa9e   : > { %7978 = vrcp.f32 %v3938_v30  ;;  %v12163_v30 = vld [vmem:[#allocation78_spill] sm:$0xff] }
 0xaa1   : > { %v7973_v33 = vpop.eup %7972  ;;  %v3940_v8 = vpop.xlane.xlu0 %3939 }
 0xaa2   : > { %7980 = vrcp.f32 %v3940_v8  ;;  %v3980_v27 = vmul.f32 %v7973_v33, %v10575_v42  ;;  %v3044_v33 = vadd.f32 %v10417_v45, %v12163_v30 }
 0xaa3   : > { %v7975_v10 = vpop.eup %7974 }
 0xaa4   : > { %v3979_v29 = vmul.f32 %v7975_v10, %v10580_v22 }
 0xaa5   : > { %v3942_v46 = vpop.xlane.xlu0 %3941 }
 0xaa6   : > { %7982 = vrcp.f32 %v3942_v46  ;;  %v3995_v53 = vpack.c.bf16 %v3980_v27, %v3979_v29  ;;  %v12164_v29 = vld [vmem:[#allocation87_spill] sm:$0xff] }
 0xaa7   : > { %v7977_v39 = vpop.eup %7976  ;;  %v3055_v27 = vadd.f32 %v10421_v20, %v12164_v29 }
 0xaa8   : > { %7219 = vmatprep.mubr.bf16.mxu0 %v3995_v53  ;;  %v3981_v26 = vmul.f32 %v7977_v39, %v10586_v7 }
 0xaa9   : > { %v3944_v1 = vpop.xlane.xlu0 %3943 }
 0xaaa   : > { %7984 = vrcp.f32 %v3944_v1  ;;  %v12166_v1 = vld [vmem:[#allocation63_spill] sm:$0xff] }
 0xaab   : > { %v7979_v47 = vpop.eup %7978  ;;  %v3047_v45 = vadd.f32 %v10425_v12, %v12166_v1 }
 0xaac   : > { %v3982_v37 = vmul.f32 %v7979_v47, %v10592_v3 }
 0xaad   : > { %v3946_v21 = vpop.xlane.xlu0 %3945 }
 0xaae   : > { %7986 = vrcp.f32 %v3946_v21  ;;  %v3996_v51 = vpack.c.bf16 %v3982_v37, %v3981_v26  ;;  %v12168_v21 = vld [vmem:[#allocation91_spill] sm:$0xff] }
 0xaaf   : > { %v7981_v22 = vpop.eup %7980 }
 0xab0   : > { %7220 = vmatmul.mubr.bf16.vlgmr.msra.gmra.mxu0 %v3996_v51  ;;  %v3983_v43 = vmul.f32 %v7981_v22, %v10598_v57  ;;  %v12170_v22 = vld [vmem:[#allocation67_spill] sm:$0xff] }
 0xab1   : > { %7256 = vmatpush3.bf16.msra.mxu0 %v10632_v28  ;;  %v3948_v42 = vpop.xlane.xlu0 %3947 }
 0xab2   : > { %7257 = vmatprep.subr.bf16.mxu0 %v7615_v41  ;;  %7988 = vrcp.f32 %v3948_v42  ;;  %v3060_v42 = vadd.f32 %v10431_v54, %v12170_v22 }
 0xab3   : > { %v7983_v49 = vpop.eup %7982 }
 0xab4   : > { %v3984_v16 = vmul.f32 %v7983_v49, %v10604_v36 }
 0xab5   : > { %7258 = vmatpush3.bf16.msra.mxu0 %v7615_v41  ;;  %v3950_v7 = vpop.xlane.xlu0 %3949 }
 0xab6   : > { %7307 = vmatprep.subr.bf16.mxu0 %v10652_v63  ;;  %7990 = vrcp.f32 %v3950_v7  ;;  %v3997_v3 = vpack.c.bf16 %v3984_v16, %v3983_v43 }
 0xab7   : > { %v7985_v31 = vpop.eup %7984 }
 0xab8   : > { %7223 = vmatprep.mubr.bf16.mxu0 %v3997_v3  ;;  %v3985_v8 = vmul.f32 %v7985_v31, %v10610_v23  ;;  %v12172_v3 = vld [vmem:[#allocation94_spill] sm:$0xff] }
 0xab9   : > { %v3952_v28 = vpop.xlane.xlu0 %3951  ;;  %v7245_v5 = vpop.f32.mrf.mxu1 }
 0xaba   : > { %v10694_v57 = vadd.f32 %v7245_v5, %v3052_v4  ;;  %7992 = vrcp.f32 %v3952_v28  ;;  %v12174_v28 = vld [vmem:[#allocation70_spill] sm:$0xff] }
 0xabb   : > { %v7987_v0 = vpop.eup %7986  ;;  %v4199_v36 = vpop.f32.mrf.mxu1  ;;  %v3063_v5 = vadd.f32 %v10441_v56, %v12174_v28 }
 0xabc   : > { %v3986_v10 = vmul.f32 %v7987_v0, %v10616_v13  ;;  %v10700_v46 = vadd.f32 %v4199_v36, %v3044_v33  ;;  %v3068_v13 = vadd.f32 %v10427_v2, %v12168_v21  ;;  %v3071_v2 = vadd.f32 %v10436_v17, %v12172_v3  ;;  %v12176_v33 = vld [vmem:[#allocation96_spill] sm:$0xff]  ;;  %v12178_v17 = vld [vmem:[#allocation74_spill] sm:$0xff] }
 0xabd   : > { %v3954_v35 = vpop.xlane.xlu0 %3953  ;;  %v7246_v53 = vpop.f32.mrf.mxu1 }
 0xabe   : > { %12165 = vst [vmem:[#allocation38_spill] sm:$0xff] %v10700_v46  ;;  %7994 = vrcp.f32 %v3954_v35  ;;  %v3998_v39 = vpack.c.bf16 %v3986_v10, %v3985_v8  ;;  %v10704_v47 = vadd.f32 %v7246_v53, %v3055_v27  ;;  %v3076_v10 = vadd.f32 %v10451_v38, %v12178_v17  ;;  %v12180_v53 = vld [vmem:[#allocation77_spill] sm:$0xff] }
 0xabf   : > { %v3956_v26 = vpop.xlane.xlu1 %3955  ;;  %v4202_v37 = vpop.f32.mrf.mxu1 }
 0xac0   : > { %12167 = vst [vmem:[#allocation45_spill] sm:$0xff] %v10704_v47  ;;  %7224 = vmatmul.mubr.bf16.gmra.mxu0 %v3998_v39  ;;  %v7989_v23 = vpop.eup %7988  ;;  %v10708_v51 = vadd.f32 %v4202_v37, %v3047_v45  ;;  %7996 = vrcp.f32 %v3956_v26  ;;  %v3087_v39 = vadd.f32 %v10456_v48, %v12180_v53  ;;  %v12182_v37 = vld [vmem:[#allocation79_spill] sm:$0xff] }
 0xac1   : > { %v7249_v20 = vpop.f32.mrf.mxu1  ;;  %v3987_v16 = vmul.f32 %v7989_v23, %v10622_v19  ;;  %v3084_v19 = vadd.f32 %v10446_v32, %v12176_v33  ;;  %v3079_v23 = vadd.f32 %v10461_v61, %v12182_v37  ;;  %v12189_v47 = vld [vmem:[#allocation71_spill] sm:$0xff] }
 0xac2   : > { %12169 = vst [vmem:[#allocation65_spill] sm:$0xff] %v10708_v51  ;;  %v10712_v49 = vadd.f32 %v7249_v20, %v3068_v13 }
 0xac3   : > { %v7991_v41 = vpop.eup %7990  ;;  %v3958_v12 = vpop.xlane.xlu0 %3957 }
 0xac4   : > { %12171 = vst [vmem:[#allocation61_spill] sm:$0xff] %v10712_v49  ;;  %v4215_v43 = vpop.f32.mrf.mxu1  ;;  %7998 = vrcp.f32 %v3958_v12  ;;  %v3988_v7 = vmul.f32 %v7991_v41, %v10628_v60 }
 0xac5   : > { %v10718_v31 = vadd.f32 %v4215_v43, %v3060_v42 }
 0xac6   : > { %v7250_v18 = vpop.f32.mrf.mxu1  ;;  %v3999_v4 = vpack.c.bf16 %v3988_v7, %v3987_v16 }
 0xac7   : > { %12173 = vst [vmem:[#allocation68_spill] sm:$0xff] %v10718_v31  ;;  %v10722_v54 = vadd.f32 %v7250_v18, %v3071_v2  ;;  %v7993_v30 = vpop.eup %7992  ;;  %v3960_v2 = vpop.xlane.xlu1 %3959 }
 0xac8   : > { %v4218_v0 = vpop.f32.mrf.mxu1  ;;  %7227 = vmatprep.mubr.bf16.mxu0 %v3999_v4  ;;  %v3989_v56 = vmul.f32 %v7993_v30, %v10634_v11  ;;  %8000 = vrcp.f32 %v3960_v2 }
 0xac9   : > { %12175 = vst [vmem:[#allocation80_spill] sm:$0xff] %v10722_v54  ;;  %v10726_v36 = vadd.f32 %v4218_v0, %v3063_v5 }
 0xaca   : > { %v7253_v60 = vpop.f32.mrf.mxu1 }
 0xacb   : > { %12177 = vst [vmem:[#allocation62_spill] sm:$0xff] %v10726_v36  ;;  %v7995_v8 = vpop.eup %7994  ;;  %v10730_v29 = vadd.f32 %v7253_v60, %v3084_v19 }
 0xacc   : > { %v4231_v27 = vpop.f32.mrf.mxu1  ;;  %v3990_v35 = vmul.f32 %v7995_v8, %v10638_v55 }
 0xacd   : > { %12179 = vst [vmem:[#allocation84_spill] sm:$0xff] %v10730_v29  ;;  %v10736_v1 = vadd.f32 %v4231_v27, %v3076_v10  ;;  %v7997_v26 = vpop.eup %7996  ;;  %v10812_v10 = vpop.permute.xlu1 %4757 }
 0xace   : > { %v7254_v32 = vpop.f32.mrf.mxu1  ;;  %v4000_v45 = vpack.c.bf16 %v3990_v35, %v3989_v56  ;;  %v3991_v55 = vmul.f32 %v7997_v26, %v10641_v9 }
 0xacf   : > { %12181 = vst [vmem:[#allocation83_spill] sm:$0xff] %v10736_v1  ;;  %v10740_v21 = vadd.f32 %v7254_v32, %v3087_v39 }
 0xad0   : > { %v4234_v38 = vpop.f32.mrf.mxu1  ;;  %7228 = vmatmul.mubr.bf16.gmra.mxu0 %v4000_v45 }
 0xad1   : > { %12183 = vst [vmem:[#allocation85_spill] sm:$0xff] %v10740_v21  ;;  %v7999_v13 = vpop.eup %7998  ;;  %v10742_v20 = vadd.f32 %v4234_v38, %v3079_v23 }
 0xad2   : > { %v10744_v11 = vpop.f32.mrf.mxu1  ;;  %v3992_v48 = vmul.f32 %v7999_v13, %v10644_v14 }
 0xad3   : > { %12184 = vst [vmem:[#allocation93_spill] sm:$0xff] %v10742_v20  ;;  %4605 = vmax.xlane.f32.xlu0 %v10744_v11 }
 0xad4   : > { %v10749_v41 = vpop.f32.mrf.mxu1  ;;  %v4001_v22 = vpack.c.bf16 %v3992_v48, %v3991_v55 }
 0xad5   : > { %4874 = vxpose.xlu1.b32.start [1/16] %v10749_v41, 128  ;;  %v8001_v30 = vpop.eup %8000 }
 0xad6   : > { %v10752_v61 = vpop.f32.mrf.mxu1  ;;  %7231 = vmatprep.mubr.bf16.mxu0 %v4001_v22  ;;  %v3993_v60 = vmul.f32 %v8001_v30, %v10647_v44 }
 0xad7   : > { %4601 = vmax.xlane.f32.xlu0 %v10749_v41 }
 0xad8   : > { %v10755_v42 = vpop.f32.mrf.mxu1 }
 0xad9   : > { %4875 = vxpose.xlu1.b32.cont [2/16] %v10755_v42, 128 }
 0xada   : > { %v10759_v9 = vpop.f32.mrf.mxu1 }
 0xadb   : > { %4607 = vmax.xlane.f32.xlu0 %v10752_v61 }
 0xadc   : > { %v10763_v14 = vpop.f32.mrf.mxu1 }
 0xadd   : > { %4876 = vxpose.xlu1.b32.cont [3/16] %v10744_v11, 128 }
 0xade   : > { %v10767_v12 = vpop.f32.mrf.mxu1 }
 0xadf   : > { %4603 = vmax.xlane.f32.xlu0 %v10755_v42 }
 0xae0   : > { %v10771_v43 = vpop.f32.mrf.mxu1 }
 0xae1   : > { %4877 = vxpose.xlu1.b32.cont [4/16] %v10752_v61, 128 }
 0xae2   : > { %v10775_v16 = vpop.f32.mrf.mxu1 }
 0xae3   : > { %4613 = vmax.xlane.f32.xlu0 %v10759_v9 }
 0xae4   : > { %v10779_v7 = vpop.f32.mrf.mxu1 }
 0xae5   : > { %4878 = vxpose.xlu1.b32.cont [5/16] %v10763_v14, 128 }
 0xae6   : > { %v10783_v3 = vpop.f32.mrf.mxu1 }
 0xae7   : > { %4609 = vmax.xlane.f32.xlu0 %v10763_v14 }
 0xae8   : > { %v10787_v18 = vpop.f32.mrf.mxu1 }
 0xae9   : > { %4879 = vxpose.xlu1.b32.cont [6/16] %v10771_v43, 128 }
 0xaea   : > { %v10791_v4 = vpop.f32.mrf.mxu1 }
 0xaeb   : > { %4615 = vmax.xlane.f32.xlu0 %v10767_v12 }
 0xaec   : > { %v10795_v5 = vpop.f32.mrf.mxu1 }
 0xaed   : > { %4880 = vxpose.xlu1.b32.cont [7/16] %v10759_v9, 128 }
 0xaee   : > { %v10799_v0 = vpop.f32.mrf.mxu1 }
 0xaef   : > { %4611 = vmax.xlane.f32.xlu0 %v10771_v43 }
 0xaf0   : > { %v10803_v33 = vpop.f32.mrf.mxu1 }
 0xaf1   : > { %4881 = vxpose.xlu1.b32.cont [8/16] %v10767_v12, 128 }
 0xaf3   : > { %4621 = vmax.xlane.f32.xlu0 %v10775_v16 }
 0xaf5   : > { %4882 = vxpose.xlu1.b32.cont [9/16] %v10779_v7, 128 }
 0xaf7   : > { %4617 = vmax.xlane.f32.xlu0 %v10779_v7 }
 0xaf9   : > { %4883 = vxpose.xlu1.b32.cont [10/16] %v10787_v18, 128 }
 0xafb   : > { %4623 = vmax.xlane.f32.xlu0 %v10783_v3 }
 0xafc   : > { %v3962_v28 = vpop.xlane.xlu0 %3961 }
 0xafd   : > { %4884 = vxpose.xlu1.b32.cont [11/16] %v10775_v16, 128  ;;  %8002 = vrcp.f32 %v3962_v28 }
 0xaff   : > { %4619 = vmax.xlane.f32.xlu0 %v10787_v18 }
 0xb00   : > { %v10820_v44 = vpop.permute.xlu0 %4759 }
 0xb01   : > { %4885 = vxpose.xlu1.b32.cont [12/16] %v10783_v3, 128 }
 0xb03   : > { %4629 = vmax.xlane.f32.xlu0 %v10791_v4 }
 0xb05   : > { %4886 = vxpose.xlu1.b32.cont [13/16] %v10795_v5, 128 }
 0xb07   : > { %4625 = vmax.xlane.f32.xlu0 %v10795_v5 }
 0xb09   : > { %4887 = vxpose.xlu1.b32.cont [14/16] %v10803_v33, 128 }
 0xb0a   : > { %v8003_v19 = vpop.eup %8002 }
 0xb0b   : > { %4631 = vmax.xlane.f32.xlu0 %v10799_v0  ;;  %v3994_v8 = vmul.f32 %v8003_v19, %v10655_v52 }
 0xb0d   : > { %4888 = vxpose.xlu1.b32.cont [15/16] %v10791_v4, 128  ;;  %v4002_v17 = vpack.c.bf16 %v3994_v8, %v3993_v60 }
 0xb0f   : > { %4627 = vmax.xlane.f32.xlu0 %v10803_v33  ;;  %7232 = vmatmul.mubr.bf16.gmra.mxu0 %v4002_v17 }
 0xb11   : > { %4889 = vxpose.xlu1.b32.end [16/16] %v10799_v0, 128 }
 0xb51   : > { %v10814_v27 = vpop.trf.xlu1 }
 0xb52   : > { %4906 = vmax.xlane.f32.xlu0 %v10814_v27 }
 0xb55   : > { %v10817_v56 = vpop.trf.xlu1 }
 0xb56   : > { %4908 = vmax.xlane.f32.xlu0 %v10817_v56 }
 0xb59   : > { %v10822_v52 = vpop.trf.xlu1 }
 0xb5a   : > { %4910 = vmax.xlane.f32.xlu0 %v10822_v52 }
 0xb5c   : > { %v4606_v35 = vpop.xlane.xlu0 %4605 }
 0xb5d   : > { %v4635_v53 = vsub.f32 %v10744_v11, %v4606_v35  ;;  %v10826_v39 = vpop.trf.xlu1 }
 0xb5e   : > { %4912 = vmax.xlane.f32.xlu0 %v10826_v39 }
 0xb5f   : > { %v4653_v32 = vmul.f32 1.442695, %v4635_v53 }
 0xb60   : > { %v4602_v45 = vpop.xlane.xlu0 %4601 }
 0xb61   : > { %8004 = vpow2.f32 %v4653_v32  ;;  %v4633_v26 = vsub.f32 %v10749_v41, %v4602_v45  ;;  %v10830_v37 = vpop.trf.xlu1 }
 0xb62   : > { %4914 = vmax.xlane.f32.xlu0 %v10830_v37 }
 0xb63   : > { %v4649_v23 = vmul.f32 1.442695, %v4633_v26 }
 0xb64   : > { %v4608_v38 = vpop.xlane.xlu0 %4607 }
 0xb65   : > { %8006 = vpow2.f32 %v4649_v23  ;;  %v4636_v13 = vsub.f32 %v10752_v61, %v4608_v38  ;;  %v10834_v55 = vpop.trf.xlu1 }
 0xb66   : > { %4916 = vmax.xlane.f32.xlu0 %v10834_v55 }
 0xb67   : > { %v4655_v11 = vmul.f32 1.442695, %v4636_v13 }
 0xb68   : > { %v4604_v48 = vpop.xlane.xlu0 %4603 }
 0xb69   : > { %8008 = vpow2.f32 %v4655_v11  ;;  %v4634_v22 = vsub.f32 %v10755_v42, %v4604_v48  ;;  %v10838_v2 = vpop.trf.xlu1 }
 0xb6a   : > { %4918 = vmax.xlane.f32.xlu0 %v10838_v2 }
 0xb6b   : > { %v4651_v41 = vmul.f32 1.442695, %v4634_v22 }
 0xb6c   : > { %v4614_v28 = vpop.xlane.xlu0 %4613 }
 0xb6d   : > { %8010 = vpow2.f32 %v4651_v41  ;;  %v4639_v30 = vsub.f32 %v10759_v9, %v4614_v28  ;;  %v10842_v19 = vpop.trf.xlu1 }
 0xb6e   : > { %v10844_v61 = vpop.eup %8004  ;;  %4920 = vmax.xlane.f32.xlu0 %v10842_v19 }
 0xb6f   : > { %v4661_v60 = vmul.f32 1.442695, %v4639_v30  ;;  %4685 = vadd.xlane.f32.xlu1 %v10844_v61 }
 0xb70   : > { %v4610_v8 = vpop.xlane.xlu0 %4609  ;;  %v7221_v42 = vpop.f32.mrf.mxu0 }
 0xb71   : > { %8012 = vpow2.f32 %v4661_v60  ;;  %v4637_v17 = vsub.f32 %v10763_v14, %v4610_v8  ;;  %v10851_v32 = vpop.trf.xlu1 }
 0xb72   : > { %v10849_v35 = vpop.eup %8006  ;;  %v4037_v53 = vpop.f32.mrf.mxu0 }
 0xb73   : > { %v4657_v9 = vmul.f32 1.442695, %v4637_v17  ;;  %4681 = vadd.xlane.f32.xlu0 %v10849_v35 }
 0xb74   : > { %v4616_v45 = vpop.xlane.xlu0 %4615  ;;  %v7222_v26 = vpop.f32.mrf.mxu0 }
 0xb75   : > { %8014 = vpow2.f32 %v4657_v9  ;;  %v4640_v23 = vsub.f32 %v10767_v12, %v4616_v45  ;;  %v4263_v48 = vpack.c.bf16 %v7222_v26, %v7221_v42  ;;  %v10859_v41 = vpop.trf.xlu1 }
 0xb76   : > { %v10855_v38 = vpop.eup %8008  ;;  %v4040_v13 = vpop.f32.mrf.mxu0 }
 0xb77   : > { %v4262_v11 = vpack.c.bf16 %v4040_v13, %v4037_v53  ;;  %4922 = vmax.xlane.f32.xlu0 %v10851_v32  ;;  %4687 = vadd.xlane.f32.xlu1 %v10855_v38  ;;  %v4663_v14 = vmul.f32 1.442695, %v4640_v23 }
 0xb78   : > { %v4612_v22 = vpop.xlane.xlu0 %4611 }
 0xb79   : > { %v4638_v28 = vsub.f32 %v10771_v43, %v4612_v22  ;;  %7259 = vmatprep.mubr.msk.bf16.mxu0 %vm1356_vm0, %v4262_v11  ;;  %8016 = vpow2.f32 %v4663_v14  ;;  %v10882_v26 = vpop.trf.xlu1 }
 0xb7a   : > { %v10863_v30 = vpop.eup %8010  ;;  %7260 = vmatmul.mubr.msk.bf16.vlgmr.msra.gmra.mxu0 %vm1356_vm0, %v4263_v48 }
 0xb7b   : > { %v4659_v12 = vmul.f32 1.442695, %v4638_v28  ;;  %7308 = vmatpush3.bf16.msra.mxu0 %v10652_v63  ;;  %4924 = vmax.xlane.f32.xlu0 %v10859_v41 }
 0xb7c   : > { %4683 = vadd.xlane.f32.xlu1 %v10863_v30  ;;  %7309 = vmatprep.subr.bf16.mxu0 %v10666_v59  ;;  %v10870_v60 = vpop.xlane.xlu0 %4621 }
 0xb7d   : > { %8018 = vpow2.f32 %v4659_v12  ;;  %v10894_v12 = vpop.trf.xlu1 }
 0xb7e   : > { %v10872_v43 = vpop.eup %8012 }
 0xb7f   : > { %7310 = vmatpush3.bf16.msra.mxu0 %v10666_v59  ;;  %4693 = vadd.xlane.f32.xlu0 %v10872_v43 }
 0xb80   : > { %7311 = vmatprep.subr.bf16.mxu0 %v10678_v24  ;;  %v4618_v8 = vpop.xlane.xlu0 %4617  ;;  %v7225_v42 = vpop.f32.mrf.mxu0 }
 0xb81   : > { %v4641_v17 = vsub.f32 %v10779_v7, %v4618_v8 }
 0xb82   : > { %v10878_v53 = vpop.eup %8014  ;;  %v4053_v9 = vpop.f32.mrf.mxu0 }
 0xb83   : > { %v4665_v45 = vmul.f32 1.442695, %v4641_v17  ;;  %7312 = vmatpush3.bf16.msra.mxu0 %v10678_v24  ;;  %4689 = vadd.xlane.f32.xlu0 %v10878_v53 }
 0xb84   : > { %7313 = vmatprep.subr.bf16.mxu0 %v10680_v34  ;;  %v4624_v23 = vpop.xlane.xlu0 %4623  ;;  %v7226_v13 = vpop.f32.mrf.mxu0 }
 0xb85   : > { %8020 = vpow2.f32 %v4665_v45  ;;  %v4265_v7 = vpack.c.bf16 %v7226_v13, %v7225_v42  ;;  %v10900_v42 = vpop.trf.xlu1 }
 0xb86   : > { %v4056_v11 = vpop.f32.mrf.mxu0  ;;  %v10888_v22 = vpop.eup %8016 }
 0xb87   : > { %v4264_v14 = vpack.c.bf16 %v4056_v11, %v4053_v9  ;;  %7314 = vmatpush3.bf16.msra.mxu0 %v10680_v34  ;;  %4926 = vmax.xlane.f32.xlu0 %v10882_v26 }
 0xb88   : > { %7315 = vmatprep.subr.bf16.mxu0 %v10820_v44  ;;  %v4620_v48 = vpop.xlane.xlu0 %4619 }
 0xb89   : > { %7263 = vmatprep.mubr.msk.bf16.mxu0 %vm1356_vm0, %v4264_v14 }
 0xb8a   : > { %v10891_v28 = vpop.eup %8018  ;;  %7264 = vmatmul.mubr.msk.bf16.gmra.mxu0 %vm1356_vm0, %v4265_v7  ;;  %v10908_v7 = vpop.trf.xlu1 }
 0xb8b   : > { %7316 = vmatpush3.bf16.msra.mxu0 %v10820_v44  ;;  %4695 = vadd.xlane.f32.xlu0 %v10888_v22 }
 0xb8c   : > { %4691 = vadd.xlane.f32.xlu1 %v10891_v28  ;;  %7317 = vmatprep.subr.bf16.mxu0 %v10812_v10  ;;  %v4630_v8 = vpop.xlane.xlu0 %4629 }
 0xb8d   : > { %v4647_v20 = vsub.f32 %v10791_v4, %v4630_v8 }
 0xb8f   : > { %7318 = vmatpush3.bf16.msra.mxu0 %v10812_v10  ;;  %v4677_v31 = vmul.f32 1.442695, %v4647_v20  ;;  %v12185_v20 = vld [vmem:[#allocation54_spill] sm:$0xff] }
 0xb90   : > { %4928 = vmax.xlane.f32.xlu1 %v10894_v12  ;;  %v4626_v17 = vpop.xlane.xlu0 %4625  ;;  %v7229_v9 = vpop.f32.mrf.mxu0 }
 0xb91   : > { %v4645_v45 = vsub.f32 %v10795_v5, %v4626_v17  ;;  %v10915_v17 = vpop.trf.xlu1 }
 0xb92   : > { %v10905_v13 = vpop.eup %8020  ;;  %v4069_v11 = vpop.f32.mrf.mxu0 }
 0xb93   : > { %4697 = vadd.xlane.f32.xlu0 %v10905_v13  ;;  %v4673_v21 = vmul.f32 1.442695, %v4645_v45 }
 0xb94   : > { %v7230_v14 = vpop.f32.mrf.mxu0  ;;  %v4632_v1 = vpop.xlane.xlu0 %4631 }
 0xb95   : > { %v4267_v54 = vpack.c.bf16 %v7230_v14, %v7229_v9  ;;  %8022 = vpow2.f32 %v4673_v21  ;;  %v4648_v5 = vsub.f32 %v10799_v0, %v4632_v1  ;;  %v4644_v0 = vsub.f32 %v10783_v3, %v4624_v23 }
 0xb96   : > { %v4072_v29 = vpop.f32.mrf.mxu0  ;;  %8024 = vpow2.f32 %v4677_v31  ;;  %v4642_v9 = vsub.f32 %v10787_v18, %v4620_v48 }
 0xb97   : > { %v4266_v36 = vpack.c.bf16 %v4072_v29, %v4069_v11  ;;  %4930 = vmax.xlane.f32.xlu0 %v10900_v42  ;;  %v4679_v4 = vmul.f32 1.442695, %v4648_v5  ;;  %v10919_v29 = vpop.trf.xlu1  ;;  %v4671_v8 = vmul.f32 1.442695, %v4644_v0 }
 0xb98   : > { %v4628_v45 = vpop.xlane.xlu0 %4627  ;;  %v4667_v11 = vmul.f32 1.442695, %v4642_v9 }
 0xb99   : > { %7267 = vmatprep.mubr.msk.bf16.mxu0 %vm1356_vm0, %v4266_v36  ;;  %8026 = vpow2.f32 %v4679_v4  ;;  %v4643_v36 = vsub.f32 %v10775_v16, %v10870_v60  ;;  %v4646_v14 = vsub.f32 %v10803_v33, %v4628_v45  ;;  %v12186_v16 = vld [vmem:[#allocation55_spill] sm:$0xff] }
 0xb9a   : > { %7268 = vmatmul.mubr.msk.bf16.gmra.mxu0 %vm1356_vm0, %v4267_v54 }
 0xb9b   : > { %4932 = vmax.xlane.f32.xlu0 %v10908_v7  ;;  %v4669_v21 = vmul.f32 1.442695, %v4643_v36  ;;  %v4675_v5 = vmul.f32 1.442695, %v4646_v14 }
 0xb9d   : > { %8028 = vpow2.f32 %v4669_v21 }
 0xb9e   : > { %8030 = vpow2.f32 %v4671_v8 }
 0xb9f   : > { %4934 = vmax.xlane.f32.xlu0 %v10915_v17  ;;  %8032 = vpow2.f32 %v4667_v11 }
 0xba0   : > { %8034 = vpow2.f32 %v4675_v5 }
 0xba1   : > { %4755 = vrot.lane.b32.xlu1 %v12185_v20, %s8568_s3 }
 0xba2   : > { %v10924_v1 = vpop.eup %8022 }
 0xba3   : > { %4936 = vmax.xlane.f32.xlu0 %v10919_v29  ;;  %v10927_v54 = vpop.eup %8024 }
 0xba6   : > { %v10930_v31 = vpop.eup %8026 }
 0xba7   : > { %4705 = vadd.xlane.f32.xlu0 %v10924_v1 }
 0xbaa   : > { %v10938_v4 = vpop.eup %8028 }
 0xbab   : > { %4709 = vadd.xlane.f32.xlu0 %v10927_v54  ;;  %v10943_v3 = vpop.eup %8030 }
 0xbac   : > { %v10946_v18 = vpop.eup %8032 }
 0xbad   : > { %v10949_v33 = vpop.eup %8034 }
 0xbaf   : > { %4711 = vadd.xlane.f32.xlu0 %v10930_v31 }
 0xbc5   : > { %4701 = vadd.xlane.f32.xlu1 %v10938_v4  ;;  %4753 = vrot.lane.b32.xlu0 %v12186_v16, %s8568_s3  ;;  %s12231_s3 = sld [smem:[#allocation109_spill]] }
 0xbc9   : > { %4703 = vadd.xlane.f32.xlu1 %v10943_v3 }
 0xbcb   : > { %s11610_s9 = scalar_lea.hbm %s12231_s3, %s6449_s5 }
 0xbcd   : > { %4699 = vadd.xlane.f32.xlu1 %v10946_v18 }
 0xbcf   : > { %v7233_v60 = vpop.f32.mrf.mxu0 }
 0xbd1   : > { %4707 = vadd.xlane.f32.xlu1 %v10949_v33  ;;  %v4085_v23 = vpop.f32.mrf.mxu0 }
 0xbd3   : > { %v7234_v48 = vpop.f32.mrf.mxu0 }
 0xbd4   : > { %v4269_v21 = vpack.c.bf16 %v7234_v48, %v7233_v60 }
 0xbd5   : > { %v4088_v20 = vpop.f32.mrf.mxu0 }
 0xbd6   : > { %v4268_v36 = vpack.c.bf16 %v4088_v20, %v4085_v23 }
 0xbd8   : > { %7271 = vmatprep.mubr.msk.bf16.mxu0 %vm1356_vm0, %v4268_v36 }
 0xbd9   : > { %7272 = vmatmul.mubr.msk.bf16.gmra.mxu0 %vm1356_vm0, %v4269_v21 }
 0xbdb   : > { %v4907_v0 = vpop.xlane.xlu0 %4906 }
 0xbdc   : > { %v4938_v8 = vsub.f32 %v10814_v27, %v4907_v0 }
 0xbde   : > { %v4954_v9 = vmul.f32 1.442695, %v4938_v8 }
 0xbdf   : > { %v4909_v45 = vpop.xlane.xlu0 %4908 }
 0xbe0   : > { %8036 = vpow2.f32 %v4954_v9  ;;  %v4939_v11 = vsub.f32 %v10817_v56, %v4909_v45 }
 0xbe2   : > { %v4956_v14 = vmul.f32 1.442695, %v4939_v11 }
 0xbe3   : > { %v4911_v5 = vpop.xlane.xlu0 %4910 }
 0xbe4   : > { %8038 = vpow2.f32 %v4956_v14  ;;  %v4940_v16 = vsub.f32 %v10822_v52, %v4911_v5 }
 0xbe6   : > { %v4958_v49 = vmul.f32 1.442695, %v4940_v16 }
 0xbe7   : > { %v4913_v23 = vpop.xlane.xlu0 %4912 }
 0xbe8   : > { %8040 = vpow2.f32 %v4958_v49  ;;  %v4941_v60 = vsub.f32 %v10826_v39, %v4913_v23 }
 0xbea   : > { %v4960_v48 = vmul.f32 1.442695, %v4941_v60 }
 0xbeb   : > { %v4915_v20 = vpop.xlane.xlu0 %4914 }
 0xbec   : > { %8042 = vpow2.f32 %v4960_v48  ;;  %v4942_v27 = vsub.f32 %v10830_v37, %v4915_v20 }
 0xbed   : > { %v10959_v36 = vpop.eup %8036 }
 0xbee   : > { %v4962_v21 = vmul.f32 1.442695, %v4942_v27  ;;  %4986 = vadd.xlane.f32.xlu0 %v10959_v36 }
 0xbef   : > { %v4917_v56 = vpop.xlane.xlu0 %4916 }
 0xbf0   : > { %8044 = vpow2.f32 %v4962_v21  ;;  %v4943_v0 = vsub.f32 %v10834_v55, %v4917_v56 }
 0xbf1   : > { %v10963_v52 = vpop.eup %8038 }
 0xbf2   : > { %v4964_v8 = vmul.f32 1.442695, %v4943_v0  ;;  %4988 = vadd.xlane.f32.xlu1 %v10963_v52 }
 0xbf3   : > { %v4919_v49 = vpop.xlane.xlu0 %4918 }
 0xbf4   : > { %8046 = vpow2.f32 %v4964_v8  ;;  %v4944_v39 = vsub.f32 %v10838_v2, %v4919_v49 }
 0xbf5   : > { %v10967_v9 = vpop.eup %8040 }
 0xbf6   : > { %v4966_v37 = vmul.f32 1.442695, %v4944_v39  ;;  %4990 = vadd.xlane.f32.xlu1 %v10967_v9 }
 0xbf7   : > { %v4921_v45 = vpop.xlane.xlu0 %4920 }
 0xbf8   : > { %8048 = vpow2.f32 %v4966_v37  ;;  %v4945_v11 = vsub.f32 %v10842_v19, %v4921_v45  ;;  %v4686_v5 = vpop.xlane.xlu1 %4685 }
 0xbf9   : > { %v10971_v14 = vpop.eup %8042 }
 0xbfa   : > { %v4968_v55 = vmul.f32 1.442695, %v4945_v11  ;;  %4992 = vadd.xlane.f32.xlu1 %v10971_v14 }
 0xbfc   : > { %8050 = vpow2.f32 %v4968_v55  ;;  %v4682_v16 = vpop.xlane.xlu0 %4681 }
 0xbfd   : > { %v10974_v23 = vpop.eup %8044  ;;  %8052 = vrcp.f32 %v4682_v16 }
 0xbfe   : > { %4994 = vadd.xlane.f32.xlu1 %v10974_v23 }
 0xc00   : > { %v4688_v2 = vpop.xlane.xlu1 %4687  ;;  %v4923_v60 = vpop.xlane.xlu0 %4922 }
 0xc01   : > { %v10977_v48 = vpop.eup %8046  ;;  %v4946_v20 = vsub.f32 %v10851_v32, %v4923_v60 }
 0xc02   : > { %4996 = vadd.xlane.f32.xlu1 %v10977_v48 }
 0xc03   : > { %v4970_v19 = vmul.f32 1.442695, %v4946_v20 }
 0xc04   : > { %v4925_v27 = vpop.xlane.xlu0 %4924 }
 0xc05   : > { %v10981_v21 = vpop.eup %8048  ;;  %8054 = vpow2.f32 %v4970_v19  ;;  %v4684_v56 = vpop.xlane.xlu1 %4683  ;;  %v4947_v0 = vsub.f32 %v10859_v41, %v4925_v27 }
 0xc06   : > { %8056 = vrcp.f32 %v4684_v56  ;;  %4998 = vadd.xlane.f32.xlu1 %v10981_v21 }
 0xc07   : > { %v4972_v8 = vmul.f32 1.442695, %v4947_v0 }
 0xc08   : > { %v4694_v49 = vpop.xlane.xlu0 %4693 }
 0xc09   : > { %v10985_v39 = vpop.eup %8050  ;;  %8058 = vpow2.f32 %v4972_v8 }
 0xc0a   : > { %5000 = vadd.xlane.f32.xlu1 %v10985_v39  ;;  %v8053_v45 = vpop.eup %8052 }
 0xc0b   : > { %v4729_v41 = vmul.f32 %v8053_v45, %v10849_v35 }
 0xc0c   : > { %v4690_v32 = vpop.xlane.xlu0 %4689 }
 0xc10   : > { %v4927_v37 = vpop.xlane.xlu0 %4926 }
 0xc11   : > { %v4948_v11 = vsub.f32 %v10882_v26, %v4927_v37 }
 0xc12   : > { %v10989_v55 = vpop.eup %8054 }
 0xc13   : > { %v8057_v16 = vpop.eup %8056  ;;  %v4974_v60 = vmul.f32 1.442695, %v4948_v11  ;;  %5002 = vadd.xlane.f32.xlu0 %v10989_v55 }
 0xc14   : > { %v4730_v20 = vmul.f32 %v8057_v16, %v10863_v30  ;;  %v4696_v0 = vpop.xlane.xlu0 %4695 }
 0xc15   : > { %8060 = vpow2.f32 %v4974_v60  ;;  %v4692_v19 = vpop.xlane.xlu1 %4691 }
 0xc16   : > { %v10994_v27 = vpop.eup %8058  ;;  %v4745_v56 = vpack.c.bf16 %v4730_v20, %v4729_v41 }
 0xc17   : > { %5004 = vadd.xlane.f32.xlu1 %v10994_v27 }
 0xc18   : > { %7323 = vmatprep.mubr.bf16.mxu0 %v4745_v56 }
 0xc19   : > { %v4929_v26 = vpop.xlane.xlu1 %4928 }
 0xc1a   : > { %v4949_v8 = vsub.f32 %v10894_v12, %v4929_v26 }
 0xc1c   : > { %v4976_v37 = vmul.f32 1.442695, %v4949_v8  ;;  %v10998_v11 = vpop.xlane.xlu0 %4697 }
 0xc1d   : > { %v11000_v51 = vpop.permute.xlu1 %4755 }
 0xc1e   : > { %8062 = vpow2.f32 %v4976_v37  ;;  %7319 = vmatprep.subr.bf16.mxu0 %v11000_v51 }
 0xc1f   : > { %7320 = vmatpush3.bf16.msra.mxu0 %v11000_v51 }
 0xc20   : > { %v4931_v35 = vpop.xlane.xlu0 %4930 }
 0xc21   : > { %v4950_v30 = vsub.f32 %v10900_v42, %v4931_v35 }
 0xc22   : > { %v11005_v45 = vpop.eup %8060 }
 0xc23   : > { %v4978_v16 = vmul.f32 1.442695, %v4950_v30  ;;  %5006 = vadd.xlane.f32.xlu0 %v11005_v45 }
 0xc24   : > { %v4933_v60 = vpop.xlane.xlu0 %4932 }
 0xc25   : > { %8064 = vpow2.f32 %v4978_v16  ;;  %v4951_v12 = vsub.f32 %v10908_v7, %v4933_v60  ;;  %v12187_v16 = vld [vmem:[#allocation82_spill] sm:$0xff] }
 0xc26   : > { %v3315_v60 = vadd.f32 %v10465_v40, %v12187_v16  ;;  %v3318_v40 = vadd.f32 %v10475_v50, %v12189_v47 }
 0xc27   : > { %v4980_v41 = vmul.f32 1.442695, %v4951_v12 }
 0xc28   : > { %v4935_v20 = vpop.xlane.xlu0 %4934 }
 0xc29   : > { %8066 = vpow2.f32 %v4980_v41  ;;  %v4952_v56 = vsub.f32 %v10915_v17, %v4935_v20  ;;  %v12188_v20 = vld [vmem:[#allocation89_spill] sm:$0xff] }
 0xc2a   : > { %8068 = vrcp.f32 %v4686_v5 }
 0xc2b   : > { %v11010_v26 = vpop.eup %8062  ;;  %8070 = vrcp.f32 %v4688_v2  ;;  %v4982_v8 = vmul.f32 1.442695, %v4952_v56  ;;  %v3307_v56 = vadd.f32 %v10470_v15, %v12188_v20 }
 0xc2c   : > { %8072 = vrcp.f32 %v4692_v19  ;;  %5008 = vadd.xlane.f32.xlu1 %v11010_v26  ;;  %v4937_v42 = vpop.xlane.xlu0 %4936 }
 0xc2d   : > { %8074 = vpow2.f32 %v4982_v8  ;;  %v4953_v37 = vsub.f32 %v10919_v29, %v4937_v42 }
 0xc2e   : > { %8076 = vrcp.f32 %v4690_v32 }
 0xc2f   : > { %v4984_v35 = vmul.f32 1.442695, %v4953_v37 }
 0xc30   : > { %v11014_v7 = vpop.xlane.xlu0 %4705 }
 0xc31   : > { %8078 = vpow2.f32 %v4984_v35 }
 0xc32   : > { %v11016_v30 = vpop.eup %8064  ;;  %8080 = vrcp.f32 %v4696_v0 }
 0xc33   : > { %5010 = vadd.xlane.f32.xlu0 %v11016_v30  ;;  %8082 = vrcp.f32 %v4694_v49 }
 0xc34   : > { %v11019_v17 = vpop.xlane.xlu0 %4709 }
 0xc36   : > { %v11021_v5 = vpop.eup %8066 }
 0xc37   : > { %v8069_v2 = vpop.eup %8068  ;;  %5012 = vadd.xlane.f32.xlu1 %v11021_v5 }
 0xc38   : > { %v8071_v19 = vpop.eup %8070  ;;  %v11024_v29 = vpop.xlane.xlu0 %4711  ;;  %v4731_v16 = vmul.f32 %v8069_v2, %v10844_v61 }
 0xc39   : > { %v8073_v32 = vpop.eup %8072  ;;  %v4732_v49 = vmul.f32 %v8071_v19, %v10855_v38 }
 0xc3a   : > { %v11028_v12 = vpop.eup %8074  ;;  %v7261_v0 = vpop.f32.mrf.mxu0  ;;  %v4734_v35 = vmul.f32 %v8073_v32, %v10891_v28 }
 0xc3b   : > { %v8077_v41 = vpop.eup %8076  ;;  %v11033_v8 = vadd.f32 %v7261_v0, %v3315_v60  ;;  %5014 = vadd.xlane.f32.xlu0 %v11028_v12  ;;  %v12190_v60 = vld [vmem:[#allocation81_spill] sm:$0xff]  ;;  %v4746_v50 = vpack.c.bf16 %v4732_v49, %v4731_v16 }
 0xc3c   : > { %v11036_v42 = vpop.permute.xlu0 %4753  ;;  %v4345_v37 = vpop.f32.mrf.mxu0  ;;  %v4733_v19 = vmul.f32 %v8077_v41, %v10878_v53  ;;  %v12191_v0 = vld [vmem:[#allocation41_spill] sm:$0xff] }
 0xc3d   : > { %v11042_v46 = vadd.f32 %v4345_v37, %v3307_v56  ;;  %7321 = vmatprep.subr.bf16.mxu0 %v11036_v42  ;;  %v3310_v20 = vadd.f32 %v12191_v0, %v12190_v60  ;;  %v12192_v37 = vld [vmem:[#allocation88_spill] sm:$0xff] }
 0xc3e   : > { %v11045_v15 = vpop.eup %8078  ;;  %7322 = vmatpush3.bf16.msra.mxu0 %v11036_v42  ;;  %v7262_v38 = vpop.f32.mrf.mxu0  ;;  %v4747_v2 = vpack.c.bf16 %v4734_v35, %v4733_v19  ;;  %v12193_v35 = vld [vmem:[#allocation35_spill] sm:$0xff] }
 0xc3f   : > { %v11051_v28 = vadd.f32 %v7262_v38, %v3318_v40  ;;  %5016 = vadd.xlane.f32.xlu1 %v11045_v15  ;;  %7339 = vmatprep.subr.bf16.mxu0 %v10652_v63  ;;  %v8081_v47 = vpop.eup %8080  ;;  %v3331_v40 = vadd.f32 %v12193_v35, %v12192_v37  ;;  %v12194_v38 = vld [vmem:[#allocation69_spill] sm:$0xff]  ;;  %v12200_v37 = vld [vmem:[#allocation92_spill] sm:$0xff] }
 0xc40   : > { %v4348_v61 = vpop.f32.mrf.mxu0  ;;  %v8083_v56 = vpop.eup %8082  ;;  %v4736_v53 = vmul.f32 %v8081_v47, %v10888_v22  ;;  %v12196_v22 = vld [vmem:[#allocation90_spill] sm:$0xff]  ;;  %v12201_v35 = vld [vmem:[#allocation33_spill] sm:$0xff] }
 0xc41   : > { %v11055_v32 = vadd.f32 %v4348_v61, %v3310_v20  ;;  %7324 = vmatmul.mubr.bf16.vlgmr.msra.gmra.mxu0 %v4746_v50  ;;  %v4735_v41 = vmul.f32 %v8083_v56, %v10872_v43  ;;  %v12198_v61 = vld [vmem:[#allocation73_spill] sm:$0xff] }
 0xc42   : > { %7327 = vmatprep.mubr.bf16.mxu0 %v4747_v2  ;;  %7340 = vmatpush3.bf16.msra.mxu0 %v10652_v63  ;;  %v12195_v63 = vld [vmem:[#allocation39_spill] sm:$0xff] }
 0xc43   : > { %7341 = vmatprep.subr.bf16.mxu0 %v10666_v59  ;;  %v4748_v49 = vpack.c.bf16 %v4736_v53, %v4735_v41  ;;  %v3323_v19 = vadd.f32 %v12195_v63, %v12194_v38  ;;  %v12202_v38 = vld [vmem:[#allocation75_spill] sm:$0xff] }
 0xc44   : > { %v12203_v63 = vld [vmem:[#allocation43_spill] sm:$0xff] }
 0xc46   : > { %7342 = vmatpush3.bf16.msra.mxu0 %v10666_v59  ;;  %v12197_v59 = vld [vmem:[#allocation37_spill] sm:$0xff] }
 0xc47   : > { %7343 = vmatprep.subr.bf16.mxu0 %v10678_v24  ;;  %v3334_v0 = vadd.f32 %v12197_v59, %v12196_v22  ;;  %v12205_v22 = vld [vmem:[#allocation34_spill] sm:$0xff] }
 0xc49   : > { %7328 = vmatmul.mubr.bf16.gmra.mxu0 %v4748_v49 }
 0xc4a   : > { %7344 = vmatpush3.bf16.msra.mxu0 %v10678_v24  ;;  %v7265_v16 = vpop.f32.mrf.mxu0  ;;  %v12199_v24 = vld [vmem:[#allocation42_spill] sm:$0xff] }
 0xc4b   : > { %v11068_v60 = vadd.f32 %v7265_v16, %v3331_v40  ;;  %7345 = vmatprep.subr.bf16.mxu0 %v10680_v34  ;;  %v3326_v2 = vadd.f32 %v12199_v24, %v12198_v61  ;;  %v3347_v40 = vadd.f32 %v12201_v35, %v12200_v37 }
 0xc4c   : > { %v4361_v43 = vpop.f32.mrf.mxu0 }
 0xc4d   : > { %v11073_v20 = vadd.f32 %v4361_v43, %v3323_v19  ;;  %v3339_v19 = vadd.f32 %v12203_v63, %v12202_v38  ;;  %v12204_v43 = vld [vmem:[#allocation60_spill] sm:$0xff] }
 0xc4e   : > { %v4702_v50 = vpop.xlane.xlu1 %4701  ;;  %7346 = vmatpush3.bf16.msra.mxu0 %v10680_v34  ;;  %v7266_v47 = vpop.f32.mrf.mxu0  ;;  %v3350_v59 = vadd.f32 %v12205_v22, %v12204_v43 }
 0xc4f   : > { %v11078_v56 = vadd.f32 %v7266_v47, %v3334_v0  ;;  %7347 = vmatprep.subr.bf16.mxu0 %v10820_v44 }
 0xc50   : > { %v4364_v53 = vpop.f32.mrf.mxu0 }
 0xc51   : > { %v11081_v41 = vadd.f32 %v4364_v53, %v3326_v2 }
 0xc52   : > { %v4704_v49 = vpop.xlane.xlu1 %4703  ;;  %7348 = vmatpush3.bf16.msra.mxu0 %v10820_v44 }
 0xc53   : > { %7349 = vmatprep.subr.bf16.mxu0 %v10812_v10  ;;  %8084 = vrcp.f32 %v4704_v49 }
 0xc54   : > { %8086 = vrcp.f32 %v10998_v11 }
 0xc55   : > { %8088 = vrcp.f32 %v4702_v50  ;;  %v12207_v50 = vld [vmem:[#allocation44_spill] sm:$0xff] }
 0xc56   : > { %v4700_v34 = vpop.xlane.xlu1 %4699  ;;  %7350 = vmatpush3.bf16.msra.mxu0 %v10812_v10 }
 0xc57   : > { %8090 = vrcp.f32 %v4700_v34  ;;  %7351 = vmatprep.subr.bf16.mxu0 %v11000_v51 }
 0xc58   : > { %8092 = vrcp.f32 %v11014_v7  ;;  %v12206_v7 = vld [vmem:[#allocation59_spill] sm:$0xff] }
 0xc59   : > { %v3342_v47 = vadd.f32 %v12207_v50, %v12206_v7 }
 0xc5a   : > { %v4708_v16 = vpop.xlane.xlu1 %4707  ;;  %7352 = vmatpush3.bf16.msra.mxu0 %v11000_v51  ;;  %v7269_v44 = vpop.f32.mrf.mxu0 }
 0xc5b   : > { %8094 = vrcp.f32 %v4708_v16  ;;  %v11094_v11 = vadd.f32 %v7269_v44, %v3347_v40  ;;  %7353 = vmatprep.subr.bf16.mxu0 %v11036_v42 }
 0xc5c   : > { %8096 = vrcp.f32 %v11024_v29  ;;  %v4377_v10 = vpop.f32.mrf.mxu0 }
 0xc5d   : > { %v11100_v0 = vadd.f32 %v4377_v10, %v3339_v19  ;;  %8098 = vrcp.f32 %v11019_v17 }
 0xc5e   : > { %7354 = vmatpush3.bf16.msra.mxu0 %v11036_v42  ;;  %v7270_v51 = vpop.f32.mrf.mxu0 }
 0xc5f   : > { %v11106_v61 = vadd.f32 %v7270_v51, %v3350_v59 }
 0xc60   : > { %v4380_v24 = vpop.f32.mrf.mxu0  ;;  %v8085_v2 = vpop.eup %8084 }
 0xc61   : > { %v11108_v53 = vadd.f32 %v4380_v24, %v3342_v47  ;;  %v8087_v29 = vpop.eup %8086  ;;  %v4740_v37 = vmul.f32 %v8085_v2, %v10943_v3  ;;  %v7617_v47 = vld [vmem:[#allocation13 + $0x30] sm:$0xff]  }
 0xc62   : > { %v8089_v49 = vpop.eup %8088  ;;  %v4737_v35 = vmul.f32 %v8087_v29, %v10905_v13 }
 0xc63   : > { %v4739_v40 = vmul.f32 %v8089_v49, %v10938_v4 }
 0xc64   : > { %v8091_v34 = vpop.eup %8090 }
 0xc65   : > { %v4738_v17 = vmul.f32 %v8091_v34, %v10946_v18  ;;  %v8093_v42 = vpop.eup %8092  ;;  %v4750_v38 = vpack.c.bf16 %v4740_v37, %v4739_v40 }
 0xc66   : > { %v4741_v19 = vmul.f32 %v8093_v42, %v10924_v1  ;;  %v7616_v1 = vld [vmem:[#allocation13 + $0x38] sm:$0xff]  }
 0xc67   : > { %v4749_v16 = vpack.c.bf16 %v4738_v17, %v4737_v35  ;;  %7371 = vmatprep.subr.bf16.mxu1 %v7616_v1 }
 0xc68   : > { %v8095_v44 = vpop.eup %8094  ;;  %7372 = vmatpush3.bf16.msra.mxu1 %v7616_v1 }
 0xc69   : > { %v8097_v63 = vpop.eup %8096  ;;  %7331 = vmatprep.mubr.bf16.mxu0 %v4749_v16  ;;  %v4742_v10 = vmul.f32 %v8095_v44, %v10949_v33  ;;  %7373 = vmatprep.subr.bf16.mxu1 %v7617_v47  ;;  %v12208_v16 = vld [vmem:[#allocation58_spill] sm:$0xff] }
 0xc6a   : > { %7332 = vmatmul.mubr.bf16.gmra.mxu0 %v4750_v38  ;;  %v8099_v43 = vpop.eup %8098  ;;  %v4744_v3 = vmul.f32 %v8097_v63, %v10930_v31 }
 0xc6b   : > { %v4751_v22 = vpack.c.bf16 %v4742_v10, %v4741_v19  ;;  %v4743_v13 = vmul.f32 %v8099_v43, %v10927_v54  ;;  %v12210_v19 = vld [vmem:[#allocation56_spill] sm:$0xff]  ;;  %v12211_v10 = vld [vmem:[#allocation46_spill] sm:$0xff] }
 0xc6c   : > { %7374 = vmatpush3.bf16.msra.mxu1 %v7617_v47  ;;  %v3355_v43 = vadd.f32 %v12211_v10, %v12210_v19 }
 0xc6d   : > { %7335 = vmatprep.mubr.bf16.mxu0 %v4751_v22  ;;  %v4752_v18 = vpack.c.bf16 %v4744_v3, %v4743_v13  ;;  %v12212_v13 = vld [vmem:[#allocation57_spill] sm:$0xff] }
 0xc72   : > { %7336 = vmatmul.mubr.bf16.gmra.mxu0 %v4752_v18  ;;  %v12213_v18 = vld [vmem:[#allocation36_spill] sm:$0xff] }
 0xc77   : > { %v4987_v4 = vpop.xlane.xlu0 %4986 }
 0xc78   : > { %8100 = vrcp.f32 %v4987_v4  ;;  %v3366_v4 = vadd.f32 %v12213_v18, %v12212_v13 }
 0xc7b   : > { %v4989_v59 = vpop.xlane.xlu1 %4988 }
 0xc7c   : > { %8102 = vrcp.f32 %v4989_v59 }
 0xc7f   : > { %v4991_v51 = vpop.xlane.xlu1 %4990 }
 0xc80   : > { %8104 = vrcp.f32 %v4991_v51 }
 0xc83   : > { %v4993_v7 = vpop.xlane.xlu1 %4992 }
 0xc84   : > { %8106 = vrcp.f32 %v4993_v7 }
 0xc85   : > { %v8101_v33 = vpop.eup %8100 }
 0xc86   : > { %v5034_v54 = vmul.f32 %v8101_v33, %v10959_v36 }
 0xc87   : > { %v4995_v50 = vpop.xlane.xlu1 %4994 }
 0xc88   : > { %8108 = vrcp.f32 %v4995_v50 }
 0xc89   : > { %v8103_v31 = vpop.eup %8102 }
 0xc8a   : > { %v5035_v24 = vmul.f32 %v8103_v31, %v10963_v52  ;;  %v12209_v52 = vld [vmem:[#allocation32_spill] sm:$0xff] }
 0xc8b   : > { %v4997_v2 = vpop.xlane.xlu1 %4996  ;;  %v3363_v44 = vadd.f32 %v12209_v52, %v12208_v16 }
 0xc8c   : > { %8110 = vrcp.f32 %v4997_v2  ;;  %v5050_v29 = vpack.c.bf16 %v5035_v24, %v5034_v54 }
 0xc8d   : > { %v8105_v49 = vpop.eup %8104 }
 0xc8e   : > { %7355 = vmatprep.mubr.bf16.mxu0 %v5050_v29  ;;  %v5036_v35 = vmul.f32 %v8105_v49, %v10967_v9 }
 0xc8f   : > { %v4999_v34 = vpop.xlane.xlu1 %4998 }
 0xc90   : > { %8112 = vrcp.f32 %v4999_v34 }
 0xc91   : > { %v8107_v37 = vpop.eup %8106 }
 0xc92   : > { %v5037_v17 = vmul.f32 %v8107_v37, %v10971_v14 }
 0xc93   : > { %v5001_v42 = vpop.xlane.xlu1 %5000 }
 0xc94   : > { %v5051_v40 = vpack.c.bf16 %v5037_v17, %v5036_v35  ;;  %8114 = vrcp.f32 %v5001_v42 }
 0xc95   : > { %v8109_v36 = vpop.eup %8108 }
 0xc96   : > { %7356 = vmatmul.mubr.bf16.vlgmr.msra.gmra.mxu0 %v5051_v40  ;;  %v5038_v9 = vmul.f32 %v8109_v36, %v10974_v23 }
 0xc99   : > { %v8111_v38 = vpop.eup %8110  ;;  %v7273_v63 = vpop.f32.mrf.mxu0 }
 0xc9a   : > { %v11126_v22 = vadd.f32 %v7273_v63, %v3363_v44  ;;  %v5039_v14 = vmul.f32 %v8111_v38, %v10977_v48 }
 0xc9b   : > { %v4393_v3 = vpop.f32.mrf.mxu0 }
 0xc9c   : > { %v11132_v59 = vadd.f32 %v4393_v3, %v3355_v43  ;;  %v5003_v51 = vpop.xlane.xlu0 %5002  ;;  %v5052_v7 = vpack.c.bf16 %v5039_v14, %v5038_v9  ;;  %v7619_v3 = vld [vmem:[#allocation14 + $0x30] sm:$0xff]  }
 0xc9d   : > { %v7274_v1 = vpop.f32.mrf.mxu0  ;;  %v8113_v50 = vpop.eup %8112  ;;  %8116 = vrcp.f32 %v5003_v51 }
 0xc9e   : > { %v11134_v33 = vadd.f32 %v7274_v1, %v3366_v4  ;;  %7359 = vmatprep.mubr.bf16.mxu0 %v5052_v7  ;;  %v5040_v23 = vmul.f32 %v8113_v50, %v10981_v21 }
 0xc9f   : > { %v11146_v13 = vpop.f32.mrf.mxu0 }
 0xca0   : > { %v5005_v47 = vpop.xlane.xlu1 %5004 }
 0xca1   : > { %v8115_v31 = vpop.eup %8114  ;;  %8118 = vrcp.f32 %v5005_v47 }
 0xca2   : > { %v5041_v48 = vmul.f32 %v8115_v31, %v10985_v39 }
 0xca4   : > { %v5053_v54 = vpack.c.bf16 %v5041_v48, %v5040_v23 }
 0xca6   : > { %7360 = vmatmul.mubr.bf16.gmra.mxu0 %v5053_v54 }
 0xcaa   : > { %v8117_v24 = vpop.eup %8116 }
 0xcab   : > { %v5042_v29 = vmul.f32 %v8117_v24, %v10989_v55 }
 0xcac   : > { %v5007_v34 = vpop.xlane.xlu0 %5006 }
 0xcad   : > { %8120 = vrcp.f32 %v5007_v34 }
 0xcae   : > { %v8119_v2 = vpop.eup %8118 }
 0xcaf   : > { %v5043_v49 = vmul.f32 %v8119_v2, %v10994_v27 }
 0xcb1   : > { %v5054_v37 = vpack.c.bf16 %v5043_v49, %v5042_v29 }
 0xcb3   : > { %7363 = vmatprep.mubr.bf16.mxu0 %v5054_v37 }
 0xcb5   : > { %v5009_v35 = vpop.xlane.xlu1 %5008 }
 0xcb6   : > { %8122 = vrcp.f32 %v5009_v35 }
 0xcba   : > { %v8121_v21 = vpop.eup %8120 }
 0xcbb   : > { %v5044_v36 = vmul.f32 %v8121_v21, %v11005_v45 }
 0xcbc   : > { %v5011_v17 = vpop.xlane.xlu0 %5010 }
 0xcbd   : > { %8124 = vrcp.f32 %v5011_v17 }
 0xcc0   : > { %v5013_v42 = vpop.xlane.xlu1 %5012 }
 0xcc1   : > { %8126 = vrcp.f32 %v5013_v42 }
 0xcc3   : > { %v8123_v39 = vpop.eup %8122 }
 0xcc4   : > { %v5015_v40 = vpop.xlane.xlu0 %5014  ;;  %v5045_v16 = vmul.f32 %v8123_v39, %v11010_v26  ;;  %v7618_v26 = vld [vmem:[#allocation14 + $0x38] sm:$0xff]  }
 0xcc5   : > { %8128 = vrcp.f32 %v5015_v40  ;;  %7391 = vmatprep.subr.bf16.mxu0 %v7618_v26 }
 0xcc6   : > { %v5055_v55 = vpack.c.bf16 %v5045_v16, %v5044_v36  ;;  %7392 = vmatpush3.bf16.msra.mxu0 %v7618_v26 }
 0xcc7   : > { %7393 = vmatprep.subr.bf16.mxu0 %v7619_v3 }
 0xcc8   : > { %7364 = vmatmul.mubr.bf16.gmra.mxu0 %v5055_v55  ;;  %v5017_v27 = vpop.xlane.xlu1 %5016 }
 0xcc9   : > { %8130 = vrcp.f32 %v5017_v27 }
 0xcca   : > { %v8125_v52 = vpop.eup %8124  ;;  %7394 = vmatpush3.bf16.msra.mxu0 %v7619_v3 }
 0xccb   : > { %v5046_v38 = vmul.f32 %v8125_v52, %v11016_v30 }
 0xcce   : > { %v8127_v44 = vpop.eup %8126 }
 0xccf   : > { %v5047_v63 = vmul.f32 %v8127_v44, %v11021_v5 }
 0xcd1   : > { %v5056_v19 = vpack.c.bf16 %v5047_v63, %v5046_v38 }
 0xcd2   : > { %v8129_v10 = vpop.eup %8128 }
 0xcd3   : > { %7367 = vmatprep.mubr.bf16.mxu0 %v5056_v19  ;;  %v5048_v9 = vmul.f32 %v8129_v10, %v11028_v12 }
 0xcd6   : > { %v8131_v43 = vpop.eup %8130 }
 0xcd7   : > { %v5049_v45 = vmul.f32 %v8131_v43, %v11045_v15 }
 0xcd9   : > { %v5057_v14 = vpack.c.bf16 %v5049_v45, %v5048_v9 }
 0xcdb   : > { %7368 = vmatmul.mubr.bf16.gmra.mxu0 %v5057_v14 }
 0xd01   : > { %v7325_v30 = vpop.f32.mrf.mxu0 }
 0xd03   : > { %v4811_v5 = vpop.f32.mrf.mxu0 }
 0xd05   : > { %v7326_v18 = vpop.f32.mrf.mxu0 }
 0xd06   : > { %v5156_v7 = vpack.c.bf16 %v7326_v18, %v7325_v30 }
 0xd07   : > { %v4814_v4 = vpop.f32.mrf.mxu0 }
 0xd08   : > { %v5155_v51 = vpack.c.bf16 %v4814_v4, %v4811_v5 }
 0xd09   : > { %v7329_v1 = vpop.f32.mrf.mxu0 }
 0xd0a   : > { %7375 = vmatprep.mubr.msk.bf16.mxu1 %vm1356_vm0, %v5155_v51 }
 0xd0b   : > { %v4827_v12 = vpop.f32.mrf.mxu0  ;;  %7376 = vmatmul.mubr.msk.bf16.vlgmr.msra.gmra.mxu1 %vm1356_vm0, %v5156_v7 }
 0xd0d   : > { %v7330_v15 = vpop.f32.mrf.mxu0 }
 0xd0e   : > { %v5158_v31 = vpack.c.bf16 %v7330_v15, %v7329_v1  ;;  %v11168_v15 = vld [vmem:[%s11781_s10] ss:$0 sm:$0xff] }
 0xd0f   : > { %v4830_v50 = vpop.f32.mrf.mxu0 }
 0xd10   : > { %v5157_v47 = vpack.c.bf16 %v4830_v50, %v4827_v12  ;;  %v8196_v50 = vld [vmem:[%s8924_s16 + $0x10] sm:$0xff] }
 0xd12   : > { %7379 = vmatprep.mubr.msk.bf16.mxu1 %vm1356_vm0, %v5157_v47 }
 0xd13   : > { %7380 = vmatmul.mubr.msk.bf16.gmra.mxu1 %vm1356_vm0, %v5158_v31 }
 0xd2a   : > { %v7333_v23 = vpop.f32.mrf.mxu0 }
 0xd2c   : > { %v4843_v48 = vpop.f32.mrf.mxu0 }
 0xd2e   : > { %v7334_v54 = vpop.f32.mrf.mxu0 }
 0xd2f   : > { %v5160_v29 = vpack.c.bf16 %v7334_v54, %v7333_v23 }
 0xd30   : > { %v4846_v24 = vpop.f32.mrf.mxu0 }
 0xd31   : > { %v5159_v2 = vpack.c.bf16 %v4846_v24, %v4843_v48  ;;  %v8197_v48 = vld [vmem:[%s8924_s16] sm:$0xff] }
 0xd32   : > { %v7337_v49 = vpop.f32.mrf.mxu0 }
 0xd33   : > { %7383 = vmatprep.mubr.msk.bf16.mxu1 %vm1356_vm0, %v5159_v2 }
 0xd34   : > { %v4859_v34 = vpop.f32.mrf.mxu0  ;;  %7384 = vmatmul.mubr.msk.bf16.gmra.mxu1 %vm1356_vm0, %v5160_v29  ;;  %v8198_v29 = vld [vmem:[%s8924_s16 + $0x18] sm:$0xff] }
 0xd36   : > { %v7338_v37 = vpop.f32.mrf.mxu0 }
 0xd37   : > { %v5162_v42 = vpack.c.bf16 %v7338_v37, %v7337_v49 }
 0xd38   : > { %v4862_v35 = vpop.f32.mrf.mxu0 }
 0xd39   : > { %v5161_v17 = vpack.c.bf16 %v4862_v35, %v4859_v34  ;;  %v8199_v35 = vld [vmem:[%s8924_s16 + $0x8] sm:$0xff] }
 0xd3b   : > { %7387 = vmatprep.mubr.msk.bf16.mxu1 %vm1356_vm0, %v5161_v17 }
 0xd3c   : > { %7388 = vmatmul.mubr.msk.bf16.gmra.mxu1 %vm1356_vm0, %v5162_v42 }
 0xd56   : > { %v7357_v21 = vpop.f32.mrf.mxu0 }
 0xd58   : > { %v5092_v39 = vpop.f32.mrf.mxu0 }
 0xd5a   : > { %v7358_v40 = vpop.f32.mrf.mxu0 }
 0xd5b   : > { %v5318_v55 = vpack.c.bf16 %v7358_v40, %v7357_v21 }
 0xd5c   : > { %v5095_v36 = vpop.f32.mrf.mxu0 }
 0xd5d   : > { %v5317_v16 = vpack.c.bf16 %v5095_v36, %v5092_v39  ;;  %v8200_v39 = vld [vmem:[%s8924_s16 + $0x30] sm:$0xff] }
 0xd5e   : > { %v12214_v36 = vld [vmem:[#allocation38_spill] sm:$0xff] }
 0xd5f   : > { %7395 = vmatprep.mubr.msk.bf16.mxu0 %vm1356_vm0, %v5317_v16 }
 0xd60   : > { %7396 = vmatmul.mubr.msk.bf16.vlgmr.msra.gmra.mxu0 %vm1356_vm0, %v5318_v55  ;;  %v8201_v55 = vld [vmem:[%s8924_s16 + $0x20] sm:$0xff] }
 0xd66   : > { %v7361_v27 = vpop.f32.mrf.mxu0 }
 0xd68   : > { %v5108_v52 = vpop.f32.mrf.mxu0 }
 0xd6a   : > { %v7362_v44 = vpop.f32.mrf.mxu0 }
 0xd6b   : > { %v5320_v19 = vpack.c.bf16 %v7362_v44, %v7361_v27  ;;  %v12215_v27 = vld [vmem:[#allocation45_spill] sm:$0xff] }
 0xd6c   : > { %v5111_v38 = vpop.f32.mrf.mxu0 }
 0xd6d   : > { %v5319_v63 = vpack.c.bf16 %v5111_v38, %v5108_v52 }
 0xd6f   : > { %7399 = vmatprep.mubr.msk.bf16.mxu0 %vm1356_vm0, %v5319_v63 }
 0xd70   : > { %7400 = vmatmul.mubr.msk.bf16.gmra.mxu0 %vm1356_vm0, %v5320_v19  ;;  %v8202_v19 = vld [vmem:[%s8924_s16 + $0x38] sm:$0xff] }
 0xd88   : > { %v7365_v10 = vpop.f32.mrf.mxu0 }
 0xd8a   : > { %v5124_v43 = vpop.f32.mrf.mxu0 }
 0xd8c   : > { %v7366_v9 = vpop.f32.mrf.mxu0 }
 0xd8d   : > { %v5322_v14 = vpack.c.bf16 %v7366_v9, %v7365_v10 }
 0xd8e   : > { %v5127_v45 = vpop.f32.mrf.mxu0 }
 0xd8f   : > { %v5321_v26 = vpack.c.bf16 %v5127_v45, %v5124_v43  ;;  %v12216_v43 = vld [vmem:[#allocation65_spill] sm:$0xff] }
 0xd90   : > { %v8203_v45 = vld [vmem:[%s8924_s16 + $0x28] sm:$0xff] }
 0xd91   : > { %7403 = vmatprep.mubr.msk.bf16.mxu0 %vm1356_vm0, %v5321_v26 }
 0xd92   : > { %7404 = vmatmul.mubr.msk.bf16.gmra.mxu0 %vm1356_vm0, %v5322_v14 }
 0xd9b   : > { %v7369_v3 = vpop.f32.mrf.mxu0 }
 0xd9d   : > { %v5140_v30 = vpop.f32.mrf.mxu0 }
 0xd9f   : > { %v7370_v5 = vpop.f32.mrf.mxu0 }
 0xda0   : > { %v5324_v51 = vpack.c.bf16 %v7370_v5, %v7369_v3 }
 0xda1   : > { %v5143_v18 = vpop.f32.mrf.mxu0 }
 0xda2   : > { %v5323_v4 = vpack.c.bf16 %v5143_v18, %v5140_v30  ;;  %v12217_v18 = vld [vmem:[#allocation61_spill] sm:$0xff] }
 0xda4   : > { %7407 = vmatprep.mubr.msk.bf16.mxu0 %vm1356_vm0, %v5323_v4 }
 0xda5   : > { %7408 = vmatmul.mubr.msk.bf16.gmra.mxu0 %vm1356_vm0, %v5324_v51 }
 0xdcb   : > { %v7377_v7 = vpop.f32.mrf.mxu1 }
 0xdcc   : > { %v5303_v1 = vadd.f32 %v7377_v7, %v10662_v62  ;;  %v8204_v7 = vld [vmem:[%s8924_s16 + $0x50] sm:$0xff] }
 0xdcd   : > { %v5238_v12 = vpop.f32.mrf.mxu1 }
 0xdce   : > { %v5481_v47 = vadd.f32 %v8196_v50, %v5303_v1  ;;  %v5301_v31 = vadd.f32 %v5238_v12, %v10668_v6  ;;  %v12218_v12 = vld [vmem:[#allocation68_spill] sm:$0xff] }
 0xdcf   : > { %v7378_v23 = vpop.f32.mrf.mxu1 }
 0xdd0   : > { %v5479_v54 = vadd.f32 %v8197_v48, %v5301_v31  ;;  %v5304_v24 = vadd.f32 %v7378_v23, %v10674_v58  ;;  %v11175_v2 = vadd.f32 %v11168_v15, %v5481_v47  ;;  %v8205_v31 = vld [vmem:[%s8924_s16 + $0x40] sm:$0xff] }
 0xdd1   : > { %v5241_v62 = vpop.f32.mrf.mxu1  ;;  %v12219_v48 = vld [vmem:[#allocation80_spill] sm:$0xff] }
 0xdd2   : > { %v5482_v49 = vadd.f32 %v8198_v29, %v5304_v24  ;;  %v5302_v34 = vadd.f32 %v5241_v62, %v10676_v25  ;;  %5524 = vadd.xlane.f32.xlu0 %v11175_v2  ;;  %v11183_v42 = vadd.f32 %v11168_v15, %v5479_v54  ;;  %v8206_v29 = vld [vmem:[%s8924_s16 + $0x58] sm:$0xff] }
 0xdd3   : > { %v7381_v37 = vpop.f32.mrf.mxu1 }
 0xdd4   : > { %v5480_v6 = vadd.f32 %v8199_v35, %v5302_v34  ;;  %v5307_v17 = vadd.f32 %v7381_v37, %v10694_v57  ;;  %v11186_v58 = vadd.f32 %v11168_v15, %v5482_v49  ;;  %v12220_v34 = vld [vmem:[#allocation62_spill] sm:$0xff] }
 0xdd5   : > { %v5254_v21 = vpop.f32.mrf.mxu1 }
 0xdd6   : > { %v5485_v40 = vadd.f32 %v8200_v39, %v5307_v17  ;;  %v5305_v25 = vadd.f32 %v5254_v21, %v12214_v36  ;;  %5520 = vadd.xlane.f32.xlu0 %v11183_v42  ;;  %5526 = vadd.xlane.f32.xlu1 %v11186_v58  ;;  %v11195_v44 = vadd.f32 %v11168_v15, %v5480_v6  ;;  %v8207_v6 = vld [vmem:[%s8924_s16 + $0x48] sm:$0xff]  ;;  %v12221_v21 = vld [vmem:[#allocation84_spill] sm:$0xff] }
 0xdd7   : > { %v7382_v16 = vpop.f32.mrf.mxu1 }
 0xdd8   : > { %v5483_v57 = vadd.f32 %v8201_v55, %v5305_v25  ;;  %v5308_v52 = vadd.f32 %v7382_v16, %v12215_v27  ;;  %v11198_v38 = vadd.f32 %v11168_v15, %v5485_v40  ;;  %v8208_v16 = vld [vmem:[%s8924_s16 + $0x70] sm:$0xff] }
 0xdd9   : > { %v5257_v63 = vpop.f32.mrf.mxu1 }
 0xdda   : > { %v5486_v10 = vadd.f32 %v8202_v19, %v5308_v52  ;;  %v5306_v9 = vadd.f32 %v5257_v63, %v12216_v43  ;;  %5522 = vadd.xlane.f32.xlu1 %v11195_v44  ;;  %5532 = vadd.xlane.f32.xlu0 %v11198_v38  ;;  %v11206_v14 = vadd.f32 %v11168_v15, %v5483_v57  ;;  %v12222_v57 = vld [vmem:[#allocation83_spill] sm:$0xff]  ;;  %v8209_v63 = vld [vmem:[%s8924_s16 + $0x60] sm:$0xff] }
 0xddc   : > { %v5484_v26 = vadd.f32 %v8203_v45, %v5306_v9  ;;  %v11209_v3 = vadd.f32 %v11168_v15, %v5486_v10  ;;  %v12223_v10 = vld [vmem:[#allocation85_spill] sm:$0xff] }
 0xdde   : > { %5528 = vadd.xlane.f32.xlu0 %v11206_v14  ;;  %5534 = vadd.xlane.f32.xlu1 %v11209_v3  ;;  %v11214_v30 = vadd.f32 %v11168_v15, %v5484_v26 }
 0xde2   : > { %5530 = vadd.xlane.f32.xlu1 %v11214_v30 }
 0xdf4   : > { %v7385_v5 = vpop.f32.mrf.mxu1 }
 0xdf5   : > { %v5311_v4 = vadd.f32 %v7385_v5, %v12217_v18  ;;  %v8210_v5 = vld [vmem:[%s8924_s16 + $0x78] sm:$0xff] }
 0xdf6   : > { %v5270_v51 = vpop.f32.mrf.mxu1 }
 0xdf7   : > { %v5489_v1 = vadd.f32 %v8204_v7, %v5311_v4  ;;  %v5309_v50 = vadd.f32 %v5270_v51, %v12218_v12  ;;  %v12224_v4 = vld [vmem:[#allocation93_spill] sm:$0xff] }
 0xdf8   : > { %v7386_v47 = vpop.f32.mrf.mxu1  ;;  %v8211_v7 = vld [vmem:[%s8924_s16 + $0x68] sm:$0xff]  ;;  %s12225_s16 = sld [smem:[#allocation104_spill]] }
 0xdf9   : > { %v5487_v23 = vadd.f32 %v8205_v31, %v5309_v50  ;;  %v5312_v54 = vadd.f32 %v7386_v47, %v12219_v48  ;;  %v11223_v24 = vadd.f32 %v11168_v15, %v5489_v1 }
 0xdfa   : > { %v5273_v62 = vpop.f32.mrf.mxu1 }
 0xdfb   : > { %v5490_v49 = vadd.f32 %v8206_v29, %v5312_v54  ;;  %v5310_v37 = vadd.f32 %v5273_v62, %v12220_v34  ;;  %5540 = vadd.xlane.f32.xlu0 %v11223_v24  ;;  %v11231_v40 = vadd.f32 %v11168_v15, %v5487_v23  ;;  %v8212_v62 = vld [vmem:[%s8932_s24 + $0x10] sm:$0xff] }
 0xdfc   : > { %v7389_v35 = vpop.f32.mrf.mxu1 }
 0xdfd   : > { %v5488_v17 = vadd.f32 %v8207_v6, %v5310_v37  ;;  %v5315_v39 = vadd.f32 %v7389_v35, %v12221_v21  ;;  %v11234_v36 = vadd.f32 %v11168_v15, %v5490_v49  ;;  %v8213_v37 = vld [vmem:[%s8932_s24] sm:$0xff] }
 0xdfe   : > { %v5286_v25 = vpop.f32.mrf.mxu1  ;;  %v11269_v54 = vld [vmem:[%s12225_s16] ss:$0 sm:$0xff]  ;;  %s8446_s16 = sshll.u32 %s8569_s27, 4  ;;  %s8447_s16 = int_to_ptr.vmem [resolvable:$false] %s8446_s16 }
 0xdff   : > { %v5493_v55 = vadd.f32 %v8208_v16, %v5315_v39  ;;  %v5313_v27 = vadd.f32 %v5286_v25, %v12222_v57  ;;  %5536 = vadd.xlane.f32.xlu0 %v11231_v40  ;;  %5542 = vadd.xlane.f32.xlu1 %v11234_v36  ;;  %v11243_v9 = vadd.f32 %v11168_v15, %v5488_v17  ;;  %v8214_v17 = vld [vmem:[%s8932_s24 + $0x18] sm:$0xff]  ;;  %v8215_v25 = vld [vmem:[%s8932_s24 + $0x8] sm:$0xff]  ;;  %s8448_s20 = scalar_lea.vmem %s8447_s16, 4096  ;;  %p8449_p12 = scmp.lt.s32.totalorder %s11612_s26, %s8447_s16 }
 0xe00   : > { %v7390_v52 = vpop.f32.mrf.mxu1  ;;  %p8450_p7 = scmp.lt.s32.totalorder %s8448_s20, %s8442_s17 }
 0xe01   : > { %v5491_v19 = vadd.f32 %v8209_v63, %v5313_v27  ;;  %v5316_v43 = vadd.f32 %v7390_v52, %v12223_v10  ;;  %v11246_v45 = vadd.f32 %v11168_v15, %v5493_v55  ;;  %v8216_v52 = vld [vmem:[%s8932_s24 + $0x30] sm:$0xff] }
 0xe02   : > { %v5289_v26 = vpop.f32.mrf.mxu1  ;;  %p8451_p3 = por %p8450_p7, %p8449_p12 }
 0xe03   : > { %v5494_v18 = vadd.f32 %v8210_v5, %v5316_v43  ;;  %v5314_v51 = vadd.f32 %v5289_v26, %v12224_v4  ;;  %5538 = vadd.xlane.f32.xlu1 %v11243_v9  ;;  %5548 = vadd.xlane.f32.xlu0 %v11246_v45  ;;  %v11254_v12 = vadd.f32 %v11168_v15, %v5491_v19  ;;  %v8217_v43 = vld [vmem:[%s8932_s24 + $0x20] sm:$0xff] }
 0xe04   : > { %p8452_p8 = pnand %p8451_p3, %p8445_p11 }
 0xe05   : > { %v5492_v1 = vadd.f32 %v8211_v7, %v5314_v51  ;;  %v11257_v50 = vadd.f32 %v11168_v15, %v5494_v18  ;;  %v8218_v51 = vld [vmem:[%s8932_s24 + $0x38] sm:$0xff] }
 0xe07   : > { %5544 = vadd.xlane.f32.xlu0 %v11254_v12  ;;  %5550 = vadd.xlane.f32.xlu1 %v11257_v50  ;;  %v11262_v47 = vadd.f32 %v11168_v15, %v5492_v1 }
 0xe0b   : > { %5546 = vadd.xlane.f32.xlu1 %v11262_v47 }
 0xe20   : > { %v7397_v31 = vpop.f32.mrf.mxu0 }
 0xe21   : > { %v5465_v23 = vadd.f32 %v7397_v31, %v11033_v8 }
 0xe22   : > { %v5400_v48 = vpop.f32.mrf.mxu0 }
 0xe23   : > { %v5743_v29 = vadd.f32 %v8212_v62, %v5465_v23  ;;  %v5463_v49 = vadd.f32 %v5400_v48, %v11042_v46 }
 0xe24   : > { %v7398_v34 = vpop.f32.mrf.mxu0 }
 0xe25   : > { %v5741_v15 = vadd.f32 %v8213_v37, %v5463_v49  ;;  %v5466_v35 = vadd.f32 %v7398_v34, %v11051_v28  ;;  %v11276_v6 = vadd.f32 %v11269_v54, %v5743_v29  ;;  %v8220_v29 = vld [vmem:[%s8932_s24 + $0x50] sm:$0xff] }
 0xe26   : > { %v5403_v8 = vpop.f32.mrf.mxu0 }
 0xe27   : > { %v5744_v21 = vadd.f32 %v8214_v17, %v5466_v35  ;;  %v5464_v39 = vadd.f32 %v5403_v8, %v11055_v32  ;;  %5786 = vadd.xlane.f32.xlu0 %v11276_v6  ;;  %v11283_v46 = vadd.f32 %v11269_v54, %v5741_v15  ;;  %v8221_v15 = vld [vmem:[%s8932_s24 + $0x40] sm:$0xff] }
 0xe29   : > { %v5742_v16 = vadd.f32 %v8215_v25, %v5464_v39  ;;  %v11286_v55 = vadd.f32 %v11269_v54, %v5744_v21  ;;  %v8222_v39 = vld [vmem:[%s8932_s24 + $0x58] sm:$0xff] }
 0xe2b   : > { %5782 = vadd.xlane.f32.xlu0 %v11283_v46  ;;  %5788 = vadd.xlane.f32.xlu1 %v11286_v55  ;;  %v11291_v28 = vadd.f32 %v11269_v54, %v5742_v16 }
 0xe2f   : > { %5784 = vadd.xlane.f32.xlu1 %v11291_v28 }
 0xe30   : > { %v7401_v32 = vpop.f32.mrf.mxu0 }
 0xe31   : > { %v5469_v57 = vadd.f32 %v7401_v32, %v11068_v60  ;;  %v8219_v60 = vld [vmem:[%s8932_s24 + $0x28] sm:$0xff] }
 0xe32   : > { %v5416_v27 = vpop.f32.mrf.mxu0 }
 0xe33   : > { %v5747_v63 = vadd.f32 %v8216_v52, %v5469_v57  ;;  %v5467_v19 = vadd.f32 %v5416_v27, %v11073_v20 }
 0xe34   : > { %v7402_v10 = vpop.f32.mrf.mxu0 }
 0xe35   : > { %v5745_v26 = vadd.f32 %v8217_v43, %v5467_v19  ;;  %v5470_v5 = vadd.f32 %v7402_v10, %v11078_v56  ;;  %v11300_v18 = vadd.f32 %v11269_v54, %v5747_v63  ;;  %v12226_v10 = vld [vmem:[#allocation40_spill] sm:$0xff]  ;;  %v12227_v43 = vld [vmem:[#allocation47_spill] sm:$0xff] }
 0xe36   : > { %v5419_v4 = vpop.f32.mrf.mxu0 }
 0xe37   : > { %v5748_v7 = vadd.f32 %v8218_v51, %v5470_v5  ;;  %v5468_v1 = vadd.f32 %v5419_v4, %v11081_v41  ;;  %5794 = vadd.xlane.f32.xlu0 %v11300_v18  ;;  %v11307_v20 = vadd.f32 %v11269_v54, %v5745_v26  ;;  %v3358_v26 = vadd.f32 %v12227_v43, %v12226_v10 }
 0xe39   : > { %v5746_v31 = vadd.f32 %v8219_v60, %v5468_v1  ;;  %v11310_v23 = vadd.f32 %v11269_v54, %v5748_v7  ;;  %v4421_v1 = vadd.f32 %v11146_v13, %v3358_v26  ;;  %v8224_v60 = vld [vmem:[%s8932_s24 + $0x60] sm:$0xff] }
 0xe3b   : > { %5790 = vadd.xlane.f32.xlu0 %v11307_v20  ;;  %5796 = vadd.xlane.f32.xlu1 %v11310_v23  ;;  %v11315_v56 = vadd.f32 %v11269_v54, %v5746_v31 }
 0xe3f   : > { %5792 = vadd.xlane.f32.xlu1 %v11315_v56 }
 0xe52   : > { %v7405_v41 = vpop.f32.mrf.mxu0 }
 0xe53   : > { %v5473_v48 = vadd.f32 %v7405_v41, %v11094_v11  ;;  %v8223_v11 = vld [vmem:[%s8932_s24 + $0x48] sm:$0xff] }
 0xe54   : > { %v5432_v62 = vpop.f32.mrf.mxu0 }
 0xe55   : > { %v5751_v49 = vadd.f32 %v8220_v29, %v5473_v48  ;;  %v5471_v34 = vadd.f32 %v5432_v62, %v11100_v0  ;;  %v8225_v29 = vld [vmem:[%s8932_s24 + $0x70] sm:$0xff] }
 0xe56   : > { %v7406_v37 = vpop.f32.mrf.mxu0 }
 0xe57   : > { %v5749_v35 = vadd.f32 %v8221_v15, %v5471_v34  ;;  %v5474_v8 = vadd.f32 %v7406_v37, %v11106_v61  ;;  %v11324_v17 = vadd.f32 %v11269_v54, %v5751_v49 }
 0xe58   : > { %v5435_v21 = vpop.f32.mrf.mxu0 }
 0xe59   : > { %v5752_v25 = vadd.f32 %v8222_v39, %v5474_v8  ;;  %v5472_v16 = vadd.f32 %v5435_v21, %v11108_v53  ;;  %5802 = vadd.xlane.f32.xlu0 %v11324_v17  ;;  %v11331_v57 = vadd.f32 %v11269_v54, %v5749_v35  ;;  %v8227_v39 = vld [vmem:[%s8932_s24 + $0x78] sm:$0xff] }
 0xe5b   : > { %v5750_v32 = vadd.f32 %v8223_v11, %v5472_v16  ;;  %v11334_v0 = vadd.f32 %v11269_v54, %v5752_v25  ;;  %v5525_v61 = vpop.xlane.xlu0 %5524 }
 0xe5c   : > { %v5555_v35 = vmul.f32 0.0078125, %v5525_v61 }
 0xe5d   : > { %5798 = vadd.xlane.f32.xlu0 %v11331_v57  ;;  %5804 = vadd.xlane.f32.xlu1 %v11334_v0  ;;  %v11339_v27 = vadd.f32 %v11269_v54, %v5750_v32 }
 0xe5e   : > { %v11368_v32 = vsub.f32 %v11175_v2, %v5555_v35 }
 0xe5f   : > { %v5527_v53 = vpop.xlane.xlu1 %5526  ;;  %v5521_v52 = vpop.xlane.xlu0 %5520 }
 0xe60   : > { %v5553_v41 = vmul.f32 0.0078125, %v5521_v52  ;;  %v5587_v2 = vmul.f32 %v11368_v32, %v11368_v32 }
 0xe61   : > { %5800 = vadd.xlane.f32.xlu1 %v11339_v27 }
 0xe62   : > { %v11356_v13 = vsub.f32 %v11183_v42, %v5553_v41  ;;  %v5556_v42 = vmul.f32 0.0078125, %v5527_v53 }
 0xe63   : > { %v5523_v51 = vpop.xlane.xlu1 %5522  ;;  %v5533_v48 = vpop.xlane.xlu0 %5532 }
 0xe64   : > { %v5554_v21 = vmul.f32 0.0078125, %v5523_v51  ;;  %v11380_v43 = vsub.f32 %v11186_v58, %v5556_v42  ;;  %v5559_v53 = vmul.f32 0.0078125, %v5533_v48 }
 0xe65   : > { %v7409_v63 = vpop.f32.mrf.mxu0 }
 0xe66   : > { %v5477_v5 = vadd.f32 %v7409_v63, %v11126_v22  ;;  %v8226_v22 = vld [vmem:[%s8932_s24 + $0x68] sm:$0xff]  ;;  %v11371_v61 = vsub.f32 %v11195_v44, %v5554_v21  ;;  %s12228_s24 = sld [smem:[#allocation105_spill]] }
 0xe67   : > { %v5448_v19 = vpop.f32.mrf.mxu0  ;;  %v5535_v8 = vpop.xlane.xlu1 %5534 }
 0xe68   : > { %v5475_v4 = vadd.f32 %v5448_v19, %v11132_v59  ;;  %v5755_v49 = vadd.f32 %v8225_v29, %v5477_v5  ;;  %v5529_v11 = vpop.xlane.xlu0 %5528  ;;  %v5585_v19 = vmul.f32 %v11356_v13, %v11356_v13  ;;  %v5588_v5 = vmul.f32 %v11380_v43, %v11380_v43 }
 0xe69   : > { %v7410_v7 = vpop.f32.mrf.mxu0  ;;  %v5557_v52 = vmul.f32 0.0078125, %v5529_v11  ;;  %v5560_v58 = vmul.f32 0.0078125, %v5535_v8 }
 0xe6a   : > { %v5753_v31 = vadd.f32 %v8224_v60, %v5475_v4  ;;  %v5478_v34 = vadd.f32 %v7410_v7, %v11134_v33  ;;  %v11360_v16 = vadd.f32 %v11269_v54, %v5755_v49  ;;  %v11392_v4 = vsub.f32 %v11198_v38, %v5559_v53 }
 0xe6b   : > { %v5451_v62 = vpop.f32.mrf.mxu0  ;;  %v5531_v10 = vpop.xlane.xlu1 %5530  ;;  %v11385_v44 = vsub.f32 %v11206_v14, %v5557_v52  ;;  %v11400_v7 = vsub.f32 %v11209_v3, %v5560_v58 }
 0xe6c   : > { %v5476_v37 = vadd.f32 %v5451_v62, %v4421_v1  ;;  %v11351_v15 = vadd.f32 %v11269_v54, %v5753_v31  ;;  %v5756_v25 = vadd.f32 %v8227_v39, %v5478_v34  ;;  %v5558_v26 = vmul.f32 0.0078125, %v5531_v10 }
 0xe6d   : > { %v5589_v14 = vmul.f32 %v11385_v44, %v11385_v44  ;;  %v5591_v60 = vmul.f32 %v11392_v4, %v11392_v4 }
 0xe6e   : > { %v5754_v59 = vadd.f32 %v8226_v22, %v5476_v37  ;;  %5806 = vadd.xlane.f32.xlu0 %v11351_v15  ;;  %v11374_v63 = vadd.f32 %v11269_v54, %v5756_v25  ;;  %v11395_v51 = vsub.f32 %v11214_v30, %v5558_v26  ;;  %v5592_v30 = vmul.f32 %v11400_v7, %v11400_v7 }
 0xe70   : > { %v11363_v33 = vadd.f32 %v11269_v54, %v5754_v59  ;;  %v5586_v54 = vmul.f32 %v11371_v61, %v11371_v61  ;;  %v5590_v1 = vmul.f32 %v11395_v51, %v11395_v51 }
 0xe72   : > { %5810 = vadd.xlane.f32.xlu0 %v11360_v16  ;;  %5808 = vadd.xlane.f32.xlu1 %v11363_v33 }
 0xe76   : > { %5812 = vadd.xlane.f32.xlu1 %v11374_v63  ;;  %5601 = vadd.xlane.f32.xlu0 %v5585_v19 }
 0xe7a   : > { %5603 = vadd.xlane.f32.xlu1 %v5586_v54  ;;  %5605 = vadd.xlane.f32.xlu0 %v5587_v2 }
 0xe7e   : > { %5607 = vadd.xlane.f32.xlu1 %v5588_v5  ;;  %5609 = vadd.xlane.f32.xlu0 %v5589_v14 }
 0xe82   : > { %5611 = vadd.xlane.f32.xlu1 %v5590_v1  ;;  %5613 = vadd.xlane.f32.xlu0 %v5591_v60 }
 0xe84   : > { %v5541_v38 = vpop.xlane.xlu0 %5540 }
 0xe85   : > { %v5563_v48 = vmul.f32 0.0078125, %v5541_v38 }
 0xe86   : > { %5615 = vadd.xlane.f32.xlu1 %v5592_v30 }
 0xe87   : > { %v11412_v37 = vsub.f32 %v11223_v24, %v5563_v48 }
 0xe88   : > { %v5543_v31 = vpop.xlane.xlu1 %5542  ;;  %v5537_v41 = vpop.xlane.xlu0 %5536 }
 0xe89   : > { %v5561_v62 = vmul.f32 0.0078125, %v5537_v41  ;;  %v5564_v29 = vmul.f32 0.0078125, %v5543_v31  ;;  %v5595_v24 = vmul.f32 %v11412_v37, %v11412_v37 }
 0xe8b   : > { %v11409_v3 = vsub.f32 %v11231_v40, %v5561_v62  ;;  %v11420_v8 = vsub.f32 %v11234_v36, %v5564_v29 }
 0xe8c   : > { %v5539_v49 = vpop.xlane.xlu1 %5538  ;;  %v5549_v34 = vpop.xlane.xlu0 %5548 }
 0xe8d   : > { %v5562_v22 = vmul.f32 0.0078125, %v5539_v49  ;;  %v5593_v59 = vmul.f32 %v11409_v3, %v11409_v3  ;;  %v5567_v39 = vmul.f32 0.0078125, %v5549_v34  ;;  %v5596_v36 = vmul.f32 %v11420_v8, %v11420_v8 }
 0xe8f   : > { %v11417_v35 = vsub.f32 %v11243_v9, %v5562_v22  ;;  %5617 = vadd.xlane.f32.xlu0 %v5593_v59  ;;  %v11432_v52 = vsub.f32 %v11246_v45, %v5567_v39 }
 0xe90   : > { %v5551_v21 = vpop.xlane.xlu1 %5550  ;;  %v5545_v40 = vpop.xlane.xlu0 %5544 }
 0xe91   : > { %v5565_v25 = vmul.f32 0.0078125, %v5545_v40  ;;  %v5594_v11 = vmul.f32 %v11417_v35, %v11417_v35  ;;  %v5568_v19 = vmul.f32 0.0078125, %v5551_v21  ;;  %v5599_v45 = vmul.f32 %v11432_v52, %v11432_v52 }
 0xe93   : > { %v11427_v42 = vsub.f32 %v11254_v12, %v5565_v25  ;;  %5619 = vadd.xlane.f32.xlu1 %v5594_v11  ;;  %5621 = vadd.xlane.f32.xlu0 %v5595_v24  ;;  %v11440_v12 = vsub.f32 %v11257_v50, %v5568_v19 }
 0xe94   : > { %v5547_v9 = vpop.xlane.xlu1 %5546 }
 0xe95   : > { %v5566_v10 = vmul.f32 0.0078125, %v5547_v9  ;;  %v5597_v2 = vmul.f32 %v11427_v42, %v11427_v42  ;;  %v5600_v54 = vmul.f32 %v11440_v12, %v11440_v12 }
 0xe97   : > { %v11437_v53 = vsub.f32 %v11262_v47, %v5566_v10  ;;  %5623 = vadd.xlane.f32.xlu1 %v5596_v36  ;;  %5625 = vadd.xlane.f32.xlu0 %v5597_v2 }
 0xe99   : > { %v5598_v26 = vmul.f32 %v11437_v53, %v11437_v53 }
 0xe9b   : > { %5627 = vadd.xlane.f32.xlu1 %v5598_v26  ;;  %5629 = vadd.xlane.f32.xlu0 %v5599_v45 }
 0xe9f   : > { %5631 = vadd.xlane.f32.xlu1 %v5600_v54 }
 0xeb0   : > { %v5787_v5 = vpop.xlane.xlu0 %5786 }
 0xeb1   : > { %v5816_v47 = vmul.f32 0.0078125, %v5787_v5 }
 0xeb3   : > { %v11449_v58 = vsub.f32 %v11276_v6, %v5816_v47 }
 0xeb4   : > { %v5789_v14 = vpop.xlane.xlu1 %5788  ;;  %v5783_v50 = vpop.xlane.xlu0 %5782 }
 0xeb5   : > { %v5817_v1 = vmul.f32 0.0078125, %v5789_v14  ;;  %v5814_v60 = vmul.f32 0.0078125, %v5783_v50  ;;  %v5848_v38 = vmul.f32 %v11449_v58, %v11449_v58 }
 0xeb7   : > { %v11454_v30 = vsub.f32 %v11286_v55, %v5817_v1  ;;  %v11457_v31 = vsub.f32 %v11283_v46, %v5814_v60  ;;  %5866 = vadd.xlane.f32.xlu0 %v5848_v38 }
 0xeb8   : > { %v5785_v41 = vpop.xlane.xlu1 %5784 }
 0xeb9   : > { %v5815_v48 = vmul.f32 0.0078125, %v5785_v41  ;;  %v5849_v6 = vmul.f32 %v11454_v30, %v11454_v30  ;;  %v5846_v62 = vmul.f32 %v11457_v31, %v11457_v31 }
 0xebb   : > { %v11464_v29 = vsub.f32 %v11291_v28, %v5815_v48  ;;  %5868 = vadd.xlane.f32.xlu1 %v5849_v6  ;;  %5862 = vadd.xlane.f32.xlu0 %v5846_v62 }
 0xebd   : > { %v5847_v55 = vmul.f32 %v11464_v29, %v11464_v29 }
 0xebf   : > { %5864 = vadd.xlane.f32.xlu1 %v5847_v55 }
 0xec0   : > { %v5795_v46 = vpop.xlane.xlu0 %5794 }
 0xec1   : > { %v5820_v49 = vmul.f32 0.0078125, %v5795_v46 }
 0xec3   : > { %v11469_v34 = vsub.f32 %v11300_v18, %v5820_v49 }
 0xec4   : > { %v5797_v22 = vpop.xlane.xlu1 %5796  ;;  %v5791_v59 = vpop.xlane.xlu0 %5790 }
 0xec5   : > { %v5821_v21 = vmul.f32 0.0078125, %v5797_v22  ;;  %v5818_v40 = vmul.f32 0.0078125, %v5791_v59  ;;  %v5852_v39 = vmul.f32 %v11469_v34, %v11469_v34 }
 0xec7   : > { %v11474_v28 = vsub.f32 %v11310_v23, %v5821_v21  ;;  %v11477_v25 = vsub.f32 %v11307_v20, %v5818_v40  ;;  %5874 = vadd.xlane.f32.xlu0 %v5852_v39 }
 0xec8   : > { %v5793_v11 = vpop.xlane.xlu1 %5792 }
 0xec9   : > { %v5819_v24 = vmul.f32 0.0078125, %v5793_v11  ;;  %v5853_v18 = vmul.f32 %v11474_v28, %v11474_v28  ;;  %v5850_v9 = vmul.f32 %v11477_v25, %v11477_v25 }
 0xecb   : > { %v11484_v36 = vsub.f32 %v11315_v56, %v5819_v24  ;;  %5876 = vadd.xlane.f32.xlu1 %v5853_v18  ;;  %5870 = vadd.xlane.f32.xlu0 %v5850_v9 }
 0xecd   : > { %v5851_v23 = vmul.f32 %v11484_v36, %v11484_v36 }
 0xecf   : > { %5872 = vadd.xlane.f32.xlu1 %v5851_v23 }
 0xee2   : > { %v5803_v20 = vpop.xlane.xlu0 %5802 }
 0xee3   : > { %v5824_v19 = vmul.f32 0.0078125, %v5803_v20 }
 0xee5   : > { %v11489_v10 = vsub.f32 %v11324_v17, %v5824_v19 }
 0xee6   : > { %v5805_v2 = vpop.xlane.xlu1 %5804  ;;  %v5799_v26 = vpop.xlane.xlu0 %5798 }
 0xee7   : > { %v5825_v45 = vmul.f32 0.0078125, %v5805_v2  ;;  %v5822_v54 = vmul.f32 0.0078125, %v5799_v26  ;;  %v5856_v5 = vmul.f32 %v11489_v10, %v11489_v10 }
 0xee9   : > { %v11494_v56 = vsub.f32 %v11334_v0, %v5825_v45  ;;  %v11497_v47 = vsub.f32 %v11331_v57, %v5822_v54  ;;  %5882 = vadd.xlane.f32.xlu0 %v5856_v5 }
 0xeea   : > { %v5801_v14 = vpop.xlane.xlu1 %5800 }
 0xeeb   : > { %v5823_v50 = vmul.f32 0.0078125, %v5801_v14  ;;  %v5857_v17 = vmul.f32 %v11494_v56, %v11494_v56  ;;  %v5854_v1 = vmul.f32 %v11497_v47, %v11497_v47 }
 0xeed   : > { %v11504_v60 = vsub.f32 %v11339_v27, %v5823_v50  ;;  %5884 = vadd.xlane.f32.xlu1 %v5857_v17  ;;  %5878 = vadd.xlane.f32.xlu0 %v5854_v1 }
 0xeef   : > { %v5855_v0 = vmul.f32 %v11504_v60, %v11504_v60 }
 0xef1   : > { %5880 = vadd.xlane.f32.xlu1 %v5855_v0 }
 0xef7   : > { %v5807_v57 = vpop.xlane.xlu0 %5806 }
 0xef8   : > { %v5826_v38 = vmul.f32 0.0078125, %v5807_v57 }
 0xefa   : > { %v11509_v41 = vsub.f32 %v11351_v15, %v5826_v38 }
 0xefb   : > { %v5809_v48 = vpop.xlane.xlu1 %5808  ;;  %v5811_v6 = vpop.xlane.xlu0 %5810 }
 0xefc   : > { %v5827_v62 = vmul.f32 0.0078125, %v5809_v48  ;;  %v5828_v55 = vmul.f32 0.0078125, %v5811_v6  ;;  %v5858_v46 = vmul.f32 %v11509_v41, %v11509_v41 }
 0xefe   : > { %v11514_v27 = vsub.f32 %v11363_v33, %v5827_v62  ;;  %v11517_v49 = vsub.f32 %v11360_v16, %v5828_v55  ;;  %5886 = vadd.xlane.f32.xlu0 %v5858_v46  ;;  %v11531_v62 = vld [vmem:[%s12228_s24] ss:$0 sm:$0xff] }
 0xeff   : > { %v5813_v22 = vpop.xlane.xlu1 %5812  ;;  %v5602_v59 = vpop.xlane.xlu0 %5601 }
 0xf00   : > { %v5829_v21 = vmul.f32 0.0078125, %v5813_v22  ;;  %v5633_v40 = vmul.f32 0.0078125, %v5602_v59  ;;  %v5859_v15 = vmul.f32 %v11514_v27, %v11514_v27  ;;  %v5860_v39 = vmul.f32 %v11517_v49, %v11517_v49  ;;  %v11537_v22 = vld [vmem:[%s12229_s18] ss:$0 sm:$0xff] }
 0xf02   : > { %v11524_v11 = vsub.f32 %v11374_v63, %v5829_v21  ;;  %v5649_v24 = vadd.f32 1e-05, %v5633_v40  ;;  %5888 = vadd.xlane.f32.xlu1 %v5859_v15  ;;  %5890 = vadd.xlane.f32.xlu0 %v5860_v39 }
 0xf03   : > { %v5604_v33 = vpop.xlane.xlu1 %5603  ;;  %v5606_v16 = vpop.xlane.xlu0 %5605 }
 0xf04   : > { %8132 = vrsqrt.f32 %v5649_v24  ;;  %v5634_v18 = vmul.f32 0.0078125, %v5604_v33  ;;  %v5635_v9 = vmul.f32 0.0078125, %v5606_v16  ;;  %v5861_v23 = vmul.f32 %v11524_v11, %v11524_v11 }
 0xf06   : > { %v5650_v20 = vadd.f32 1e-05, %v5634_v18  ;;  %v5651_v19 = vadd.f32 1e-05, %v5635_v9  ;;  %5892 = vadd.xlane.f32.xlu1 %v5861_v23 }
 0xf07   : > { %v5608_v2 = vpop.xlane.xlu1 %5607  ;;  %v5610_v26 = vpop.xlane.xlu0 %5609 }
 0xf08   : > { %8134 = vrsqrt.f32 %v5650_v20  ;;  %v5636_v45 = vmul.f32 0.0078125, %v5608_v2  ;;  %v5637_v63 = vmul.f32 0.0078125, %v5610_v26 }
 0xf09   : > { %8136 = vrsqrt.f32 %v5651_v19 }
 0xf0a   : > { %v5652_v54 = vadd.f32 1e-05, %v5636_v45  ;;  %v5653_v5 = vadd.f32 1e-05, %v5637_v63 }
 0xf0b   : > { %v5612_v14 = vpop.xlane.xlu1 %5611  ;;  %v5614_v50 = vpop.xlane.xlu0 %5613 }
 0xf0c   : > { %8138 = vrsqrt.f32 %v5652_v54  ;;  %v5638_v17 = vmul.f32 0.0078125, %v5612_v14  ;;  %v5639_v1 = vmul.f32 0.0078125, %v5614_v50 }
 0xf0d   : > { %8140 = vrsqrt.f32 %v5653_v5 }
 0xf0e   : > { %v5654_v0 = vadd.f32 1e-05, %v5638_v17  ;;  %v5655_v57 = vadd.f32 1e-05, %v5639_v1 }
 0xf0f   : > { %v5616_v38 = vpop.xlane.xlu1 %5615 }
 0xf10   : > { %8142 = vrsqrt.f32 %v5654_v0  ;;  %v5640_v48 = vmul.f32 0.0078125, %v5616_v38 }
 0xf11   : > { %v8133_v6 = vpop.eup %8132  ;;  %8144 = vrsqrt.f32 %v5655_v57 }
 0xf12   : > { %v5681_v55 = vmul.f32 %v8133_v6, %v11356_v13  ;;  %v5656_v46 = vadd.f32 1e-05, %v5640_v48 }
 0xf14   : > { %v5703_v59 = vmul.f32 %v11531_v62, %v5681_v55  ;;  %8146 = vrsqrt.f32 %v5656_v46 }
 0xf15   : > { %v8135_v21 = vpop.eup %8134 }
 0xf16   : > { %v8137_v40 = vpop.eup %8136  ;;  %v5725_v15 = vadd.f32 %v11537_v22, %v5703_v59  ;;  %v5682_v39 = vmul.f32 %v8135_v21, %v11371_v61 }
 0xf17   : > { %v5683_v24 = vmul.f32 %v8137_v40, %v11368_v32 }
 0xf18   : > { %6002 = vst [vmem:[%s11544_s23] sm:$0xff] %v5725_v15  ;;  %v5704_v13 = vmul.f32 %v11531_v62, %v5682_v39  ;;  %v5618_v33 = vpop.xlane.xlu0 %5617 }
 0xf19   : > { %v8139_v16 = vpop.eup %8138  ;;  %v5705_v18 = vmul.f32 %v11531_v62, %v5683_v24  ;;  %v5641_v9 = vmul.f32 0.0078125, %v5618_v33 }
 0xf1a   : > { %v8141_v23 = vpop.eup %8140  ;;  %v5726_v20 = vadd.f32 %v11537_v22, %v5704_v13  ;;  %v5684_v61 = vmul.f32 %v8139_v16, %v11380_v43 }
 0xf1b   : > { %v5727_v32 = vadd.f32 %v11537_v22, %v5705_v18  ;;  %v5685_v19 = vmul.f32 %v8141_v23, %v11385_v44  ;;  %v5657_v2 = vadd.f32 1e-05, %v5641_v9 }
 0xf1c   : > { %6003 = vst [vmem:[%s11544_s23 + $0x8] sm:$0xff] %v5726_v20  ;;  %v5706_v26 = vmul.f32 %v11531_v62, %v5684_v61  ;;  %v5620_v45 = vpop.xlane.xlu1 %5619  ;;  %v5622_v63 = vpop.xlane.xlu0 %5621 }
 0xf1d   : > { %v8143_v54 = vpop.eup %8142  ;;  %6004 = vst [vmem:[%s11544_s23 + $0x10] sm:$0xff] %v5727_v32  ;;  %v5707_v5 = vmul.f32 %v11531_v62, %v5685_v19  ;;  %8148 = vrsqrt.f32 %v5657_v2  ;;  %v5642_v14 = vmul.f32 0.0078125, %v5620_v45  ;;  %v5643_v50 = vmul.f32 0.0078125, %v5622_v63 }
 0xf1e   : > { %v8145_v43 = vpop.eup %8144  ;;  %v5728_v17 = vadd.f32 %v11537_v22, %v5706_v26  ;;  %v5686_v44 = vmul.f32 %v8143_v54, %v11395_v51 }
 0xf1f   : > { %v5729_v1 = vadd.f32 %v11537_v22, %v5707_v5  ;;  %v5687_v0 = vmul.f32 %v8145_v43, %v11392_v4  ;;  %v5658_v57 = vadd.f32 1e-05, %v5642_v14  ;;  %v5659_v38 = vadd.f32 1e-05, %v5643_v50 }
 0xf20   : > { %6005 = vst [vmem:[%s11544_s23 + $0x18] sm:$0xff] %v5728_v17  ;;  %v5708_v48 = vmul.f32 %v11531_v62, %v5686_v44  ;;  %v5624_v6 = vpop.xlane.xlu1 %5623  ;;  %v5626_v55 = vpop.xlane.xlu0 %5625 }
 0xf21   : > { %v8147_v46 = vpop.eup %8146  ;;  %6006 = vst [vmem:[%s11544_s23 + $0x20] sm:$0xff] %v5729_v1  ;;  %v5709_v59 = vmul.f32 %v11531_v62, %v5687_v0  ;;  %8150 = vrsqrt.f32 %v5658_v57  ;;  %v5644_v21 = vmul.f32 0.0078125, %v5624_v6  ;;  %v5645_v51 = vmul.f32 0.0078125, %v5626_v55 }
 0xf22   : > { %v5730_v40 = vadd.f32 %v11537_v22, %v5708_v48  ;;  %v5688_v4 = vmul.f32 %v8147_v46, %v11400_v7  ;;  %8152 = vrsqrt.f32 %v5659_v38 }
 0xf23   : > { %v5731_v15 = vadd.f32 %v11537_v22, %v5709_v59  ;;  %v5660_v39 = vadd.f32 1e-05, %v5644_v21  ;;  %v5661_v24 = vadd.f32 1e-05, %v5645_v51 }
 0xf24   : > { %6007 = vst [vmem:[%s11544_s23 + $0x28] sm:$0xff] %v5730_v40  ;;  %v5710_v13 = vmul.f32 %v11531_v62, %v5688_v4  ;;  %v5628_v33 = vpop.xlane.xlu1 %5627  ;;  %v5630_v16 = vpop.xlane.xlu0 %5629 }
 0xf25   : > { %6008 = vst [vmem:[%s11544_s23 + $0x30] sm:$0xff] %v5731_v15  ;;  %8154 = vrsqrt.f32 %v5660_v39  ;;  %v5646_v18 = vmul.f32 0.0078125, %v5628_v33  ;;  %v5647_v9 = vmul.f32 0.0078125, %v5630_v16 }
 0xf26   : > { %v5732_v23 = vadd.f32 %v11537_v22, %v5710_v13  ;;  %8156 = vrsqrt.f32 %v5661_v24 }
 0xf27   : > { %v5662_v20 = vadd.f32 1e-05, %v5646_v18  ;;  %v5663_v7 = vadd.f32 1e-05, %v5647_v9 }
 0xf28   : > { %6009 = vst [vmem:[%s11544_s23 + $0x38] sm:$0xff] %v5732_v23  ;;  %v5632_v61 = vpop.xlane.xlu1 %5631 }
 0xf29   : > { %8158 = vrsqrt.f32 %v5662_v20  ;;  %v5648_v32 = vmul.f32 0.0078125, %v5632_v61 }
 0xf2a   : > { %v8149_v19 = vpop.eup %8148  ;;  %8160 = vrsqrt.f32 %v5663_v7 }
 0xf2b   : > { %v5689_v2 = vmul.f32 %v8149_v19, %v11409_v3  ;;  %v5664_v26 = vadd.f32 1e-05, %v5648_v32 }
 0xf2d   : > { %v5711_v45 = vmul.f32 %v11531_v62, %v5689_v2  ;;  %8162 = vrsqrt.f32 %v5664_v26 }
 0xf2e   : > { %v8151_v63 = vpop.eup %8150 }
 0xf2f   : > { %v8153_v54 = vpop.eup %8152  ;;  %v5733_v5 = vadd.f32 %v11537_v22, %v5711_v45  ;;  %v5690_v14 = vmul.f32 %v8151_v63, %v11417_v35 }
 0xf30   : > { %v5691_v50 = vmul.f32 %v8153_v54, %v11412_v37 }
 0xf31   : > { %6010 = vst [vmem:[%s11544_s23 + $0x40] sm:$0xff] %v5733_v5  ;;  %v5712_v43 = vmul.f32 %v11531_v62, %v5690_v14 }
 0xf32   : > { %v8155_v17 = vpop.eup %8154  ;;  %v5713_v3 = vmul.f32 %v11531_v62, %v5691_v50 }
 0xf33   : > { %v8157_v44 = vpop.eup %8156  ;;  %v5734_v1 = vadd.f32 %v11537_v22, %v5712_v43  ;;  %v5692_v0 = vmul.f32 %v8155_v17, %v11420_v8 }
 0xf34   : > { %v5735_v57 = vadd.f32 %v11537_v22, %v5713_v3  ;;  %v5693_v38 = vmul.f32 %v8157_v44, %v11427_v42 }
 0xf35   : > { %6011 = vst [vmem:[%s11544_s23 + $0x48] sm:$0xff] %v5734_v1  ;;  %v5714_v37 = vmul.f32 %v11531_v62, %v5692_v0 }
 0xf36   : > { %v8159_v35 = vpop.eup %8158  ;;  %6012 = vst [vmem:[%s11544_s23 + $0x50] sm:$0xff] %v5735_v57  ;;  %v5715_v48 = vmul.f32 %v11531_v62, %v5693_v38 }
 0xf37   : > { %v8161_v6 = vpop.eup %8160  ;;  %v5736_v55 = vadd.f32 %v11537_v22, %v5714_v37  ;;  %v5694_v8 = vmul.f32 %v8159_v35, %v11437_v53 }
 0xf38   : > { %v5737_v46 = vadd.f32 %v11537_v22, %v5715_v48  ;;  %v5695_v42 = vmul.f32 %v8161_v6, %v11432_v52 }
 0xf39   : > { %6013 = vst [vmem:[%s11544_s23 + $0x58] sm:$0xff] %v5736_v55  ;;  %v5716_v59 = vmul.f32 %v11531_v62, %v5694_v8 }
 0xf3a   : > { %v8163_v21 = vpop.eup %8162  ;;  %6014 = vst [vmem:[%s11544_s23 + $0x60] sm:$0xff] %v5737_v46  ;;  %v5717_v51 = vmul.f32 %v11531_v62, %v5695_v42 }
 0xf3b   : > { %v5738_v40 = vadd.f32 %v11537_v22, %v5716_v59  ;;  %v5696_v4 = vmul.f32 %v8163_v21, %v11440_v12 }
 0xf3c   : > { %v5739_v53 = vadd.f32 %v11537_v22, %v5717_v51 }
 0xf3d   : > { %6015 = vst [vmem:[%s11544_s23 + $0x68] sm:$0xff] %v5738_v40  ;;  %v5718_v52 = vmul.f32 %v11531_v62, %v5696_v4 }
 0xf3e   : > { %6016 = vst [vmem:[%s11544_s23 + $0x70] sm:$0xff] %v5739_v53 }
 0xf3f   : > { %v5740_v12 = vadd.f32 %v11537_v22, %v5718_v52 }
 0xf40   : > { %v5867_v15 = vpop.xlane.xlu0 %5866 }
 0xf41   : > { %6017 = vst [vmem:[%s11544_s23 + $0x78] sm:$0xff] %v5740_v12  ;;  %v5896_v39 = vmul.f32 0.0078125, %v5867_v15 }
 0xf42   : > { %8455 = shalt.err (!%p8452_p8)
}
 0xf43   : > { %s8456_s21 = scalar_lea.hbm %s11610_s9, 2048  ;;  %s8460_s22 = scalar_lea.hbm %s12231_s3, 4096 }
 0xf44   : > { %p8457_p2 = scmp.ne.s32.totalorder %s11610_s9, %s8456_s21  ;;  %p8461_p10 = scmp.lt.s32.totalorder %s11610_s9, %s12231_s3 }
 0xf45   : > { %p8462_p0 = scmp.lt.s32.totalorder %s8460_s22, %s8456_s21 }
 0xf46   : > { %p8458_p13 = pnand %p8457_p2, %p12232_p1 }
 0xf47   : > { %p8463_p5 = por %p8462_p0, %p8461_p10 }
 0xf48   : > { %p8459_p9 = pneg %p8458_p13 }
 0xf4a   : > { %p8464_p6 = pnand %p8463_p5, %p8459_p9 }
 0xf4c   : > { %8467 = shalt.err (!%p8464_p6)
}
 0xf4d   : > { %s8570_s12 = smov 128   ;;  %s8571_s7 = smov 8   ;;  %v5912_v62 = vadd.f32 1e-05, %v5896_v39  ;;  %v5869_v22 = vpop.xlane.xlu1 %5868  ;;  %v5863_v24 = vpop.xlane.xlu0 %5862 }
 0xf4e   : > { %7485 = dma.vmem_to_hbm [thread:$0]  (%p12232_p1), %s11612_s26, 2048, %s11610_s9, %s6035_s15, %s8570_s12, %s8570_s12, %s8571_s7   ;;  %v5897_v13 = vmul.f32 0.0078125, %v5869_v22  ;;  %v5894_v33 = vmul.f32 0.0078125, %v5863_v24 }
 0xf4f   : > { %8164 = vrsqrt.f32 %v5912_v62  ;;  %s12233_s26 = sld [smem:[#allocation107_spill]]  ;;  %s11658_s20 = scalar_lea.vmem [#allocation17], %s8920_s25 }
 0xf50   : > { %v5913_v16 = vadd.f32 1e-05, %v5897_v13  ;;  %v5910_v18 = vadd.f32 1e-05, %v5894_v33  ;;  %s12234_s16 = sld [smem:[#allocation108_spill]]  ;;  %s6069_s25 = sshll.u32 %s11658_s20, 4  ;;  %s11726_s25 = int_to_ptr.vmem [resolvable:$true] %s6069_s25 }
 0xf51   : > { %v5865_v9 = vpop.xlane.xlu1 %5864  ;;  %v5875_v7 = vpop.xlane.xlu0 %5874  ;;  %s12235_s13 = sld [smem:[#allocation110_spill]]  ;;  %s6040_s18 = scalar_lea.sflag [#allocation18], %s8917_s30 }
 0xf52   : > { %8166 = vrsqrt.f32 %v5913_v16  ;;  %v5895_v23 = vmul.f32 0.0078125, %v5865_v9  ;;  %v5900_v61 = vmul.f32 0.0078125, %v5875_v7  ;;  %s8468_s23 = scalar_lea.vmem %s11726_s25, 2048  ;;  %s8572_s17 = smov [#allocation17]  }
 0xf53   : > { %8168 = vrsqrt.f32 %v5910_v18  ;;  %p8469_p4 = scmp.ne.s32.totalorder %s11726_s25, %s8468_s23  ;;  %s8472_s27 = sshll.u32 %s8572_s17, 4  ;;  %s8473_s27 = int_to_ptr.vmem [resolvable:$false] %s8472_s27 }
 0xf54   : > { %v5911_v20 = vadd.f32 1e-05, %v5895_v23  ;;  %v5916_v26 = vadd.f32 1e-05, %v5900_v61  ;;  %s8474_s1 = scalar_lea.vmem %s8473_s27, 4096  ;;  %p8475_p7 = scmp.lt.s32.totalorder %s11726_s25, %s8473_s27 }
 0xf55   : > { %v11645_v19 = vld [vmem:[%s12233_s26] ss:$0 sm:$0xff]  ;;  %v5877_v63 = vpop.xlane.xlu1 %5876  ;;  %v5871_v54 = vpop.xlane.xlu0 %5870  ;;  %p8470_p11 = pnand %p8469_p4, %p12232_p1  ;;  %p8476_p3 = scmp.lt.s32.totalorder %s8474_s1, %s8468_s23 }
 0xf56   : > { %8170 = vrsqrt.f32 %v5911_v20  ;;  %v11651_v45 = vld [vmem:[%s12234_s16] ss:$0 sm:$0xff]  ;;  %v5901_v14 = vmul.f32 0.0078125, %v5877_v63  ;;  %v5898_v50 = vmul.f32 0.0078125, %v5871_v54 }
 0xf57   : > { %8172 = vrsqrt.f32 %v5916_v26  ;;  %s11724_s22 = scalar_lea.hbm %s12235_s13, %s6449_s5  ;;  %p8471_p12 = pneg %p8470_p11 }
 0xf58   : > { %v5917_v44 = vadd.f32 1e-05, %v5901_v14  ;;  %v5914_v1 = vadd.f32 1e-05, %v5898_v50  ;;  %p8477_p8 = por %p8476_p3, %p8475_p7 }
 0xf59   : > { %v5873_v57 = vpop.xlane.xlu1 %5872 }
 0xf5a   : > { %8174 = vrsqrt.f32 %v5917_v44  ;;  %v5899_v37 = vmul.f32 0.0078125, %v5873_v57  ;;  %p8478_p2 = pnand %p8477_p8, %p8471_p12 }
 0xf5b   : > { %8176 = vrsqrt.f32 %v5914_v1 }
 0xf5c   : > { %v8165_v32 = vpop.eup %8164  ;;  %v5915_v6 = vadd.f32 1e-05, %v5899_v37 }
 0xf5d   : > { %v5944_v2 = vmul.f32 %v8165_v32, %v11449_v58 }
 0xf5e   : > { %8178 = vrsqrt.f32 %v5915_v6 }
 0xf5f   : > { %v5966_v5 = vmul.f32 %v11645_v19, %v5944_v2  ;;  %v8167_v43 = vpop.eup %8166 }
 0xf60   : > { %v8169_v17 = vpop.eup %8168  ;;  %v5945_v58 = vmul.f32 %v8167_v43, %v11454_v30 }
 0xf61   : > { %v5988_v3 = vadd.f32 %v11651_v45, %v5966_v5  ;;  %v5942_v0 = vmul.f32 %v8169_v17, %v11457_v31 }
 0xf62   : > { %v5967_v38 = vmul.f32 %v11645_v19, %v5945_v58 }
 0xf63   : > { %6020 = vst [vmem:[%s11658_s20 + $0x10] sm:$0xff] %v5988_v3  ;;  %v8171_v35 = vpop.eup %8170  ;;  %v5964_v48 = vmul.f32 %v11645_v19, %v5942_v0 }
 0xf64   : > { %v5989_v30 = vadd.f32 %v11651_v45, %v5967_v38  ;;  %v5943_v31 = vmul.f32 %v8171_v35, %v11464_v29  ;;  %v8173_v42 = vpop.eup %8172 }
 0xf65   : > { %v5986_v55 = vadd.f32 %v11651_v45, %v5964_v48  ;;  %v5948_v59 = vmul.f32 %v8173_v42, %v11469_v34 }
 0xf66   : > { %6021 = vst [vmem:[%s11658_s20 + $0x18] sm:$0xff] %v5989_v30  ;;  %v5965_v8 = vmul.f32 %v11645_v19, %v5943_v31 }
 0xf67   : > { %6018 = vst [vmem:[%s11658_s20] sm:$0xff] %v5986_v55  ;;  %v5970_v21 = vmul.f32 %v11645_v19, %v5948_v59  ;;  %v8175_v29 = vpop.eup %8174 }
 0xf68   : > { %v5987_v46 = vadd.f32 %v11651_v45, %v5965_v8  ;;  %v8177_v51 = vpop.eup %8176  ;;  %v5949_v4 = vmul.f32 %v8175_v29, %v11474_v28 }
 0xf69   : > { %v5992_v40 = vadd.f32 %v11651_v45, %v5970_v21  ;;  %v5946_v53 = vmul.f32 %v8177_v51, %v11477_v25 }
 0xf6a   : > { %6019 = vst [vmem:[%s11658_s20 + $0x8] sm:$0xff] %v5987_v46  ;;  %v5971_v52 = vmul.f32 %v11645_v19, %v5949_v4 }
 0xf6b   : > { %6024 = vst [vmem:[%s11658_s20 + $0x30] sm:$0xff] %v5992_v40  ;;  %v8179_v12 = vpop.eup %8178  ;;  %v5968_v15 = vmul.f32 %v11645_v19, %v5946_v53 }
 0xf6c   : > { %v5993_v34 = vadd.f32 %v11651_v45, %v5971_v52  ;;  %v5947_v39 = vmul.f32 %v8179_v12, %v11484_v36 }
 0xf6d   : > { %v5990_v62 = vadd.f32 %v11651_v45, %v5968_v15 }
 0xf6e   : > { %6025 = vst [vmem:[%s11658_s20 + $0x38] sm:$0xff] %v5993_v34  ;;  %v5969_v22 = vmul.f32 %v11645_v19, %v5947_v39 }
 0xf6f   : > { %6022 = vst [vmem:[%s11658_s20 + $0x20] sm:$0xff] %v5990_v62 }
 0xf70   : > { %v5991_v28 = vadd.f32 %v11651_v45, %v5969_v22 }
 0xf72   : > { %6023 = vst [vmem:[%s11658_s20 + $0x28] sm:$0xff] %v5991_v28  ;;  %v5883_v25 = vpop.xlane.xlu0 %5882 }
 0xf73   : > { %v5904_v24 = vmul.f32 0.0078125, %v5883_v25 }
 0xf75   : > { %v5920_v13 = vadd.f32 1e-05, %v5904_v24 }
 0xf76   : > { %v5885_v33 = vpop.xlane.xlu1 %5884  ;;  %v5879_v16 = vpop.xlane.xlu0 %5878 }
 0xf77   : > { %8180 = vrsqrt.f32 %v5920_v13  ;;  %v5905_v18 = vmul.f32 0.0078125, %v5885_v33  ;;  %v5902_v9 = vmul.f32 0.0078125, %v5879_v16 }
 0xf79   : > { %v5921_v23 = vadd.f32 1e-05, %v5905_v18  ;;  %v5918_v20 = vadd.f32 1e-05, %v5902_v9 }
 0xf7a   : > { %v5881_v36 = vpop.xlane.xlu1 %5880 }
 0xf7b   : > { %8182 = vrsqrt.f32 %v5921_v23  ;;  %v5903_v7 = vmul.f32 0.0078125, %v5881_v36 }
 0xf7c   : > { %8184 = vrsqrt.f32 %v5918_v20 }
 0xf7d   : > { %v5919_v61 = vadd.f32 1e-05, %v5903_v7 }
 0xf7f   : > { %8186 = vrsqrt.f32 %v5919_v61 }
 0xf84   : > { %v8181_v32 = vpop.eup %8180 }
 0xf85   : > { %v5952_v2 = vmul.f32 %v8181_v32, %v11489_v10 }
 0xf87   : > { %v5974_v26 = vmul.f32 %v11645_v19, %v5952_v2  ;;  %v5887_v63 = vpop.xlane.xlu0 %5886 }
 0xf88   : > { %v8183_v54 = vpop.eup %8182  ;;  %v5906_v5 = vmul.f32 0.0078125, %v5887_v63 }
 0xf89   : > { %v8185_v14 = vpop.eup %8184  ;;  %v5996_v50 = vadd.f32 %v11651_v45, %v5974_v26  ;;  %v5953_v43 = vmul.f32 %v8183_v54, %v11494_v56 }
 0xf8a   : > { %v5950_v17 = vmul.f32 %v8185_v14, %v11497_v47  ;;  %v5922_v3 = vadd.f32 1e-05, %v5906_v5 }
 0xf8b   : > { %6028 = vst [vmem:[%s11658_s20 + $0x50] sm:$0xff] %v5996_v50  ;;  %v5975_v58 = vmul.f32 %v11645_v19, %v5953_v43  ;;  %v5889_v44 = vpop.xlane.xlu1 %5888  ;;  %v5891_v10 = vpop.xlane.xlu0 %5890 }
 0xf8c   : > { %v8187_v1 = vpop.eup %8186  ;;  %v5972_v0 = vmul.f32 %v11645_v19, %v5950_v17  ;;  %8188 = vrsqrt.f32 %v5922_v3  ;;  %v5907_v57 = vmul.f32 0.0078125, %v5889_v44  ;;  %v5908_v38 = vmul.f32 0.0078125, %v5891_v10 }
 0xf8d   : > { %v5997_v37 = vadd.f32 %v11651_v45, %v5975_v58  ;;  %v5951_v56 = vmul.f32 %v8187_v1, %v11504_v60 }
 0xf8e   : > { %v5994_v47 = vadd.f32 %v11651_v45, %v5972_v0  ;;  %v5923_v35 = vadd.f32 1e-05, %v5907_v57  ;;  %v5924_v48 = vadd.f32 1e-05, %v5908_v38 }
 0xf8f   : > { %6029 = vst [vmem:[%s11658_s20 + $0x58] sm:$0xff] %v5997_v37  ;;  %v5973_v30 = vmul.f32 %v11645_v19, %v5951_v56  ;;  %v5893_v31 = vpop.xlane.xlu1 %5892 }
 0xf90   : > { %6026 = vst [vmem:[%s11658_s20 + $0x40] sm:$0xff] %v5994_v47  ;;  %8190 = vrsqrt.f32 %v5923_v35  ;;  %v5909_v6 = vmul.f32 0.0078125, %v5893_v31 }
 0xf91   : > { %v5995_v55 = vadd.f32 %v11651_v45, %v5973_v30  ;;  %8192 = vrsqrt.f32 %v5924_v48 }
 0xf92   : > { %v5925_v8 = vadd.f32 1e-05, %v5909_v6 }
 0xf93   : > { %6027 = vst [vmem:[%s11658_s20 + $0x48] sm:$0xff] %v5995_v55 }
 0xf94   : > { %8194 = vrsqrt.f32 %v5925_v8 }
 0xf99   : > { %v8189_v60 = vpop.eup %8188 }
 0xf9a   : > { %v5954_v46 = vmul.f32 %v8189_v60, %v11509_v41 }
 0xf9c   : > { %v5976_v42 = vmul.f32 %v11645_v19, %v5954_v46 }
 0xf9d   : > { %v8191_v59 = vpop.eup %8190 }
 0xf9e   : > { %v8193_v21 = vpop.eup %8192  ;;  %v5998_v29 = vadd.f32 %v11651_v45, %v5976_v42  ;;  %v5955_v51 = vmul.f32 %v8191_v59, %v11514_v27 }
 0xf9f   : > { %v5956_v40 = vmul.f32 %v8193_v21, %v11517_v49 }
 0xfa0   : > { %6030 = vst [vmem:[%s11658_s20 + $0x60] sm:$0xff] %v5998_v29  ;;  %v5977_v4 = vmul.f32 %v11645_v19, %v5955_v51 }
 0xfa1   : > { %v8195_v53 = vpop.eup %8194  ;;  %v5978_v41 = vmul.f32 %v11645_v19, %v5956_v40 }
 0xfa2   : > { %v5999_v52 = vadd.f32 %v11651_v45, %v5977_v4  ;;  %v5957_v12 = vmul.f32 %v8195_v53, %v11524_v11 }
 0xfa3   : > { %v6000_v15 = vadd.f32 %v11651_v45, %v5978_v41 }
 0xfa4   : > { %6031 = vst [vmem:[%s11658_s20 + $0x68] sm:$0xff] %v5999_v52  ;;  %v5979_v27 = vmul.f32 %v11645_v19, %v5957_v12 }
 0xfa5   : > { %6032 = vst [vmem:[%s11658_s20 + $0x70] sm:$0xff] %v6000_v15 }
 0xfa6   : > { %v6001_v49 = vadd.f32 %v11651_v45, %v5979_v27 }
 0xfa8   : > { %6033 = vst [vmem:[%s11658_s20 + $0x78] sm:$0xff] %v6001_v49 }
 0xfa9   : > { %8481 = shalt.err (!%p8478_p2)
}
 0xfaa   : > { %s8482_s5 = scalar_lea.hbm %s11724_s22, 2048  ;;  %s8486_s9 = scalar_lea.hbm %s12235_s13, 4096 }
 0xfab   : > { %p8483_p13 = scmp.ne.s32.totalorder %s11724_s22, %s8482_s5  ;;  %p8487_p0 = scmp.lt.s32.totalorder %s11724_s22, %s12235_s13 }
 0xfac   : > { %p8488_p5 = scmp.lt.s32.totalorder %s8486_s9, %s8482_s5 }
 0xfad   : > { %p8484_p9 = pnand %p8483_p13, %p12232_p1 }
 0xfae   : > { %p8489_p6 = por %p8488_p5, %p8487_p0 }
 0xfaf   : > { %p8485_p10 = pneg %p8484_p9 }
 0xfb1   : > { %p8490_p4 = pnand %p8489_p6, %p8485_p10 }
 0xfb3   : > { %8493 = shalt.err (!%p8490_p4)
}
 0xfb4   : > { %7486 = dma.vmem_to_hbm [thread:$0]  (%p12232_p1), %s11726_s25, 2048, %s11724_s22, %s6040_s18, %s8570_s12, %s8570_s12, %s8571_s7  }
 0xfb5 PF: > { %s12236_s20 = sld [smem:[#allocation26_spill]] }
 0xfb6   : > { %s12237_s21 = sld [smem:[#allocation31_spill]] }
 0xfb7   : > { %s12238_s24 = sld [smem:[#allocation27_spill]] }
 0xfbb   : > { %s6084_s23 = sand.u32 1, %s12236_s20  }
 0xfbc   : > { %p12239_p11 = scmp.ne.s32.totalorder %s12237_s21, 0  ;;  %s6085_s17 = scalar_lea.sflag [#allocation4], %s6084_s23 }
 0xfbd   : > { %p12240_p12 = scmp.ge.s32.totalorder %s12238_s24, 2 }
 0xfbf   : > { %p7516_p7 = pnand %p12240_p12, %p12239_p11 }
 0xfc1   : > { %p7517_p3 = pneg %p7516_p7 }
 0xfc3   : > { %8531 = dma.done.wait (%p7517_p3), %s6085_s17, 2048  }
 0xfc4   : > { %8533 = vsyncadd (%p7517_p3), %s6085_s17, 4294965248  ;;  %s6094_s27 = scalar_lea.sflag [#allocation18], %s6084_s23 }
 0xfc5   : > { %8535 = dma.done.wait (%p7517_p3), %s6094_s27, 2048  }
 0xfc6   : > { %8537 = vsyncadd (%p7517_p3), %s6094_s27, 4294965248  ;;  %s12241_s30 = sld [smem:[#allocation28_spill]]  ;;  %s12243_s27 = smov %s8544_s28 }
 0xfc7   : > { %s12242_s2 = sld [smem:[#allocation30_spill]]  ;;  %s12244_s28 = smov %s8548_s29 }
 0xfcc   : > { %p41_p1 = scmp.ge.s32.totalorder %s12241_s30, 4  }
 0xfcd   : > { %s12245_s29 = smov %s12242_s2 }
 0xfce   :  { %43 = sbr.rel (!%p41_p1) target bundleno = 27 (0x1b), region = 200 }
 0xfd3   :  { %6099 = vsyncpa [#allocation3], 1 }
 0xfd4   :  { %6101 = vsyncpa [#allocation3 + $0x1], 1 }
 0xfd5   :  { %6102 = vsyncpa [#allocation6], 1 }
 0xfd6   :  { %6104 = vsyncpa [#allocation6 + $0x1], 1 }
 0xfd7   :  { %6105 = vsyncpa [#allocation9], 1 }
 0xfd8   :  { %6106 = vsyncpa [#allocation12], 1 }
 0xfd9   :  { %6107 = vsyncpa [#allocation15], 1 }
 0xfda   :  { %6108 = vsyncpa [#allocation4], 1 }
 0xfdb   :  { %6110 = vsyncpa [#allocation4 + $0x1], 1 }
 0xfdc   :  { %6111 = vsyncpa [#allocation18], 1 }
 0xfdd   :  { %6113 = vsyncpa [#allocation18 + $0x1], 1 }

</bundles_post_ra>
